<compile_context>
chip_gen: v7x
topology: tpu7x:2x2x1
jax: 0.10.0
libtpu: 0.0.40
codegen_flags: <defaults>
</compile_context>

<pallas_src>
import math

import jax
import jax.numpy as jnp
from jax import lax
from jax.experimental import pallas as pl
from jax.experimental.pallas import tpu as pltpu

# ----- model sizes (scaled down from 50/1024/12001 for a small synthetic run) -----
F_IN = 50          # input feature size (same as module)
H = 128            # lstm_size (module uses 1024; 128 keeps lanes aligned)
NUM_LAYERS = 8     # blstm1 (1 layer) + blstm_stack (7 layers), all bidirectional
C_OUT = 128        # target_size (module uses 12001)

TIME_CHUNK = 8               # frames per recurrence chunk (bounds the unrolled loop)
GX_ROW_TILE = 256            # row tile of the per-layer input GEMM
VMEM_LIMIT = 32 * 1024 * 1024


def _round_up(x, m):
    return (x + m - 1) // m * m


def _pad_rows(a, rows):
    if a.shape[0] == rows:
        return a
    pad = [(0, rows - a.shape[0])] + [(0, 0)] * (a.ndim - 1)
    return jnp.pad(a, pad)


# ---------------------------------------------------------------------------
# Kernel 1: sequence-wide input projection GEMM, tiled over (gate-slab, rows)
# ---------------------------------------------------------------------------
def _gx_gemm_l0_kernel(x_ref, tmask_ref, fmask_ref, w_ref, b_ref, gx_ref):
    # layer 0: SpecAugment fused -> (x * fmask) @ W scaled by tmask, + bias.
    x = (x_ref[...] * fmask_ref[...]).astype(jnp.bfloat16)          # (nt, F)
    acc = jnp.dot(x, w_ref[...], preferred_element_type=jnp.float32)
    gx_ref[...] = (tmask_ref[...] * acc + b_ref[...]).astype(gx_ref.dtype)


def _gx_gemm_pair_kernel(hf_ref, hb_ref, wf_ref, wb_ref, b_ref, gx_ref):
    # layers >= 1: input is the split bidirectional output (y_fwd | y_bwd),
    # consumed directly as two accumulated dots (no HBM concat).
    acc = jnp.dot(hf_ref[...], wf_ref[...], preferred_element_type=jnp.float32)
    acc = acc + jnp.dot(hb_ref[...], wb_ref[...],
                        preferred_element_type=jnp.float32)
    gx_ref[...] = (acc + b_ref[...]).astype(gx_ref.dtype)


def gx_gemm_l0(x_rows, tmask_rows, fmask_row, w_ih, b, nt):
    Nr, K = x_rows.shape
    G = w_ih.shape[1]
    gt = 4 * H                                  # per-direction gate slab
    grid = (G // gt, Nr // nt)                  # weight tile on OUTER axis
    return pl.pallas_call(
        _gx_gemm_l0_kernel,
        out_shape=jax.ShapeDtypeStruct((Nr, G), jnp.bfloat16),
        grid=grid,
        in_specs=[pl.BlockSpec((nt, K), lambda g, r: (r, 0)),
                  pl.BlockSpec((nt, 1), lambda g, r: (r, 0)),
                  pl.BlockSpec((1, K), lambda g, r: (0, 0)),
                  pl.BlockSpec((K, gt), lambda g, r: (0, g)),
                  pl.BlockSpec((1, gt), lambda g, r: (0, g))],
        out_specs=pl.BlockSpec((nt, gt), lambda g, r: (r, g)),
        compiler_params=pltpu.CompilerParams(
            dimension_semantics=("parallel", "parallel"),
            vmem_limit_bytes=VMEM_LIMIT),
    )(x_rows, tmask_rows, fmask_row, w_ih, b)


def gx_gemm_pair(hf_rows, hb_rows, w_f, w_b, b, nt):
    Nr, K = hf_rows.shape
    G = w_f.shape[1]
    gt = 4 * H
    grid = (G // gt, Nr // nt)
    return pl.pallas_call(
        _gx_gemm_pair_kernel,
        out_shape=jax.ShapeDtypeStruct((Nr, G), jnp.bfloat16),
        grid=grid,
        in_specs=[pl.BlockSpec((nt, K), lambda g, r: (r, 0)),
                  pl.BlockSpec((nt, K), lambda g, r: (r, 0)),
                  pl.BlockSpec((K, gt), lambda g, r: (0, g)),
                  pl.BlockSpec((K, gt), lambda g, r: (0, g)),
                  pl.BlockSpec((1, gt), lambda g, r: (0, g))],
        out_specs=pl.BlockSpec((nt, gt), lambda g, r: (r, g)),
        compiler_params=pltpu.CompilerParams(
            dimension_semantics=("parallel", "parallel"),
            vmem_limit_bytes=VMEM_LIMIT),
    )(hf_rows, hb_rows, w_f, w_b, b)


# ---------------------------------------------------------------------------
# Kernel 2: bidirectional LSTM recurrence.
# Both directions fused in ONE loop; gx streamed in time chunks (grid axis,
# "arbitrary"); backward direction's chunks / local steps are reversed.
# ---------------------------------------------------------------------------
def _bilstm_chunk_kernel(gxf_ref, gxb_ref, vf_ref, vb_ref, whf_ref, whb_ref,
                         yf_ref, yb_ref, hf, cf, hb, cb):
    c = pl.program_id(0)
    tc = gxf_ref.shape[0]
    Hd = hf.shape[-1]

    @pl.when(c == 0)
    def _():
        hf[...] = jnp.zeros_like(hf); cf[...] = jnp.zeros_like(cf)
        hb[...] = jnp.zeros_like(hb); cb[...] = jnp.zeros_like(cb)

    def gates_to_hc(gates, c_prev):
        # PyTorch gate order: i, f, g, o (lane-aligned slabs, Hd = 128)
        i_g = jax.nn.sigmoid(gates[:, 0 * Hd:1 * Hd])
        f_g = jax.nn.sigmoid(gates[:, 1 * Hd:2 * Hd])
        g_g = jnp.tanh(gates[:, 2 * Hd:3 * Hd])
        o_g = jax.nn.sigmoid(gates[:, 3 * Hd:4 * Hd])
        c_new = f_g * c_prev + i_g * g_g
        return o_g * jnp.tanh(c_new), c_new

    # TODO(synk): hold W_hh in MXU weight registers across steps via
    # pltpu.matmul_push_rhs / matmul_acc_lhs / matmul_pop instead of jnp.dot.
    def step(s, carry):
        tb = tc - 1 - s                                   # backward local time
        g_f = gxf_ref[s].astype(jnp.float32) + jnp.dot(
            hf[...].astype(jnp.bfloat16), whf_ref[...],
            preferred_element_type=jnp.float32)
        g_b = gxb_ref[tb].astype(jnp.float32) + jnp.dot(
            hb[...].astype(jnp.bfloat16), whb_ref[...],
            preferred_element_type=jnp.float32)
        hf_new, cf_new = gates_to_hc(g_f, cf[...])
        hb_new, cb_new = gates_to_hc(g_b, cb[...])
        # pack_padded_sequence emulation: zero state/output at padded frames.
        v_f = vf_ref[s]
        v_b = vb_ref[tb]
        hf_v = hf_new * v_f
        hb_v = hb_new * v_b
        cf[...] = cf_new * v_f; hf[...] = hf_v
        cb[...] = cb_new * v_b; hb[...] = hb_v
        yf_ref[s] = hf_v.astype(yf_ref.dtype)
        yb_ref[tb] = hb_v.astype(yb_ref.dtype)
        return carry

    # unroll is bounded by the chunk length (TIME_CHUNK), not the full T.
    lax.fori_loop(0, tc, step, 0, unroll=True)


def bilstm_recurrence(gx, valid, w_hh_f, w_hh_b, tc):
    Tp, Bb, _G = gx.shape
    Hd = w_hh_f.shape[0]
    nc = Tp // tc
    y_f, y_b = pl.pallas_call(
        _bilstm_chunk_kernel,
        out_shape=(jax.ShapeDtypeStruct((Tp, Bb, Hd), jnp.bfloat16),
                   jax.ShapeDtypeStruct((Tp, Bb, Hd), jnp.bfloat16)),
        grid=(nc,),
        in_specs=[pl.BlockSpec((tc, Bb, 4 * Hd), lambda c: (c, 0, 0)),
                  pl.BlockSpec((tc, Bb, 4 * Hd), lambda c: (nc - 1 - c, 0, 1)),
                  pl.BlockSpec((tc, Bb, 1), lambda c: (c, 0, 0)),
                  pl.BlockSpec((tc, Bb, 1), lambda c: (nc - 1 - c, 0, 0)),
                  pl.BlockSpec((Hd, 4 * Hd), lambda c: (0, 0)),
                  pl.BlockSpec((Hd, 4 * Hd), lambda c: (0, 0))],
        out_specs=(pl.BlockSpec((tc, Bb, Hd), lambda c: (c, 0, 0)),
                   pl.BlockSpec((tc, Bb, Hd), lambda c: (nc - 1 - c, 0, 0))),
        scratch_shapes=[pltpu.VMEM((Bb, Hd), jnp.float32),
                        pltpu.VMEM((Bb, Hd), jnp.float32),
                        pltpu.VMEM((Bb, Hd), jnp.float32),
                        pltpu.VMEM((Bb, Hd), jnp.float32)],
        compiler_params=pltpu.CompilerParams(
            dimension_semantics=("arbitrary",),
            vmem_limit_bytes=VMEM_LIMIT),
    )(gx, gx, valid, valid, w_hh_f, w_hh_b)
    return y_f, y_b


# ---------------------------------------------------------------------------
# Kernel 3: final linear + permute(1,2,0) + log_softmax(dim=2 == TIME), fused.
# Grid (C-tiles outer, B inner) so w_out streams once; h fed as (B, K, T) so
# the matmul is the natural (ct,K)@(K,T) MXU form (no in-kernel transposes).
# ---------------------------------------------------------------------------
def _head_kernel(hf_ref, hb_ref, wf_ref, wb_ref, b_ref, logits_ref, logprob_ref):
    logits = (jnp.dot(wf_ref[...], hf_ref[...], preferred_element_type=jnp.float32)
              + jnp.dot(wb_ref[...], hb_ref[...], preferred_element_type=jnp.float32)
              + b_ref[...])                                        # (ct, T)
    m = jnp.max(logits, axis=-1, keepdims=True)
    s = logits - m
    lse = jnp.log(jnp.sum(jnp.exp(s), axis=-1, keepdims=True))
    logits_ref[...] = logits
    logprob_ref[...] = s - lse


def head(h_f, h_b, w_out_f, w_out_b, b_out):
    B, K, T = h_f.shape
    C = w_out_f.shape[0]
    ct = 128
    C_pad = _round_up(C, ct)
    if C_pad > C:
        pad = C_pad - C
        w_out_f = jnp.pad(w_out_f, ((0, pad), (0, 0)))
        w_out_b = jnp.pad(w_out_b, ((0, pad), (0, 0)))
        b_out = jnp.pad(b_out, ((0, pad), (0, 0)))
    logits, log_probs = pl.pallas_call(
        _head_kernel,
        out_shape=(jax.ShapeDtypeStruct((B, C_pad, T), jnp.float32),
                   jax.ShapeDtypeStruct((B, C_pad, T), jnp.float32)),
        grid=(C_pad // ct, B),
        in_specs=[pl.BlockSpec((None, K, T), lambda c, b: (b, 0, 0)),
                  pl.BlockSpec((None, K, T), lambda c, b: (b, 0, 0)),
                  pl.BlockSpec((ct, K), lambda c, b: (c, 0)),
                  pl.BlockSpec((ct, K), lambda c, b: (c, 0)),
                  pl.BlockSpec((ct, 1), lambda c, b: (c, 0))],
        out_specs=(pl.BlockSpec((None, ct, T), lambda c, b: (b, c, 0)),
                   pl.BlockSpec((None, ct, T), lambda c, b: (b, c, 0))),
        compiler_params=pltpu.CompilerParams(
            dimension_semantics=("parallel", "parallel"),
            vmem_limit_bytes=VMEM_LIMIT),
    )(h_f, h_b, w_out_f, w_out_b, b_out)
    if C_pad > C:
        logits = logits[:, :C, :]
        log_probs = log_probs[:, :C, :]
    return log_probs, logits


# ---------------------------------------------------------------------------
# SpecAugment (torchaudio.functional.mask_along_axis semantics, JAX RNG)
# ---------------------------------------------------------------------------
def _mask_bounds(key, size, mask_param):
    k1, k2 = jax.random.split(key)
    mp = min(mask_param, size)
    value = jax.random.uniform(k1) * mp
    min_value = jax.random.uniform(k2) * (size - value)
    start = jnp.floor(min_value).astype(jnp.int32)
    end = start + jnp.floor(value).astype(jnp.int32)
    return start, end


def build_specaug_masks(key, T, F):
    """Two time masks (param 20) + two feature masks (param 10), shared across batch."""
    keys = jax.random.split(key, 4)
    tmask = jnp.ones((T,), jnp.float32)
    for k in keys[:2]:
        s, e = _mask_bounds(k, T, 20)
        idx = jnp.arange(T)
        tmask = tmask * jnp.where((idx >= s) & (idx < e), 0.0, 1.0)
    fmask = jnp.ones((F,), jnp.float32)
    for k in keys[2:]:
        s, e = _mask_bounds(k, F, 10)
        idx = jnp.arange(F)
        fmask = fmask * jnp.where((idx >= s) & (idx < e), 0.0, 1.0)
    return tmask, fmask


# ---------------------------------------------------------------------------
# Parameters (deterministic synthetic init; bf16 matmul weights, f32 biases)
# ---------------------------------------------------------------------------
def init_params(key):
    params = {"layers": []}
    bound = 1.0 / math.sqrt(H)
    for layer_idx in range(NUM_LAYERS):
        key, k1, k2, k3, k4, k5, k6 = jax.random.split(key, 7)
        layer = {}
        if layer_idx == 0:
            layer["w_ih"] = jax.random.uniform(
                k1, (F_IN, 8 * H), jnp.float32, -bound, bound).astype(jnp.bfloat16)
        else:
            # split along the input axis: rows for y_fwd / y_bwd halves
            layer["w_ih_f"] = jax.random.uniform(
                k1, (H, 8 * H), jnp.float32, -bound, bound).astype(jnp.bfloat16)
            layer["w_ih_b"] = jax.random.uniform(
                k2, (H, 8 * H), jnp.float32, -bound, bound).astype(jnp.bfloat16)
        layer["w_hh_f"] = jax.random.uniform(
            k3, (H, 4 * H), jnp.float32, -bound, bound).astype(jnp.bfloat16)
        layer["w_hh_b"] = jax.random.uniform(
            k4, (H, 4 * H), jnp.float32, -bound, bound).astype(jnp.bfloat16)
        # combined bias = b_ih + b_hh (sum of two independent uniforms)
        layer["b"] = (jax.random.uniform(k5, (1, 8 * H), jnp.float32, -bound, bound)
                      + jax.random.uniform(k6, (1, 8 * H), jnp.float32, -bound, bound))
        params["layers"].append(layer)
    key, k1, k2, k3 = jax.random.split(key, 4)
    bound_o = 1.0 / math.sqrt(2 * H)
    params["w_out_f"] = jax.random.uniform(
        k1, (C_OUT, H), jnp.float32, -bound_o, bound_o).astype(jnp.bfloat16)
    params["w_out_b"] = jax.random.uniform(
        k2, (C_OUT, H), jnp.float32, -bound_o, bound_o).astype(jnp.bfloat16)
    params["b_out"] = jax.random.uniform(
        k3, (C_OUT, 1), jnp.float32, -bound_o, bound_o)
    return params


# ---------------------------------------------------------------------------
# Forward pass (mirrors Model.forward)
# ---------------------------------------------------------------------------
def forward(params, audio_features, audio_features_len, mask_key):
    B, T, F = audio_features.shape
    tc = TIME_CHUNK
    T_pad = _round_up(T, tc)
    N = T_pad * B

    # SpecAugment: 2x time mask + 2x feature mask, fused into the layer-0 GEMM
    # as rank-1 vectors (no materialized (T*B, F) mask in HBM).
    tmask, fmask = build_specaug_masks(mask_key, T, F)
    if T_pad > T:
        tmask = jnp.pad(tmask, (0, T_pad - T))

    # torch.swapaxes(x, 0, 1) -> time-major, padded in T, flattened (row = t*B + b)
    x = jnp.swapaxes(audio_features, 0, 1)                              # (T, B, F)
    if T_pad > T:
        x = jnp.pad(x, ((0, T_pad - T), (0, 0), (0, 0)))
    x_flat = x.reshape(N, F)
    tmask_rows = jnp.broadcast_to(tmask[:, None, None], (T_pad, B, 1)).reshape(N, 1)
    fmask_row = fmask[None, :]                                          # (1, F)

    # pack_padded_sequence / pad_packed_sequence validity mask
    valid = (jnp.arange(T_pad)[:, None] < audio_features_len[None, :]
             ).astype(jnp.float32)[:, :, None]                          # (T_pad, B, 1)

    nt = min(GX_ROW_TILE, N)
    N_rows = _round_up(N, nt)

    layer0 = params["layers"][0]
    gx_flat = gx_gemm_l0(_pad_rows(x_flat, N_rows), _pad_rows(tmask_rows, N_rows),
                         fmask_row, layer0["w_ih"], layer0["b"], nt)
    gx = gx_flat[:N].reshape(T_pad, B, 8 * H)
    y_f, y_b = bilstm_recurrence(gx, valid, layer0["w_hh_f"], layer0["w_hh_b"], tc)

    for layer in params["layers"][1:]:
        hf_rows = _pad_rows(y_f.reshape(N, H), N_rows)
        hb_rows = _pad_rows(y_b.reshape(N, H), N_rows)
        gx_flat = gx_gemm_pair(hf_rows, hb_rows,
                               layer["w_ih_f"], layer["w_ih_b"], layer["b"], nt)
        gx = gx_flat[:N].reshape(T_pad, B, 8 * H)
        y_f, y_b = bilstm_recurrence(gx, valid, layer["w_hh_f"], layer["w_hh_b"], tc)

    # final_linear + permute(1,2,0) + log_softmax(dim=2) fused; one small
    # outside transpose presents h as (B, 2H-split, T) for natural MXU form.
    h_f = jnp.transpose(y_f[:T], (1, 2, 0))                             # (B, H, T) bf16
    h_b = jnp.transpose(y_b[:T], (1, 2, 0))
    log_probs, logits = head(h_f, h_b,
                             params["w_out_f"], params["w_out_b"], params["b_out"])
    return log_probs, logits


# ---------------------------------------------------------------------------
if __name__ == "__main__":
    key = jax.random.PRNGKey(0)
    k_param, k_in, k_mask = jax.random.split(key, 3)

    B, T = 2, 12
    params = init_params(k_param)
    audio_features = jax.random.normal(k_in, (B, T, F_IN), jnp.float32)
    # pack_padded_sequence requires sorted (descending) lengths
    audio_features_len = jnp.array([12, 9], jnp.int32)

    fwd = jax.jit(forward)
    log_probs, logits = fwd(params, audio_features, audio_features_len, k_mask)
    jax.block_until_ready((log_probs, logits))

    assert log_probs.shape == (B, C_OUT, T)
    assert logits.shape == (B, C_OUT, T)
    assert bool(jnp.all(jnp.isfinite(log_probs)))
    assert bool(jnp.all(jnp.isfinite(logits)))
    # log_softmax over the time axis (dim=2 of (B,C,T)): exp must sum to 1 along T
    sums = jnp.sum(jnp.exp(log_probs), axis=2)
    assert bool(jnp.allclose(sums, 1.0, atol=1e-3))
    print("KERNEL_OK")
</pallas_src>

<mosaic_0001>
module attributes {stable_mosaic.version = 11 : i64} {
  func.func @_gx_gemm_l0_kernel(%arg0: i32, %arg1: i32, %arg2: memref<32x50xf32, #tpu.memory_space<vmem>>, %arg3: memref<32x1xf32, #tpu.memory_space<vmem>>, %arg4: memref<1x50xf32, #tpu.memory_space<vmem>>, %arg5: memref<50x512xbf16, #tpu.memory_space<vmem>>, %arg6: memref<1x512xf32, #tpu.memory_space<vmem>>, %arg7: memref<32x512xbf16, #tpu.memory_space<vmem>>) attributes {dimension_semantics = [#tpu.dimension_semantics<parallel>, #tpu.dimension_semantics<parallel>], iteration_bounds = array<i64: 2, 1>, scalar_prefetch = 0 : i64, scratch_operands = 0 : i64, tpu.core_type = #tpu.core_type<tc>, window_params = [{transform_indices = @transform_0, window_bounds = array<i64: 32, 50>}, {transform_indices = @transform_1, window_bounds = array<i64: 32, 1>}, {pipeline_mode = #tpu.pipeline_mode<synchronous>, transform_indices = @transform_2, window_bounds = array<i64: 1, 50>}, {transform_indices = @transform_3, window_bounds = array<i64: 50, 512>}, {transform_indices = @transform_4, window_bounds = array<i64: 1, 512>}, {transform_indices = @transform_5, window_bounds = array<i64: 32, 512>}]} {
    %c0 = arith.constant 0 : index
    %c0_0 = arith.constant 0 : index
    %0 = vector.load %arg2[%c0, %c0_0] : memref<32x50xf32, #tpu.memory_space<vmem>>, vector<32x50xf32>
    %c0_1 = arith.constant 0 : index
    %c0_2 = arith.constant 0 : index
    %1 = vector.load %arg4[%c0_1, %c0_2] : memref<1x50xf32, #tpu.memory_space<vmem>>, vector<1x50xf32>
    %2 = vector.broadcast %1 : vector<1x50xf32> to vector<32x50xf32>
    %3 = arith.mulf %0, %2 : vector<32x50xf32>
    %4 = arith.truncf %3 : vector<32x50xf32> to vector<32x50xbf16>
    %c0_3 = arith.constant 0 : index
    %c0_4 = arith.constant 0 : index
    %5 = vector.load %arg5[%c0_3, %c0_4] : memref<50x512xbf16, #tpu.memory_space<vmem>>, vector<50x512xbf16>
    %cst = arith.constant dense<0.000000e+00> : vector<32x512xf32>
    %6 = tpu.matmul %4, %5, %cst {dimension_numbers = #tpu.dot_dimension_numbers<[1], [0], [0], [1], [0, 0, 1, 1], [], []>} : vector<32x50xbf16>, vector<50x512xbf16>, vector<32x512xf32> -> vector<32x512xf32>
    %c0_5 = arith.constant 0 : index
    %c0_6 = arith.constant 0 : index
    %7 = vector.load %arg3[%c0_5, %c0_6] : memref<32x1xf32, #tpu.memory_space<vmem>>, vector<32x1xf32>
    %8 = vector.broadcast %7 : vector<32x1xf32> to vector<32x512xf32>
    %9 = arith.mulf %8, %6 : vector<32x512xf32>
    %c0_7 = arith.constant 0 : index
    %c0_8 = arith.constant 0 : index
    %10 = vector.load %arg6[%c0_7, %c0_8] : memref<1x512xf32, #tpu.memory_space<vmem>>, vector<1x512xf32>
    %11 = vector.broadcast %10 : vector<1x512xf32> to vector<32x512xf32>
    %12 = arith.addf %9, %11 : vector<32x512xf32>
    %13 = arith.truncf %12 : vector<32x512xf32> to vector<32x512xbf16>
    %c0_9 = arith.constant 0 : index
    %c0_10 = arith.constant 0 : index
    %14 = vector.load %arg7[%c0_9, %c0_10] : memref<32x512xbf16, #tpu.memory_space<vmem>>, vector<32x512xbf16>
    tpu.vector_store %arg7[%c0_9, %c0_10], %13 {strides = array<i32>} : memref<32x512xbf16, #tpu.memory_space<vmem>>, vector<32x512xbf16>,
    return
  }
  func.func @transform_0(%arg0: i32, %arg1: i32) -> (i32, i32) {
    %c0_i32 = arith.constant 0 : i32
    %c0_i32_0 = arith.constant 0 : i32
    return %arg1, %c0_i32 : i32, i32
  }
  func.func @transform_1(%arg0: i32, %arg1: i32) -> (i32, i32) {
    %c0_i32 = arith.constant 0 : i32
    %c0_i32_0 = arith.constant 0 : i32
    return %arg1, %c0_i32 : i32, i32
  }
  func.func @transform_2(%arg0: i32, %arg1: i32) -> (i32, i32) {
    %c0_i32 = arith.constant 0 : i32
    %c0_i32_0 = arith.constant 0 : i32
    %c0_i32_1 = arith.constant 0 : i32
    return %c0_i32, %c0_i32_0 : i32, i32
  }
  func.func @transform_3(%arg0: i32, %arg1: i32) -> (i32, i32) {
    %c0_i32 = arith.constant 0 : i32
    %c0_i32_0 = arith.constant 0 : i32
    return %c0_i32, %arg0 : i32, i32
  }
  func.func @transform_4(%arg0: i32, %arg1: i32) -> (i32, i32) {
    %c0_i32 = arith.constant 0 : i32
    %c0_i32_0 = arith.constant 0 : i32
    return %c0_i32, %arg0 : i32, i32
  }
  func.func @transform_5(%arg0: i32, %arg1: i32) -> (i32, i32) {
    %c0_i32 = arith.constant 0 : i32
    return %arg1, %arg0 : i32, i32
  }
}

module attributes {stable_mosaic.version = 11 : i64} {
  func.func @_gx_gemm_pair_kernel(%arg0: i32, %arg1: i32, %arg2: memref<32x128xbf16, #tpu.memory_space<vmem>>, %arg3: memref<32x128xbf16, #tpu.memory_space<vmem>>, %arg4: memref<128x512xbf16, #tpu.memory_space<vmem>>, %arg5: memref<128x512xbf16, #tpu.memory_space<vmem>>, %arg6: memref<1x512xf32, #tpu.memory_space<vmem>>, %arg7: memref<32x512xbf16, #tpu.memory_space<vmem>>) attributes {dimension_semantics = [#tpu.dimension_semantics<parallel>, #tpu.dimension_semantics<parallel>], iteration_bounds = array<i64: 2, 1>, scalar_prefetch = 0 : i64, scratch_operands = 0 : i64, tpu.core_type = #tpu.core_type<tc>, window_params = [{transform_indices = @transform_0, window_bounds = array<i64: 32, 128>}, {transform_indices = @transform_1, window_bounds = array<i64: 32, 128>}, {transform_indices = @transform_2, window_bounds = array<i64: 128, 512>}, {transform_indices = @transform_3, window_bounds = array<i64: 128, 512>}, {transform_indices = @transform_4, window_bounds = array<i64: 1, 512>}, {transform_indices = @transform_5, window_bounds = array<i64: 32, 512>}]} {
    %c0 = arith.constant 0 : index
    %c0_0 = arith.constant 0 : index
    %0 = vector.load %arg2[%c0, %c0_0] : memref<32x128xbf16, #tpu.memory_space<vmem>>, vector<32x128xbf16>
    %c0_1 = arith.constant 0 : index
    %c0_2 = arith.constant 0 : index
    %1 = vector.load %arg4[%c0_1, %c0_2] : memref<128x512xbf16, #tpu.memory_space<vmem>>, vector<128x512xbf16>
    %cst = arith.constant dense<0.000000e+00> : vector<32x512xf32>
    %2 = tpu.matmul %0, %1, %cst {dimension_numbers = #tpu.dot_dimension_numbers<[1], [0], [0], [1], [0, 0, 1, 1], [], []>} : vector<32x128xbf16>, vector<128x512xbf16>, vector<32x512xf32> -> vector<32x512xf32>
    %c0_3 = arith.constant 0 : index
    %c0_4 = arith.constant 0 : index
    %3 = vector.load %arg3[%c0_3, %c0_4] : memref<32x128xbf16, #tpu.memory_space<vmem>>, vector<32x128xbf16>
    %c0_5 = arith.constant 0 : index
    %c0_6 = arith.constant 0 : index
    %4 = vector.load %arg5[%c0_5, %c0_6] : memref<128x512xbf16, #tpu.memory_space<vmem>>, vector<128x512xbf16>
    %cst_7 = arith.constant dense<0.000000e+00> : vector<32x512xf32>
    %5 = tpu.matmul %3, %4, %cst_7 {dimension_numbers = #tpu.dot_dimension_numbers<[1], [0], [0], [1], [0, 0, 1, 1], [], []>} : vector<32x128xbf16>, vector<128x512xbf16>, vector<32x512xf32> -> vector<32x512xf32>
    %6 = arith.addf %2, %5 : vector<32x512xf32>
    %c0_8 = arith.constant 0 : index
    %c0_9 = arith.constant 0 : index
    %7 = vector.load %arg6[%c0_8, %c0_9] : memref<1x512xf32, #tpu.memory_space<vmem>>, vector<1x512xf32>
    %8 = vector.broadcast %7 : vector<1x512xf32> to vector<32x512xf32>
    %9 = arith.addf %6, %8 : vector<32x512xf32>
    %10 = arith.truncf %9 : vector<32x512xf32> to vector<32x512xbf16>
    %c0_10 = arith.constant 0 : index
    %c0_11 = arith.constant 0 : index
    %11 = vector.load %arg7[%c0_10, %c0_11] : memref<32x512xbf16, #tpu.memory_space<vmem>>, vector<32x512xbf16>
    tpu.vector_store %arg7[%c0_10, %c0_11], %10 {strides = array<i32>} : memref<32x512xbf16, #tpu.memory_space<vmem>>, vector<32x512xbf16>,
    return
  }
  func.func @transform_0(%arg0: i32, %arg1: i32) -> (i32, i32) {
    %c0_i32 = arith.constant 0 : i32
    %c0_i32_0 = arith.constant 0 : i32
    return %arg1, %c0_i32 : i32, i32
  }
  func.func @transform_1(%arg0: i32, %arg1: i32) -> (i32, i32) {
    %c0_i32 = arith.constant 0 : i32
    %c0_i32_0 = arith.constant 0 : i32
    return %arg1, %c0_i32 : i32, i32
  }
  func.func @transform_2(%arg0: i32, %arg1: i32) -> (i32, i32) {
    %c0_i32 = arith.constant 0 : i32
    %c0_i32_0 = arith.constant 0 : i32
    return %c0_i32, %arg0 : i32, i32
  }
  func.func @transform_3(%arg0: i32, %arg1: i32) -> (i32, i32) {
    %c0_i32 = arith.constant 0 : i32
    %c0_i32_0 = arith.constant 0 : i32
    return %c0_i32, %arg0 : i32, i32
  }
  func.func @transform_4(%arg0: i32, %arg1: i32) -> (i32, i32) {
    %c0_i32 = arith.constant 0 : i32
    %c0_i32_0 = arith.constant 0 : i32
    return %c0_i32, %arg0 : i32, i32
  }
  func.func @transform_5(%arg0: i32, %arg1: i32) -> (i32, i32) {
    %c0_i32 = arith.constant 0 : i32
    return %arg1, %arg0 : i32, i32
  }
}

module attributes {stable_mosaic.version = 11 : i64} {
  func.func @_bilstm_chunk_kernel(%arg0: i32, %arg1: memref<8x2x512xbf16, #tpu.memory_space<vmem>>, %arg2: memref<8x2x512xbf16, #tpu.memory_space<vmem>>, %arg3: memref<8x2x1xf32, #tpu.memory_space<vmem>>, %arg4: memref<8x2x1xf32, #tpu.memory_space<vmem>>, %arg5: memref<128x512xbf16, #tpu.memory_space<vmem>>, %arg6: memref<128x512xbf16, #tpu.memory_space<vmem>>, %arg7: memref<8x2x128xbf16, #tpu.memory_space<vmem>>, %arg8: memref<8x2x128xbf16, #tpu.memory_space<vmem>>, %arg9: memref<2x128xf32, #tpu.memory_space<vmem>>, %arg10: memref<2x128xf32, #tpu.memory_space<vmem>>, %arg11: memref<2x128xf32, #tpu.memory_space<vmem>>, %arg12: memref<2x128xf32, #tpu.memory_space<vmem>>) attributes {dimension_semantics = [#tpu.dimension_semantics<arbitrary>], iteration_bounds = array<i64: 2>, scalar_prefetch = 0 : i64, scratch_operands = 4 : i64, tpu.core_type = #tpu.core_type<tc>, window_params = [{transform_indices = @transform_0, window_bounds = array<i64: 8, 2, 512>}, {transform_indices = @transform_1, window_bounds = array<i64: 8, 2, 512>}, {transform_indices = @transform_2, window_bounds = array<i64: 8, 2, 1>}, {transform_indices = @transform_3, window_bounds = array<i64: 8, 2, 1>}, {pipeline_mode = #tpu.pipeline_mode<synchronous>, transform_indices = @transform_4, window_bounds = array<i64: 128, 512>}, {pipeline_mode = #tpu.pipeline_mode<synchronous>, transform_indices = @transform_5, window_bounds = array<i64: 128, 512>}, {transform_indices = @transform_6, window_bounds = array<i64: 8, 2, 128>}, {transform_indices = @transform_7, window_bounds = array<i64: 8, 2, 128>}]} {
    %c0_i32 = arith.constant 0 : i32
    %0 = arith.cmpi eq, %arg0, %c0_i32 : i32
    %1 = arith.extui %0 : i1 to i32
    %c0_i32_0 = arith.constant 0 : i32
    %2 = arith.cmpi ne, %1, %c0_i32_0 : i32
    scf.if %2 {
      %cst_328 = arith.constant 0.000000e+00 : f32
      %795 = vector.broadcast %cst_328 : f32 to vector<2x128xf32>
      %c0_329 = arith.constant 0 : index
      %c0_330 = arith.constant 0 : index
      %796 = vector.load %arg9[%c0_329, %c0_330] : memref<2x128xf32, #tpu.memory_space<vmem>>, vector<2x128xf32>
      tpu.vector_store %arg9[%c0_329, %c0_330], %795 {strides = array<i32>} : memref<2x128xf32, #tpu.memory_space<vmem>>, vector<2x128xf32>,
      %cst_331 = arith.constant 0.000000e+00 : f32
      %797 = vector.broadcast %cst_331 : f32 to vector<2x128xf32>
      %c0_332 = arith.constant 0 : index
      %c0_333 = arith.constant 0 : index
      %798 = vector.load %arg10[%c0_332, %c0_333] : memref<2x128xf32, #tpu.memory_space<vmem>>, vector<2x128xf32>
      tpu.vector_store %arg10[%c0_332, %c0_333], %797 {strides = array<i32>} : memref<2x128xf32, #tpu.memory_space<vmem>>, vector<2x128xf32>,
      %cst_334 = arith.constant 0.000000e+00 : f32
      %799 = vector.broadcast %cst_334 : f32 to vector<2x128xf32>
      %c0_335 = arith.constant 0 : index
      %c0_336 = arith.constant 0 : index
      %800 = vector.load %arg11[%c0_335, %c0_336] : memref<2x128xf32, #tpu.memory_space<vmem>>, vector<2x128xf32>
      tpu.vector_store %arg11[%c0_335, %c0_336], %799 {strides = array<i32>} : memref<2x128xf32, #tpu.memory_space<vmem>>, vector<2x128xf32>,
      %cst_337 = arith.constant 0.000000e+00 : f32
      %801 = vector.broadcast %cst_337 : f32 to vector<2x128xf32>
      %c0_338 = arith.constant 0 : index
      %c0_339 = arith.constant 0 : index
      %802 = vector.load %arg12[%c0_338, %c0_339] : memref<2x128xf32, #tpu.memory_space<vmem>>, vector<2x128xf32>
      tpu.vector_store %arg12[%c0_338, %c0_339], %801 {strides = array<i32>} : memref<2x128xf32, #tpu.memory_space<vmem>>, vector<2x128xf32>,
    } else {
    }
    %c0_i32_1 = arith.constant 0 : i32
    %c7_i32 = arith.constant 7 : i32
    %3 = arith.subi %c7_i32, %c0_i32_1 : i32
    %4 = arith.index_cast %c0_i32_1 : i32 to index
    %c0 = arith.constant 0 : index
    %c0_2 = arith.constant 0 : index
    %5 = vector.load %arg1[%4, %c0, %c0_2] : memref<8x2x512xbf16, #tpu.memory_space<vmem>>, vector<1x2x512xbf16>
    %6 = vector.shape_cast %5 : vector<1x2x512xbf16> to vector<2x512xbf16>
    %7 = arith.extf %6 : vector<2x512xbf16> to vector<2x512xf32>
    %c0_3 = arith.constant 0 : index
    %c0_4 = arith.constant 0 : index
    %8 = vector.load %arg9[%c0_3, %c0_4] : memref<2x128xf32, #tpu.memory_space<vmem>>, vector<2x128xf32>
    %9 = arith.truncf %8 : vector<2x128xf32> to vector<2x128xbf16>
    %c0_5 = arith.constant 0 : index
    %c0_6 = arith.constant 0 : index
    %10 = vector.load %arg5[%c0_5, %c0_6] : memref<128x512xbf16, #tpu.memory_space<vmem>>, vector<128x512xbf16>
    %cst = arith.constant dense<0.000000e+00> : vector<2x512xf32>
    %11 = tpu.matmul %9, %10, %cst {dimension_numbers = #tpu.dot_dimension_numbers<[1], [0], [0], [1], [0, 0, 1, 1], [], []>} : vector<2x128xbf16>, vector<128x512xbf16>, vector<2x512xf32> -> vector<2x512xf32>
    %12 = arith.addf %7, %11 : vector<2x512xf32>
    %13 = arith.index_cast %3 : i32 to index
    %c0_7 = arith.constant 0 : index
    %c0_8 = arith.constant 0 : index
    %14 = vector.load %arg2[%13, %c0_7, %c0_8] : memref<8x2x512xbf16, #tpu.memory_space<vmem>>, vector<1x2x512xbf16>
    %15 = vector.shape_cast %14 : vector<1x2x512xbf16> to vector<2x512xbf16>
    %16 = arith.extf %15 : vector<2x512xbf16> to vector<2x512xf32>
    %c0_9 = arith.constant 0 : index
    %c0_10 = arith.constant 0 : index
    %17 = vector.load %arg11[%c0_9, %c0_10] : memref<2x128xf32, #tpu.memory_space<vmem>>, vector<2x128xf32>
    %18 = arith.truncf %17 : vector<2x128xf32> to vector<2x128xbf16>
    %c0_11 = arith.constant 0 : index
    %c0_12 = arith.constant 0 : index
    %19 = vector.load %arg6[%c0_11, %c0_12] : memref<128x512xbf16, #tpu.memory_space<vmem>>, vector<128x512xbf16>
    %cst_13 = arith.constant dense<0.000000e+00> : vector<2x512xf32>
    %20 = tpu.matmul %18, %19, %cst_13 {dimension_numbers = #tpu.dot_dimension_numbers<[1], [0], [0], [1], [0, 0, 1, 1], [], []>} : vector<2x128xbf16>, vector<128x512xbf16>, vector<2x512xf32> -> vector<2x512xf32>
    %21 = arith.addf %16, %20 : vector<2x512xf32>
    %c0_14 = arith.constant 0 : index
    %c0_15 = arith.constant 0 : index
    %22 = vector.load %arg10[%c0_14, %c0_15] : memref<2x128xf32, #tpu.memory_space<vmem>>, vector<2x128xf32>
    %23 = vector.extract_strided_slice %12 {offsets = [0, 0], sizes = [2, 128], strides = [1, 1]} : vector<2x512xf32> to vector<2x128xf32>
    %24 = arith.negf %23 : vector<2x128xf32>
    %25 = math.exp %24 : vector<2x128xf32>
    %cst_16 = arith.constant 1.000000e+00 : f32
    %26 = vector.broadcast %cst_16 : f32 to vector<2x128xf32>
    %27 = arith.addf %26, %25 : vector<2x128xf32>
    %28 = arith.divf %26, %27 : vector<2x128xf32>
    %29 = vector.extract_strided_slice %12 {offsets = [0, 128], sizes = [2, 128], strides = [1, 1]} : vector<2x512xf32> to vector<2x128xf32>
    %30 = arith.negf %29 : vector<2x128xf32>
    %31 = math.exp %30 : vector<2x128xf32>
    %cst_17 = arith.constant 1.000000e+00 : f32
    %32 = vector.broadcast %cst_17 : f32 to vector<2x128xf32>
    %33 = arith.addf %32, %31 : vector<2x128xf32>
    %34 = arith.divf %32, %33 : vector<2x128xf32>
    %35 = vector.extract_strided_slice %12 {offsets = [0, 256], sizes = [2, 128], strides = [1, 1]} : vector<2x512xf32> to vector<2x128xf32>
    %36 = math.tanh %35 : vector<2x128xf32>
    %37 = vector.extract_strided_slice %12 {offsets = [0, 384], sizes = [2, 128], strides = [1, 1]} : vector<2x512xf32> to vector<2x128xf32>
    %38 = arith.negf %37 : vector<2x128xf32>
    %39 = math.exp %38 : vector<2x128xf32>
    %cst_18 = arith.constant 1.000000e+00 : f32
    %40 = vector.broadcast %cst_18 : f32 to vector<2x128xf32>
    %41 = arith.addf %40, %39 : vector<2x128xf32>
    %42 = arith.divf %40, %41 : vector<2x128xf32>
    %43 = arith.mulf %34, %22 : vector<2x128xf32>
    %44 = arith.mulf %28, %36 : vector<2x128xf32>
    %45 = arith.addf %43, %44 : vector<2x128xf32>
    %46 = math.tanh %45 : vector<2x128xf32>
    %47 = arith.mulf %42, %46 : vector<2x128xf32>
    %c0_19 = arith.constant 0 : index
    %c0_20 = arith.constant 0 : index
    %48 = vector.load %arg12[%c0_19, %c0_20] : memref<2x128xf32, #tpu.memory_space<vmem>>, vector<2x128xf32>
    %49 = vector.extract_strided_slice %21 {offsets = [0, 0], sizes = [2, 128], strides = [1, 1]} : vector<2x512xf32> to vector<2x128xf32>
    %50 = arith.negf %49 : vector<2x128xf32>
    %51 = math.exp %50 : vector<2x128xf32>
    %cst_21 = arith.constant 1.000000e+00 : f32
    %52 = vector.broadcast %cst_21 : f32 to vector<2x128xf32>
    %53 = arith.addf %52, %51 : vector<2x128xf32>
    %54 = arith.divf %52, %53 : vector<2x128xf32>
    %55 = vector.extract_strided_slice %21 {offsets = [0, 128], sizes = [2, 128], strides = [1, 1]} : vector<2x512xf32> to vector<2x128xf32>
    %56 = arith.negf %55 : vector<2x128xf32>
    %57 = math.exp %56 : vector<2x128xf32>
    %cst_22 = arith.constant 1.000000e+00 : f32
    %58 = vector.broadcast %cst_22 : f32 to vector<2x128xf32>
    %59 = arith.addf %58, %57 : vector<2x128xf32>
    %60 = arith.divf %58, %59 : vector<2x128xf32>
    %61 = vector.extract_strided_slice %21 {offsets = [0, 256], sizes = [2, 128], strides = [1, 1]} : vector<2x512xf32> to vector<2x128xf32>
    %62 = math.tanh %61 : vector<2x128xf32>
    %63 = vector.extract_strided_slice %21 {offsets = [0, 384], sizes = [2, 128], strides = [1, 1]} : vector<2x512xf32> to vector<2x128xf32>
    %64 = arith.negf %63 : vector<2x128xf32>
    %65 = math.exp %64 : vector<2x128xf32>
    %cst_23 = arith.constant 1.000000e+00 : f32
    %66 = vector.broadcast %cst_23 : f32 to vector<2x128xf32>
    %67 = arith.addf %66, %65 : vector<2x128xf32>
    %68 = arith.divf %66, %67 : vector<2x128xf32>
    %69 = arith.mulf %60, %48 : vector<2x128xf32>
    %70 = arith.mulf %54, %62 : vector<2x128xf32>
    %71 = arith.addf %69, %70 : vector<2x128xf32>
    %72 = math.tanh %71 : vector<2x128xf32>
    %73 = arith.mulf %68, %72 : vector<2x128xf32>
    %74 = arith.index_cast %c0_i32_1 : i32 to index
    %c0_24 = arith.constant 0 : index
    %c0_25 = arith.constant 0 : index
    %75 = vector.load %arg3[%74, %c0_24, %c0_25] : memref<8x2x1xf32, #tpu.memory_space<vmem>>, vector<1x2x1xf32>
    %76 = vector.shape_cast %75 : vector<1x2x1xf32> to vector<2x1xf32>
    %77 = arith.index_cast %3 : i32 to index
    %c0_26 = arith.constant 0 : index
    %c0_27 = arith.constant 0 : index
    %78 = vector.load %arg4[%77, %c0_26, %c0_27] : memref<8x2x1xf32, #tpu.memory_space<vmem>>, vector<1x2x1xf32>
    %79 = vector.shape_cast %78 : vector<1x2x1xf32> to vector<2x1xf32>
    %80 = vector.broadcast %76 : vector<2x1xf32> to vector<2x128xf32>
    %81 = arith.mulf %47, %80 : vector<2x128xf32>
    %82 = vector.broadcast %79 : vector<2x1xf32> to vector<2x128xf32>
    %83 = arith.mulf %73, %82 : vector<2x128xf32>
    %84 = vector.broadcast %76 : vector<2x1xf32> to vector<2x128xf32>
    %85 = arith.mulf %45, %84 : vector<2x128xf32>
    %c0_28 = arith.constant 0 : index
    %c0_29 = arith.constant 0 : index
    %86 = vector.load %arg10[%c0_28, %c0_29] : memref<2x128xf32, #tpu.memory_space<vmem>>, vector<2x128xf32>
    tpu.vector_store %arg10[%c0_28, %c0_29], %85 {strides = array<i32>} : memref<2x128xf32, #tpu.memory_space<vmem>>, vector<2x128xf32>,
    %c0_30 = arith.constant 0 : index
    %c0_31 = arith.constant 0 : index
    %87 = vector.load %arg9[%c0_30, %c0_31] : memref<2x128xf32, #tpu.memory_space<vmem>>, vector<2x128xf32>
    tpu.vector_store %arg9[%c0_30, %c0_31], %81 {strides = array<i32>} : memref<2x128xf32, #tpu.memory_space<vmem>>, vector<2x128xf32>,
    %88 = vector.broadcast %79 : vector<2x1xf32> to vector<2x128xf32>
    %89 = arith.mulf %71, %88 : vector<2x128xf32>
    %c0_32 = arith.constant 0 : index
    %c0_33 = arith.constant 0 : index
    %90 = vector.load %arg12[%c0_32, %c0_33] : memref<2x128xf32, #tpu.memory_space<vmem>>, vector<2x128xf32>
    tpu.vector_store %arg12[%c0_32, %c0_33], %89 {strides = array<i32>} : memref<2x128xf32, #tpu.memory_space<vmem>>, vector<2x128xf32>,
    %c0_34 = arith.constant 0 : index
    %c0_35 = arith.constant 0 : index
    %91 = vector.load %arg11[%c0_34, %c0_35] : memref<2x128xf32, #tpu.memory_space<vmem>>, vector<2x128xf32>
    tpu.vector_store %arg11[%c0_34, %c0_35], %83 {strides = array<i32>} : memref<2x128xf32, #tpu.memory_space<vmem>>, vector<2x128xf32>,
    %92 = arith.truncf %81 : vector<2x128xf32> to vector<2x128xbf16>
    %93 = arith.index_cast %c0_i32_1 : i32 to index
    %c0_36 = arith.constant 0 : index
    %c0_37 = arith.constant 0 : index
    %94 = vector.load %arg7[%93, %c0_36, %c0_37] : memref<8x2x128xbf16, #tpu.memory_space<vmem>>, vector<1x2x128xbf16>
    %95 = vector.shape_cast %94 : vector<1x2x128xbf16> to vector<2x128xbf16>
    %96 = vector.shape_cast %92 : vector<2x128xbf16> to vector<1x2x128xbf16>
    tpu.vector_store %arg7[%93, %c0_36, %c0_37], %96 {strides = array<i32>} : memref<8x2x128xbf16, #tpu.memory_space<vmem>>, vector<1x2x128xbf16>,
    %97 = arith.truncf %83 : vector<2x128xf32> to vector<2x128xbf16>
    %98 = arith.index_cast %3 : i32 to index
    %c0_38 = arith.constant 0 : index
    %c0_39 = arith.constant 0 : index
    %99 = vector.load %arg8[%98, %c0_38, %c0_39] : memref<8x2x128xbf16, #tpu.memory_space<vmem>>, vector<1x2x128xbf16>
    %100 = vector.shape_cast %99 : vector<1x2x128xbf16> to vector<2x128xbf16>
    %101 = vector.shape_cast %97 : vector<2x128xbf16> to vector<1x2x128xbf16>
    tpu.vector_store %arg8[%98, %c0_38, %c0_39], %101 {strides = array<i32>} : memref<8x2x128xbf16, #tpu.memory_space<vmem>>, vector<1x2x128xbf16>,
    %c1_i32 = arith.constant 1 : i32
    %c7_i32_40 = arith.constant 7 : i32
    %102 = arith.subi %c7_i32_40, %c1_i32 : i32
    %103 = arith.index_cast %c1_i32 : i32 to index
    %c0_41 = arith.constant 0 : index
    %c0_42 = arith.constant 0 : index
    %104 = vector.load %arg1[%103, %c0_41, %c0_42] : memref<8x2x512xbf16, #tpu.memory_space<vmem>>, vector<1x2x512xbf16>
    %105 = vector.shape_cast %104 : vector<1x2x512xbf16> to vector<2x512xbf16>
    %106 = arith.extf %105 : vector<2x512xbf16> to vector<2x512xf32>
    %c0_43 = arith.constant 0 : index
    %c0_44 = arith.constant 0 : index
    %107 = vector.load %arg9[%c0_43, %c0_44] : memref<2x128xf32, #tpu.memory_space<vmem>>, vector<2x128xf32>
    %108 = arith.truncf %107 : vector<2x128xf32> to vector<2x128xbf16>
    %c0_45 = arith.constant 0 : index
    %c0_46 = arith.constant 0 : index
    %109 = vector.load %arg5[%c0_45, %c0_46] : memref<128x512xbf16, #tpu.memory_space<vmem>>, vector<128x512xbf16>
    %cst_47 = arith.constant dense<0.000000e+00> : vector<2x512xf32>
    %110 = tpu.matmul %108, %109, %cst_47 {dimension_numbers = #tpu.dot_dimension_numbers<[1], [0], [0], [1], [0, 0, 1, 1], [], []>} : vector<2x128xbf16>, vector<128x512xbf16>, vector<2x512xf32> -> vector<2x512xf32>
    %111 = arith.addf %106, %110 : vector<2x512xf32>
    %112 = arith.index_cast %102 : i32 to index
    %c0_48 = arith.constant 0 : index
    %c0_49 = arith.constant 0 : index
    %113 = vector.load %arg2[%112, %c0_48, %c0_49] : memref<8x2x512xbf16, #tpu.memory_space<vmem>>, vector<1x2x512xbf16>
    %114 = vector.shape_cast %113 : vector<1x2x512xbf16> to vector<2x512xbf16>
    %115 = arith.extf %114 : vector<2x512xbf16> to vector<2x512xf32>
    %c0_50 = arith.constant 0 : index
    %c0_51 = arith.constant 0 : index
    %116 = vector.load %arg11[%c0_50, %c0_51] : memref<2x128xf32, #tpu.memory_space<vmem>>, vector<2x128xf32>
    %117 = arith.truncf %116 : vector<2x128xf32> to vector<2x128xbf16>
    %c0_52 = arith.constant 0 : index
    %c0_53 = arith.constant 0 : index
    %118 = vector.load %arg6[%c0_52, %c0_53] : memref<128x512xbf16, #tpu.memory_space<vmem>>, vector<128x512xbf16>
    %cst_54 = arith.constant dense<0.000000e+00> : vector<2x512xf32>
    %119 = tpu.matmul %117, %118, %cst_54 {dimension_numbers = #tpu.dot_dimension_numbers<[1], [0], [0], [1], [0, 0, 1, 1], [], []>} : vector<2x128xbf16>, vector<128x512xbf16>, vector<2x512xf32> -> vector<2x512xf32>
    %120 = arith.addf %115, %119 : vector<2x512xf32>
    %c0_55 = arith.constant 0 : index
    %c0_56 = arith.constant 0 : index
    %121 = vector.load %arg10[%c0_55, %c0_56] : memref<2x128xf32, #tpu.memory_space<vmem>>, vector<2x128xf32>
    %122 = vector.extract_strided_slice %111 {offsets = [0, 0], sizes = [2, 128], strides = [1, 1]} : vector<2x512xf32> to vector<2x128xf32>
    %123 = arith.negf %122 : vector<2x128xf32>
    %124 = math.exp %123 : vector<2x128xf32>
    %cst_57 = arith.constant 1.000000e+00 : f32
    %125 = vector.broadcast %cst_57 : f32 to vector<2x128xf32>
    %126 = arith.addf %125, %124 : vector<2x128xf32>
    %127 = arith.divf %125, %126 : vector<2x128xf32>
    %128 = vector.extract_strided_slice %111 {offsets = [0, 128], sizes = [2, 128], strides = [1, 1]} : vector<2x512xf32> to vector<2x128xf32>
    %129 = arith.negf %128 : vector<2x128xf32>
    %130 = math.exp %129 : vector<2x128xf32>
    %cst_58 = arith.constant 1.000000e+00 : f32
    %131 = vector.broadcast %cst_58 : f32 to vector<2x128xf32>
    %132 = arith.addf %131, %130 : vector<2x128xf32>
    %133 = arith.divf %131, %132 : vector<2x128xf32>
    %134 = vector.extract_strided_slice %111 {offsets = [0, 256], sizes = [2, 128], strides = [1, 1]} : vector<2x512xf32> to vector<2x128xf32>
    %135 = math.tanh %134 : vector<2x128xf32>
    %136 = vector.extract_strided_slice %111 {offsets = [0, 384], sizes = [2, 128], strides = [1, 1]} : vector<2x512xf32> to vector<2x128xf32>
    %137 = arith.negf %136 : vector<2x128xf32>
    %138 = math.exp %137 : vector<2x128xf32>
    %cst_59 = arith.constant 1.000000e+00 : f32
    %139 = vector.broadcast %cst_59 : f32 to vector<2x128xf32>
    %140 = arith.addf %139, %138 : vector<2x128xf32>
    %141 = arith.divf %139, %140 : vector<2x128xf32>
    %142 = arith.mulf %133, %121 : vector<2x128xf32>
    %143 = arith.mulf %127, %135 : vector<2x128xf32>
    %144 = arith.addf %142, %143 : vector<2x128xf32>
    %145 = math.tanh %144 : vector<2x128xf32>
    %146 = arith.mulf %141, %145 : vector<2x128xf32>
    %c0_60 = arith.constant 0 : index
    %c0_61 = arith.constant 0 : index
    %147 = vector.load %arg12[%c0_60, %c0_61] : memref<2x128xf32, #tpu.memory_space<vmem>>, vector<2x128xf32>
    %148 = vector.extract_strided_slice %120 {offsets = [0, 0], sizes = [2, 128], strides = [1, 1]} : vector<2x512xf32> to vector<2x128xf32>
    %149 = arith.negf %148 : vector<2x128xf32>
    %150 = math.exp %149 : vector<2x128xf32>
    %cst_62 = arith.constant 1.000000e+00 : f32
    %151 = vector.broadcast %cst_62 : f32 to vector<2x128xf32>
    %152 = arith.addf %151, %150 : vector<2x128xf32>
    %153 = arith.divf %151, %152 : vector<2x128xf32>
    %154 = vector.extract_strided_slice %120 {offsets = [0, 128], sizes = [2, 128], strides = [1, 1]} : vector<2x512xf32> to vector<2x128xf32>
    %155 = arith.negf %154 : vector<2x128xf32>
    %156 = math.exp %155 : vector<2x128xf32>
    %cst_63 = arith.constant 1.000000e+00 : f32
    %157 = vector.broadcast %cst_63 : f32 to vector<2x128xf32>
    %158 = arith.addf %157, %156 : vector<2x128xf32>
    %159 = arith.divf %157, %158 : vector<2x128xf32>
    %160 = vector.extract_strided_slice %120 {offsets = [0, 256], sizes = [2, 128], strides = [1, 1]} : vector<2x512xf32> to vector<2x128xf32>
    %161 = math.tanh %160 : vector<2x128xf32>
    %162 = vector.extract_strided_slice %120 {offsets = [0, 384], sizes = [2, 128], strides = [1, 1]} : vector<2x512xf32> to vector<2x128xf32>
    %163 = arith.negf %162 : vector<2x128xf32>
    %164 = math.exp %163 : vector<2x128xf32>
    %cst_64 = arith.constant 1.000000e+00 : f32
    %165 = vector.broadcast %cst_64 : f32 to vector<2x128xf32>
    %166 = arith.addf %165, %164 : vector<2x128xf32>
    %167 = arith.divf %165, %166 : vector<2x128xf32>
    %168 = arith.mulf %159, %147 : vector<2x128xf32>
    %169 = arith.mulf %153, %161 : vector<2x128xf32>
    %170 = arith.addf %168, %169 : vector<2x128xf32>
    %171 = math.tanh %170 : vector<2x128xf32>
    %172 = arith.mulf %167, %171 : vector<2x128xf32>
    %173 = arith.index_cast %c1_i32 : i32 to index
    %c0_65 = arith.constant 0 : index
    %c0_66 = arith.constant 0 : index
    %174 = vector.load %arg3[%173, %c0_65, %c0_66] : memref<8x2x1xf32, #tpu.memory_space<vmem>>, vector<1x2x1xf32>
    %175 = vector.shape_cast %174 : vector<1x2x1xf32> to vector<2x1xf32>
    %176 = arith.index_cast %102 : i32 to index
    %c0_67 = arith.constant 0 : index
    %c0_68 = arith.constant 0 : index
    %177 = vector.load %arg4[%176, %c0_67, %c0_68] : memref<8x2x1xf32, #tpu.memory_space<vmem>>, vector<1x2x1xf32>
    %178 = vector.shape_cast %177 : vector<1x2x1xf32> to vector<2x1xf32>
    %179 = vector.broadcast %175 : vector<2x1xf32> to vector<2x128xf32>
    %180 = arith.mulf %146, %179 : vector<2x128xf32>
    %181 = vector.broadcast %178 : vector<2x1xf32> to vector<2x128xf32>
    %182 = arith.mulf %172, %181 : vector<2x128xf32>
    %183 = vector.broadcast %175 : vector<2x1xf32> to vector<2x128xf32>
    %184 = arith.mulf %144, %183 : vector<2x128xf32>
    %c0_69 = arith.constant 0 : index
    %c0_70 = arith.constant 0 : index
    %185 = vector.load %arg10[%c0_69, %c0_70] : memref<2x128xf32, #tpu.memory_space<vmem>>, vector<2x128xf32>
    tpu.vector_store %arg10[%c0_69, %c0_70], %184 {strides = array<i32>} : memref<2x128xf32, #tpu.memory_space<vmem>>, vector<2x128xf32>,
    %c0_71 = arith.constant 0 : index
    %c0_72 = arith.constant 0 : index
    %186 = vector.load %arg9[%c0_71, %c0_72] : memref<2x128xf32, #tpu.memory_space<vmem>>, vector<2x128xf32>
    tpu.vector_store %arg9[%c0_71, %c0_72], %180 {strides = array<i32>} : memref<2x128xf32, #tpu.memory_space<vmem>>, vector<2x128xf32>,
    %187 = vector.broadcast %178 : vector<2x1xf32> to vector<2x128xf32>
    %188 = arith.mulf %170, %187 : vector<2x128xf32>
    %c0_73 = arith.constant 0 : index
    %c0_74 = arith.constant 0 : index
    %189 = vector.load %arg12[%c0_73, %c0_74] : memref<2x128xf32, #tpu.memory_space<vmem>>, vector<2x128xf32>
    tpu.vector_store %arg12[%c0_73, %c0_74], %188 {strides = array<i32>} : memref<2x128xf32, #tpu.memory_space<vmem>>, vector<2x128xf32>,
    %c0_75 = arith.constant 0 : index
    %c0_76 = arith.constant 0 : index
    %190 = vector.load %arg11[%c0_75, %c0_76] : memref<2x128xf32, #tpu.memory_space<vmem>>, vector<2x128xf32>
    tpu.vector_store %arg11[%c0_75, %c0_76], %182 {strides = array<i32>} : memref<2x128xf32, #tpu.memory_space<vmem>>, vector<2x128xf32>,
    %191 = arith.truncf %180 : vector<2x128xf32> to vector<2x128xbf16>
    %192 = arith.index_cast %c1_i32 : i32 to index
    %c0_77 = arith.constant 0 : index
    %c0_78 = arith.constant 0 : index
    %193 = vector.load %arg7[%192, %c0_77, %c0_78] : memref<8x2x128xbf16, #tpu.memory_space<vmem>>, vector<1x2x128xbf16>
    %194 = vector.shape_cast %193 : vector<1x2x128xbf16> to vector<2x128xbf16>
    %195 = vector.shape_cast %191 : vector<2x128xbf16> to vector<1x2x128xbf16>
    tpu.vector_store %arg7[%192, %c0_77, %c0_78], %195 {strides = array<i32>} : memref<8x2x128xbf16, #tpu.memory_space<vmem>>, vector<1x2x128xbf16>,
    %196 = arith.truncf %182 : vector<2x128xf32> to vector<2x128xbf16>
    %197 = arith.index_cast %102 : i32 to index
    %c0_79 = arith.constant 0 : index
    %c0_80 = arith.constant 0 : index
    %198 = vector.load %arg8[%197, %c0_79, %c0_80] : memref<8x2x128xbf16, #tpu.memory_space<vmem>>, vector<1x2x128xbf16>
    %199 = vector.shape_cast %198 : vector<1x2x128xbf16> to vector<2x128xbf16>
    %200 = vector.shape_cast %196 : vector<2x128xbf16> to vector<1x2x128xbf16>
    tpu.vector_store %arg8[%197, %c0_79, %c0_80], %200 {strides = array<i32>} : memref<8x2x128xbf16, #tpu.memory_space<vmem>>, vector<1x2x128xbf16>,
    %c2_i32 = arith.constant 2 : i32
    %c7_i32_81 = arith.constant 7 : i32
    %201 = arith.subi %c7_i32_81, %c2_i32 : i32
    %202 = arith.index_cast %c2_i32 : i32 to index
    %c0_82 = arith.constant 0 : index
    %c0_83 = arith.constant 0 : index
    %203 = vector.load %arg1[%202, %c0_82, %c0_83] : memref<8x2x512xbf16, #tpu.memory_space<vmem>>, vector<1x2x512xbf16>
    %204 = vector.shape_cast %203 : vector<1x2x512xbf16> to vector<2x512xbf16>
    %205 = arith.extf %204 : vector<2x512xbf16> to vector<2x512xf32>
    %c0_84 = arith.constant 0 : index
    %c0_85 = arith.constant 0 : index
    %206 = vector.load %arg9[%c0_84, %c0_85] : memref<2x128xf32, #tpu.memory_space<vmem>>, vector<2x128xf32>
    %207 = arith.truncf %206 : vector<2x128xf32> to vector<2x128xbf16>
    %c0_86 = arith.constant 0 : index
    %c0_87 = arith.constant 0 : index
    %208 = vector.load %arg5[%c0_86, %c0_87] : memref<128x512xbf16, #tpu.memory_space<vmem>>, vector<128x512xbf16>
    %cst_88 = arith.constant dense<0.000000e+00> : vector<2x512xf32>
    %209 = tpu.matmul %207, %208, %cst_88 {dimension_numbers = #tpu.dot_dimension_numbers<[1], [0], [0], [1], [0, 0, 1, 1], [], []>} : vector<2x128xbf16>, vector<128x512xbf16>, vector<2x512xf32> -> vector<2x512xf32>
    %210 = arith.addf %205, %209 : vector<2x512xf32>
    %211 = arith.index_cast %201 : i32 to index
    %c0_89 = arith.constant 0 : index
    %c0_90 = arith.constant 0 : index
    %212 = vector.load %arg2[%211, %c0_89, %c0_90] : memref<8x2x512xbf16, #tpu.memory_space<vmem>>, vector<1x2x512xbf16>
    %213 = vector.shape_cast %212 : vector<1x2x512xbf16> to vector<2x512xbf16>
    %214 = arith.extf %213 : vector<2x512xbf16> to vector<2x512xf32>
    %c0_91 = arith.constant 0 : index
    %c0_92 = arith.constant 0 : index
    %215 = vector.load %arg11[%c0_91, %c0_92] : memref<2x128xf32, #tpu.memory_space<vmem>>, vector<2x128xf32>
    %216 = arith.truncf %215 : vector<2x128xf32> to vector<2x128xbf16>
    %c0_93 = arith.constant 0 : index
    %c0_94 = arith.constant 0 : index
    %217 = vector.load %arg6[%c0_93, %c0_94] : memref<128x512xbf16, #tpu.memory_space<vmem>>, vector<128x512xbf16>
    %cst_95 = arith.constant dense<0.000000e+00> : vector<2x512xf32>
    %218 = tpu.matmul %216, %217, %cst_95 {dimension_numbers = #tpu.dot_dimension_numbers<[1], [0], [0], [1], [0, 0, 1, 1], [], []>} : vector<2x128xbf16>, vector<128x512xbf16>, vector<2x512xf32> -> vector<2x512xf32>
    %219 = arith.addf %214, %218 : vector<2x512xf32>
    %c0_96 = arith.constant 0 : index
    %c0_97 = arith.constant 0 : index
    %220 = vector.load %arg10[%c0_96, %c0_97] : memref<2x128xf32, #tpu.memory_space<vmem>>, vector<2x128xf32>
    %221 = vector.extract_strided_slice %210 {offsets = [0, 0], sizes = [2, 128], strides = [1, 1]} : vector<2x512xf32> to vector<2x128xf32>
    %222 = arith.negf %221 : vector<2x128xf32>
    %223 = math.exp %222 : vector<2x128xf32>
    %cst_98 = arith.constant 1.000000e+00 : f32
    %224 = vector.broadcast %cst_98 : f32 to vector<2x128xf32>
    %225 = arith.addf %224, %223 : vector<2x128xf32>
    %226 = arith.divf %224, %225 : vector<2x128xf32>
    %227 = vector.extract_strided_slice %210 {offsets = [0, 128], sizes = [2, 128], strides = [1, 1]} : vector<2x512xf32> to vector<2x128xf32>
    %228 = arith.negf %227 : vector<2x128xf32>
    %229 = math.exp %228 : vector<2x128xf32>
    %cst_99 = arith.constant 1.000000e+00 : f32
    %230 = vector.broadcast %cst_99 : f32 to vector<2x128xf32>
    %231 = arith.addf %230, %229 : vector<2x128xf32>
    %232 = arith.divf %230, %231 : vector<2x128xf32>
    %233 = vector.extract_strided_slice %210 {offsets = [0, 256], sizes = [2, 128], strides = [1, 1]} : vector<2x512xf32> to vector<2x128xf32>
    %234 = math.tanh %233 : vector<2x128xf32>
    %235 = vector.extract_strided_slice %210 {offsets = [0, 384], sizes = [2, 128], strides = [1, 1]} : vector<2x512xf32> to vector<2x128xf32>
    %236 = arith.negf %235 : vector<2x128xf32>
    %237 = math.exp %236 : vector<2x128xf32>
    %cst_100 = arith.constant 1.000000e+00 : f32
    %238 = vector.broadcast %cst_100 : f32 to vector<2x128xf32>
    %239 = arith.addf %238, %237 : vector<2x128xf32>
    %240 = arith.divf %238, %239 : vector<2x128xf32>
    %241 = arith.mulf %232, %220 : vector<2x128xf32>
    %242 = arith.mulf %226, %234 : vector<2x128xf32>
    %243 = arith.addf %241, %242 : vector<2x128xf32>
    %244 = math.tanh %243 : vector<2x128xf32>
    %245 = arith.mulf %240, %244 : vector<2x128xf32>
    %c0_101 = arith.constant 0 : index
    %c0_102 = arith.constant 0 : index
    %246 = vector.load %arg12[%c0_101, %c0_102] : memref<2x128xf32, #tpu.memory_space<vmem>>, vector<2x128xf32>
    %247 = vector.extract_strided_slice %219 {offsets = [0, 0], sizes = [2, 128], strides = [1, 1]} : vector<2x512xf32> to vector<2x128xf32>
    %248 = arith.negf %247 : vector<2x128xf32>
    %249 = math.exp %248 : vector<2x128xf32>
    %cst_103 = arith.constant 1.000000e+00 : f32
    %250 = vector.broadcast %cst_103 : f32 to vector<2x128xf32>
    %251 = arith.addf %250, %249 : vector<2x128xf32>
    %252 = arith.divf %250, %251 : vector<2x128xf32>
    %253 = vector.extract_strided_slice %219 {offsets = [0, 128], sizes = [2, 128], strides = [1, 1]} : vector<2x512xf32> to vector<2x128xf32>
    %254 = arith.negf %253 : vector<2x128xf32>
    %255 = math.exp %254 : vector<2x128xf32>
    %cst_104 = arith.constant 1.000000e+00 : f32
    %256 = vector.broadcast %cst_104 : f32 to vector<2x128xf32>
    %257 = arith.addf %256, %255 : vector<2x128xf32>
    %258 = arith.divf %256, %257 : vector<2x128xf32>
    %259 = vector.extract_strided_slice %219 {offsets = [0, 256], sizes = [2, 128], strides = [1, 1]} : vector<2x512xf32> to vector<2x128xf32>
    %260 = math.tanh %259 : vector<2x128xf32>
    %261 = vector.extract_strided_slice %219 {offsets = [0, 384], sizes = [2, 128], strides = [1, 1]} : vector<2x512xf32> to vector<2x128xf32>
    %262 = arith.negf %261 : vector<2x128xf32>
    %263 = math.exp %262 : vector<2x128xf32>
    %cst_105 = arith.constant 1.000000e+00 : f32
    %264 = vector.broadcast %cst_105 : f32 to vector<2x128xf32>
    %265 = arith.addf %264, %263 : vector<2x128xf32>
    %266 = arith.divf %264, %265 : vector<2x128xf32>
    %267 = arith.mulf %258, %246 : vector<2x128xf32>
    %268 = arith.mulf %252, %260 : vector<2x128xf32>
    %269 = arith.addf %267, %268 : vector<2x128xf32>
    %270 = math.tanh %269 : vector<2x128xf32>
    %271 = arith.mulf %266, %270 : vector<2x128xf32>
    %272 = arith.index_cast %c2_i32 : i32 to index
    %c0_106 = arith.constant 0 : index
    %c0_107 = arith.constant 0 : index
    %273 = vector.load %arg3[%272, %c0_106, %c0_107] : memref<8x2x1xf32, #tpu.memory_space<vmem>>, vector<1x2x1xf32>
    %274 = vector.shape_cast %273 : vector<1x2x1xf32> to vector<2x1xf32>
    %275 = arith.index_cast %201 : i32 to index
    %c0_108 = arith.constant 0 : index
    %c0_109 = arith.constant 0 : index
    %276 = vector.load %arg4[%275, %c0_108, %c0_109] : memref<8x2x1xf32, #tpu.memory_space<vmem>>, vector<1x2x1xf32>
    %277 = vector.shape_cast %276 : vector<1x2x1xf32> to vector<2x1xf32>
    %278 = vector.broadcast %274 : vector<2x1xf32> to vector<2x128xf32>
    %279 = arith.mulf %245, %278 : vector<2x128xf32>
    %280 = vector.broadcast %277 : vector<2x1xf32> to vector<2x128xf32>
    %281 = arith.mulf %271, %280 : vector<2x128xf32>
    %282 = vector.broadcast %274 : vector<2x1xf32> to vector<2x128xf32>
    %283 = arith.mulf %243, %282 : vector<2x128xf32>
    %c0_110 = arith.constant 0 : index
    %c0_111 = arith.constant 0 : index
    %284 = vector.load %arg10[%c0_110, %c0_111] : memref<2x128xf32, #tpu.memory_space<vmem>>, vector<2x128xf32>
    tpu.vector_store %arg10[%c0_110, %c0_111], %283 {strides = array<i32>} : memref<2x128xf32, #tpu.memory_space<vmem>>, vector<2x128xf32>,
    %c0_112 = arith.constant 0 : index
    %c0_113 = arith.constant 0 : index
    %285 = vector.load %arg9[%c0_112, %c0_113] : memref<2x128xf32, #tpu.memory_space<vmem>>, vector<2x128xf32>
    tpu.vector_store %arg9[%c0_112, %c0_113], %279 {strides = array<i32>} : memref<2x128xf32, #tpu.memory_space<vmem>>, vector<2x128xf32>,
    %286 = vector.broadcast %277 : vector<2x1xf32> to vector<2x128xf32>
    %287 = arith.mulf %269, %286 : vector<2x128xf32>
    %c0_114 = arith.constant 0 : index
    %c0_115 = arith.constant 0 : index
    %288 = vector.load %arg12[%c0_114, %c0_115] : memref<2x128xf32, #tpu.memory_space<vmem>>, vector<2x128xf32>
    tpu.vector_store %arg12[%c0_114, %c0_115], %287 {strides = array<i32>} : memref<2x128xf32, #tpu.memory_space<vmem>>, vector<2x128xf32>,
    %c0_116 = arith.constant 0 : index
    %c0_117 = arith.constant 0 : index
    %289 = vector.load %arg11[%c0_116, %c0_117] : memref<2x128xf32, #tpu.memory_space<vmem>>, vector<2x128xf32>
    tpu.vector_store %arg11[%c0_116, %c0_117], %281 {strides = array<i32>} : memref<2x128xf32, #tpu.memory_space<vmem>>, vector<2x128xf32>,
    %290 = arith.truncf %279 : vector<2x128xf32> to vector<2x128xbf16>
    %291 = arith.index_cast %c2_i32 : i32 to index
    %c0_118 = arith.constant 0 : index
    %c0_119 = arith.constant 0 : index
    %292 = vector.load %arg7[%291, %c0_118, %c0_119] : memref<8x2x128xbf16, #tpu.memory_space<vmem>>, vector<1x2x128xbf16>
    %293 = vector.shape_cast %292 : vector<1x2x128xbf16> to vector<2x128xbf16>
    %294 = vector.shape_cast %290 : vector<2x128xbf16> to vector<1x2x128xbf16>
    tpu.vector_store %arg7[%291, %c0_118, %c0_119], %294 {strides = array<i32>} : memref<8x2x128xbf16, #tpu.memory_space<vmem>>, vector<1x2x128xbf16>,
    %295 = arith.truncf %281 : vector<2x128xf32> to vector<2x128xbf16>
    %296 = arith.index_cast %201 : i32 to index
    %c0_120 = arith.constant 0 : index
    %c0_121 = arith.constant 0 : index
    %297 = vector.load %arg8[%296, %c0_120, %c0_121] : memref<8x2x128xbf16, #tpu.memory_space<vmem>>, vector<1x2x128xbf16>
    %298 = vector.shape_cast %297 : vector<1x2x128xbf16> to vector<2x128xbf16>
    %299 = vector.shape_cast %295 : vector<2x128xbf16> to vector<1x2x128xbf16>
    tpu.vector_store %arg8[%296, %c0_120, %c0_121], %299 {strides = array<i32>} : memref<8x2x128xbf16, #tpu.memory_space<vmem>>, vector<1x2x128xbf16>,
    %c3_i32 = arith.constant 3 : i32
    %c7_i32_122 = arith.constant 7 : i32
    %300 = arith.subi %c7_i32_122, %c3_i32 : i32
    %301 = arith.index_cast %c3_i32 : i32 to index
    %c0_123 = arith.constant 0 : index
    %c0_124 = arith.constant 0 : index
    %302 = vector.load %arg1[%301, %c0_123, %c0_124] : memref<8x2x512xbf16, #tpu.memory_space<vmem>>, vector<1x2x512xbf16>
    %303 = vector.shape_cast %302 : vector<1x2x512xbf16> to vector<2x512xbf16>
    %304 = arith.extf %303 : vector<2x512xbf16> to vector<2x512xf32>
    %c0_125 = arith.constant 0 : index
    %c0_126 = arith.constant 0 : index
    %305 = vector.load %arg9[%c0_125, %c0_126] : memref<2x128xf32, #tpu.memory_space<vmem>>, vector<2x128xf32>
    %306 = arith.truncf %305 : vector<2x128xf32> to vector<2x128xbf16>
    %c0_127 = arith.constant 0 : index
    %c0_128 = arith.constant 0 : index
    %307 = vector.load %arg5[%c0_127, %c0_128] : memref<128x512xbf16, #tpu.memory_space<vmem>>, vector<128x512xbf16>
    %cst_129 = arith.constant dense<0.000000e+00> : vector<2x512xf32>
    %308 = tpu.matmul %306, %307, %cst_129 {dimension_numbers = #tpu.dot_dimension_numbers<[1], [0], [0], [1], [0, 0, 1, 1], [], []>} : vector<2x128xbf16>, vector<128x512xbf16>, vector<2x512xf32> -> vector<2x512xf32>
    %309 = arith.addf %304, %308 : vector<2x512xf32>
    %310 = arith.index_cast %300 : i32 to index
    %c0_130 = arith.constant 0 : index
    %c0_131 = arith.constant 0 : index
    %311 = vector.load %arg2[%310, %c0_130, %c0_131] : memref<8x2x512xbf16, #tpu.memory_space<vmem>>, vector<1x2x512xbf16>
    %312 = vector.shape_cast %311 : vector<1x2x512xbf16> to vector<2x512xbf16>
    %313 = arith.extf %312 : vector<2x512xbf16> to vector<2x512xf32>
    %c0_132 = arith.constant 0 : index
    %c0_133 = arith.constant 0 : index
    %314 = vector.load %arg11[%c0_132, %c0_133] : memref<2x128xf32, #tpu.memory_space<vmem>>, vector<2x128xf32>
    %315 = arith.truncf %314 : vector<2x128xf32> to vector<2x128xbf16>
    %c0_134 = arith.constant 0 : index
    %c0_135 = arith.constant 0 : index
    %316 = vector.load %arg6[%c0_134, %c0_135] : memref<128x512xbf16, #tpu.memory_space<vmem>>, vector<128x512xbf16>
    %cst_136 = arith.constant dense<0.000000e+00> : vector<2x512xf32>
    %317 = tpu.matmul %315, %316, %cst_136 {dimension_numbers = #tpu.dot_dimension_numbers<[1], [0], [0], [1], [0, 0, 1, 1], [], []>} : vector<2x128xbf16>, vector<128x512xbf16>, vector<2x512xf32> -> vector<2x512xf32>
    %318 = arith.addf %313, %317 : vector<2x512xf32>
    %c0_137 = arith.constant 0 : index
    %c0_138 = arith.constant 0 : index
    %319 = vector.load %arg10[%c0_137, %c0_138] : memref<2x128xf32, #tpu.memory_space<vmem>>, vector<2x128xf32>
    %320 = vector.extract_strided_slice %309 {offsets = [0, 0], sizes = [2, 128], strides = [1, 1]} : vector<2x512xf32> to vector<2x128xf32>
    %321 = arith.negf %320 : vector<2x128xf32>
    %322 = math.exp %321 : vector<2x128xf32>
    %cst_139 = arith.constant 1.000000e+00 : f32
    %323 = vector.broadcast %cst_139 : f32 to vector<2x128xf32>
    %324 = arith.addf %323, %322 : vector<2x128xf32>
    %325 = arith.divf %323, %324 : vector<2x128xf32>
    %326 = vector.extract_strided_slice %309 {offsets = [0, 128], sizes = [2, 128], strides = [1, 1]} : vector<2x512xf32> to vector<2x128xf32>
    %327 = arith.negf %326 : vector<2x128xf32>
    %328 = math.exp %327 : vector<2x128xf32>
    %cst_140 = arith.constant 1.000000e+00 : f32
    %329 = vector.broadcast %cst_140 : f32 to vector<2x128xf32>
    %330 = arith.addf %329, %328 : vector<2x128xf32>
    %331 = arith.divf %329, %330 : vector<2x128xf32>
    %332 = vector.extract_strided_slice %309 {offsets = [0, 256], sizes = [2, 128], strides = [1, 1]} : vector<2x512xf32> to vector<2x128xf32>
    %333 = math.tanh %332 : vector<2x128xf32>
    %334 = vector.extract_strided_slice %309 {offsets = [0, 384], sizes = [2, 128], strides = [1, 1]} : vector<2x512xf32> to vector<2x128xf32>
    %335 = arith.negf %334 : vector<2x128xf32>
    %336 = math.exp %335 : vector<2x128xf32>
    %cst_141 = arith.constant 1.000000e+00 : f32
    %337 = vector.broadcast %cst_141 : f32 to vector<2x128xf32>
    %338 = arith.addf %337, %336 : vector<2x128xf32>
    %339 = arith.divf %337, %338 : vector<2x128xf32>
    %340 = arith.mulf %331, %319 : vector<2x128xf32>
    %341 = arith.mulf %325, %333 : vector<2x128xf32>
    %342 = arith.addf %340, %341 : vector<2x128xf32>
    %343 = math.tanh %342 : vector<2x128xf32>
    %344 = arith.mulf %339, %343 : vector<2x128xf32>
    %c0_142 = arith.constant 0 : index
    %c0_143 = arith.constant 0 : index
    %345 = vector.load %arg12[%c0_142, %c0_143] : memref<2x128xf32, #tpu.memory_space<vmem>>, vector<2x128xf32>
    %346 = vector.extract_strided_slice %318 {offsets = [0, 0], sizes = [2, 128], strides = [1, 1]} : vector<2x512xf32> to vector<2x128xf32>
    %347 = arith.negf %346 : vector<2x128xf32>
    %348 = math.exp %347 : vector<2x128xf32>
    %cst_144 = arith.constant 1.000000e+00 : f32
    %349 = vector.broadcast %cst_144 : f32 to vector<2x128xf32>
    %350 = arith.addf %349, %348 : vector<2x128xf32>
    %351 = arith.divf %349, %350 : vector<2x128xf32>
    %352 = vector.extract_strided_slice %318 {offsets = [0, 128], sizes = [2, 128], strides = [1, 1]} : vector<2x512xf32> to vector<2x128xf32>
    %353 = arith.negf %352 : vector<2x128xf32>
    %354 = math.exp %353 : vector<2x128xf32>
    %cst_145 = arith.constant 1.000000e+00 : f32
    %355 = vector.broadcast %cst_145 : f32 to vector<2x128xf32>
    %356 = arith.addf %355, %354 : vector<2x128xf32>
    %357 = arith.divf %355, %356 : vector<2x128xf32>
    %358 = vector.extract_strided_slice %318 {offsets = [0, 256], sizes = [2, 128], strides = [1, 1]} : vector<2x512xf32> to vector<2x128xf32>
    %359 = math.tanh %358 : vector<2x128xf32>
    %360 = vector.extract_strided_slice %318 {offsets = [0, 384], sizes = [2, 128], strides = [1, 1]} : vector<2x512xf32> to vector<2x128xf32>
    %361 = arith.negf %360 : vector<2x128xf32>
    %362 = math.exp %361 : vector<2x128xf32>
    %cst_146 = arith.constant 1.000000e+00 : f32
    %363 = vector.broadcast %cst_146 : f32 to vector<2x128xf32>
    %364 = arith.addf %363, %362 : vector<2x128xf32>
    %365 = arith.divf %363, %364 : vector<2x128xf32>
    %366 = arith.mulf %357, %345 : vector<2x128xf32>
    %367 = arith.mulf %351, %359 : vector<2x128xf32>
    %368 = arith.addf %366, %367 : vector<2x128xf32>
    %369 = math.tanh %368 : vector<2x128xf32>
    %370 = arith.mulf %365, %369 : vector<2x128xf32>
    %371 = arith.index_cast %c3_i32 : i32 to index
    %c0_147 = arith.constant 0 : index
    %c0_148 = arith.constant 0 : index
    %372 = vector.load %arg3[%371, %c0_147, %c0_148] : memref<8x2x1xf32, #tpu.memory_space<vmem>>, vector<1x2x1xf32>
    %373 = vector.shape_cast %372 : vector<1x2x1xf32> to vector<2x1xf32>
    %374 = arith.index_cast %300 : i32 to index
    %c0_149 = arith.constant 0 : index
    %c0_150 = arith.constant 0 : index
    %375 = vector.load %arg4[%374, %c0_149, %c0_150] : memref<8x2x1xf32, #tpu.memory_space<vmem>>, vector<1x2x1xf32>
    %376 = vector.shape_cast %375 : vector<1x2x1xf32> to vector<2x1xf32>
    %377 = vector.broadcast %373 : vector<2x1xf32> to vector<2x128xf32>
    %378 = arith.mulf %344, %377 : vector<2x128xf32>
    %379 = vector.broadcast %376 : vector<2x1xf32> to vector<2x128xf32>
    %380 = arith.mulf %370, %379 : vector<2x128xf32>
    %381 = vector.broadcast %373 : vector<2x1xf32> to vector<2x128xf32>
    %382 = arith.mulf %342, %381 : vector<2x128xf32>
    %c0_151 = arith.constant 0 : index
    %c0_152 = arith.constant 0 : index
    %383 = vector.load %arg10[%c0_151, %c0_152] : memref<2x128xf32, #tpu.memory_space<vmem>>, vector<2x128xf32>
    tpu.vector_store %arg10[%c0_151, %c0_152], %382 {strides = array<i32>} : memref<2x128xf32, #tpu.memory_space<vmem>>, vector<2x128xf32>,
    %c0_153 = arith.constant 0 : index
    %c0_154 = arith.constant 0 : index
    %384 = vector.load %arg9[%c0_153, %c0_154] : memref<2x128xf32, #tpu.memory_space<vmem>>, vector<2x128xf32>
    tpu.vector_store %arg9[%c0_153, %c0_154], %378 {strides = array<i32>} : memref<2x128xf32, #tpu.memory_space<vmem>>, vector<2x128xf32>,
    %385 = vector.broadcast %376 : vector<2x1xf32> to vector<2x128xf32>
    %386 = arith.mulf %368, %385 : vector<2x128xf32>
    %c0_155 = arith.constant 0 : index
    %c0_156 = arith.constant 0 : index
    %387 = vector.load %arg12[%c0_155, %c0_156] : memref<2x128xf32, #tpu.memory_space<vmem>>, vector<2x128xf32>
    tpu.vector_store %arg12[%c0_155, %c0_156], %386 {strides = array<i32>} : memref<2x128xf32, #tpu.memory_space<vmem>>, vector<2x128xf32>,
    %c0_157 = arith.constant 0 : index
    %c0_158 = arith.constant 0 : index
    %388 = vector.load %arg11[%c0_157, %c0_158] : memref<2x128xf32, #tpu.memory_space<vmem>>, vector<2x128xf32>
    tpu.vector_store %arg11[%c0_157, %c0_158], %380 {strides = array<i32>} : memref<2x128xf32, #tpu.memory_space<vmem>>, vector<2x128xf32>,
    %389 = arith.truncf %378 : vector<2x128xf32> to vector<2x128xbf16>
    %390 = arith.index_cast %c3_i32 : i32 to index
    %c0_159 = arith.constant 0 : index
    %c0_160 = arith.constant 0 : index
    %391 = vector.load %arg7[%390, %c0_159, %c0_160] : memref<8x2x128xbf16, #tpu.memory_space<vmem>>, vector<1x2x128xbf16>
    %392 = vector.shape_cast %391 : vector<1x2x128xbf16> to vector<2x128xbf16>
    %393 = vector.shape_cast %389 : vector<2x128xbf16> to vector<1x2x128xbf16>
    tpu.vector_store %arg7[%390, %c0_159, %c0_160], %393 {strides = array<i32>} : memref<8x2x128xbf16, #tpu.memory_space<vmem>>, vector<1x2x128xbf16>,
    %394 = arith.truncf %380 : vector<2x128xf32> to vector<2x128xbf16>
    %395 = arith.index_cast %300 : i32 to index
    %c0_161 = arith.constant 0 : index
    %c0_162 = arith.constant 0 : index
    %396 = vector.load %arg8[%395, %c0_161, %c0_162] : memref<8x2x128xbf16, #tpu.memory_space<vmem>>, vector<1x2x128xbf16>
    %397 = vector.shape_cast %396 : vector<1x2x128xbf16> to vector<2x128xbf16>
    %398 = vector.shape_cast %394 : vector<2x128xbf16> to vector<1x2x128xbf16>
    tpu.vector_store %arg8[%395, %c0_161, %c0_162], %398 {strides = array<i32>} : memref<8x2x128xbf16, #tpu.memory_space<vmem>>, vector<1x2x128xbf16>,
    %c4_i32 = arith.constant 4 : i32
    %c7_i32_163 = arith.constant 7 : i32
    %399 = arith.subi %c7_i32_163, %c4_i32 : i32
    %400 = arith.index_cast %c4_i32 : i32 to index
    %c0_164 = arith.constant 0 : index
    %c0_165 = arith.constant 0 : index
    %401 = vector.load %arg1[%400, %c0_164, %c0_165] : memref<8x2x512xbf16, #tpu.memory_space<vmem>>, vector<1x2x512xbf16>
    %402 = vector.shape_cast %401 : vector<1x2x512xbf16> to vector<2x512xbf16>
    %403 = arith.extf %402 : vector<2x512xbf16> to vector<2x512xf32>
    %c0_166 = arith.constant 0 : index
    %c0_167 = arith.constant 0 : index
    %404 = vector.load %arg9[%c0_166, %c0_167] : memref<2x128xf32, #tpu.memory_space<vmem>>, vector<2x128xf32>
    %405 = arith.truncf %404 : vector<2x128xf32> to vector<2x128xbf16>
    %c0_168 = arith.constant 0 : index
    %c0_169 = arith.constant 0 : index
    %406 = vector.load %arg5[%c0_168, %c0_169] : memref<128x512xbf16, #tpu.memory_space<vmem>>, vector<128x512xbf16>
    %cst_170 = arith.constant dense<0.000000e+00> : vector<2x512xf32>
    %407 = tpu.matmul %405, %406, %cst_170 {dimension_numbers = #tpu.dot_dimension_numbers<[1], [0], [0], [1], [0, 0, 1, 1], [], []>} : vector<2x128xbf16>, vector<128x512xbf16>, vector<2x512xf32> -> vector<2x512xf32>
    %408 = arith.addf %403, %407 : vector<2x512xf32>
    %409 = arith.index_cast %399 : i32 to index
    %c0_171 = arith.constant 0 : index
    %c0_172 = arith.constant 0 : index
    %410 = vector.load %arg2[%409, %c0_171, %c0_172] : memref<8x2x512xbf16, #tpu.memory_space<vmem>>, vector<1x2x512xbf16>
    %411 = vector.shape_cast %410 : vector<1x2x512xbf16> to vector<2x512xbf16>
    %412 = arith.extf %411 : vector<2x512xbf16> to vector<2x512xf32>
    %c0_173 = arith.constant 0 : index
    %c0_174 = arith.constant 0 : index
    %413 = vector.load %arg11[%c0_173, %c0_174] : memref<2x128xf32, #tpu.memory_space<vmem>>, vector<2x128xf32>
    %414 = arith.truncf %413 : vector<2x128xf32> to vector<2x128xbf16>
    %c0_175 = arith.constant 0 : index
    %c0_176 = arith.constant 0 : index
    %415 = vector.load %arg6[%c0_175, %c0_176] : memref<128x512xbf16, #tpu.memory_space<vmem>>, vector<128x512xbf16>
    %cst_177 = arith.constant dense<0.000000e+00> : vector<2x512xf32>
    %416 = tpu.matmul %414, %415, %cst_177 {dimension_numbers = #tpu.dot_dimension_numbers<[1], [0], [0], [1], [0, 0, 1, 1], [], []>} : vector<2x128xbf16>, vector<128x512xbf16>, vector<2x512xf32> -> vector<2x512xf32>
    %417 = arith.addf %412, %416 : vector<2x512xf32>
    %c0_178 = arith.constant 0 : index
    %c0_179 = arith.constant 0 : index
    %418 = vector.load %arg10[%c0_178, %c0_179] : memref<2x128xf32, #tpu.memory_space<vmem>>, vector<2x128xf32>
    %419 = vector.extract_strided_slice %408 {offsets = [0, 0], sizes = [2, 128], strides = [1, 1]} : vector<2x512xf32> to vector<2x128xf32>
    %420 = arith.negf %419 : vector<2x128xf32>
    %421 = math.exp %420 : vector<2x128xf32>
    %cst_180 = arith.constant 1.000000e+00 : f32
    %422 = vector.broadcast %cst_180 : f32 to vector<2x128xf32>
    %423 = arith.addf %422, %421 : vector<2x128xf32>
    %424 = arith.divf %422, %423 : vector<2x128xf32>
    %425 = vector.extract_strided_slice %408 {offsets = [0, 128], sizes = [2, 128], strides = [1, 1]} : vector<2x512xf32> to vector<2x128xf32>
    %426 = arith.negf %425 : vector<2x128xf32>
    %427 = math.exp %426 : vector<2x128xf32>
    %cst_181 = arith.constant 1.000000e+00 : f32
    %428 = vector.broadcast %cst_181 : f32 to vector<2x128xf32>
    %429 = arith.addf %428, %427 : vector<2x128xf32>
    %430 = arith.divf %428, %429 : vector<2x128xf32>
    %431 = vector.extract_strided_slice %408 {offsets = [0, 256], sizes = [2, 128], strides = [1, 1]} : vector<2x512xf32> to vector<2x128xf32>
    %432 = math.tanh %431 : vector<2x128xf32>
    %433 = vector.extract_strided_slice %408 {offsets = [0, 384], sizes = [2, 128], strides = [1, 1]} : vector<2x512xf32> to vector<2x128xf32>
    %434 = arith.negf %433 : vector<2x128xf32>
    %435 = math.exp %434 : vector<2x128xf32>
    %cst_182 = arith.constant 1.000000e+00 : f32
    %436 = vector.broadcast %cst_182 : f32 to vector<2x128xf32>
    %437 = arith.addf %436, %435 : vector<2x128xf32>
    %438 = arith.divf %436, %437 : vector<2x128xf32>
    %439 = arith.mulf %430, %418 : vector<2x128xf32>
    %440 = arith.mulf %424, %432 : vector<2x128xf32>
    %441 = arith.addf %439, %440 : vector<2x128xf32>
    %442 = math.tanh %441 : vector<2x128xf32>
    %443 = arith.mulf %438, %442 : vector<2x128xf32>
    %c0_183 = arith.constant 0 : index
    %c0_184 = arith.constant 0 : index
    %444 = vector.load %arg12[%c0_183, %c0_184] : memref<2x128xf32, #tpu.memory_space<vmem>>, vector<2x128xf32>
    %445 = vector.extract_strided_slice %417 {offsets = [0, 0], sizes = [2, 128], strides = [1, 1]} : vector<2x512xf32> to vector<2x128xf32>
    %446 = arith.negf %445 : vector<2x128xf32>
    %447 = math.exp %446 : vector<2x128xf32>
    %cst_185 = arith.constant 1.000000e+00 : f32
    %448 = vector.broadcast %cst_185 : f32 to vector<2x128xf32>
    %449 = arith.addf %448, %447 : vector<2x128xf32>
    %450 = arith.divf %448, %449 : vector<2x128xf32>
    %451 = vector.extract_strided_slice %417 {offsets = [0, 128], sizes = [2, 128], strides = [1, 1]} : vector<2x512xf32> to vector<2x128xf32>
    %452 = arith.negf %451 : vector<2x128xf32>
    %453 = math.exp %452 : vector<2x128xf32>
    %cst_186 = arith.constant 1.000000e+00 : f32
    %454 = vector.broadcast %cst_186 : f32 to vector<2x128xf32>
    %455 = arith.addf %454, %453 : vector<2x128xf32>
    %456 = arith.divf %454, %455 : vector<2x128xf32>
    %457 = vector.extract_strided_slice %417 {offsets = [0, 256], sizes = [2, 128], strides = [1, 1]} : vector<2x512xf32> to vector<2x128xf32>
    %458 = math.tanh %457 : vector<2x128xf32>
    %459 = vector.extract_strided_slice %417 {offsets = [0, 384], sizes = [2, 128], strides = [1, 1]} : vector<2x512xf32> to vector<2x128xf32>
    %460 = arith.negf %459 : vector<2x128xf32>
    %461 = math.exp %460 : vector<2x128xf32>
    %cst_187 = arith.constant 1.000000e+00 : f32
    %462 = vector.broadcast %cst_187 : f32 to vector<2x128xf32>
    %463 = arith.addf %462, %461 : vector<2x128xf32>
    %464 = arith.divf %462, %463 : vector<2x128xf32>
    %465 = arith.mulf %456, %444 : vector<2x128xf32>
    %466 = arith.mulf %450, %458 : vector<2x128xf32>
    %467 = arith.addf %465, %466 : vector<2x128xf32>
    %468 = math.tanh %467 : vector<2x128xf32>
    %469 = arith.mulf %464, %468 : vector<2x128xf32>
    %470 = arith.index_cast %c4_i32 : i32 to index
    %c0_188 = arith.constant 0 : index
    %c0_189 = arith.constant 0 : index
    %471 = vector.load %arg3[%470, %c0_188, %c0_189] : memref<8x2x1xf32, #tpu.memory_space<vmem>>, vector<1x2x1xf32>
    %472 = vector.shape_cast %471 : vector<1x2x1xf32> to vector<2x1xf32>
    %473 = arith.index_cast %399 : i32 to index
    %c0_190 = arith.constant 0 : index
    %c0_191 = arith.constant 0 : index
    %474 = vector.load %arg4[%473, %c0_190, %c0_191] : memref<8x2x1xf32, #tpu.memory_space<vmem>>, vector<1x2x1xf32>
    %475 = vector.shape_cast %474 : vector<1x2x1xf32> to vector<2x1xf32>
    %476 = vector.broadcast %472 : vector<2x1xf32> to vector<2x128xf32>
    %477 = arith.mulf %443, %476 : vector<2x128xf32>
    %478 = vector.broadcast %475 : vector<2x1xf32> to vector<2x128xf32>
    %479 = arith.mulf %469, %478 : vector<2x128xf32>
    %480 = vector.broadcast %472 : vector<2x1xf32> to vector<2x128xf32>
    %481 = arith.mulf %441, %480 : vector<2x128xf32>
    %c0_192 = arith.constant 0 : index
    %c0_193 = arith.constant 0 : index
    %482 = vector.load %arg10[%c0_192, %c0_193] : memref<2x128xf32, #tpu.memory_space<vmem>>, vector<2x128xf32>
    tpu.vector_store %arg10[%c0_192, %c0_193], %481 {strides = array<i32>} : memref<2x128xf32, #tpu.memory_space<vmem>>, vector<2x128xf32>,
    %c0_194 = arith.constant 0 : index
    %c0_195 = arith.constant 0 : index
    %483 = vector.load %arg9[%c0_194, %c0_195] : memref<2x128xf32, #tpu.memory_space<vmem>>, vector<2x128xf32>
    tpu.vector_store %arg9[%c0_194, %c0_195], %477 {strides = array<i32>} : memref<2x128xf32, #tpu.memory_space<vmem>>, vector<2x128xf32>,
    %484 = vector.broadcast %475 : vector<2x1xf32> to vector<2x128xf32>
    %485 = arith.mulf %467, %484 : vector<2x128xf32>
    %c0_196 = arith.constant 0 : index
    %c0_197 = arith.constant 0 : index
    %486 = vector.load %arg12[%c0_196, %c0_197] : memref<2x128xf32, #tpu.memory_space<vmem>>, vector<2x128xf32>
    tpu.vector_store %arg12[%c0_196, %c0_197], %485 {strides = array<i32>} : memref<2x128xf32, #tpu.memory_space<vmem>>, vector<2x128xf32>,
    %c0_198 = arith.constant 0 : index
    %c0_199 = arith.constant 0 : index
    %487 = vector.load %arg11[%c0_198, %c0_199] : memref<2x128xf32, #tpu.memory_space<vmem>>, vector<2x128xf32>
    tpu.vector_store %arg11[%c0_198, %c0_199], %479 {strides = array<i32>} : memref<2x128xf32, #tpu.memory_space<vmem>>, vector<2x128xf32>,
    %488 = arith.truncf %477 : vector<2x128xf32> to vector<2x128xbf16>
    %489 = arith.index_cast %c4_i32 : i32 to index
    %c0_200 = arith.constant 0 : index
    %c0_201 = arith.constant 0 : index
    %490 = vector.load %arg7[%489, %c0_200, %c0_201] : memref<8x2x128xbf16, #tpu.memory_space<vmem>>, vector<1x2x128xbf16>
    %491 = vector.shape_cast %490 : vector<1x2x128xbf16> to vector<2x128xbf16>
    %492 = vector.shape_cast %488 : vector<2x128xbf16> to vector<1x2x128xbf16>
    tpu.vector_store %arg7[%489, %c0_200, %c0_201], %492 {strides = array<i32>} : memref<8x2x128xbf16, #tpu.memory_space<vmem>>, vector<1x2x128xbf16>,
    %493 = arith.truncf %479 : vector<2x128xf32> to vector<2x128xbf16>
    %494 = arith.index_cast %399 : i32 to index
    %c0_202 = arith.constant 0 : index
    %c0_203 = arith.constant 0 : index
    %495 = vector.load %arg8[%494, %c0_202, %c0_203] : memref<8x2x128xbf16, #tpu.memory_space<vmem>>, vector<1x2x128xbf16>
    %496 = vector.shape_cast %495 : vector<1x2x128xbf16> to vector<2x128xbf16>
    %497 = vector.shape_cast %493 : vector<2x128xbf16> to vector<1x2x128xbf16>
    tpu.vector_store %arg8[%494, %c0_202, %c0_203], %497 {strides = array<i32>} : memref<8x2x128xbf16, #tpu.memory_space<vmem>>, vector<1x2x128xbf16>,
    %c5_i32 = arith.constant 5 : i32
    %c7_i32_204 = arith.constant 7 : i32
    %498 = arith.subi %c7_i32_204, %c5_i32 : i32
    %499 = arith.index_cast %c5_i32 : i32 to index
    %c0_205 = arith.constant 0 : index
    %c0_206 = arith.constant 0 : index
    %500 = vector.load %arg1[%499, %c0_205, %c0_206] : memref<8x2x512xbf16, #tpu.memory_space<vmem>>, vector<1x2x512xbf16>
    %501 = vector.shape_cast %500 : vector<1x2x512xbf16> to vector<2x512xbf16>
    %502 = arith.extf %501 : vector<2x512xbf16> to vector<2x512xf32>
    %c0_207 = arith.constant 0 : index
    %c0_208 = arith.constant 0 : index
    %503 = vector.load %arg9[%c0_207, %c0_208] : memref<2x128xf32, #tpu.memory_space<vmem>>, vector<2x128xf32>
    %504 = arith.truncf %503 : vector<2x128xf32> to vector<2x128xbf16>
    %c0_209 = arith.constant 0 : index
    %c0_210 = arith.constant 0 : index
    %505 = vector.load %arg5[%c0_209, %c0_210] : memref<128x512xbf16, #tpu.memory_space<vmem>>, vector<128x512xbf16>
    %cst_211 = arith.constant dense<0.000000e+00> : vector<2x512xf32>
    %506 = tpu.matmul %504, %505, %cst_211 {dimension_numbers = #tpu.dot_dimension_numbers<[1], [0], [0], [1], [0, 0, 1, 1], [], []>} : vector<2x128xbf16>, vector<128x512xbf16>, vector<2x512xf32> -> vector<2x512xf32>
    %507 = arith.addf %502, %506 : vector<2x512xf32>
    %508 = arith.index_cast %498 : i32 to index
    %c0_212 = arith.constant 0 : index
    %c0_213 = arith.constant 0 : index
    %509 = vector.load %arg2[%508, %c0_212, %c0_213] : memref<8x2x512xbf16, #tpu.memory_space<vmem>>, vector<1x2x512xbf16>
    %510 = vector.shape_cast %509 : vector<1x2x512xbf16> to vector<2x512xbf16>
    %511 = arith.extf %510 : vector<2x512xbf16> to vector<2x512xf32>
    %c0_214 = arith.constant 0 : index
    %c0_215 = arith.constant 0 : index
    %512 = vector.load %arg11[%c0_214, %c0_215] : memref<2x128xf32, #tpu.memory_space<vmem>>, vector<2x128xf32>
    %513 = arith.truncf %512 : vector<2x128xf32> to vector<2x128xbf16>
    %c0_216 = arith.constant 0 : index
    %c0_217 = arith.constant 0 : index
    %514 = vector.load %arg6[%c0_216, %c0_217] : memref<128x512xbf16, #tpu.memory_space<vmem>>, vector<128x512xbf16>
    %cst_218 = arith.constant dense<0.000000e+00> : vector<2x512xf32>
    %515 = tpu.matmul %513, %514, %cst_218 {dimension_numbers = #tpu.dot_dimension_numbers<[1], [0], [0], [1], [0, 0, 1, 1], [], []>} : vector<2x128xbf16>, vector<128x512xbf16>, vector<2x512xf32> -> vector<2x512xf32>
    %516 = arith.addf %511, %515 : vector<2x512xf32>
    %c0_219 = arith.constant 0 : index
    %c0_220 = arith.constant 0 : index
    %517 = vector.load %arg10[%c0_219, %c0_220] : memref<2x128xf32, #tpu.memory_space<vmem>>, vector<2x128xf32>
    %518 = vector.extract_strided_slice %507 {offsets = [0, 0], sizes = [2, 128], strides = [1, 1]} : vector<2x512xf32> to vector<2x128xf32>
    %519 = arith.negf %518 : vector<2x128xf32>
    %520 = math.exp %519 : vector<2x128xf32>
    %cst_221 = arith.constant 1.000000e+00 : f32
    %521 = vector.broadcast %cst_221 : f32 to vector<2x128xf32>
    %522 = arith.addf %521, %520 : vector<2x128xf32>
    %523 = arith.divf %521, %522 : vector<2x128xf32>
    %524 = vector.extract_strided_slice %507 {offsets = [0, 128], sizes = [2, 128], strides = [1, 1]} : vector<2x512xf32> to vector<2x128xf32>
    %525 = arith.negf %524 : vector<2x128xf32>
    %526 = math.exp %525 : vector<2x128xf32>
    %cst_222 = arith.constant 1.000000e+00 : f32
    %527 = vector.broadcast %cst_222 : f32 to vector<2x128xf32>
    %528 = arith.addf %527, %526 : vector<2x128xf32>
    %529 = arith.divf %527, %528 : vector<2x128xf32>
    %530 = vector.extract_strided_slice %507 {offsets = [0, 256], sizes = [2, 128], strides = [1, 1]} : vector<2x512xf32> to vector<2x128xf32>
    %531 = math.tanh %530 : vector<2x128xf32>
    %532 = vector.extract_strided_slice %507 {offsets = [0, 384], sizes = [2, 128], strides = [1, 1]} : vector<2x512xf32> to vector<2x128xf32>
    %533 = arith.negf %532 : vector<2x128xf32>
    %534 = math.exp %533 : vector<2x128xf32>
    %cst_223 = arith.constant 1.000000e+00 : f32
    %535 = vector.broadcast %cst_223 : f32 to vector<2x128xf32>
    %536 = arith.addf %535, %534 : vector<2x128xf32>
    %537 = arith.divf %535, %536 : vector<2x128xf32>
    %538 = arith.mulf %529, %517 : vector<2x128xf32>
    %539 = arith.mulf %523, %531 : vector<2x128xf32>
    %540 = arith.addf %538, %539 : vector<2x128xf32>
    %541 = math.tanh %540 : vector<2x128xf32>
    %542 = arith.mulf %537, %541 : vector<2x128xf32>
    %c0_224 = arith.constant 0 : index
    %c0_225 = arith.constant 0 : index
    %543 = vector.load %arg12[%c0_224, %c0_225] : memref<2x128xf32, #tpu.memory_space<vmem>>, vector<2x128xf32>
    %544 = vector.extract_strided_slice %516 {offsets = [0, 0], sizes = [2, 128], strides = [1, 1]} : vector<2x512xf32> to vector<2x128xf32>
    %545 = arith.negf %544 : vector<2x128xf32>
    %546 = math.exp %545 : vector<2x128xf32>
    %cst_226 = arith.constant 1.000000e+00 : f32
    %547 = vector.broadcast %cst_226 : f32 to vector<2x128xf32>
    %548 = arith.addf %547, %546 : vector<2x128xf32>
    %549 = arith.divf %547, %548 : vector<2x128xf32>
    %550 = vector.extract_strided_slice %516 {offsets = [0, 128], sizes = [2, 128], strides = [1, 1]} : vector<2x512xf32> to vector<2x128xf32>
    %551 = arith.negf %550 : vector<2x128xf32>
    %552 = math.exp %551 : vector<2x128xf32>
    %cst_227 = arith.constant 1.000000e+00 : f32
    %553 = vector.broadcast %cst_227 : f32 to vector<2x128xf32>
    %554 = arith.addf %553, %552 : vector<2x128xf32>
    %555 = arith.divf %553, %554 : vector<2x128xf32>
    %556 = vector.extract_strided_slice %516 {offsets = [0, 256], sizes = [2, 128], strides = [1, 1]} : vector<2x512xf32> to vector<2x128xf32>
    %557 = math.tanh %556 : vector<2x128xf32>
    %558 = vector.extract_strided_slice %516 {offsets = [0, 384], sizes = [2, 128], strides = [1, 1]} : vector<2x512xf32> to vector<2x128xf32>
    %559 = arith.negf %558 : vector<2x128xf32>
    %560 = math.exp %559 : vector<2x128xf32>
    %cst_228 = arith.constant 1.000000e+00 : f32
    %561 = vector.broadcast %cst_228 : f32 to vector<2x128xf32>
    %562 = arith.addf %561, %560 : vector<2x128xf32>
    %563 = arith.divf %561, %562 : vector<2x128xf32>
    %564 = arith.mulf %555, %543 : vector<2x128xf32>
    %565 = arith.mulf %549, %557 : vector<2x128xf32>
    %566 = arith.addf %564, %565 : vector<2x128xf32>
    %567 = math.tanh %566 : vector<2x128xf32>
    %568 = arith.mulf %563, %567 : vector<2x128xf32>
    %569 = arith.index_cast %c5_i32 : i32 to index
    %c0_229 = arith.constant 0 : index
    %c0_230 = arith.constant 0 : index
    %570 = vector.load %arg3[%569, %c0_229, %c0_230] : memref<8x2x1xf32, #tpu.memory_space<vmem>>, vector<1x2x1xf32>
    %571 = vector.shape_cast %570 : vector<1x2x1xf32> to vector<2x1xf32>
    %572 = arith.index_cast %498 : i32 to index
    %c0_231 = arith.constant 0 : index
    %c0_232 = arith.constant 0 : index
    %573 = vector.load %arg4[%572, %c0_231, %c0_232] : memref<8x2x1xf32, #tpu.memory_space<vmem>>, vector<1x2x1xf32>
    %574 = vector.shape_cast %573 : vector<1x2x1xf32> to vector<2x1xf32>
    %575 = vector.broadcast %571 : vector<2x1xf32> to vector<2x128xf32>
    %576 = arith.mulf %542, %575 : vector<2x128xf32>
    %577 = vector.broadcast %574 : vector<2x1xf32> to vector<2x128xf32>
    %578 = arith.mulf %568, %577 : vector<2x128xf32>
    %579 = vector.broadcast %571 : vector<2x1xf32> to vector<2x128xf32>
    %580 = arith.mulf %540, %579 : vector<2x128xf32>
    %c0_233 = arith.constant 0 : index
    %c0_234 = arith.constant 0 : index
    %581 = vector.load %arg10[%c0_233, %c0_234] : memref<2x128xf32, #tpu.memory_space<vmem>>, vector<2x128xf32>
    tpu.vector_store %arg10[%c0_233, %c0_234], %580 {strides = array<i32>} : memref<2x128xf32, #tpu.memory_space<vmem>>, vector<2x128xf32>,
    %c0_235 = arith.constant 0 : index
    %c0_236 = arith.constant 0 : index
    %582 = vector.load %arg9[%c0_235, %c0_236] : memref<2x128xf32, #tpu.memory_space<vmem>>, vector<2x128xf32>
    tpu.vector_store %arg9[%c0_235, %c0_236], %576 {strides = array<i32>} : memref<2x128xf32, #tpu.memory_space<vmem>>, vector<2x128xf32>,
    %583 = vector.broadcast %574 : vector<2x1xf32> to vector<2x128xf32>
    %584 = arith.mulf %566, %583 : vector<2x128xf32>
    %c0_237 = arith.constant 0 : index
    %c0_238 = arith.constant 0 : index
    %585 = vector.load %arg12[%c0_237, %c0_238] : memref<2x128xf32, #tpu.memory_space<vmem>>, vector<2x128xf32>
    tpu.vector_store %arg12[%c0_237, %c0_238], %584 {strides = array<i32>} : memref<2x128xf32, #tpu.memory_space<vmem>>, vector<2x128xf32>,
    %c0_239 = arith.constant 0 : index
    %c0_240 = arith.constant 0 : index
    %586 = vector.load %arg11[%c0_239, %c0_240] : memref<2x128xf32, #tpu.memory_space<vmem>>, vector<2x128xf32>
    tpu.vector_store %arg11[%c0_239, %c0_240], %578 {strides = array<i32>} : memref<2x128xf32, #tpu.memory_space<vmem>>, vector<2x128xf32>,
    %587 = arith.truncf %576 : vector<2x128xf32> to vector<2x128xbf16>
    %588 = arith.index_cast %c5_i32 : i32 to index
    %c0_241 = arith.constant 0 : index
    %c0_242 = arith.constant 0 : index
    %589 = vector.load %arg7[%588, %c0_241, %c0_242] : memref<8x2x128xbf16, #tpu.memory_space<vmem>>, vector<1x2x128xbf16>
    %590 = vector.shape_cast %589 : vector<1x2x128xbf16> to vector<2x128xbf16>
    %591 = vector.shape_cast %587 : vector<2x128xbf16> to vector<1x2x128xbf16>
    tpu.vector_store %arg7[%588, %c0_241, %c0_242], %591 {strides = array<i32>} : memref<8x2x128xbf16, #tpu.memory_space<vmem>>, vector<1x2x128xbf16>,
    %592 = arith.truncf %578 : vector<2x128xf32> to vector<2x128xbf16>
    %593 = arith.index_cast %498 : i32 to index
    %c0_243 = arith.constant 0 : index
    %c0_244 = arith.constant 0 : index
    %594 = vector.load %arg8[%593, %c0_243, %c0_244] : memref<8x2x128xbf16, #tpu.memory_space<vmem>>, vector<1x2x128xbf16>
    %595 = vector.shape_cast %594 : vector<1x2x128xbf16> to vector<2x128xbf16>
    %596 = vector.shape_cast %592 : vector<2x128xbf16> to vector<1x2x128xbf16>
    tpu.vector_store %arg8[%593, %c0_243, %c0_244], %596 {strides = array<i32>} : memref<8x2x128xbf16, #tpu.memory_space<vmem>>, vector<1x2x128xbf16>,
    %c6_i32 = arith.constant 6 : i32
    %c7_i32_245 = arith.constant 7 : i32
    %597 = arith.subi %c7_i32_245, %c6_i32 : i32
    %598 = arith.index_cast %c6_i32 : i32 to index
    %c0_246 = arith.constant 0 : index
    %c0_247 = arith.constant 0 : index
    %599 = vector.load %arg1[%598, %c0_246, %c0_247] : memref<8x2x512xbf16, #tpu.memory_space<vmem>>, vector<1x2x512xbf16>
    %600 = vector.shape_cast %599 : vector<1x2x512xbf16> to vector<2x512xbf16>
    %601 = arith.extf %600 : vector<2x512xbf16> to vector<2x512xf32>
    %c0_248 = arith.constant 0 : index
    %c0_249 = arith.constant 0 : index
    %602 = vector.load %arg9[%c0_248, %c0_249] : memref<2x128xf32, #tpu.memory_space<vmem>>, vector<2x128xf32>
    %603 = arith.truncf %602 : vector<2x128xf32> to vector<2x128xbf16>
    %c0_250 = arith.constant 0 : index
    %c0_251 = arith.constant 0 : index
    %604 = vector.load %arg5[%c0_250, %c0_251] : memref<128x512xbf16, #tpu.memory_space<vmem>>, vector<128x512xbf16>
    %cst_252 = arith.constant dense<0.000000e+00> : vector<2x512xf32>
    %605 = tpu.matmul %603, %604, %cst_252 {dimension_numbers = #tpu.dot_dimension_numbers<[1], [0], [0], [1], [0, 0, 1, 1], [], []>} : vector<2x128xbf16>, vector<128x512xbf16>, vector<2x512xf32> -> vector<2x512xf32>
    %606 = arith.addf %601, %605 : vector<2x512xf32>
    %607 = arith.index_cast %597 : i32 to index
    %c0_253 = arith.constant 0 : index
    %c0_254 = arith.constant 0 : index
    %608 = vector.load %arg2[%607, %c0_253, %c0_254] : memref<8x2x512xbf16, #tpu.memory_space<vmem>>, vector<1x2x512xbf16>
    %609 = vector.shape_cast %608 : vector<1x2x512xbf16> to vector<2x512xbf16>
    %610 = arith.extf %609 : vector<2x512xbf16> to vector<2x512xf32>
    %c0_255 = arith.constant 0 : index
    %c0_256 = arith.constant 0 : index
    %611 = vector.load %arg11[%c0_255, %c0_256] : memref<2x128xf32, #tpu.memory_space<vmem>>, vector<2x128xf32>
    %612 = arith.truncf %611 : vector<2x128xf32> to vector<2x128xbf16>
    %c0_257 = arith.constant 0 : index
    %c0_258 = arith.constant 0 : index
    %613 = vector.load %arg6[%c0_257, %c0_258] : memref<128x512xbf16, #tpu.memory_space<vmem>>, vector<128x512xbf16>
    %cst_259 = arith.constant dense<0.000000e+00> : vector<2x512xf32>
    %614 = tpu.matmul %612, %613, %cst_259 {dimension_numbers = #tpu.dot_dimension_numbers<[1], [0], [0], [1], [0, 0, 1, 1], [], []>} : vector<2x128xbf16>, vector<128x512xbf16>, vector<2x512xf32> -> vector<2x512xf32>
    %615 = arith.addf %610, %614 : vector<2x512xf32>
    %c0_260 = arith.constant 0 : index
    %c0_261 = arith.constant 0 : index
    %616 = vector.load %arg10[%c0_260, %c0_261] : memref<2x128xf32, #tpu.memory_space<vmem>>, vector<2x128xf32>
    %617 = vector.extract_strided_slice %606 {offsets = [0, 0], sizes = [2, 128], strides = [1, 1]} : vector<2x512xf32> to vector<2x128xf32>
    %618 = arith.negf %617 : vector<2x128xf32>
    %619 = math.exp %618 : vector<2x128xf32>
    %cst_262 = arith.constant 1.000000e+00 : f32
    %620 = vector.broadcast %cst_262 : f32 to vector<2x128xf32>
    %621 = arith.addf %620, %619 : vector<2x128xf32>
    %622 = arith.divf %620, %621 : vector<2x128xf32>
    %623 = vector.extract_strided_slice %606 {offsets = [0, 128], sizes = [2, 128], strides = [1, 1]} : vector<2x512xf32> to vector<2x128xf32>
    %624 = arith.negf %623 : vector<2x128xf32>
    %625 = math.exp %624 : vector<2x128xf32>
    %cst_263 = arith.constant 1.000000e+00 : f32
    %626 = vector.broadcast %cst_263 : f32 to vector<2x128xf32>
    %627 = arith.addf %626, %625 : vector<2x128xf32>
    %628 = arith.divf %626, %627 : vector<2x128xf32>
    %629 = vector.extract_strided_slice %606 {offsets = [0, 256], sizes = [2, 128], strides = [1, 1]} : vector<2x512xf32> to vector<2x128xf32>
    %630 = math.tanh %629 : vector<2x128xf32>
    %631 = vector.extract_strided_slice %606 {offsets = [0, 384], sizes = [2, 128], strides = [1, 1]} : vector<2x512xf32> to vector<2x128xf32>
    %632 = arith.negf %631 : vector<2x128xf32>
    %633 = math.exp %632 : vector<2x128xf32>
    %cst_264 = arith.constant 1.000000e+00 : f32
    %634 = vector.broadcast %cst_264 : f32 to vector<2x128xf32>
    %635 = arith.addf %634, %633 : vector<2x128xf32>
    %636 = arith.divf %634, %635 : vector<2x128xf32>
    %637 = arith.mulf %628, %616 : vector<2x128xf32>
    %638 = arith.mulf %622, %630 : vector<2x128xf32>
    %639 = arith.addf %637, %638 : vector<2x128xf32>
    %640 = math.tanh %639 : vector<2x128xf32>
    %641 = arith.mulf %636, %640 : vector<2x128xf32>
    %c0_265 = arith.constant 0 : index
    %c0_266 = arith.constant 0 : index
    %642 = vector.load %arg12[%c0_265, %c0_266] : memref<2x128xf32, #tpu.memory_space<vmem>>, vector<2x128xf32>
    %643 = vector.extract_strided_slice %615 {offsets = [0, 0], sizes = [2, 128], strides = [1, 1]} : vector<2x512xf32> to vector<2x128xf32>
    %644 = arith.negf %643 : vector<2x128xf32>
    %645 = math.exp %644 : vector<2x128xf32>
    %cst_267 = arith.constant 1.000000e+00 : f32
    %646 = vector.broadcast %cst_267 : f32 to vector<2x128xf32>
    %647 = arith.addf %646, %645 : vector<2x128xf32>
    %648 = arith.divf %646, %647 : vector<2x128xf32>
    %649 = vector.extract_strided_slice %615 {offsets = [0, 128], sizes = [2, 128], strides = [1, 1]} : vector<2x512xf32> to vector<2x128xf32>
    %650 = arith.negf %649 : vector<2x128xf32>
    %651 = math.exp %650 : vector<2x128xf32>
    %cst_268 = arith.constant 1.000000e+00 : f32
    %652 = vector.broadcast %cst_268 : f32 to vector<2x128xf32>
    %653 = arith.addf %652, %651 : vector<2x128xf32>
    %654 = arith.divf %652, %653 : vector<2x128xf32>
    %655 = vector.extract_strided_slice %615 {offsets = [0, 256], sizes = [2, 128], strides = [1, 1]} : vector<2x512xf32> to vector<2x128xf32>
    %656 = math.tanh %655 : vector<2x128xf32>
    %657 = vector.extract_strided_slice %615 {offsets = [0, 384], sizes = [2, 128], strides = [1, 1]} : vector<2x512xf32> to vector<2x128xf32>
    %658 = arith.negf %657 : vector<2x128xf32>
    %659 = math.exp %658 : vector<2x128xf32>
    %cst_269 = arith.constant 1.000000e+00 : f32
    %660 = vector.broadcast %cst_269 : f32 to vector<2x128xf32>
    %661 = arith.addf %660, %659 : vector<2x128xf32>
    %662 = arith.divf %660, %661 : vector<2x128xf32>
    %663 = arith.mulf %654, %642 : vector<2x128xf32>
    %664 = arith.mulf %648, %656 : vector<2x128xf32>
    %665 = arith.addf %663, %664 : vector<2x128xf32>
    %666 = math.tanh %665 : vector<2x128xf32>
    %667 = arith.mulf %662, %666 : vector<2x128xf32>
    %668 = arith.index_cast %c6_i32 : i32 to index
    %c0_270 = arith.constant 0 : index
    %c0_271 = arith.constant 0 : index
    %669 = vector.load %arg3[%668, %c0_270, %c0_271] : memref<8x2x1xf32, #tpu.memory_space<vmem>>, vector<1x2x1xf32>
    %670 = vector.shape_cast %669 : vector<1x2x1xf32> to vector<2x1xf32>
    %671 = arith.index_cast %597 : i32 to index
    %c0_272 = arith.constant 0 : index
    %c0_273 = arith.constant 0 : index
    %672 = vector.load %arg4[%671, %c0_272, %c0_273] : memref<8x2x1xf32, #tpu.memory_space<vmem>>, vector<1x2x1xf32>
    %673 = vector.shape_cast %672 : vector<1x2x1xf32> to vector<2x1xf32>
    %674 = vector.broadcast %670 : vector<2x1xf32> to vector<2x128xf32>
    %675 = arith.mulf %641, %674 : vector<2x128xf32>
    %676 = vector.broadcast %673 : vector<2x1xf32> to vector<2x128xf32>
    %677 = arith.mulf %667, %676 : vector<2x128xf32>
    %678 = vector.broadcast %670 : vector<2x1xf32> to vector<2x128xf32>
    %679 = arith.mulf %639, %678 : vector<2x128xf32>
    %c0_274 = arith.constant 0 : index
    %c0_275 = arith.constant 0 : index
    %680 = vector.load %arg10[%c0_274, %c0_275] : memref<2x128xf32, #tpu.memory_space<vmem>>, vector<2x128xf32>
    tpu.vector_store %arg10[%c0_274, %c0_275], %679 {strides = array<i32>} : memref<2x128xf32, #tpu.memory_space<vmem>>, vector<2x128xf32>,
    %c0_276 = arith.constant 0 : index
    %c0_277 = arith.constant 0 : index
    %681 = vector.load %arg9[%c0_276, %c0_277] : memref<2x128xf32, #tpu.memory_space<vmem>>, vector<2x128xf32>
    tpu.vector_store %arg9[%c0_276, %c0_277], %675 {strides = array<i32>} : memref<2x128xf32, #tpu.memory_space<vmem>>, vector<2x128xf32>,
    %682 = vector.broadcast %673 : vector<2x1xf32> to vector<2x128xf32>
    %683 = arith.mulf %665, %682 : vector<2x128xf32>
    %c0_278 = arith.constant 0 : index
    %c0_279 = arith.constant 0 : index
    %684 = vector.load %arg12[%c0_278, %c0_279] : memref<2x128xf32, #tpu.memory_space<vmem>>, vector<2x128xf32>
    tpu.vector_store %arg12[%c0_278, %c0_279], %683 {strides = array<i32>} : memref<2x128xf32, #tpu.memory_space<vmem>>, vector<2x128xf32>,
    %c0_280 = arith.constant 0 : index
    %c0_281 = arith.constant 0 : index
    %685 = vector.load %arg11[%c0_280, %c0_281] : memref<2x128xf32, #tpu.memory_space<vmem>>, vector<2x128xf32>
    tpu.vector_store %arg11[%c0_280, %c0_281], %677 {strides = array<i32>} : memref<2x128xf32, #tpu.memory_space<vmem>>, vector<2x128xf32>,
    %686 = arith.truncf %675 : vector<2x128xf32> to vector<2x128xbf16>
    %687 = arith.index_cast %c6_i32 : i32 to index
    %c0_282 = arith.constant 0 : index
    %c0_283 = arith.constant 0 : index
    %688 = vector.load %arg7[%687, %c0_282, %c0_283] : memref<8x2x128xbf16, #tpu.memory_space<vmem>>, vector<1x2x128xbf16>
    %689 = vector.shape_cast %688 : vector<1x2x128xbf16> to vector<2x128xbf16>
    %690 = vector.shape_cast %686 : vector<2x128xbf16> to vector<1x2x128xbf16>
    tpu.vector_store %arg7[%687, %c0_282, %c0_283], %690 {strides = array<i32>} : memref<8x2x128xbf16, #tpu.memory_space<vmem>>, vector<1x2x128xbf16>,
    %691 = arith.truncf %677 : vector<2x128xf32> to vector<2x128xbf16>
    %692 = arith.index_cast %597 : i32 to index
    %c0_284 = arith.constant 0 : index
    %c0_285 = arith.constant 0 : index
    %693 = vector.load %arg8[%692, %c0_284, %c0_285] : memref<8x2x128xbf16, #tpu.memory_space<vmem>>, vector<1x2x128xbf16>
    %694 = vector.shape_cast %693 : vector<1x2x128xbf16> to vector<2x128xbf16>
    %695 = vector.shape_cast %691 : vector<2x128xbf16> to vector<1x2x128xbf16>
    tpu.vector_store %arg8[%692, %c0_284, %c0_285], %695 {strides = array<i32>} : memref<8x2x128xbf16, #tpu.memory_space<vmem>>, vector<1x2x128xbf16>,
    %c7_i32_286 = arith.constant 7 : i32
    %c7_i32_287 = arith.constant 7 : i32
    %696 = arith.subi %c7_i32_287, %c7_i32_286 : i32
    %697 = arith.index_cast %c7_i32_286 : i32 to index
    %c0_288 = arith.constant 0 : index
    %c0_289 = arith.constant 0 : index
    %698 = vector.load %arg1[%697, %c0_288, %c0_289] : memref<8x2x512xbf16, #tpu.memory_space<vmem>>, vector<1x2x512xbf16>
    %699 = vector.shape_cast %698 : vector<1x2x512xbf16> to vector<2x512xbf16>
    %700 = arith.extf %699 : vector<2x512xbf16> to vector<2x512xf32>
    %c0_290 = arith.constant 0 : index
    %c0_291 = arith.constant 0 : index
    %701 = vector.load %arg9[%c0_290, %c0_291] : memref<2x128xf32, #tpu.memory_space<vmem>>, vector<2x128xf32>
    %702 = arith.truncf %701 : vector<2x128xf32> to vector<2x128xbf16>
    %c0_292 = arith.constant 0 : index
    %c0_293 = arith.constant 0 : index
    %703 = vector.load %arg5[%c0_292, %c0_293] : memref<128x512xbf16, #tpu.memory_space<vmem>>, vector<128x512xbf16>
    %cst_294 = arith.constant dense<0.000000e+00> : vector<2x512xf32>
    %704 = tpu.matmul %702, %703, %cst_294 {dimension_numbers = #tpu.dot_dimension_numbers<[1], [0], [0], [1], [0, 0, 1, 1], [], []>} : vector<2x128xbf16>, vector<128x512xbf16>, vector<2x512xf32> -> vector<2x512xf32>
    %705 = arith.addf %700, %704 : vector<2x512xf32>
    %706 = arith.index_cast %696 : i32 to index
    %c0_295 = arith.constant 0 : index
    %c0_296 = arith.constant 0 : index
    %707 = vector.load %arg2[%706, %c0_295, %c0_296] : memref<8x2x512xbf16, #tpu.memory_space<vmem>>, vector<1x2x512xbf16>
    %708 = vector.shape_cast %707 : vector<1x2x512xbf16> to vector<2x512xbf16>
    %709 = arith.extf %708 : vector<2x512xbf16> to vector<2x512xf32>
    %c0_297 = arith.constant 0 : index
    %c0_298 = arith.constant 0 : index
    %710 = vector.load %arg11[%c0_297, %c0_298] : memref<2x128xf32, #tpu.memory_space<vmem>>, vector<2x128xf32>
    %711 = arith.truncf %710 : vector<2x128xf32> to vector<2x128xbf16>
    %c0_299 = arith.constant 0 : index
    %c0_300 = arith.constant 0 : index
    %712 = vector.load %arg6[%c0_299, %c0_300] : memref<128x512xbf16, #tpu.memory_space<vmem>>, vector<128x512xbf16>
    %cst_301 = arith.constant dense<0.000000e+00> : vector<2x512xf32>
    %713 = tpu.matmul %711, %712, %cst_301 {dimension_numbers = #tpu.dot_dimension_numbers<[1], [0], [0], [1], [0, 0, 1, 1], [], []>} : vector<2x128xbf16>, vector<128x512xbf16>, vector<2x512xf32> -> vector<2x512xf32>
    %714 = arith.addf %709, %713 : vector<2x512xf32>
    %c0_302 = arith.constant 0 : index
    %c0_303 = arith.constant 0 : index
    %715 = vector.load %arg10[%c0_302, %c0_303] : memref<2x128xf32, #tpu.memory_space<vmem>>, vector<2x128xf32>
    %716 = vector.extract_strided_slice %705 {offsets = [0, 0], sizes = [2, 128], strides = [1, 1]} : vector<2x512xf32> to vector<2x128xf32>
    %717 = arith.negf %716 : vector<2x128xf32>
    %718 = math.exp %717 : vector<2x128xf32>
    %cst_304 = arith.constant 1.000000e+00 : f32
    %719 = vector.broadcast %cst_304 : f32 to vector<2x128xf32>
    %720 = arith.addf %719, %718 : vector<2x128xf32>
    %721 = arith.divf %719, %720 : vector<2x128xf32>
    %722 = vector.extract_strided_slice %705 {offsets = [0, 128], sizes = [2, 128], strides = [1, 1]} : vector<2x512xf32> to vector<2x128xf32>
    %723 = arith.negf %722 : vector<2x128xf32>
    %724 = math.exp %723 : vector<2x128xf32>
    %cst_305 = arith.constant 1.000000e+00 : f32
    %725 = vector.broadcast %cst_305 : f32 to vector<2x128xf32>
    %726 = arith.addf %725, %724 : vector<2x128xf32>
    %727 = arith.divf %725, %726 : vector<2x128xf32>
    %728 = vector.extract_strided_slice %705 {offsets = [0, 256], sizes = [2, 128], strides = [1, 1]} : vector<2x512xf32> to vector<2x128xf32>
    %729 = math.tanh %728 : vector<2x128xf32>
    %730 = vector.extract_strided_slice %705 {offsets = [0, 384], sizes = [2, 128], strides = [1, 1]} : vector<2x512xf32> to vector<2x128xf32>
    %731 = arith.negf %730 : vector<2x128xf32>
    %732 = math.exp %731 : vector<2x128xf32>
    %cst_306 = arith.constant 1.000000e+00 : f32
    %733 = vector.broadcast %cst_306 : f32 to vector<2x128xf32>
    %734 = arith.addf %733, %732 : vector<2x128xf32>
    %735 = arith.divf %733, %734 : vector<2x128xf32>
    %736 = arith.mulf %727, %715 : vector<2x128xf32>
    %737 = arith.mulf %721, %729 : vector<2x128xf32>
    %738 = arith.addf %736, %737 : vector<2x128xf32>
    %739 = math.tanh %738 : vector<2x128xf32>
    %740 = arith.mulf %735, %739 : vector<2x128xf32>
    %c0_307 = arith.constant 0 : index
    %c0_308 = arith.constant 0 : index
    %741 = vector.load %arg12[%c0_307, %c0_308] : memref<2x128xf32, #tpu.memory_space<vmem>>, vector<2x128xf32>
    %742 = vector.extract_strided_slice %714 {offsets = [0, 0], sizes = [2, 128], strides = [1, 1]} : vector<2x512xf32> to vector<2x128xf32>
    %743 = arith.negf %742 : vector<2x128xf32>
    %744 = math.exp %743 : vector<2x128xf32>
    %cst_309 = arith.constant 1.000000e+00 : f32
    %745 = vector.broadcast %cst_309 : f32 to vector<2x128xf32>
    %746 = arith.addf %745, %744 : vector<2x128xf32>
    %747 = arith.divf %745, %746 : vector<2x128xf32>
    %748 = vector.extract_strided_slice %714 {offsets = [0, 128], sizes = [2, 128], strides = [1, 1]} : vector<2x512xf32> to vector<2x128xf32>
    %749 = arith.negf %748 : vector<2x128xf32>
    %750 = math.exp %749 : vector<2x128xf32>
    %cst_310 = arith.constant 1.000000e+00 : f32
    %751 = vector.broadcast %cst_310 : f32 to vector<2x128xf32>
    %752 = arith.addf %751, %750 : vector<2x128xf32>
    %753 = arith.divf %751, %752 : vector<2x128xf32>
    %754 = vector.extract_strided_slice %714 {offsets = [0, 256], sizes = [2, 128], strides = [1, 1]} : vector<2x512xf32> to vector<2x128xf32>
    %755 = math.tanh %754 : vector<2x128xf32>
    %756 = vector.extract_strided_slice %714 {offsets = [0, 384], sizes = [2, 128], strides = [1, 1]} : vector<2x512xf32> to vector<2x128xf32>
    %757 = arith.negf %756 : vector<2x128xf32>
    %758 = math.exp %757 : vector<2x128xf32>
    %cst_311 = arith.constant 1.000000e+00 : f32
    %759 = vector.broadcast %cst_311 : f32 to vector<2x128xf32>
    %760 = arith.addf %759, %758 : vector<2x128xf32>
    %761 = arith.divf %759, %760 : vector<2x128xf32>
    %762 = arith.mulf %753, %741 : vector<2x128xf32>
    %763 = arith.mulf %747, %755 : vector<2x128xf32>
    %764 = arith.addf %762, %763 : vector<2x128xf32>
    %765 = math.tanh %764 : vector<2x128xf32>
    %766 = arith.mulf %761, %765 : vector<2x128xf32>
    %767 = arith.index_cast %c7_i32_286 : i32 to index
    %c0_312 = arith.constant 0 : index
    %c0_313 = arith.constant 0 : index
    %768 = vector.load %arg3[%767, %c0_312, %c0_313] : memref<8x2x1xf32, #tpu.memory_space<vmem>>, vector<1x2x1xf32>
    %769 = vector.shape_cast %768 : vector<1x2x1xf32> to vector<2x1xf32>
    %770 = arith.index_cast %696 : i32 to index
    %c0_314 = arith.constant 0 : index
    %c0_315 = arith.constant 0 : index
    %771 = vector.load %arg4[%770, %c0_314, %c0_315] : memref<8x2x1xf32, #tpu.memory_space<vmem>>, vector<1x2x1xf32>
    %772 = vector.shape_cast %771 : vector<1x2x1xf32> to vector<2x1xf32>
    %773 = vector.broadcast %769 : vector<2x1xf32> to vector<2x128xf32>
    %774 = arith.mulf %740, %773 : vector<2x128xf32>
    %775 = vector.broadcast %772 : vector<2x1xf32> to vector<2x128xf32>
    %776 = arith.mulf %766, %775 : vector<2x128xf32>
    %777 = vector.broadcast %769 : vector<2x1xf32> to vector<2x128xf32>
    %778 = arith.mulf %738, %777 : vector<2x128xf32>
    %c0_316 = arith.constant 0 : index
    %c0_317 = arith.constant 0 : index
    %779 = vector.load %arg10[%c0_316, %c0_317] : memref<2x128xf32, #tpu.memory_space<vmem>>, vector<2x128xf32>
    tpu.vector_store %arg10[%c0_316, %c0_317], %778 {strides = array<i32>} : memref<2x128xf32, #tpu.memory_space<vmem>>, vector<2x128xf32>,
    %c0_318 = arith.constant 0 : index
    %c0_319 = arith.constant 0 : index
    %780 = vector.load %arg9[%c0_318, %c0_319] : memref<2x128xf32, #tpu.memory_space<vmem>>, vector<2x128xf32>
    tpu.vector_store %arg9[%c0_318, %c0_319], %774 {strides = array<i32>} : memref<2x128xf32, #tpu.memory_space<vmem>>, vector<2x128xf32>,
    %781 = vector.broadcast %772 : vector<2x1xf32> to vector<2x128xf32>
    %782 = arith.mulf %764, %781 : vector<2x128xf32>
    %c0_320 = arith.constant 0 : index
    %c0_321 = arith.constant 0 : index
    %783 = vector.load %arg12[%c0_320, %c0_321] : memref<2x128xf32, #tpu.memory_space<vmem>>, vector<2x128xf32>
    tpu.vector_store %arg12[%c0_320, %c0_321], %782 {strides = array<i32>} : memref<2x128xf32, #tpu.memory_space<vmem>>, vector<2x128xf32>,
    %c0_322 = arith.constant 0 : index
    %c0_323 = arith.constant 0 : index
    %784 = vector.load %arg11[%c0_322, %c0_323] : memref<2x128xf32, #tpu.memory_space<vmem>>, vector<2x128xf32>
    tpu.vector_store %arg11[%c0_322, %c0_323], %776 {strides = array<i32>} : memref<2x128xf32, #tpu.memory_space<vmem>>, vector<2x128xf32>,
    %785 = arith.truncf %774 : vector<2x128xf32> to vector<2x128xbf16>
    %786 = arith.index_cast %c7_i32_286 : i32 to index
    %c0_324 = arith.constant 0 : index
    %c0_325 = arith.constant 0 : index
    %787 = vector.load %arg7[%786, %c0_324, %c0_325] : memref<8x2x128xbf16, #tpu.memory_space<vmem>>, vector<1x2x128xbf16>
    %788 = vector.shape_cast %787 : vector<1x2x128xbf16> to vector<2x128xbf16>
    %789 = vector.shape_cast %785 : vector<2x128xbf16> to vector<1x2x128xbf16>
    tpu.vector_store %arg7[%786, %c0_324, %c0_325], %789 {strides = array<i32>} : memref<8x2x128xbf16, #tpu.memory_space<vmem>>, vector<1x2x128xbf16>,
    %790 = arith.truncf %776 : vector<2x128xf32> to vector<2x128xbf16>
    %791 = arith.index_cast %696 : i32 to index
    %c0_326 = arith.constant 0 : index
    %c0_327 = arith.constant 0 : index
    %792 = vector.load %arg8[%791, %c0_326, %c0_327] : memref<8x2x128xbf16, #tpu.memory_space<vmem>>, vector<1x2x128xbf16>
    %793 = vector.shape_cast %792 : vector<1x2x128xbf16> to vector<2x128xbf16>
    %794 = vector.shape_cast %790 : vector<2x128xbf16> to vector<1x2x128xbf16>
    tpu.vector_store %arg8[%791, %c0_326, %c0_327], %794 {strides = array<i32>} : memref<8x2x128xbf16, #tpu.memory_space<vmem>>, vector<1x2x128xbf16>,
    %c8_i32 = arith.constant 8 : i32
    return
  }
  func.func @transform_0(%arg0: i32) -> (i32, i32, i32) {
    %c0_i32 = arith.constant 0 : i32
    %c0_i32_0 = arith.constant 0 : i32
    %c0_i32_1 = arith.constant 0 : i32
    return %arg0, %c0_i32, %c0_i32_0 : i32, i32, i32
  }
  func.func @transform_1(%arg0: i32) -> (i32, i32, i32) {
    %c1_i32 = arith.constant 1 : i32
    %0 = arith.subi %c1_i32, %arg0 : i32
    %c0_i32 = arith.constant 0 : i32
    %c1_i32_0 = arith.constant 1 : i32
    %c0_i32_1 = arith.constant 0 : i32
    return %0, %c0_i32, %c1_i32_0 : i32, i32, i32
  }
  func.func @transform_2(%arg0: i32) -> (i32, i32, i32) {
    %c0_i32 = arith.constant 0 : i32
    %c0_i32_0 = arith.constant 0 : i32
    %c0_i32_1 = arith.constant 0 : i32
    return %arg0, %c0_i32, %c0_i32_0 : i32, i32, i32
  }
  func.func @transform_3(%arg0: i32) -> (i32, i32, i32) {
    %c1_i32 = arith.constant 1 : i32
    %0 = arith.subi %c1_i32, %arg0 : i32
    %c0_i32 = arith.constant 0 : i32
    %c0_i32_0 = arith.constant 0 : i32
    %c0_i32_1 = arith.constant 0 : i32
    return %0, %c0_i32, %c0_i32_0 : i32, i32, i32
  }
  func.func @transform_4(%arg0: i32) -> (i32, i32) {
    %c0_i32 = arith.constant 0 : i32
    %c0_i32_0 = arith.constant 0 : i32
    %c0_i32_1 = arith.constant 0 : i32
    return %c0_i32, %c0_i32_0 : i32, i32
  }
  func.func @transform_5(%arg0: i32) -> (i32, i32) {
    %c0_i32 = arith.constant 0 : i32
    %c0_i32_0 = arith.constant 0 : i32
    %c0_i32_1 = arith.constant 0 : i32
    return %c0_i32, %c0_i32_0 : i32, i32
  }
  func.func @transform_6(%arg0: i32) -> (i32, i32, i32) {
    %c0_i32 = arith.constant 0 : i32
    %c0_i32_0 = arith.constant 0 : i32
    %c0_i32_1 = arith.constant 0 : i32
    return %arg0, %c0_i32, %c0_i32_0 : i32, i32, i32
  }
  func.func @transform_7(%arg0: i32) -> (i32, i32, i32) {
    %c1_i32 = arith.constant 1 : i32
    %0 = arith.subi %c1_i32, %arg0 : i32
    %c0_i32 = arith.constant 0 : i32
    %c0_i32_0 = arith.constant 0 : i32
    %c0_i32_1 = arith.constant 0 : i32
    return %0, %c0_i32, %c0_i32_0 : i32, i32, i32
  }
}

module attributes {stable_mosaic.version = 11 : i64} {
  func.func @_head_kernel(%arg0: i32, %arg1: i32, %arg2: memref<1x128x12xbf16, #tpu.memory_space<vmem>>, %arg3: memref<1x128x12xbf16, #tpu.memory_space<vmem>>, %arg4: memref<128x128xbf16, #tpu.memory_space<vmem>>, %arg5: memref<128x128xbf16, #tpu.memory_space<vmem>>, %arg6: memref<128x1xf32, #tpu.memory_space<vmem>>, %arg7: memref<1x128x12xf32, #tpu.memory_space<vmem>>, %arg8: memref<1x128x12xf32, #tpu.memory_space<vmem>>) attributes {dimension_semantics = [#tpu.dimension_semantics<parallel>, #tpu.dimension_semantics<parallel>], iteration_bounds = array<i64: 1, 2>, scalar_prefetch = 0 : i64, scratch_operands = 0 : i64, tpu.core_type = #tpu.core_type<tc>, window_params = [{transform_indices = @transform_0, window_bounds = array<i64: 1, 128, 12>}, {transform_indices = @transform_1, window_bounds = array<i64: 1, 128, 12>}, {transform_indices = @transform_2, window_bounds = array<i64: 128, 128>}, {transform_indices = @transform_3, window_bounds = array<i64: 128, 128>}, {transform_indices = @transform_4, window_bounds = array<i64: 128, 1>}, {transform_indices = @transform_5, window_bounds = array<i64: 1, 128, 12>}, {transform_indices = @transform_6, window_bounds = array<i64: 1, 128, 12>}]} {
    %c0 = arith.constant 0 : index
    %c0_0 = arith.constant 0 : index
    %0 = vector.load %arg4[%c0, %c0_0] : memref<128x128xbf16, #tpu.memory_space<vmem>>, vector<128x128xbf16>
    %c0_1 = arith.constant 0 : index
    %c0_2 = arith.constant 0 : index
    %c0_3 = arith.constant 0 : index
    %1 = vector.load %arg2[%c0_1, %c0_2, %c0_3] : memref<1x128x12xbf16, #tpu.memory_space<vmem>>, vector<1x128x12xbf16>
    %2 = vector.shape_cast %1 : vector<1x128x12xbf16> to vector<128x12xbf16>
    %cst = arith.constant dense<0.000000e+00> : vector<128x12xf32>
    %3 = tpu.matmul %0, %2, %cst {dimension_numbers = #tpu.dot_dimension_numbers<[1], [0], [0], [1], [0, 0, 1, 1], [], []>} : vector<128x128xbf16>, vector<128x12xbf16>, vector<128x12xf32> -> vector<128x12xf32>
    %c0_4 = arith.constant 0 : index
    %c0_5 = arith.constant 0 : index
    %4 = vector.load %arg5[%c0_4, %c0_5] : memref<128x128xbf16, #tpu.memory_space<vmem>>, vector<128x128xbf16>
    %c0_6 = arith.constant 0 : index
    %c0_7 = arith.constant 0 : index
    %c0_8 = arith.constant 0 : index
    %5 = vector.load %arg3[%c0_6, %c0_7, %c0_8] : memref<1x128x12xbf16, #tpu.memory_space<vmem>>, vector<1x128x12xbf16>
    %6 = vector.shape_cast %5 : vector<1x128x12xbf16> to vector<128x12xbf16>
    %cst_9 = arith.constant dense<0.000000e+00> : vector<128x12xf32>
    %7 = tpu.matmul %4, %6, %cst_9 {dimension_numbers = #tpu.dot_dimension_numbers<[1], [0], [0], [1], [0, 0, 1, 1], [], []>} : vector<128x128xbf16>, vector<128x12xbf16>, vector<128x12xf32> -> vector<128x12xf32>
    %8 = arith.addf %3, %7 : vector<128x12xf32>
    %c0_10 = arith.constant 0 : index
    %c0_11 = arith.constant 0 : index
    %9 = vector.load %arg6[%c0_10, %c0_11] : memref<128x1xf32, #tpu.memory_space<vmem>>, vector<128x1xf32>
    %10 = vector.broadcast %9 : vector<128x1xf32> to vector<128x12xf32>
    %11 = arith.addf %8, %10 : vector<128x12xf32>
    %cst_12 = arith.constant dense<0xFF800000> : vector<128xf32>
    %12 = vector.multi_reduction <maximumf>, %11, %cst_12 [1] : vector<128x12xf32> to vector<128xf32>
    %13 = vector.shape_cast %12 : vector<128xf32> to vector<128x1xf32>
    %14 = vector.broadcast %13 : vector<128x1xf32> to vector<128x12xf32>
    %15 = arith.subf %11, %14 : vector<128x12xf32>
    %16 = math.exp %15 : vector<128x12xf32>
    %cst_13 = arith.constant dense<0.000000e+00> : vector<128xf32>
    %17 = vector.multi_reduction <add>, %16, %cst_13 [1] : vector<128x12xf32> to vector<128xf32>
    %18 = vector.shape_cast %17 : vector<128xf32> to vector<128x1xf32>
    %19 = math.log %18 : vector<128x1xf32>
    %c0_14 = arith.constant 0 : index
    %c0_15 = arith.constant 0 : index
    %c0_16 = arith.constant 0 : index
    %20 = vector.load %arg7[%c0_14, %c0_15, %c0_16] : memref<1x128x12xf32, #tpu.memory_space<vmem>>, vector<1x128x12xf32>
    %21 = vector.shape_cast %20 : vector<1x128x12xf32> to vector<128x12xf32>
    %22 = vector.shape_cast %11 : vector<128x12xf32> to vector<1x128x12xf32>
    tpu.vector_store %arg7[%c0_14, %c0_15, %c0_16], %22 {strides = array<i32>} : memref<1x128x12xf32, #tpu.memory_space<vmem>>, vector<1x128x12xf32>,
    %23 = vector.broadcast %19 : vector<128x1xf32> to vector<128x12xf32>
    %24 = arith.subf %15, %23 : vector<128x12xf32>
    %c0_17 = arith.constant 0 : index
    %c0_18 = arith.constant 0 : index
    %c0_19 = arith.constant 0 : index
    %25 = vector.load %arg8[%c0_17, %c0_18, %c0_19] : memref<1x128x12xf32, #tpu.memory_space<vmem>>, vector<1x128x12xf32>
    %26 = vector.shape_cast %25 : vector<1x128x12xf32> to vector<128x12xf32>
    %27 = vector.shape_cast %24 : vector<128x12xf32> to vector<1x128x12xf32>
    tpu.vector_store %arg8[%c0_17, %c0_18, %c0_19], %27 {strides = array<i32>} : memref<1x128x12xf32, #tpu.memory_space<vmem>>, vector<1x128x12xf32>,
    return
  }
  func.func @transform_0(%arg0: i32, %arg1: i32) -> (i32, i32, i32) {
    %c0_i32 = arith.constant 0 : i32
    %c0_i32_0 = arith.constant 0 : i32
    %c0_i32_1 = arith.constant 0 : i32
    return %arg1, %c0_i32, %c0_i32_0 : i32, i32, i32
  }
  func.func @transform_1(%arg0: i32, %arg1: i32) -> (i32, i32, i32) {
    %c0_i32 = arith.constant 0 : i32
    %c0_i32_0 = arith.constant 0 : i32
    %c0_i32_1 = arith.constant 0 : i32
    return %arg1, %c0_i32, %c0_i32_0 : i32, i32, i32
  }
  func.func @transform_2(%arg0: i32, %arg1: i32) -> (i32, i32) {
    %c0_i32 = arith.constant 0 : i32
    %c0_i32_0 = arith.constant 0 : i32
    return %arg0, %c0_i32 : i32, i32
  }
  func.func @transform_3(%arg0: i32, %arg1: i32) -> (i32, i32) {
    %c0_i32 = arith.constant 0 : i32
    %c0_i32_0 = arith.constant 0 : i32
    return %arg0, %c0_i32 : i32, i32
  }
  func.func @transform_4(%arg0: i32, %arg1: i32) -> (i32, i32) {
    %c0_i32 = arith.constant 0 : i32
    %c0_i32_0 = arith.constant 0 : i32
    return %arg0, %c0_i32 : i32, i32
  }
  func.func @transform_5(%arg0: i32, %arg1: i32) -> (i32, i32, i32) {
    %c0_i32 = arith.constant 0 : i32
    %c0_i32_0 = arith.constant 0 : i32
    return %arg1, %arg0, %c0_i32 : i32, i32, i32
  }
  func.func @transform_6(%arg0: i32, %arg1: i32) -> (i32, i32, i32) {
    %c0_i32 = arith.constant 0 : i32
    %c0_i32_0 = arith.constant 0 : i32
    return %arg1, %arg0, %c0_i32 : i32, i32, i32
  }
}

</mosaic_0001>

<bundles_post_ra>
// kernel: forward.17
= control target key start
LH: loop header
LB: loop body
LE: loop exit
PB: predicated region body
PF: predicated region fallthrough
CT: control target
= control target key end

     0   :  { %s1053_s18 = smov 0   ;;  %s1055_s19 = smov 0   ;;  %s1184_s0 = inlined_call_operand.vmem [shape: f32[32,50], index: 0, kind: input, shape index: {}]   ;;  %s1185_s1 = inlined_call_operand.vmem [shape: f32[32,1], index: 1, kind: input, shape index: {}]   ;;  %s1186_s2 = inlined_call_operand.vmem [shape: f32[1,50], index: 2, kind: input, shape index: {}]   ;;  %s1187_s3 = inlined_call_operand.vmem [shape: bf16[50,1024], index: 3, kind: input, shape index: {}]   ;;  %s1188_s4 = inlined_call_operand.vmem [shape: f32[1,1024], index: 4, kind: input, shape index: {}]   ;;  %s1189_s5 = inlined_call_operand.vmem [shape: bf16[32,1024], index: 5, kind: output, shape index: {}]  }
   0x1   :  { %s1057_s20 = smov 0   ;;  %s1059_s21 = smov 0  }
   0x2   :  { %s1061_s22 = smov 0  }
   0x3 LB: > { %s27_s23 = sadd.s32 1, %s1016_s21  ;;  %s858_s24 = sadd.s32 4294967295, %s1020_s22   ;;  %s1020_s22 = sphi %s1061_s22, %s15_s22   ;;  %s1016_s21 = sphi %s1059_s21, %s1194_s21   ;;  %s1012_s20 = sphi %s1057_s20, %s1193_s20   ;;  %s1008_s19 = sphi %s1055_s19, %s1192_s19   ;;  %s1004_s18 = sphi %s1053_s18, %s1191_s18  }
   0x4   : > { %p29_p0 = scmp.ge.s32.totalorder %s27_s23, 2  ;;  %p114_p1 = scmp.ne.s32.totalorder %s1008_s19, %s1004_s18 }
   0x5   : > { %p115_p2 = scmp.eq.s32.totalorder %s1020_s22, 0  ;;  %p172_p4 = scmp.eq.s32.totalorder %s858_s24, 1 }
   0x6   : > { %s1196_s23 = smov (%p29_p0, %s27_s23), 0  ;;  %s107_s26 = sadd.s32 1, %s1008_s19 }
   0x7   : > { %p116_p3 = por %p115_p2, %p114_p1  ;;  %s104_s25 = ssub.s32 %s1016_s21, %s1196_s23 }
   0x8   : > { %p105_p5 = scmp.eq.s32.totalorder %s104_s25, 0  ;;  %p1088_p6 = por %p172_p4, %p114_p1 }
   0x9   : > { %p863_p7 = scmp.ge.s32.totalorder %s1020_s22, 2 }
   0xa   : > { %s1093_s28 = scalar_select %p105_p5, %s1008_s19, %s107_s26  }
   0xb   : > { %215 = sbr.rel (%p863_p7) target bundleno = 29 (0x1d), region = 28 }
  0x12   : > { %218 = sbr.rel (!%p116_p3) target bundleno = 29 (0x1d), region = 32  ;;  %s220_s29 = sand.u32 (%p116_p3), 1, %s1008_s19  }
  0x13   : > { %s905_s30 = sshll.u32 (%p116_p3), %s1016_s21, 4  ;;  %s915_s6 = smul.u32 (%p116_p3), 112, %s220_s29 }
  0x14   : > { %s225_s9 = scalar_lea.vmem (%p116_p3), %s1187_s3, %s905_s30 }
  0x15   : > { %v238_v0 = vld [vmem:[%s225_s9] sm:$0xff] (%p116_p3)  ;;  %v240_v1 = vld [vmem:[%s225_s9 + $0x8] sm:$0xff] (%p116_p3)  ;;  %s222_s10 = scalar_lea.vmem (%p116_p3), [#allocation2], %s915_s6 }
  0x16   : > { %v242_v2 = vld [vmem:[%s225_s9 + $0x20] sm:$0xff] (%p116_p3)  ;;  %v244_v3 = vld [vmem:[%s225_s9 + $0x28] sm:$0xff] (%p116_p3)  ;;  %239 = vst [vmem:[%s222_s10] sm:$0xff] (%p116_p3), %v238_v0  ;;  %241 = vst [vmem:[%s222_s10 + $0x8] sm:$0xff] (%p116_p3), %v240_v1 }
  0x17   : > { %v246_v4 = vld [vmem:[%s225_s9 + $0x40] sm:$0xff] (%p116_p3)  ;;  %v248_v5 = vld [vmem:[%s225_s9 + $0x48] sm:$0xff] (%p116_p3)  ;;  %243 = vst [vmem:[%s222_s10 + $0x10] sm:$0xff] (%p116_p3), %v242_v2  ;;  %245 = vst [vmem:[%s222_s10 + $0x18] sm:$0xff] (%p116_p3), %v244_v3 }
  0x18   : > { %247 = vst [vmem:[%s222_s10 + $0x20] sm:$0xff] (%p116_p3), %v246_v4  ;;  %249 = vst [vmem:[%s222_s10 + $0x28] sm:$0xff] (%p116_p3), %v248_v5  ;;  %v250_v6 = vld [vmem:[%s225_s9 + $0x60] sm:$0xff] (%p116_p3)  ;;  %v252_v7 = vld [vmem:[%s225_s9 + $0x68] sm:$0xff] (%p116_p3) }
  0x19   : > { %v254_v8 = vld [vmem:[%s225_s9 + $0x80] sm:$0xff]  ;;  %251 = vst [vmem:[%s222_s10 + $0x30] sm:$0xff] %v250_v6  ;;  %253 = vst [vmem:[%s222_s10 + $0x38] sm:$0xff] %v252_v7  ;;  %v256_v9 = vld [vmem:[%s225_s9 + $0x88] sm:$0xff] }
  0x1a   : > { %255 = vst [vmem:[%s222_s10 + $0x40] sm:$0xff] %v254_v8  ;;  %v258_v10 = vld [vmem:[%s225_s9 + $0xa0] sm:$0xff]  ;;  %v260_v11 = vld [vmem:[%s225_s9 + $0xa8] sm:$0xff]  ;;  %257 = vst [vmem:[%s222_s10 + $0x48] sm:$0xff] %v256_v9 }
  0x1b   : > { %259 = vst [vmem:[%s222_s10 + $0x50] sm:$0xff] %v258_v10  ;;  %261 = vst [vmem:[%s222_s10 + $0x58] sm:$0xff] %v260_v11  ;;  %v262_v12 = vld [vmem:[%s225_s9 + $0xc0] sm:$0xff]  ;;  %v264_v13 = vld [vmem:[%s225_s9 + $0xc8] sm:$0xff] }
  0x1c   : > { %263 = vst [vmem:[%s222_s10 + $0x60] sm:$0xff] %v262_v12  ;;  %265 = vst [vmem:[%s222_s10 + $0x68] sm:$0xff] %v264_v13 }
  0x1d PF: > { %p866_p8 = scmp.ge.s32.totalorder %s1020_s22, 1  ;;  %p278_p9 = scmp.lt.s32.totalorder %s1020_s22, 3 }
  0x1f   : > { %p279_p10 = pnand %p866_p8, %p278_p9 }
  0x20   : > { %s285_s11 = sand.u32 (!%p279_p10), 1, %s1004_s18   ;;  %v1022_v14 = vmov (!%p279_p10), 0   ;;  %v573_v15 = vld [vmem:[%s1185_s1] sm:$0xff] (!%p279_p10)  ;;  %v575_v16 = vld [vmem:[%s1185_s1 + $0x10] sm:$0xff] (!%p279_p10)  ;;  %v574_v17 = vld [vmem:[%s1185_s1 + $0x8] sm:$0xff] (!%p279_p10)  ;;  %vm454_vm0 = vcmask (!%p279_p10), 1040384   ;;  %v615_v50 = vlaneseq (!%p279_p10) }
  0x21   : > { %282 = sbr.rel (%p279_p10) target bundleno = 293 (0x125), region = 59  ;;  %499 = vmatprep.mubr.bf16.mxu0 (!%p279_p10), %v1022_v14  ;;  %552 = vmatprep.mubr.bf16.mxu1 (!%p279_p10), %v1022_v14  ;;  %v576_v19 = vld [vmem:[%s1185_s1 + $0x18] sm:$0xff] (!%p279_p10)  ;;  %v346_v28 = vld [vmem:[%s1184_s0] sm:$0xff] (!%p279_p10)  ;;  %v347_v29 = vld [vmem:[%s1184_s0 + $0x8] sm:$0xff] (!%p279_p10)  ;;  %vm447_vm1 = vcmask (!%p279_p10), 408576   ;;  %s868_s16 = sshll.u32 (!%p279_p10), %s1012_s20, 2 }
  0x22   : > { %s916_s12 = smul.u32 (!%p279_p10), 112, %s285_s11  ;;  %958 = vset.pattern.permute.xlu0 (!%p279_p10), %v1022_v14  ;;  %959 = vset.pattern.permute.xlu1 (!%p279_p10), %v1022_v14  ;;  %v869_v32 = vld [vmem:[%s1186_s2] ss:$0 sm:$0xff] (!%p279_p10)  ;;  %v348_v45 = vld [vmem:[%s1184_s0 + $0x10] sm:$0xff] (!%p279_p10)  ;;  %v349_v46 = vld [vmem:[%s1184_s0 + $0x18] sm:$0xff] (!%p279_p10)  ;;  %p339_p11 = scmp.lt.s32.totalorder (!%p279_p10), %s868_s16, 7 }
  0x23   : > { %579 = vperm.xlu0 (!%p279_p10), %958, %v573_v15   ;;  %589 = vperm.xlu1 (!%p279_p10), %959, %v575_v16   ;;  %v357_v40 = vmul.f32 (!%p279_p10), %v869_v32, %v346_v28  ;;  %v358_v41 = vmul.f32 (!%p279_p10), %v869_v32, %v347_v29  ;;  %v359_v47 = vmul.f32 (!%p279_p10), %v869_v32, %v348_v45  ;;  %v616_v51 = vshrl.u32 (!%p279_p10), %v615_v50, 7  ;;  %s867_s26 = sshll.u32 (!%p279_p10), %s285_s11, 6 }
  0x24   : > { %s287_s25 = scalar_lea.vmem (!%p279_p10), [#allocation2], %s916_s12  ;;  %v360_v48 = vmul.f32 (!%p279_p10), %v869_v32, %v349_v46  ;;  %s1145_s18 = scalar_lea.vmem (!%p279_p10), [#allocation3], %s867_s26 }
  0x25   : > { %v960_v18 = vld [vmem:[%s287_s25 + $0x4] ss:$16 sps:$4 sm:$0xff] (!%p279_p10)   ;;  %v962_v20 = vld [vmem:[%s287_s25 + $0xc] ss:$16 sps:$4 sm:$0xff] (!%p279_p10)   ;;  %v964_v21 = vld [vmem:[%s287_s25] ss:$16 sps:$4 sm:$0xff] (!%p279_p10)   ;;  %v361_v44 = vpack.c.bf16 (!%p279_p10), %v358_v41, %v357_v40 }
  0x26   : > { %467 = vmatprep.subr.bf16.mxu0 (!%p279_p10), %v960_v18  ;;  %v965_v22 = vld [vmem:[%s287_s25 + $0x8] ss:$16 sps:$4 sm:$0xff] (!%p279_p10)   ;;  %520 = vmatprep.subr.bf16.mxu1 (!%p279_p10), %v962_v20  ;;  %v966_v23 = vld [vmem:[%s287_s25 + $0x24] ss:$16 sps:$4 sm:$0xff] (!%p279_p10)   ;;  %v968_v24 = vld [vmem:[%s287_s25 + $0x2c] ss:$16 sps:$4 sm:$0xff] (!%p279_p10)   ;;  %v362_v49 = vpack.c.bf16 (!%p279_p10), %v360_v48, %v359_v47 }
  0x27   : > { %584 = vperm.xlu0 (!%p279_p10), %958, %v574_v17   ;;  %468 = vmatpush1.bf16.msra.mxu0 (!%p279_p10), %v964_v21  ;;  %v970_v25 = vld [vmem:[%s287_s25 + $0x20] ss:$16 sps:$4 sm:$0xff] (!%p279_p10)   ;;  %v971_v26 = vld [vmem:[%s287_s25 + $0x28] ss:$16 sps:$4 sm:$0xff] (!%p279_p10)   ;;  %v972_v27 = vld [vmem:[%s287_s25 + $0x44] ss:$16 sps:$4 sm:$0xff] (!%p279_p10)  }
  0x28   : > { %521 = vmatpush1.bf16.msra.mxu1 %v965_v22  ;;  %469 = vmatprep.subr.bf16.mxu0 %v966_v23  ;;  %v974_v30 = vld [vmem:[%s287_s25 + $0x4c] ss:$16 sps:$4 sm:$0xff]   ;;  %v976_v31 = vld [vmem:[%s287_s25 + $0x40] ss:$16 sps:$4 sm:$0xff]   ;;  %v977_v33 = vld [vmem:[%s287_s25 + $0x48] ss:$16 sps:$4 sm:$0xff]  }
  0x29   : > { %594 = vperm.xlu1 %959, %v576_v19   ;;  %522 = vmatprep.subr.bf16.mxu1 %v968_v24  ;;  %v375_v34 = vld [vmem:[%s287_s25 + $0x60] sm:$0x11]  ;;  %v376_v35 = vld [vmem:[%s287_s25 + $0x68] sm:$0x11]  ;;  %s1198_s16 = smov (!%p339_p11, %s868_s16), 7  ;;  %v617_v53 = vsub.s32 0, %v616_v51 }
  0x2a   : > { %v883_v36 = vcombine.high %v375_v34, %v375_v34  ;;  %v885_v37 = vcombine.high %v376_v35, %v376_v35  ;;  %v882_v38 = vcombine.low %v375_v34, %v375_v34  ;;  %v884_v39 = vcombine.low %v376_v35, %v376_v35  ;;  %s341_s25 = scalar_lea.vmem %s1188_s4, %s1198_s16  ;;  %s914_s11 = sshll.u32 (%p1088_p6), %s1012_s20, 4 }
  0x2b   : > { %470 = vmatpush1.bf16.msra.mxu0 %v970_v25  ;;  %v625_v54 = vsub.s32 2, %v616_v51  ;;  %v613_v55 = vld [vmem:[%s341_s25] sm:$0xf]  ;;  %v621_v56 = vsub.s32 1, %v616_v51  ;;  %v629_v57 = vsub.s32 3, %v616_v51  ;;  %s719_s6 = scalar_lea.vmem (%p1088_p6), %s1189_s5, %s914_s11 }
  0x2c   : > { %523 = vmatpush1.bf16.msra.mxu1 %v971_v26  ;;  %471 = vmatprep.subr.bf16.mxu0 %v972_v27  ;;  %v456_v42 = vsel %vm454_vm0, %v882_v38, 0  ;;  %v462_v43 = vsel %vm454_vm0, %v884_v39, 0  ;;  %v618_v58 = vrot.slane %v613_v55, %v617_v53 }
  0x2d   : > { %524 = vmatprep.subr.bf16.mxu1 %v974_v30  ;;  %v626_v59 = vrot.slane %v613_v55, %v625_v54  ;;  %v622_v0 = vrot.slane %v613_v55, %v621_v56  ;;  %v630_v1 = vrot.slane %v613_v55, %v629_v57 }
  0x2f   : > { %472 = vmatpush1.bf16.msra.mxu0 %v976_v31 }
  0x30   : > { %525 = vmatpush1.bf16.msra.mxu1 %v977_v33  ;;  %886 = vmatprep.subr.msk.bf16.mxu0 %vm454_vm0, %v883_v36 }
  0x31   : > { %889 = vmatprep.subr.msk.bf16.mxu1 %vm454_vm0, %v885_v37 }
  0x33   : > { %474 = vmatpush1.bf16.msra.mxu0 %v456_v42 }
  0x34   : > { %527 = vmatpush1.bf16.msra.mxu1 %v462_v43 }
  0x36   : > { %887 = vmatmul.mubr.msk.bf16.vlgmr.msra.gmra.mrb[0].mxu0 %vm447_vm1, %v361_v44 }
  0x37   : > { %890 = vmatmul.mubr.msk.bf16.vlgmr.msra.gmra.mrb[0].mxu1 %vm447_vm1, %v361_v44  ;;  %509 = vmatprep.mubr.bf16.mxu0 %v1022_v14 }
  0x38   : > { %562 = vmatprep.mubr.bf16.mxu1 %v1022_v14 }
  0x3e   : > { %888 = vmatmul.mubr.msk.bf16.gmra.mrb[4].mxu0 %vm447_vm1, %v362_v49 }
  0x3f   : > { %891 = vmatmul.mubr.msk.bf16.gmra.mrb[4].mxu1 %vm447_vm1, %v362_v49 }
  0xa2   : > { %v580_v52 = vpop.permute.xlu0 %579  ;;  %v590_v61 = vpop.permute.xlu1 %589 }
  0xa6   : > { %v585_v60 = vpop.permute.xlu0 %584 }
  0xa8   : > { %v595_v26 = vpop.permute.xlu1 %594 }
 0x109   : > { %v501_v62 = vpop.f32.mrb[0].mxu0 }
 0x10a   : > { %v554_v63 = vpop.f32.mrb[0].mxu1  ;;  %v597_v2 = vmul.f32 %v580_v52, %v501_v62  ;;  %v503_v4 = vpop.f32.mrb[1].mxu0 }
 0x10b   : > { %v599_v3 = vmul.f32 %v580_v52, %v554_v63  ;;  %v556_v5 = vpop.f32.mrb[1].mxu1  ;;  %v598_v6 = vmul.f32 %v580_v52, %v503_v4  ;;  %v505_v8 = vpop.f32.mrb[2].mxu0 }
 0x10c   : > { %v600_v7 = vmul.f32 %v580_v52, %v556_v5  ;;  %v558_v9 = vpop.f32.mrb[2].mxu1  ;;  %v635_v10 = vadd.f32 %v618_v58, %v597_v2  ;;  %v601_v12 = vmul.f32 %v585_v60, %v505_v8  ;;  %v507_v14 = vpop.f32.mrb[3].mxu0 }
 0x10d   : > { %v637_v11 = vadd.f32 %v626_v59, %v599_v3  ;;  %v603_v13 = vmul.f32 %v585_v60, %v558_v9  ;;  %v560_v15 = vpop.f32.mrb[3].mxu1  ;;  %v636_v16 = vadd.f32 %v622_v0, %v598_v6  ;;  %v602_v18 = vmul.f32 %v585_v60, %v507_v14 }
 0x10e   : > { %v638_v17 = vadd.f32 %v630_v1, %v600_v7  ;;  %v604_v19 = vmul.f32 %v585_v60, %v560_v15  ;;  %v639_v20 = vadd.f32 %v618_v58, %v601_v12 }
 0x10f   : > { %v641_v21 = vadd.f32 %v626_v59, %v603_v13  ;;  %v906_v22 = vpack.c.bf16 %v636_v16, %v635_v10  ;;  %v640_v24 = vadd.f32 %v622_v0, %v602_v18 }
 0x110   : > { %v907_v23 = vpack.c.bf16 %v638_v17, %v637_v11  ;;  %v642_v25 = vadd.f32 %v630_v1, %v604_v19 }
 0x111   : > { %699 = vst [vmem:[%s1145_s18] sm:$0xff] %v906_v22  ;;  %v908_v27 = vpack.c.bf16 %v640_v24, %v639_v20  ;;  %v511_v29 = vpop.f32.mrb[4].mxu0 }
 0x112   : > { %700 = vst [vmem:[%s1145_s18 + $0x8] sm:$0xff] %v907_v23  ;;  %v909_v28 = vpack.c.bf16 %v642_v25, %v641_v21  ;;  %v564_v30 = vpop.f32.mrb[4].mxu1  ;;  %v605_v31 = vmul.f32 %v590_v61, %v511_v29  ;;  %v513_v33 = vpop.f32.mrb[5].mxu0 }
 0x113   : > { %v607_v32 = vmul.f32 %v590_v61, %v564_v30  ;;  %v566_v34 = vpop.f32.mrb[5].mxu1  ;;  %701 = vst [vmem:[%s1145_s18 + $0x10] sm:$0xff] %v908_v27  ;;  %v606_v35 = vmul.f32 %v590_v61, %v513_v33  ;;  %v515_v37 = vpop.f32.mrb[6].mxu0 }
 0x114   : > { %702 = vst [vmem:[%s1145_s18 + $0x18] sm:$0xff] %v909_v28  ;;  %v608_v36 = vmul.f32 %v590_v61, %v566_v34  ;;  %v568_v38 = vpop.f32.mrb[6].mxu1  ;;  %v643_v39 = vadd.f32 %v618_v58, %v605_v31  ;;  %v609_v41 = vmul.f32 %v595_v26, %v515_v37  ;;  %v517_v43 = vpop.f32.mrb[7].mxu0 }
 0x115   : > { %v645_v40 = vadd.f32 %v626_v59, %v607_v32  ;;  %v611_v42 = vmul.f32 %v595_v26, %v568_v38  ;;  %v570_v44 = vpop.f32.mrb[7].mxu1  ;;  %v644_v45 = vadd.f32 %v622_v0, %v606_v35  ;;  %v610_v47 = vmul.f32 %v595_v26, %v517_v43 }
 0x116   : > { %v646_v46 = vadd.f32 %v630_v1, %v608_v36  ;;  %v612_v48 = vmul.f32 %v595_v26, %v570_v44  ;;  %v647_v49 = vadd.f32 %v618_v58, %v609_v41  ;;  %713 = sbr.rel (!%p1088_p6) target bundleno = 293 (0x125), region = 67 }
 0x117   : > { %v649_v50 = vadd.f32 %v626_v59, %v611_v42  ;;  %v910_v51 = vpack.c.bf16 %v644_v45, %v643_v39  ;;  %v648_v53 = vadd.f32 %v622_v0, %v610_v47 }
 0x118   : > { %v911_v52 = vpack.c.bf16 %v646_v46, %v645_v40  ;;  %v650_v54 = vadd.f32 %v630_v1, %v612_v48  ;;  %v732_v57 = vld [vmem:[%s1145_s18] sm:$0xff] (%p1088_p6) }
 0x119   : > { %703 = vst [vmem:[%s1145_s18 + $0x20] sm:$0xff] %v910_v51  ;;  %v912_v55 = vpack.c.bf16 %v648_v53, %v647_v49  ;;  %v734_v58 = vld [vmem:[%s1145_s18 + $0x8] sm:$0xff] (%p1088_p6)  ;;  %733 = vst [vmem:[%s719_s6] sm:$0xff] (%p1088_p6), %v732_v57 }
 0x11a   : > { %704 = vst [vmem:[%s1145_s18 + $0x28] sm:$0xff] %v911_v52  ;;  %v913_v56 = vpack.c.bf16 %v650_v54, %v649_v50  ;;  %v736_v59 = vld [vmem:[%s1145_s18 + $0x10] sm:$0xff] (%p1088_p6)  ;;  %735 = vst [vmem:[%s719_s6 + $0x8] sm:$0xff] (%p1088_p6), %v734_v58 }
 0x11b   : > { %705 = vst [vmem:[%s1145_s18 + $0x30] sm:$0xff] %v912_v55  ;;  %v738_v60 = vld [vmem:[%s1145_s18 + $0x18] sm:$0xff] (%p1088_p6)  ;;  %737 = vst [vmem:[%s719_s6 + $0x20] sm:$0xff] (%p1088_p6), %v736_v59 }
 0x11c   : > { %706 = vst [vmem:[%s1145_s18 + $0x38] sm:$0xff] %v913_v56  ;;  %739 = vst [vmem:[%s719_s6 + $0x28] sm:$0xff] (%p1088_p6), %v738_v60 }
 0x120   : > { %v740_v61 = vld [vmem:[%s1145_s18 + $0x20] sm:$0xff] }
 0x121   : > { %v742_v62 = vld [vmem:[%s1145_s18 + $0x28] sm:$0xff]  ;;  %741 = vst [vmem:[%s719_s6 + $0x40] sm:$0xff] %v740_v61 }
 0x122   : > { %743 = vst [vmem:[%s719_s6 + $0x48] sm:$0xff] %v742_v62  ;;  %v744_v63 = vld [vmem:[%s1145_s18 + $0x30] sm:$0xff] }
 0x123   : > { %v746_v0 = vld [vmem:[%s1145_s18 + $0x38] sm:$0xff]  ;;  %745 = vst [vmem:[%s719_s6 + $0x60] sm:$0xff] %v744_v63 }
 0x124   : > { %747 = vst [vmem:[%s719_s6 + $0x68] sm:$0xff] %v746_v0 }
 0x125 PF: > { %s15_s22 = sadd.s32 1, %s1020_s22   ;;  %s1191_s18 = smov %s1008_s19 }
 0x126   : > { %p12_p12 = scmp.ge.s32.totalorder %s15_s22, 4   ;;  %s1192_s19 = smov %s1093_s28 }
 0x127   : > { %s1193_s20 = smov %s1016_s21  ;;  %s1194_s21 = smov %s1196_s23 }
 0x128   :  { %14 = sbr.rel (!%p12_p12) target bundleno = 3 (0x3), region = 130 }

// kernel: forward.19
= control target key start
LH: loop header
LB: loop body
LE: loop exit
PB: predicated region body
PF: predicated region fallthrough
CT: control target
= control target key end

     0   :  { %s1713_s18 = smov 0   ;;  %s1715_s19 = smov 0   ;;  %s2052_s0 = inlined_call_operand.vmem [shape: bf16[32,128], index: 0, kind: input, shape index: {}]   ;;  %s2053_s1 = inlined_call_operand.vmem [shape: bf16[32,128], index: 1, kind: input, shape index: {}]   ;;  %s2054_s2 = inlined_call_operand.vmem [shape: bf16[128,1024], index: 2, kind: input, shape index: {}]   ;;  %s2055_s3 = inlined_call_operand.vmem [shape: bf16[128,1024], index: 3, kind: input, shape index: {}]   ;;  %s2056_s4 = inlined_call_operand.vmem [shape: f32[1,1024], index: 4, kind: input, shape index: {}]   ;;  %s2057_s5 = inlined_call_operand.vmem [shape: bf16[32,1024], index: 5, kind: output, shape index: {}]  }
   0x1   :  { %s1717_s20 = smov 0   ;;  %s1719_s21 = smov 0  }
   0x2   :  { %s1721_s22 = smov 0  }
   0x3 LB: > { %s27_s23 = sadd.s32 1, %s1676_s21  ;;  %s1376_s24 = sadd.s32 4294967295, %s1680_s22   ;;  %s1680_s22 = sphi %s1721_s22, %s15_s22   ;;  %s1676_s21 = sphi %s1719_s21, %s2063_s21   ;;  %s1672_s20 = sphi %s1717_s20, %s2062_s20   ;;  %s1668_s19 = sphi %s1715_s19, %s2061_s19   ;;  %s1664_s18 = sphi %s1713_s18, %s2060_s18  }
   0x4   : > { %p29_p0 = scmp.ge.s32.totalorder %s27_s23, 2  ;;  %p93_p1 = scmp.ne.s32.totalorder %s1668_s19, %s1664_s18 }
   0x5   : > { %p94_p2 = scmp.eq.s32.totalorder %s1680_s22, 0  ;;  %p177_p4 = scmp.eq.s32.totalorder %s1376_s24, 1 }
   0x6   : > { %s2065_s23 = smov (%p29_p0, %s27_s23), 0  ;;  %s86_s27 = sadd.s32 1, %s1668_s19 }
   0x7   : > { %p1745_p3 = por %p94_p2, %p93_p1  ;;  %s83_s26 = ssub.s32 %s1676_s21, %s2065_s23 }
   0x8   : > { %p84_p5 = scmp.eq.s32.totalorder %s83_s26, 0  ;;  %p1752_p6 = por %p177_p4, %p93_p1 }
   0x9   : > { %p1381_p7 = scmp.ge.s32.totalorder %s1680_s22, 2 }
   0xa   : > { %s1757_s29 = scalar_select %p84_p5, %s1668_s19, %s86_s27  }
   0xb   : > { %217 = sbr.rel (%p1381_p7) target bundleno = 58 (0x3a), region = 24 }
  0x12   : > { %220 = sbr.rel (!%p1745_p3) target bundleno = 38 (0x26), region = 28  ;;  %s222_s30 = sand.u32 (%p1745_p3), 1, %s1668_s19  }
  0x13   : > { %s1474_s6 = sshll.u32 (%p1745_p3), %s1676_s21, 4  ;;  %s1382_s7 = sshll.u32 (%p1745_p3), %s222_s30, 8 }
  0x14   : > { %s1767_s10 = scalar_lea.vmem (%p1745_p3), %s2054_s2, %s1474_s6  ;;  %s1772_s11 = scalar_lea.vmem (%p1745_p3), [#allocation2], %s1382_s7 }
  0x15   : > { %v240_v0 = vld [vmem:[%s1767_s10] sm:$0xff] (%p1745_p3)  ;;  %v242_v1 = vld [vmem:[%s1767_s10 + $0x8] sm:$0xff] (%p1745_p3) }
  0x16   : > { %v244_v2 = vld [vmem:[%s1767_s10 + $0x20] sm:$0xff] (%p1745_p3)  ;;  %241 = vst [vmem:[%s1772_s11] sm:$0xff] (%p1745_p3), %v240_v0  ;;  %243 = vst [vmem:[%s1772_s11 + $0x8] sm:$0xff] (%p1745_p3), %v242_v1  ;;  %v246_v3 = vld [vmem:[%s1767_s10 + $0x28] sm:$0xff] (%p1745_p3) }
  0x17   : > { %245 = vst [vmem:[%s1772_s11 + $0x10] sm:$0xff] (%p1745_p3), %v244_v2  ;;  %v248_v4 = vld [vmem:[%s1767_s10 + $0x40] sm:$0xff] (%p1745_p3)  ;;  %v250_v5 = vld [vmem:[%s1767_s10 + $0x48] sm:$0xff] (%p1745_p3)  ;;  %247 = vst [vmem:[%s1772_s11 + $0x18] sm:$0xff] (%p1745_p3), %v246_v3 }
  0x18   : > { %249 = vst [vmem:[%s1772_s11 + $0x20] sm:$0xff] (%p1745_p3), %v248_v4  ;;  %251 = vst [vmem:[%s1772_s11 + $0x28] sm:$0xff] (%p1745_p3), %v250_v5  ;;  %v252_v6 = vld [vmem:[%s1767_s10 + $0x60] sm:$0xff] (%p1745_p3)  ;;  %v254_v7 = vld [vmem:[%s1767_s10 + $0x68] sm:$0xff] (%p1745_p3) }
  0x19   : > { %v256_v8 = vld [vmem:[%s1767_s10 + $0x80] sm:$0xff]  ;;  %253 = vst [vmem:[%s1772_s11 + $0x30] sm:$0xff] %v252_v6  ;;  %255 = vst [vmem:[%s1772_s11 + $0x38] sm:$0xff] %v254_v7  ;;  %v258_v9 = vld [vmem:[%s1767_s10 + $0x88] sm:$0xff] }
  0x1a   : > { %257 = vst [vmem:[%s1772_s11 + $0x40] sm:$0xff] %v256_v8  ;;  %v260_v10 = vld [vmem:[%s1767_s10 + $0xa0] sm:$0xff]  ;;  %v262_v11 = vld [vmem:[%s1767_s10 + $0xa8] sm:$0xff]  ;;  %259 = vst [vmem:[%s1772_s11 + $0x48] sm:$0xff] %v258_v9 }
  0x1b   : > { %261 = vst [vmem:[%s1772_s11 + $0x50] sm:$0xff] %v260_v10  ;;  %263 = vst [vmem:[%s1772_s11 + $0x58] sm:$0xff] %v262_v11  ;;  %v264_v12 = vld [vmem:[%s1767_s10 + $0xc0] sm:$0xff]  ;;  %v266_v13 = vld [vmem:[%s1767_s10 + $0xc8] sm:$0xff] }
  0x1c   : > { %v268_v14 = vld [vmem:[%s1767_s10 + $0xe0] sm:$0xff]  ;;  %265 = vst [vmem:[%s1772_s11 + $0x60] sm:$0xff] %v264_v12  ;;  %267 = vst [vmem:[%s1772_s11 + $0x68] sm:$0xff] %v266_v13  ;;  %v270_v15 = vld [vmem:[%s1767_s10 + $0xe8] sm:$0xff] }
  0x1d   : > { %269 = vst [vmem:[%s1772_s11 + $0x70] sm:$0xff] %v268_v14  ;;  %v272_v16 = vld [vmem:[%s1767_s10 + $0x100] sm:$0xff]  ;;  %v274_v17 = vld [vmem:[%s1767_s10 + $0x108] sm:$0xff]  ;;  %271 = vst [vmem:[%s1772_s11 + $0x78] sm:$0xff] %v270_v15 }
  0x1e   : > { %273 = vst [vmem:[%s1772_s11 + $0x80] sm:$0xff] %v272_v16  ;;  %275 = vst [vmem:[%s1772_s11 + $0x88] sm:$0xff] %v274_v17  ;;  %v276_v18 = vld [vmem:[%s1767_s10 + $0x120] sm:$0xff]  ;;  %v278_v19 = vld [vmem:[%s1767_s10 + $0x128] sm:$0xff] }
  0x1f   : > { %v280_v20 = vld [vmem:[%s1767_s10 + $0x140] sm:$0xff]  ;;  %277 = vst [vmem:[%s1772_s11 + $0x90] sm:$0xff] %v276_v18  ;;  %279 = vst [vmem:[%s1772_s11 + $0x98] sm:$0xff] %v278_v19  ;;  %v282_v21 = vld [vmem:[%s1767_s10 + $0x148] sm:$0xff] }
  0x20   : > { %281 = vst [vmem:[%s1772_s11 + $0xa0] sm:$0xff] %v280_v20  ;;  %v284_v22 = vld [vmem:[%s1767_s10 + $0x160] sm:$0xff]  ;;  %v286_v23 = vld [vmem:[%s1767_s10 + $0x168] sm:$0xff]  ;;  %283 = vst [vmem:[%s1772_s11 + $0xa8] sm:$0xff] %v282_v21 }
  0x21   : > { %285 = vst [vmem:[%s1772_s11 + $0xb0] sm:$0xff] %v284_v22  ;;  %287 = vst [vmem:[%s1772_s11 + $0xb8] sm:$0xff] %v286_v23  ;;  %v288_v24 = vld [vmem:[%s1767_s10 + $0x180] sm:$0xff]  ;;  %v290_v25 = vld [vmem:[%s1767_s10 + $0x188] sm:$0xff] }
  0x22   : > { %v292_v26 = vld [vmem:[%s1767_s10 + $0x1a0] sm:$0xff]  ;;  %289 = vst [vmem:[%s1772_s11 + $0xc0] sm:$0xff] %v288_v24  ;;  %291 = vst [vmem:[%s1772_s11 + $0xc8] sm:$0xff] %v290_v25  ;;  %v294_v27 = vld [vmem:[%s1767_s10 + $0x1a8] sm:$0xff] }
  0x23   : > { %293 = vst [vmem:[%s1772_s11 + $0xd0] sm:$0xff] %v292_v26  ;;  %v296_v28 = vld [vmem:[%s1767_s10 + $0x1c0] sm:$0xff]  ;;  %v298_v29 = vld [vmem:[%s1767_s10 + $0x1c8] sm:$0xff]  ;;  %295 = vst [vmem:[%s1772_s11 + $0xd8] sm:$0xff] %v294_v27 }
  0x24   : > { %297 = vst [vmem:[%s1772_s11 + $0xe0] sm:$0xff] %v296_v28  ;;  %299 = vst [vmem:[%s1772_s11 + $0xe8] sm:$0xff] %v298_v29  ;;  %v300_v30 = vld [vmem:[%s1767_s10 + $0x1e0] sm:$0xff]  ;;  %v302_v31 = vld [vmem:[%s1767_s10 + $0x1e8] sm:$0xff] }
  0x25   : > { %301 = vst [vmem:[%s1772_s11 + $0xf0] sm:$0xff] %v300_v30  ;;  %303 = vst [vmem:[%s1772_s11 + $0xf8] sm:$0xff] %v302_v31 }
  0x26 PF: > { %309 = sbr.rel (!%p1745_p3) target bundleno = 58 (0x3a), region = 51  ;;  %s311_s12 = sand.u32 (%p1745_p3), 1, %s1668_s19  }
  0x27   : > { %s1475_s13 = sshll.u32 (%p1745_p3), %s1676_s21, 4  ;;  %s1385_s14 = sshll.u32 (%p1745_p3), %s311_s12, 8 }
  0x28   : > { %s1842_s17 = scalar_lea.vmem (%p1745_p3), %s2055_s3, %s1475_s13  ;;  %s1847_s24 = scalar_lea.vmem (%p1745_p3), [#allocation3], %s1385_s14 }
  0x29   : > { %v329_v32 = vld [vmem:[%s1842_s17] sm:$0xff] (%p1745_p3)  ;;  %v331_v33 = vld [vmem:[%s1842_s17 + $0x8] sm:$0xff] (%p1745_p3) }
  0x2a   : > { %v333_v34 = vld [vmem:[%s1842_s17 + $0x20] sm:$0xff] (%p1745_p3)  ;;  %330 = vst [vmem:[%s1847_s24] sm:$0xff] (%p1745_p3), %v329_v32  ;;  %332 = vst [vmem:[%s1847_s24 + $0x8] sm:$0xff] (%p1745_p3), %v331_v33  ;;  %v335_v35 = vld [vmem:[%s1842_s17 + $0x28] sm:$0xff] (%p1745_p3) }
  0x2b   : > { %334 = vst [vmem:[%s1847_s24 + $0x10] sm:$0xff] (%p1745_p3), %v333_v34  ;;  %v337_v36 = vld [vmem:[%s1842_s17 + $0x40] sm:$0xff] (%p1745_p3)  ;;  %v339_v37 = vld [vmem:[%s1842_s17 + $0x48] sm:$0xff] (%p1745_p3)  ;;  %336 = vst [vmem:[%s1847_s24 + $0x18] sm:$0xff] (%p1745_p3), %v335_v35 }
  0x2c   : > { %338 = vst [vmem:[%s1847_s24 + $0x20] sm:$0xff] (%p1745_p3), %v337_v36  ;;  %340 = vst [vmem:[%s1847_s24 + $0x28] sm:$0xff] (%p1745_p3), %v339_v37  ;;  %v341_v38 = vld [vmem:[%s1842_s17 + $0x60] sm:$0xff] (%p1745_p3)  ;;  %v343_v39 = vld [vmem:[%s1842_s17 + $0x68] sm:$0xff] (%p1745_p3) }
  0x2d   : > { %v345_v40 = vld [vmem:[%s1842_s17 + $0x80] sm:$0xff]  ;;  %342 = vst [vmem:[%s1847_s24 + $0x30] sm:$0xff] %v341_v38  ;;  %344 = vst [vmem:[%s1847_s24 + $0x38] sm:$0xff] %v343_v39  ;;  %v347_v41 = vld [vmem:[%s1842_s17 + $0x88] sm:$0xff] }
  0x2e   : > { %346 = vst [vmem:[%s1847_s24 + $0x40] sm:$0xff] %v345_v40  ;;  %v349_v42 = vld [vmem:[%s1842_s17 + $0xa0] sm:$0xff]  ;;  %v351_v43 = vld [vmem:[%s1842_s17 + $0xa8] sm:$0xff]  ;;  %348 = vst [vmem:[%s1847_s24 + $0x48] sm:$0xff] %v347_v41 }
  0x2f   : > { %350 = vst [vmem:[%s1847_s24 + $0x50] sm:$0xff] %v349_v42  ;;  %352 = vst [vmem:[%s1847_s24 + $0x58] sm:$0xff] %v351_v43  ;;  %v353_v44 = vld [vmem:[%s1842_s17 + $0xc0] sm:$0xff]  ;;  %v355_v45 = vld [vmem:[%s1842_s17 + $0xc8] sm:$0xff] }
  0x30   : > { %v357_v46 = vld [vmem:[%s1842_s17 + $0xe0] sm:$0xff]  ;;  %354 = vst [vmem:[%s1847_s24 + $0x60] sm:$0xff] %v353_v44  ;;  %356 = vst [vmem:[%s1847_s24 + $0x68] sm:$0xff] %v355_v45  ;;  %v359_v47 = vld [vmem:[%s1842_s17 + $0xe8] sm:$0xff] }
  0x31   : > { %358 = vst [vmem:[%s1847_s24 + $0x70] sm:$0xff] %v357_v46  ;;  %v361_v48 = vld [vmem:[%s1842_s17 + $0x100] sm:$0xff]  ;;  %v363_v49 = vld [vmem:[%s1842_s17 + $0x108] sm:$0xff]  ;;  %360 = vst [vmem:[%s1847_s24 + $0x78] sm:$0xff] %v359_v47 }
  0x32   : > { %362 = vst [vmem:[%s1847_s24 + $0x80] sm:$0xff] %v361_v48  ;;  %364 = vst [vmem:[%s1847_s24 + $0x88] sm:$0xff] %v363_v49  ;;  %v365_v50 = vld [vmem:[%s1842_s17 + $0x120] sm:$0xff]  ;;  %v367_v51 = vld [vmem:[%s1842_s17 + $0x128] sm:$0xff] }
  0x33   : > { %v369_v52 = vld [vmem:[%s1842_s17 + $0x140] sm:$0xff]  ;;  %366 = vst [vmem:[%s1847_s24 + $0x90] sm:$0xff] %v365_v50  ;;  %368 = vst [vmem:[%s1847_s24 + $0x98] sm:$0xff] %v367_v51  ;;  %v371_v53 = vld [vmem:[%s1842_s17 + $0x148] sm:$0xff] }
  0x34   : > { %370 = vst [vmem:[%s1847_s24 + $0xa0] sm:$0xff] %v369_v52  ;;  %v373_v54 = vld [vmem:[%s1842_s17 + $0x160] sm:$0xff]  ;;  %v375_v55 = vld [vmem:[%s1842_s17 + $0x168] sm:$0xff]  ;;  %372 = vst [vmem:[%s1847_s24 + $0xa8] sm:$0xff] %v371_v53 }
  0x35   : > { %374 = vst [vmem:[%s1847_s24 + $0xb0] sm:$0xff] %v373_v54  ;;  %376 = vst [vmem:[%s1847_s24 + $0xb8] sm:$0xff] %v375_v55  ;;  %v377_v56 = vld [vmem:[%s1842_s17 + $0x180] sm:$0xff]  ;;  %v379_v57 = vld [vmem:[%s1842_s17 + $0x188] sm:$0xff] }
  0x36   : > { %v381_v58 = vld [vmem:[%s1842_s17 + $0x1a0] sm:$0xff]  ;;  %378 = vst [vmem:[%s1847_s24 + $0xc0] sm:$0xff] %v377_v56  ;;  %380 = vst [vmem:[%s1847_s24 + $0xc8] sm:$0xff] %v379_v57  ;;  %v383_v59 = vld [vmem:[%s1842_s17 + $0x1a8] sm:$0xff] }
  0x37   : > { %382 = vst [vmem:[%s1847_s24 + $0xd0] sm:$0xff] %v381_v58  ;;  %v385_v60 = vld [vmem:[%s1842_s17 + $0x1c0] sm:$0xff]  ;;  %v387_v61 = vld [vmem:[%s1842_s17 + $0x1c8] sm:$0xff]  ;;  %384 = vst [vmem:[%s1847_s24 + $0xd8] sm:$0xff] %v383_v59 }
  0x38   : > { %386 = vst [vmem:[%s1847_s24 + $0xe0] sm:$0xff] %v385_v60  ;;  %388 = vst [vmem:[%s1847_s24 + $0xe8] sm:$0xff] %v387_v61  ;;  %v389_v62 = vld [vmem:[%s1842_s17 + $0x1e0] sm:$0xff]  ;;  %v391_v63 = vld [vmem:[%s1842_s17 + $0x1e8] sm:$0xff] }
  0x39   : > { %390 = vst [vmem:[%s1847_s24 + $0xf0] sm:$0xff] %v389_v62  ;;  %392 = vst [vmem:[%s1847_s24 + $0xf8] sm:$0xff] %v391_v63 }
  0x3a PF: > { %p1388_p8 = scmp.ge.s32.totalorder %s1680_s22, 1  ;;  %p405_p9 = scmp.lt.s32.totalorder %s1680_s22, 3 }
  0x3c   : > { %p406_p10 = pnand %p1388_p8, %p405_p9 }
  0x3d   : > { %s412_s25 = sand.u32 (!%p406_p10), 1, %s1664_s18   ;;  %v1682_v0 = vmov (!%p406_p10), 0   ;;  %v1596_v35 = vld [vmem:[%s2053_s1] sm:$0xff] (!%p406_p10)   ;;  %v1627_v44 = vld [vmem:[%s2053_s1 + $0x8] sm:$0xff] (!%p406_p10)   ;;  %s1392_s14 = sshll.u32 (!%p406_p10), %s1672_s20, 2 }
  0x3e   : > { %409 = sbr.rel (%p406_p10) target bundleno = 365 (0x16d), region = 78  ;;  %s1915_s26 = sshll.u32 (!%p406_p10), %s412_s25, 8  ;;  %761 = vmatprep.mubr.bf16.mxu0 (!%p406_p10), %v1682_v0  ;;  %814 = vmatprep.mubr.bf16.mxu1 (!%p406_p10), %v1682_v0 }
  0x3f   : > { %s1920_s27 = scalar_lea.vmem (!%p406_p10), [#allocation3], %s1915_s26  ;;  %s1949_s30 = scalar_lea.vmem (!%p406_p10), [#allocation2], %s1915_s26 }
  0x40   : > { %v1542_v1 = vld [vmem:[%s1920_s27 + $0x4] ss:$16 sps:$4 sm:$0xff] (!%p406_p10)   ;;  %v1544_v2 = vld [vmem:[%s1920_s27 + $0xc] ss:$16 sps:$4 sm:$0xff] (!%p406_p10)   ;;  %v1546_v3 = vld [vmem:[%s1920_s27] ss:$16 sps:$4 sm:$0xff] (!%p406_p10)  }
  0x41   : > { %729 = vmatprep.subr.bf16.mxu0 (!%p406_p10), %v1542_v1  ;;  %v1547_v4 = vld [vmem:[%s1920_s27 + $0x8] ss:$16 sps:$4 sm:$0xff] (!%p406_p10)   ;;  %782 = vmatprep.subr.bf16.mxu1 (!%p406_p10), %v1544_v2  ;;  %v1548_v5 = vld [vmem:[%s1920_s27 + $0x24] ss:$16 sps:$4 sm:$0xff] (!%p406_p10)   ;;  %v1550_v6 = vld [vmem:[%s1920_s27 + $0x2c] ss:$16 sps:$4 sm:$0xff] (!%p406_p10)  }
  0x42   : > { %730 = vmatpush1.bf16.msra.mxu0 (!%p406_p10), %v1546_v3  ;;  %783 = vmatpush1.bf16.msra.mxu1 (!%p406_p10), %v1547_v4  ;;  %v1552_v7 = vld [vmem:[%s1920_s27 + $0x20] ss:$16 sps:$4 sm:$0xff] (!%p406_p10)   ;;  %v1553_v8 = vld [vmem:[%s1920_s27 + $0x28] ss:$16 sps:$4 sm:$0xff] (!%p406_p10)   ;;  %v1554_v9 = vld [vmem:[%s1920_s27 + $0x44] ss:$16 sps:$4 sm:$0xff] (!%p406_p10)  }
  0x43   : > { %731 = vmatprep.subr.bf16.mxu0 (!%p406_p10), %v1548_v5  ;;  %784 = vmatprep.subr.bf16.mxu1 (!%p406_p10), %v1550_v6  ;;  %v1556_v10 = vld [vmem:[%s1920_s27 + $0x4c] ss:$16 sps:$4 sm:$0xff] (!%p406_p10)   ;;  %v1558_v11 = vld [vmem:[%s1920_s27 + $0x40] ss:$16 sps:$4 sm:$0xff] (!%p406_p10)   ;;  %v1559_v12 = vld [vmem:[%s1920_s27 + $0x48] ss:$16 sps:$4 sm:$0xff] (!%p406_p10)   ;;  %v1115_v6 = vlaneseq (!%p406_p10) }
  0x44   : > { %v1560_v13 = vld [vmem:[%s1920_s27 + $0x64] ss:$16 sps:$4 sm:$0xff] (!%p406_p10)   ;;  %v1562_v14 = vld [vmem:[%s1920_s27 + $0x6c] ss:$16 sps:$4 sm:$0xff] (!%p406_p10)   ;;  %v1564_v15 = vld [vmem:[%s1920_s27 + $0x60] ss:$16 sps:$4 sm:$0xff] (!%p406_p10)  }
  0x45   : > { %v1565_v16 = vld [vmem:[%s1920_s27 + $0x68] ss:$16 sps:$4 sm:$0xff]   ;;  %v1566_v17 = vld [vmem:[%s1920_s27 + $0x84] ss:$16 sps:$4 sm:$0xff]   ;;  %v1568_v18 = vld [vmem:[%s1920_s27 + $0x8c] ss:$16 sps:$4 sm:$0xff]  }
  0x46   : > { %732 = vmatpush1.bf16.msra.mxu0 %v1552_v7  ;;  %785 = vmatpush1.bf16.msra.mxu1 %v1553_v8  ;;  %v1570_v19 = vld [vmem:[%s1920_s27 + $0x80] ss:$16 sps:$4 sm:$0xff]   ;;  %v1571_v20 = vld [vmem:[%s1920_s27 + $0x88] ss:$16 sps:$4 sm:$0xff]   ;;  %v1572_v21 = vld [vmem:[%s1920_s27 + $0xa4] ss:$16 sps:$4 sm:$0xff]  }
  0x47   : > { %733 = vmatprep.subr.bf16.mxu0 %v1554_v9  ;;  %786 = vmatprep.subr.bf16.mxu1 %v1556_v10  ;;  %v1574_v22 = vld [vmem:[%s1920_s27 + $0xac] ss:$16 sps:$4 sm:$0xff]   ;;  %v1576_v23 = vld [vmem:[%s1920_s27 + $0xa0] ss:$16 sps:$4 sm:$0xff]   ;;  %v1577_v24 = vld [vmem:[%s1920_s27 + $0xa8] ss:$16 sps:$4 sm:$0xff]  }
  0x48   : > { %v1578_v25 = vld [vmem:[%s1920_s27 + $0xc4] ss:$16 sps:$4 sm:$0xff]   ;;  %v1580_v26 = vld [vmem:[%s1920_s27 + $0xcc] ss:$16 sps:$4 sm:$0xff]   ;;  %v1582_v27 = vld [vmem:[%s1920_s27 + $0xc0] ss:$16 sps:$4 sm:$0xff]  }
  0x49   : > { %v1583_v28 = vld [vmem:[%s1920_s27 + $0xc8] ss:$16 sps:$4 sm:$0xff]   ;;  %v1584_v29 = vld [vmem:[%s1920_s27 + $0xe4] ss:$16 sps:$4 sm:$0xff]   ;;  %v1586_v30 = vld [vmem:[%s1920_s27 + $0xec] ss:$16 sps:$4 sm:$0xff]  }
  0x4a   : > { %734 = vmatpush1.bf16.msra.mxu0 %v1558_v11  ;;  %787 = vmatpush1.bf16.msra.mxu1 %v1559_v12  ;;  %v1588_v31 = vld [vmem:[%s1920_s27 + $0xe0] ss:$16 sps:$4 sm:$0xff]   ;;  %v1589_v32 = vld [vmem:[%s1920_s27 + $0xe8] ss:$16 sps:$4 sm:$0xff]   ;;  %v1592_v33 = vld [vmem:[%s1949_s30 + $0x4] ss:$16 sps:$4 sm:$0xff]  }
  0x4b   : > { %735 = vmatprep.subr.bf16.mxu0 %v1560_v13  ;;  %788 = vmatprep.subr.bf16.mxu1 %v1562_v14  ;;  %v1595_v34 = vld [vmem:[%s1949_s30 + $0xc] ss:$16 sps:$4 sm:$0xff]   ;;  %v1590_v36 = vld [vmem:[%s1949_s30] ss:$16 sps:$4 sm:$0xff]   ;;  %v1593_v37 = vld [vmem:[%s1949_s30 + $0x8] ss:$16 sps:$4 sm:$0xff]  }
  0x4c   : > { %v1599_v38 = vld [vmem:[%s1949_s30 + $0x24] ss:$16 sps:$4 sm:$0xff]   ;;  %v1602_v39 = vld [vmem:[%s1949_s30 + $0x2c] ss:$16 sps:$4 sm:$0xff]   ;;  %v1597_v40 = vld [vmem:[%s1949_s30 + $0x20] ss:$16 sps:$4 sm:$0xff]  }
  0x4d   : > { %v1600_v41 = vld [vmem:[%s1949_s30 + $0x28] ss:$16 sps:$4 sm:$0xff]   ;;  %v1605_v42 = vld [vmem:[%s1949_s30 + $0x44] ss:$16 sps:$4 sm:$0xff]   ;;  %v1608_v43 = vld [vmem:[%s1949_s30 + $0x4c] ss:$16 sps:$4 sm:$0xff]  }
  0x4e   : > { %736 = vmatpush1.bf16.msra.mxu0 %v1564_v15  ;;  %789 = vmatpush1.bf16.msra.mxu1 %v1565_v16  ;;  %v1603_v45 = vld [vmem:[%s1949_s30 + $0x40] ss:$16 sps:$4 sm:$0xff]   ;;  %v1606_v46 = vld [vmem:[%s1949_s30 + $0x48] ss:$16 sps:$4 sm:$0xff]   ;;  %v1611_v47 = vld [vmem:[%s1949_s30 + $0x64] ss:$16 sps:$4 sm:$0xff]  }
  0x4f   : > { %737 = vmatprep.subr.bf16.mxu0 %v1566_v17  ;;  %790 = vmatprep.subr.bf16.mxu1 %v1568_v18  ;;  %v1614_v48 = vld [vmem:[%s1949_s30 + $0x6c] ss:$16 sps:$4 sm:$0xff]   ;;  %v1609_v49 = vld [vmem:[%s1949_s30 + $0x60] ss:$16 sps:$4 sm:$0xff]   ;;  %v1612_v50 = vld [vmem:[%s1949_s30 + $0x68] ss:$16 sps:$4 sm:$0xff]  }
  0x50   : > { %v1617_v51 = vld [vmem:[%s1949_s30 + $0x84] ss:$16 sps:$4 sm:$0xff]   ;;  %v1620_v52 = vld [vmem:[%s1949_s30 + $0x8c] ss:$16 sps:$4 sm:$0xff]   ;;  %v1615_v53 = vld [vmem:[%s1949_s30 + $0x80] ss:$16 sps:$4 sm:$0xff]  }
  0x51   : > { %v1618_v54 = vld [vmem:[%s1949_s30 + $0x88] ss:$16 sps:$4 sm:$0xff]   ;;  %v1623_v55 = vld [vmem:[%s1949_s30 + $0xa4] ss:$16 sps:$4 sm:$0xff]   ;;  %v1626_v56 = vld [vmem:[%s1949_s30 + $0xac] ss:$16 sps:$4 sm:$0xff]  }
  0x52   : > { %738 = vmatpush1.bf16.msra.mxu0 %v1570_v19  ;;  %791 = vmatpush1.bf16.msra.mxu1 %v1571_v20  ;;  %v1621_v57 = vld [vmem:[%s1949_s30 + $0xa0] ss:$16 sps:$4 sm:$0xff]   ;;  %v1624_v58 = vld [vmem:[%s1949_s30 + $0xa8] ss:$16 sps:$4 sm:$0xff]   ;;  %v1630_v59 = vld [vmem:[%s1949_s30 + $0xc4] ss:$16 sps:$4 sm:$0xff]  }
  0x53   : > { %739 = vmatprep.subr.bf16.mxu0 %v1572_v21  ;;  %792 = vmatprep.subr.bf16.mxu1 %v1574_v22  ;;  %v1633_v60 = vld [vmem:[%s1949_s30 + $0xcc] ss:$16 sps:$4 sm:$0xff]   ;;  %v1628_v61 = vld [vmem:[%s1949_s30 + $0xc0] ss:$16 sps:$4 sm:$0xff]   ;;  %v1631_v62 = vld [vmem:[%s1949_s30 + $0xc8] ss:$16 sps:$4 sm:$0xff]  }
  0x54   : > { %v1636_v63 = vld [vmem:[%s1949_s30 + $0xe4] ss:$16 sps:$4 sm:$0xff]   ;;  %v1639_v1 = vld [vmem:[%s1949_s30 + $0xec] ss:$16 sps:$4 sm:$0xff]   ;;  %v1634_v2 = vld [vmem:[%s1949_s30 + $0xe0] ss:$16 sps:$4 sm:$0xff]  }
  0x55   : > { %v1637_v3 = vld [vmem:[%s1949_s30 + $0xe8] ss:$16 sps:$4 sm:$0xff]   ;;  %v1640_v4 = vld [vmem:[%s2052_s0] sm:$0xff]   ;;  %p478_p11 = scmp.lt.s32.totalorder %s1392_s14, 7  ;;  %v1116_v7 = vshrl.u32 %v1115_v6, 7  ;;  %s1391_s24 = sshll.u32 %s412_s25, 6 }
  0x56   : > { %740 = vmatpush1.bf16.msra.mxu0 %v1576_v23  ;;  %793 = vmatpush1.bf16.msra.mxu1 %v1577_v24  ;;  %v1641_v5 = vld [vmem:[%s2052_s0 + $0x8] sm:$0xff]   ;;  %s2013_s26 = scalar_lea.vmem [#allocation4], %s1391_s24  ;;  %s1484_s18 = sshll.u32 (%p1752_p6), %s1672_s20, 4 }
  0x57   : > { %741 = vmatprep.subr.bf16.mxu0 %v1578_v25  ;;  %794 = vmatprep.subr.bf16.mxu1 %v1580_v26  ;;  %s2067_s14 = smov (!%p478_p11, %s1392_s14), 7  ;;  %v1117_v8 = vsub.s32 0, %v1116_v7  ;;  %v1125_v9 = vsub.s32 2, %v1116_v7  ;;  %v1129_v11 = vsub.s32 3, %v1116_v7  ;;  %s1219_s30 = scalar_lea.vmem (%p1752_p6), %s2057_s5, %s1484_s18 }
  0x58   : > { %s480_s17 = scalar_lea.vmem %s2056_s4, %s2067_s14 }
  0x59   : > { %v1113_v10 = vld [vmem:[%s480_s17] sm:$0xf] }
  0x5a   : > { %742 = vmatpush1.bf16.msra.mxu0 %v1582_v27  ;;  %795 = vmatpush1.bf16.msra.mxu1 %v1583_v28  ;;  %v1118_v12 = vrot.slane %v1113_v10, %v1117_v8  ;;  %v1126_v13 = vrot.slane %v1113_v10, %v1125_v9  ;;  %v1130_v15 = vrot.slane %v1113_v10, %v1129_v11 }
  0x5b   : > { %743 = vmatprep.subr.bf16.mxu0 %v1584_v29  ;;  %796 = vmatprep.subr.bf16.mxu1 %v1586_v30 }
  0x5e   : > { %744 = vmatpush1.bf16.msra.mxu0 %v1588_v31  ;;  %797 = vmatpush1.bf16.msra.mxu1 %v1589_v32 }
  0x5f   : > { %1007 = vmatprep.subr.bf16.mxu0 %v1592_v33  ;;  %1060 = vmatprep.subr.bf16.mxu1 %v1595_v34 }
  0x61   : > { %762 = vmatmul.mubr.bf16.vlgmr.msra.gmra.mrb[0].mxu0 %v1596_v35  ;;  %815 = vmatmul.mubr.bf16.vlgmr.msra.gmra.mrb[0].mxu1 %v1596_v35 }
  0x62   : > { %1008 = vmatpush1.bf16.msra.mxu0 %v1590_v36  ;;  %1061 = vmatpush1.bf16.msra.mxu1 %v1593_v37 }
  0x63   : > { %1009 = vmatprep.subr.bf16.mxu0 %v1599_v38  ;;  %1062 = vmatprep.subr.bf16.mxu1 %v1602_v39 }
  0x64   : > { %771 = vmatprep.mubr.bf16.mxu0 %v1682_v0  ;;  %824 = vmatprep.mubr.bf16.mxu1 %v1682_v0 }
  0x66   : > { %1010 = vmatpush1.bf16.msra.mxu0 %v1597_v40  ;;  %1063 = vmatpush1.bf16.msra.mxu1 %v1600_v41 }
  0x67   : > { %1011 = vmatprep.subr.bf16.mxu0 %v1605_v42  ;;  %1064 = vmatprep.subr.bf16.mxu1 %v1608_v43 }
  0x69   : > { %772 = vmatmul.mubr.bf16.gmra.mrb[4].mxu0 %v1627_v44  ;;  %825 = vmatmul.mubr.bf16.gmra.mrb[4].mxu1 %v1627_v44 }
  0x6a   : > { %1012 = vmatpush1.bf16.msra.mxu0 %v1603_v45  ;;  %1065 = vmatpush1.bf16.msra.mxu1 %v1606_v46 }
  0x6b   : > { %1013 = vmatprep.subr.bf16.mxu0 %v1611_v47  ;;  %1066 = vmatprep.subr.bf16.mxu1 %v1614_v48 }
  0x6c   : > { %1039 = vmatprep.mubr.bf16.mxu0 %v1682_v0  ;;  %1092 = vmatprep.mubr.bf16.mxu1 %v1682_v0 }
  0x6e   : > { %1014 = vmatpush1.bf16.msra.mxu0 %v1609_v49  ;;  %1067 = vmatpush1.bf16.msra.mxu1 %v1612_v50 }
  0x6f   : > { %1015 = vmatprep.subr.bf16.mxu0 %v1617_v51  ;;  %1068 = vmatprep.subr.bf16.mxu1 %v1620_v52 }
  0x72   : > { %1016 = vmatpush1.bf16.msra.mxu0 %v1615_v53  ;;  %1069 = vmatpush1.bf16.msra.mxu1 %v1618_v54 }
  0x73   : > { %1017 = vmatprep.subr.bf16.mxu0 %v1623_v55  ;;  %1070 = vmatprep.subr.bf16.mxu1 %v1626_v56 }
  0x76   : > { %1018 = vmatpush1.bf16.msra.mxu0 %v1621_v57  ;;  %1071 = vmatpush1.bf16.msra.mxu1 %v1624_v58 }
  0x77   : > { %1019 = vmatprep.subr.bf16.mxu0 %v1630_v59  ;;  %1072 = vmatprep.subr.bf16.mxu1 %v1633_v60 }
  0x7a   : > { %1020 = vmatpush1.bf16.msra.mxu0 %v1628_v61  ;;  %1073 = vmatpush1.bf16.msra.mxu1 %v1631_v62 }
  0x7b   : > { %1021 = vmatprep.subr.bf16.mxu0 %v1636_v63  ;;  %1074 = vmatprep.subr.bf16.mxu1 %v1639_v1 }
  0x7e   : > { %1022 = vmatpush1.bf16.msra.mxu0 %v1634_v2  ;;  %1075 = vmatpush1.bf16.msra.mxu1 %v1637_v3 }
  0x81   : > { %1040 = vmatmul.mubr.bf16.vlgmr.msra.gmra.mrb[0].mxu0 %v1640_v4  ;;  %1093 = vmatmul.mubr.bf16.vlgmr.msra.gmra.mrb[0].mxu1 %v1640_v4 }
  0x82   : > { %1049 = vmatprep.mubr.bf16.mxu0 %v1682_v0  ;;  %1102 = vmatprep.mubr.bf16.mxu1 %v1682_v0  ;;  %v1121_v0 = vsub.s32 1, %v1116_v7 }
  0x84   : > { %v1122_v14 = vrot.slane %v1113_v10, %v1121_v0 }
  0x89   : > { %1050 = vmatmul.mubr.bf16.gmra.mrb[4].mxu0 %v1641_v5  ;;  %1103 = vmatmul.mubr.bf16.gmra.mrb[4].mxu1 %v1641_v5 }
 0x154   : > { %v1041_v16 = vpop.f32.mrb[0].mxu0  ;;  %v1094_v17 = vpop.f32.mrb[0].mxu1 }
 0x155   : > { %v1135_v18 = vadd.f32 %v1118_v12, %v1041_v16  ;;  %v1137_v19 = vadd.f32 %v1126_v13, %v1094_v17  ;;  %v1043_v20 = vpop.f32.mrb[1].mxu0  ;;  %v1096_v21 = vpop.f32.mrb[1].mxu1 }
 0x156   : > { %v1136_v22 = vadd.f32 %v1122_v14, %v1043_v20  ;;  %v1138_v23 = vadd.f32 %v1130_v15, %v1096_v21  ;;  %v1045_v24 = vpop.f32.mrb[2].mxu0  ;;  %v1098_v25 = vpop.f32.mrb[2].mxu1 }
 0x157   : > { %v1139_v26 = vadd.f32 %v1118_v12, %v1045_v24  ;;  %v1141_v27 = vadd.f32 %v1126_v13, %v1098_v25  ;;  %v1047_v28 = vpop.f32.mrb[3].mxu0  ;;  %v1100_v29 = vpop.f32.mrb[3].mxu1 }
 0x158   : > { %v1476_v30 = vpack.c.bf16 %v1136_v22, %v1135_v18  ;;  %v1477_v31 = vpack.c.bf16 %v1138_v23, %v1137_v19  ;;  %v1140_v32 = vadd.f32 %v1122_v14, %v1047_v28  ;;  %v1142_v33 = vadd.f32 %v1130_v15, %v1100_v29 }
 0x15a   : > { %1199 = vst [vmem:[%s2013_s26] sm:$0xff] %v1476_v30  ;;  %1200 = vst [vmem:[%s2013_s26 + $0x8] sm:$0xff] %v1477_v31  ;;  %v1478_v34 = vpack.c.bf16 %v1140_v32, %v1139_v26  ;;  %v1479_v35 = vpack.c.bf16 %v1142_v33, %v1141_v27 }
 0x15c   : > { %1201 = vst [vmem:[%s2013_s26 + $0x10] sm:$0xff] %v1478_v34  ;;  %1202 = vst [vmem:[%s2013_s26 + $0x18] sm:$0xff] %v1479_v35  ;;  %v1051_v36 = vpop.f32.mrb[4].mxu0  ;;  %v1104_v37 = vpop.f32.mrb[4].mxu1 }
 0x15d   : > { %v1143_v38 = vadd.f32 %v1118_v12, %v1051_v36  ;;  %v1145_v39 = vadd.f32 %v1126_v13, %v1104_v37  ;;  %v1053_v40 = vpop.f32.mrb[5].mxu0  ;;  %v1106_v41 = vpop.f32.mrb[5].mxu1 }
 0x15e   : > { %v1144_v42 = vadd.f32 %v1122_v14, %v1053_v40  ;;  %v1146_v43 = vadd.f32 %v1130_v15, %v1106_v41  ;;  %v1055_v44 = vpop.f32.mrb[6].mxu0  ;;  %v1108_v45 = vpop.f32.mrb[6].mxu1  ;;  %1213 = sbr.rel (!%p1752_p6) target bundleno = 365 (0x16d), region = 90 }
 0x15f   : > { %v1147_v46 = vadd.f32 %v1118_v12, %v1055_v44  ;;  %v1149_v47 = vadd.f32 %v1126_v13, %v1108_v45  ;;  %v1057_v48 = vpop.f32.mrb[7].mxu0  ;;  %v1110_v49 = vpop.f32.mrb[7].mxu1 }
 0x160   : > { %v1480_v50 = vpack.c.bf16 %v1144_v42, %v1143_v38  ;;  %v1481_v51 = vpack.c.bf16 %v1146_v43, %v1145_v39  ;;  %v1148_v52 = vadd.f32 %v1122_v14, %v1057_v48  ;;  %v1150_v53 = vadd.f32 %v1130_v15, %v1110_v49 }
 0x161   : > { %v1232_v56 = vld [vmem:[%s2013_s26] sm:$0xff] (%p1752_p6)  ;;  %v1234_v57 = vld [vmem:[%s2013_s26 + $0x8] sm:$0xff] (%p1752_p6) }
 0x162   : > { %1203 = vst [vmem:[%s2013_s26 + $0x20] sm:$0xff] %v1480_v50  ;;  %1204 = vst [vmem:[%s2013_s26 + $0x28] sm:$0xff] %v1481_v51  ;;  %v1482_v54 = vpack.c.bf16 %v1148_v52, %v1147_v46  ;;  %v1483_v55 = vpack.c.bf16 %v1150_v53, %v1149_v47 }
 0x163   : > { %v1236_v58 = vld [vmem:[%s2013_s26 + $0x10] sm:$0xff] (%p1752_p6)  ;;  %v1238_v59 = vld [vmem:[%s2013_s26 + $0x18] sm:$0xff] (%p1752_p6)  ;;  %1233 = vst [vmem:[%s1219_s30] sm:$0xff] (%p1752_p6), %v1232_v56  ;;  %1235 = vst [vmem:[%s1219_s30 + $0x8] sm:$0xff] (%p1752_p6), %v1234_v57 }
 0x164   : > { %1205 = vst [vmem:[%s2013_s26 + $0x30] sm:$0xff] %v1482_v54  ;;  %1206 = vst [vmem:[%s2013_s26 + $0x38] sm:$0xff] %v1483_v55 }
 0x165   : > { %1237 = vst [vmem:[%s1219_s30 + $0x20] sm:$0xff] %v1236_v58  ;;  %1239 = vst [vmem:[%s1219_s30 + $0x28] sm:$0xff] %v1238_v59 }
 0x169   : > { %v1240_v60 = vld [vmem:[%s2013_s26 + $0x20] sm:$0xff]  ;;  %v1242_v61 = vld [vmem:[%s2013_s26 + $0x28] sm:$0xff] }
 0x16a   : > { %1241 = vst [vmem:[%s1219_s30 + $0x40] sm:$0xff] %v1240_v60  ;;  %1243 = vst [vmem:[%s1219_s30 + $0x48] sm:$0xff] %v1242_v61 }
 0x16b   : > { %v1244_v62 = vld [vmem:[%s2013_s26 + $0x30] sm:$0xff]  ;;  %v1246_v63 = vld [vmem:[%s2013_s26 + $0x38] sm:$0xff] }
 0x16c   : > { %1245 = vst [vmem:[%s1219_s30 + $0x60] sm:$0xff] %v1244_v62  ;;  %1247 = vst [vmem:[%s1219_s30 + $0x68] sm:$0xff] %v1246_v63 }
 0x16d PF: > { %s15_s22 = sadd.s32 1, %s1680_s22   ;;  %s2060_s18 = smov %s1668_s19 }
 0x16e   : > { %p12_p12 = scmp.ge.s32.totalorder %s15_s22, 4   ;;  %s2061_s19 = smov %s1757_s29 }
 0x16f   : > { %s2062_s20 = smov %s1676_s21  ;;  %s2063_s21 = smov %s2065_s23 }
 0x170   :  { %14 = sbr.rel (!%p12_p12) target bundleno = 3 (0x3), region = 161 }

// kernel: forward.33
= control target key start
LH: loop header
LB: loop body
LE: loop exit
PB: predicated region body
PF: predicated region fallthrough
CT: control target
= control target key end

     0   :  { %s1710_s21 = smov 0   ;;  %s1712_s22 = smov 0   ;;  %s2120_s0 = inlined_call_operand.vmem [shape: bf16[2,128,12], index: 0, kind: input, shape index: {}]   ;;  %s2121_s1 = inlined_call_operand.vmem [shape: bf16[2,128,12], index: 1, kind: input, shape index: {}]   ;;  %s2122_s2 = inlined_call_operand.vmem [shape: bf16[128,128], index: 2, kind: input, shape index: {}]   ;;  %s2123_s3 = inlined_call_operand.vmem [shape: bf16[128,128], index: 3, kind: input, shape index: {}]   ;;  %s2124_s4 = inlined_call_operand.vmem [shape: f32[128,1], index: 4, kind: input, shape index: {}]   ;;  %s2125_s5 = inlined_call_operand.vmem [shape: f32[2,128,12], index: 5, kind: output, shape index: {0}]   ;;  %s2126_s6 = inlined_call_operand.vmem [shape: f32[2,128,12], index: 6, kind: output, shape index: {1}]  }
   0x1   :  { %s1714_s23 = smov 0  }
   0x2 LB: > { %s26_s24 = sadd.s32 1, %s1668_s22  ;;  %p1368_p0 = scmp.ge.s32.totalorder %s1672_s23, 1  ;;  %s1672_s23 = sphi %s1714_s23, %s17_s23   ;;  %s1668_s22 = sphi %s1712_s22, %s2128_s22   ;;  %s1664_s21 = sphi %s1710_s21, %s2127_s21  }
   0x3   : > { %p27_p1 = scmp.ge.s32.totalorder %s26_s24, 2  ;;  %p274_p2 = scmp.lt.s32.totalorder %s1672_s23, 3 }
   0x5   : > { %s2130_s24 = smov (%p27_p1, %s26_s24), 0  ;;  %p275_p3 = pnand %p1368_p0, %p274_p2 }
   0x6   : > { %p337_p4 = scmp.lt.s32.totalorder (!%p275_p3), %s1664_s21, 1  ;;  %v1570_v0 = vld [vmem:[%s2123_s3] sm:$0xff] (!%p275_p3)   ;;  %v1674_v2 = vmov (!%p275_p3), 0   ;;  %v838_v19 = vld [vmem:[%s2124_s4 + $0x10] sm:$0xff] (!%p275_p3)  ;;  %v839_v21 = vld [vmem:[%s2124_s4 + $0x18] sm:$0xff] (!%p275_p3)  ;;  %vm948_vm0 = vcmask (!%p275_p3), 97280  }
   0x7   : > { %278 = sbr.rel (%p275_p3) target bundleno = 621 (0x26d), region = 40  ;;  %v1571_v1 = vld [vmem:[%s2122_s2] sm:$0xff] (!%p275_p3)   ;;  %1463 = vmatprep.mubr.bf16.mxu1 (!%p275_p3), %v1570_v0  ;;  %1553 = vset.pattern.permute.xlu1 (!%p275_p3), %v1674_v2  ;;  %v1572_v22 = vld [vmem:[%s2123_s3 + $0x8] sm:$0xff] (!%p275_p3)   ;;  %v1574_v25 = vld [vmem:[%s2123_s3 + $0x10] sm:$0xff] (!%p275_p3)  }
   0x8   : > { %1495 = vmatprep.mubr.bf16.mxu0 (!%p275_p3), %v1571_v1  ;;  %1552 = vset.pattern.permute.xlu0 (!%p275_p3), %v1674_v2  ;;  %v836_v20 = vld [vmem:[%s2124_s4] sm:$0xff] (!%p275_p3)  ;;  %v837_v23 = vld [vmem:[%s2124_s4 + $0x8] sm:$0xff] (!%p275_p3)  ;;  %v1575_v26 = vld [vmem:[%s2122_s2 + $0x10] sm:$0xff] (!%p275_p3)  }
   0x9   : > { %864 = vperm.xlu1 (!%p275_p3), %1553, %v838_v19   ;;  %854 = vperm.xlu0 (!%p275_p3), %1552, %v836_v20   ;;  %v1573_v24 = vld [vmem:[%s2122_s2 + $0x8] sm:$0xff] (!%p275_p3)   ;;  %v840_v28 = vld [vmem:[%s2124_s4 + $0x20] sm:$0xff] (!%p275_p3)  ;;  %v843_v29 = vld [vmem:[%s2124_s4 + $0x38] sm:$0xff] (!%p275_p3) }
   0xa   : > { %v841_v27 = vld [vmem:[%s2124_s4 + $0x28] sm:$0xff] (!%p275_p3)  ;;  %v1576_v30 = vld [vmem:[%s2123_s3 + $0x18] sm:$0xff] (!%p275_p3)   ;;  %v842_v31 = vld [vmem:[%s2124_s4 + $0x30] sm:$0xff] (!%p275_p3) }
   0xb   : > { %v1577_v32 = vld [vmem:[%s2122_s2 + $0x18] sm:$0xff] (!%p275_p3)   ;;  %v1578_v33 = vld [vmem:[%s2123_s3 + $0x20] sm:$0xff] (!%p275_p3)   ;;  %v845_v35 = vld [vmem:[%s2124_s4 + $0x48] sm:$0xff] (!%p275_p3) }
   0xc   : > { %v1579_v34 = vld [vmem:[%s2122_s2 + $0x20] sm:$0xff] (!%p275_p3)   ;;  %v847_v37 = vld [vmem:[%s2124_s4 + $0x58] sm:$0xff] (!%p275_p3)  ;;  %v1580_v38 = vld [vmem:[%s2123_s3 + $0x28] sm:$0xff] (!%p275_p3)  }
   0xd   : > { %869 = vperm.xlu1 (!%p275_p3), %1553, %v839_v21   ;;  %859 = vperm.xlu0 (!%p275_p3), %1552, %v837_v23   ;;  %v844_v36 = vld [vmem:[%s2124_s4 + $0x40] sm:$0xff] (!%p275_p3)  ;;  %v846_v39 = vld [vmem:[%s2124_s4 + $0x50] sm:$0xff] (!%p275_p3)  ;;  %v1581_v40 = vld [vmem:[%s2122_s2 + $0x28] sm:$0xff] (!%p275_p3)  }
   0xe   : > { %s2132_s21 = smov (!%p337_p4, %s1664_s21), 1  ;;  %v1582_v41 = vld [vmem:[%s2123_s3 + $0x30] sm:$0xff]   ;;  %v849_v43 = vld [vmem:[%s2124_s4 + $0x68] sm:$0xff]  ;;  %v848_v44 = vld [vmem:[%s2124_s4 + $0x60] sm:$0xff] }
   0xf   : > { %s1411_s29 = sshll.u32 %s2132_s21, 6  ;;  %v1583_v42 = vld [vmem:[%s2122_s2 + $0x30] sm:$0xff]   ;;  %v851_v45 = vld [vmem:[%s2124_s4 + $0x78] sm:$0xff]  ;;  %s1413_s12 = sshll.u32 %s2132_s21, 7 }
  0x10   : > { %s1740_s8 = scalar_lea.vmem %s2121_s1, %s1411_s29  ;;  %s1746_s11 = scalar_lea.vmem %s2120_s0, %s1411_s29  ;;  %v1584_v46 = vld [vmem:[%s2123_s3 + $0x38] sm:$0xff]   ;;  %v850_v47 = vld [vmem:[%s2124_s4 + $0x70] sm:$0xff] }
  0x11   : > { %v1554_v3 = vld [vmem:[%s1740_s8] sm:$0xff]   ;;  %v1556_v5 = vld [vmem:[%s1740_s8 + $0x8] sm:$0xff]   ;;  %v1558_v7 = vld [vmem:[%s1740_s8 + $0x10] sm:$0xff]   ;;  %879 = vperm.xlu1 %1553, %v841_v27   ;;  %874 = vperm.xlu0 %1552, %v840_v28   ;;  %s1861_s15 = scalar_lea.vmem %s2125_s5, %s1413_s12  ;;  %s2061_s18 = scalar_lea.vmem %s2126_s6, %s1413_s12 }
  0x12   : > { %v1555_v4 = vld [vmem:[%s1746_s11] sm:$0xff]   ;;  %1447 = vmatprep.subr.bf16.mxu1 %v1554_v3  ;;  %v1557_v6 = vld [vmem:[%s1746_s11 + $0x8] sm:$0xff]   ;;  %v1559_v8 = vld [vmem:[%s1746_s11 + $0x10] sm:$0xff]  }
  0x13   : > { %1479 = vmatprep.subr.bf16.mxu0 %v1555_v4  ;;  %1448 = vmatpush3.bf16.msra.mxu1 %v1554_v3  ;;  %v1560_v9 = vld [vmem:[%s1740_s8 + $0x18] sm:$0xff]   ;;  %v1562_v11 = vld [vmem:[%s1740_s8 + $0x20] sm:$0xff]   ;;  %v1564_v13 = vld [vmem:[%s1740_s8 + $0x28] sm:$0xff]  }
  0x14   : > { %1480 = vmatpush3.bf16.msra.mxu0 %v1555_v4  ;;  %1449 = vmatprep.subr.bf16.mxu1 %v1556_v5  ;;  %v1561_v10 = vld [vmem:[%s1746_s11 + $0x18] sm:$0xff]   ;;  %v1563_v12 = vld [vmem:[%s1746_s11 + $0x20] sm:$0xff]   ;;  %v1565_v14 = vld [vmem:[%s1746_s11 + $0x28] sm:$0xff]  }
  0x15   : > { %1481 = vmatprep.subr.bf16.mxu0 %v1557_v6  ;;  %v1566_v15 = vld [vmem:[%s1740_s8 + $0x30] sm:$0xff]   ;;  %v1568_v17 = vld [vmem:[%s1740_s8 + $0x38] sm:$0xff]   ;;  %889 = vperm.xlu1 %1553, %v843_v29  }
  0x16   : > { %v1567_v16 = vld [vmem:[%s1746_s11 + $0x30] sm:$0xff]   ;;  %v1569_v18 = vld [vmem:[%s1746_s11 + $0x38] sm:$0xff]   ;;  %884 = vperm.xlu0 %1552, %v842_v31  }
  0x17   : > { %1450 = vmatpush3.bf16.msra.mxu1 %v1556_v5  ;;  %v1585_v48 = vld [vmem:[%s2122_s2 + $0x38] sm:$0xff]  }
  0x18   : > { %1482 = vmatpush3.bf16.msra.mxu0 %v1557_v6  ;;  %1451 = vmatprep.subr.bf16.mxu1 %v1558_v7 }
  0x19   : > { %1483 = vmatprep.subr.bf16.mxu0 %v1559_v8  ;;  %899 = vperm.xlu1 %1553, %v845_v35  }
  0x1a   : > { %894 = vperm.xlu0 %1552, %v844_v36  }
  0x1b   : > { %1452 = vmatpush3.bf16.msra.mxu1 %v1558_v7 }
  0x1c   : > { %1484 = vmatpush3.bf16.msra.mxu0 %v1559_v8  ;;  %1453 = vmatprep.subr.bf16.mxu1 %v1560_v9 }
  0x1d   : > { %1485 = vmatprep.subr.bf16.mxu0 %v1561_v10  ;;  %909 = vperm.xlu1 %1553, %v847_v37  }
  0x1e   : > { %904 = vperm.xlu0 %1552, %v846_v39  }
  0x1f   : > { %1454 = vmatpush3.bf16.msra.mxu1 %v1560_v9 }
  0x20   : > { %1486 = vmatpush3.bf16.msra.mxu0 %v1561_v10  ;;  %1455 = vmatprep.subr.bf16.mxu1 %v1562_v11 }
  0x21   : > { %1487 = vmatprep.subr.bf16.mxu0 %v1563_v12  ;;  %919 = vperm.xlu1 %1553, %v849_v43  }
  0x22   : > { %914 = vperm.xlu0 %1552, %v848_v44  }
  0x23   : > { %1456 = vmatpush3.bf16.msra.mxu1 %v1562_v11 }
  0x24   : > { %1488 = vmatpush3.bf16.msra.mxu0 %v1563_v12  ;;  %1457 = vmatprep.subr.bf16.mxu1 %v1564_v13 }
  0x25   : > { %1489 = vmatprep.subr.bf16.mxu0 %v1565_v14  ;;  %929 = vperm.xlu1 %1553, %v851_v45  }
  0x26   : > { %924 = vperm.xlu0 %1552, %v850_v47  }
  0x27   : > { %1458 = vmatpush3.bf16.msra.mxu1 %v1564_v13 }
  0x28   : > { %1490 = vmatpush3.bf16.msra.mxu0 %v1565_v14  ;;  %1459 = vmatprep.subr.bf16.mxu1 %v1566_v15 }
  0x29   : > { %1491 = vmatprep.subr.bf16.mxu0 %v1567_v16 }
  0x2b   : > { %1460 = vmatpush3.bf16.msra.mxu1 %v1566_v15 }
  0x2c   : > { %1492 = vmatpush3.bf16.msra.mxu0 %v1567_v16  ;;  %1461 = vmatprep.subr.bf16.mxu1 %v1568_v17 }
  0x2d   : > { %1493 = vmatprep.subr.bf16.mxu0 %v1569_v18 }
  0x2f   : > { %1462 = vmatpush3.bf16.msra.mxu1 %v1568_v17 }
  0x30   : > { %1494 = vmatpush3.bf16.msra.mxu0 %v1569_v18 }
  0x32   : > { %1464 = vmatmul.mubr.bf16.vlgmr.msra.gmra.mrb[0].mxu1 %v1572_v22 }
  0x33   : > { %1496 = vmatmul.mubr.bf16.vlgmr.msra.gmra.mrb[0].mxu0 %v1573_v24  ;;  %1467 = vmatprep.mubr.bf16.mxu1 %v1574_v25 }
  0x34   : > { %1499 = vmatprep.mubr.bf16.mxu0 %v1575_v26 }
  0x3a   : > { %1468 = vmatmul.mubr.bf16.gmra.mrb[4].mxu1 %v1576_v30 }
  0x3b   : > { %1500 = vmatmul.mubr.bf16.gmra.mrb[4].mxu0 %v1577_v32  ;;  %1471 = vmatprep.mubr.bf16.mxu1 %v1578_v33 }
  0x3c   : > { %1503 = vmatprep.mubr.bf16.mxu0 %v1579_v34 }
  0x42   : > { %1472 = vmatmul.mubr.bf16.gmra.mrb[8].mxu1 %v1580_v38 }
  0x43   : > { %1504 = vmatmul.mubr.bf16.gmra.mrb[8].mxu0 %v1581_v40  ;;  %1475 = vmatprep.mubr.bf16.mxu1 %v1582_v41 }
  0x44   : > { %1507 = vmatprep.mubr.bf16.mxu0 %v1583_v42 }
  0x4a   : > { %1476 = vmatmul.mubr.bf16.gmra.mrb[12].mxu1 %v1584_v46 }
  0x4b   : > { %1508 = vmatmul.mubr.bf16.gmra.mrb[12].mxu0 %v1585_v48 }
  0x88   : > { %v855_v49 = vpop.permute.xlu0 %854  ;;  %v865_v50 = vpop.permute.xlu1 %864 }
  0x8c   : > { %v860_v51 = vpop.permute.xlu0 %859  ;;  %v870_v52 = vpop.permute.xlu1 %869 }
  0x90   : > { %v875_v53 = vpop.permute.xlu0 %874  ;;  %v880_v54 = vpop.permute.xlu1 %879 }
  0x94   : > { %v890_v56 = vpop.permute.xlu1 %889 }
  0x95   : > { %v885_v55 = vpop.permute.xlu0 %884 }
  0x98   : > { %v900_v10 = vpop.permute.xlu1 %899 }
  0x99   : > { %v1854_v57 = vpop.permute.xlu0 %894 }
  0x9c   : > { %v910_v32 = vpop.permute.xlu1 %909 }
  0x9d   : > { %v905_v12 = vpop.permute.xlu0 %904 }
  0xa1   : > { %v915_v34 = vpop.permute.xlu0 %914 }
 0x105   : > { %v1465_v58 = vpop.f32.mrb[0].mxu1 }
 0x106   : > { %v1497_v59 = vpop.f32.mrb[0].mxu0  ;;  %v580_v60 = vpop.f32.mrb[1].mxu1 }
 0x107   : > { %v782_v61 = vadd.f32 %v1497_v59, %v1465_v58  ;;  %v773_v62 = vpop.f32.mrb[1].mxu0  ;;  %v1466_v63 = vpop.f32.mrb[2].mxu1 }
 0x108   : > { %v774_v0 = vadd.f32 %v773_v62, %v580_v60  ;;  %v1498_v1 = vpop.f32.mrb[2].mxu0  ;;  %v583_v2 = vpop.f32.mrb[3].mxu1 }
 0x109   : > { %v1863_v3 = vadd.f32 %v865_v50, %v782_v61  ;;  %v785_v4 = vadd.f32 %v1498_v1, %v1466_v63  ;;  %v776_v5 = vpop.f32.mrb[3].mxu0 }
 0x10a   : > { %v1865_v6 = vadd.f32 %v855_v49, %v774_v0  ;;  %v777_v7 = vadd.f32 %v776_v5, %v583_v2 }
 0x10b   : > { %1127 = vst.msk [vmem:[%s1861_s15 + $0x10] sm:$0xff] %vm948_vm0, %v1863_v3  ;;  %v1870_v8 = vadd.f32 %v870_v52, %v785_v4  ;;  %v955_v9 = vsel %vm948_vm0, %v1863_v3, -inf }
 0x10c   : > { %1125 = vst.msk [vmem:[%s1861_s15] sm:$0xff] %vm948_vm0, %v1865_v6  ;;  %v1877_v11 = vadd.f32 %v860_v51, %v777_v7  ;;  %956 = vmax.xlane.f32.xlu0 %v955_v9  ;;  %v949_v20 = vsel %vm948_vm0, %v1865_v6, -inf }
 0x10d   : > { %1128 = vst.msk [vmem:[%s1861_s15 + $0x18] sm:$0xff] %vm948_vm0, %v1870_v8  ;;  %v1469_v13 = vpop.f32.mrb[4].mxu1  ;;  %v958_v31 = vsel %vm948_vm0, %v1870_v8, -inf }
 0x10e   : > { %1126 = vst.msk [vmem:[%s1861_s15 + $0x8] sm:$0xff] %vm948_vm0, %v1877_v11  ;;  %v1501_v14 = vpop.f32.mrb[4].mxu0  ;;  %v596_v15 = vpop.f32.mrb[5].mxu1  ;;  %v952_v16 = vsel %vm948_vm0, %v1877_v11, -inf }
 0x10f   : > { %v798_v17 = vadd.f32 %v1501_v14, %v1469_v13  ;;  %v789_v18 = vpop.f32.mrb[5].mxu0  ;;  %953 = vmax.xlane.f32.xlu1 %v952_v16  ;;  %v1470_v19 = vpop.f32.mrb[6].mxu1 }
 0x110   : > { %v790_v21 = vadd.f32 %v789_v18, %v596_v15  ;;  %v1502_v22 = vpop.f32.mrb[6].mxu0  ;;  %950 = vmax.xlane.f32.xlu0 %v949_v20  ;;  %v599_v23 = vpop.f32.mrb[7].mxu1 }
 0x111   : > { %v1889_v24 = vadd.f32 %v885_v55, %v798_v17  ;;  %v801_v25 = vadd.f32 %v1502_v22, %v1470_v19  ;;  %v792_v26 = vpop.f32.mrb[7].mxu0 }
 0x112   : > { %v1891_v27 = vadd.f32 %v875_v53, %v790_v21  ;;  %v793_v28 = vadd.f32 %v792_v26, %v599_v23 }
 0x113   : > { %1131 = vst.msk [vmem:[%s1861_s15 + $0x30] sm:$0xff] %vm948_vm0, %v1889_v24  ;;  %v1896_v29 = vadd.f32 %v890_v56, %v801_v25  ;;  %v967_v30 = vsel %vm948_vm0, %v1889_v24, -inf  ;;  %v925_v56 = vpop.permute.xlu0 %924 }
 0x114   : > { %1129 = vst.msk [vmem:[%s1861_s15 + $0x20] sm:$0xff] %vm948_vm0, %v1891_v27  ;;  %v1905_v33 = vadd.f32 %v880_v54, %v793_v28  ;;  %968 = vmax.xlane.f32.xlu1 %v967_v30  ;;  %959 = vmax.xlane.f32.xlu0 %v958_v31  ;;  %v961_v41 = vsel %vm948_vm0, %v1891_v27, -inf  ;;  %v920_v54 = vpop.permute.xlu1 %919 }
 0x115   : > { %1132 = vst.msk [vmem:[%s1861_s15 + $0x38] sm:$0xff] %vm948_vm0, %v1896_v29  ;;  %v1473_v35 = vpop.f32.mrb[8].mxu1  ;;  %v970_v42 = vsel %vm948_vm0, %v1896_v29, -inf }
 0x116   : > { %1130 = vst.msk [vmem:[%s1861_s15 + $0x28] sm:$0xff] %vm948_vm0, %v1905_v33  ;;  %v1505_v36 = vpop.f32.mrb[8].mxu0  ;;  %v612_v37 = vpop.f32.mrb[9].mxu1  ;;  %v964_v53 = vsel %vm948_vm0, %v1905_v33, -inf }
 0x117   : > { %v814_v38 = vadd.f32 %v1505_v36, %v1473_v35  ;;  %v805_v39 = vpop.f32.mrb[9].mxu0  ;;  %v1474_v40 = vpop.f32.mrb[10].mxu1 }
 0x118   : > { %v806_v43 = vadd.f32 %v805_v39, %v612_v37  ;;  %v1506_v44 = vpop.f32.mrb[10].mxu0  ;;  %962 = vmax.xlane.f32.xlu1 %v961_v41  ;;  %971 = vmax.xlane.f32.xlu0 %v970_v42  ;;  %v615_v45 = vpop.f32.mrb[11].mxu1 }
 0x119   : > { %v1917_v46 = vadd.f32 %v905_v12, %v814_v38  ;;  %v817_v47 = vadd.f32 %v1506_v44, %v1474_v40  ;;  %v808_v48 = vpop.f32.mrb[11].mxu0 }
 0x11a   : > { %v1920_v49 = vadd.f32 %v1854_v57, %v806_v43  ;;  %v809_v50 = vadd.f32 %v808_v48, %v615_v45 }
 0x11b   : > { %1135 = vst.msk [vmem:[%s1861_s15 + $0x50] sm:$0xff] %vm948_vm0, %v1917_v46  ;;  %v1925_v51 = vadd.f32 %v910_v32, %v817_v47  ;;  %v979_v52 = vsel %vm948_vm0, %v1917_v46, -inf }
 0x11c   : > { %1133 = vst.msk [vmem:[%s1861_s15 + $0x40] sm:$0xff] %vm948_vm0, %v1920_v49  ;;  %v1934_v55 = vadd.f32 %v900_v10, %v809_v50  ;;  %980 = vmax.xlane.f32.xlu1 %v979_v52  ;;  %965 = vmax.xlane.f32.xlu0 %v964_v53  ;;  %v973_v63 = vsel %vm948_vm0, %v1920_v49, -inf  ;;  %v930_v10 = vpop.permute.xlu1 %929 }
 0x11d   : > { %1136 = vst.msk [vmem:[%s1861_s15 + $0x58] sm:$0xff] %vm948_vm0, %v1925_v51  ;;  %v1477_v57 = vpop.f32.mrb[12].mxu1  ;;  %v982_v0 = vsel %vm948_vm0, %v1925_v51, -inf }
 0x11e   : > { %1134 = vst.msk [vmem:[%s1861_s15 + $0x48] sm:$0xff] %vm948_vm0, %v1934_v55  ;;  %v1509_v58 = vpop.f32.mrb[12].mxu0  ;;  %v628_v59 = vpop.f32.mrb[13].mxu1  ;;  %v976_v15 = vsel %vm948_vm0, %v1934_v55, -inf }
 0x11f   : > { %v830_v60 = vadd.f32 %v1509_v58, %v1477_v57  ;;  %v821_v61 = vpop.f32.mrb[13].mxu0  ;;  %v1478_v62 = vpop.f32.mrb[14].mxu1 }
 0x120   : > { %v822_v1 = vadd.f32 %v821_v61, %v628_v59  ;;  %v1510_v2 = vpop.f32.mrb[14].mxu0  ;;  %974 = vmax.xlane.f32.xlu1 %v973_v63  ;;  %983 = vmax.xlane.f32.xlu0 %v982_v0  ;;  %v631_v4 = vpop.f32.mrb[15].mxu1 }
 0x121   : > { %v1946_v5 = vadd.f32 %v925_v56, %v830_v60  ;;  %v833_v7 = vadd.f32 %v1510_v2, %v1478_v62  ;;  %v824_v9 = vpop.f32.mrb[15].mxu0 }
 0x122   : > { %v1948_v12 = vadd.f32 %v915_v34, %v822_v1  ;;  %v825_v13 = vadd.f32 %v824_v9, %v631_v4 }
 0x123   : > { %1139 = vst.msk [vmem:[%s1861_s15 + $0x70] sm:$0xff] %vm948_vm0, %v1946_v5  ;;  %v1953_v14 = vadd.f32 %v930_v10, %v833_v7  ;;  %v991_v19 = vsel %vm948_vm0, %v1946_v5, -inf }
 0x124   : > { %1137 = vst.msk [vmem:[%s1861_s15 + $0x60] sm:$0xff] %vm948_vm0, %v1948_v12  ;;  %v1960_v16 = vadd.f32 %v920_v54, %v825_v13  ;;  %977 = vmax.xlane.f32.xlu0 %v976_v15  ;;  %v985_v17 = vsel %vm948_vm0, %v1948_v12, -inf }
 0x125   : > { %1140 = vst.msk [vmem:[%s1861_s15 + $0x78] sm:$0xff] %vm948_vm0, %v1953_v14  ;;  %986 = vmax.xlane.f32.xlu1 %v985_v17  ;;  %v994_v20 = vsel %vm948_vm0, %v1953_v14, -inf }
 0x126   : > { %1138 = vst.msk [vmem:[%s1861_s15 + $0x68] sm:$0xff] %vm948_vm0, %v1960_v16  ;;  %v988_v18 = vsel %vm948_vm0, %v1960_v16, -inf }
 0x128   : > { %989 = vmax.xlane.f32.xlu0 %v988_v18 }
 0x129   : > { %992 = vmax.xlane.f32.xlu1 %v991_v19 }
 0x12c   : > { %995 = vmax.xlane.f32.xlu0 %v994_v20 }
 0x199   : > { %v957_v21 = vpop.xlane.xlu0 %956 }
 0x19a   : > { %v1977_v22 = vsub.f32 %v1863_v3, %v957_v21 }
 0x19c   : > { %v1017_v23 = vmul.f32 1.442695, %v1977_v22  ;;  %v954_v25 = vpop.xlane.xlu1 %953 }
 0x19d   : > { %v951_v26 = vpop.xlane.xlu0 %950  ;;  %v1985_v31 = vsub.f32 %v1877_v11, %v954_v25 }
 0x19e   : > { %1586 = vpow2.f32 %v1017_v23  ;;  %v1981_v28 = vsub.f32 %v1865_v6, %v951_v26 }
 0x19f   : > { %v1015_v6 = vmul.f32 1.442695, %v1985_v31 }
 0x1a0   : > { %v1013_v30 = vmul.f32 1.442695, %v1981_v28 }
 0x1a1   : > { %v969_v32 = vpop.xlane.xlu1 %968  ;;  %v960_v34 = vpop.xlane.xlu0 %959 }
 0x1a2   : > { %1588 = vpow2.f32 %v1013_v30  ;;  %v1988_v35 = vsub.f32 %v1889_v24, %v969_v32  ;;  %v1991_v3 = vsub.f32 %v1870_v8, %v960_v34 }
 0x1a4   : > { %v1025_v36 = vmul.f32 1.442695, %v1988_v35  ;;  %v1019_v37 = vmul.f32 1.442695, %v1991_v3 }
 0x1a5   : > { %v963_v38 = vpop.xlane.xlu1 %962  ;;  %v972_v39 = vpop.xlane.xlu0 %971 }
 0x1a6   : > { %1590 = vpow2.f32 %v1025_v36  ;;  %v1997_v11 = vsub.f32 %v1891_v27, %v963_v38  ;;  %v2000_v40 = vsub.f32 %v1896_v29, %v972_v39 }
 0x1a7   : > { %1592 = vpow2.f32 %v1019_v37 }
 0x1a8   : > { %v1587_v24 = vpop.eup %1586  ;;  %v1021_v8 = vmul.f32 1.442695, %v1997_v11  ;;  %1594 = vpow2.f32 %v1015_v6  ;;  %v1027_v41 = vmul.f32 1.442695, %v2000_v40 }
 0x1a9   : > { %v981_v42 = vpop.xlane.xlu1 %980  ;;  %v966_v43 = vpop.xlane.xlu0 %965  ;;  %v1051_v44 = vsel %vm948_vm0, %v1587_v24, 0.0 }
 0x1aa   : > { %1596 = vpow2.f32 %v1021_v8  ;;  %v2006_v45 = vsub.f32 %v1917_v46, %v981_v42  ;;  %v2009_v27 = vsub.f32 %v1905_v33, %v966_v43  ;;  %1052 = vadd.xlane.f32.xlu1 %v1051_v44 }
 0x1ab   : > { %1598 = vpow2.f32 %v1027_v41 }
 0x1ac   : > { %v1589_v29 = vpop.eup %1588  ;;  %v1033_v47 = vmul.f32 1.442695, %v2006_v45  ;;  %v1023_v48 = vmul.f32 1.442695, %v2009_v27 }
 0x1ad   : > { %v975_v50 = vpop.xlane.xlu1 %974  ;;  %v984_v52 = vpop.xlane.xlu0 %983  ;;  %v1045_v53 = vsel %vm948_vm0, %v1589_v29, 0.0 }
 0x1ae   : > { %1600 = vpow2.f32 %v1033_v47  ;;  %v2015_v54 = vsub.f32 %v1920_v49, %v975_v50  ;;  %v2018_v46 = vsub.f32 %v1925_v51, %v984_v52  ;;  %1046 = vadd.xlane.f32.xlu1 %v1045_v53 }
 0x1af   : > { %1602 = vpow2.f32 %v1023_v48 }
 0x1b0   : > { %v1591_v33 = vpop.eup %1590  ;;  %v1029_v56 = vmul.f32 1.442695, %v2015_v54  ;;  %v1035_v58 = vmul.f32 1.442695, %v2018_v46 }
 0x1b1   : > { %v1593_v57 = vpop.eup %1592  ;;  %v978_v59 = vpop.xlane.xlu0 %977  ;;  %v1063_v60 = vsel %vm948_vm0, %v1591_v33, 0.0 }
 0x1b2   : > { %1604 = vpow2.f32 %v1029_v56  ;;  %v2024_v61 = vsub.f32 %v1934_v55, %v978_v59  ;;  %v987_v49 = vpop.xlane.xlu1 %986  ;;  %1064 = vadd.xlane.f32.xlu1 %v1063_v60  ;;  %v1054_v51 = vsel %vm948_vm0, %v1593_v57, 0.0  ;;  %v1595_v62 = vpop.eup %1594 }
 0x1b3   : > { %v2028_v63 = vsub.f32 %v1948_v12, %v987_v49  ;;  %1055 = vadd.xlane.f32.xlu0 %v1054_v51  ;;  %1606 = vpow2.f32 %v1035_v58  ;;  %v1048_v10 = vsel %vm948_vm0, %v1595_v62, 0.0 }
 0x1b4   : > { %v1597_v0 = vpop.eup %1596  ;;  %v1031_v1 = vmul.f32 1.442695, %v2024_v61 }
 0x1b5   : > { %v1037_v2 = vmul.f32 1.442695, %v2028_v63  ;;  %v990_v4 = vpop.xlane.xlu0 %989  ;;  %v1057_v7 = vsel %vm948_vm0, %v1597_v0, 0.0  ;;  %v1599_v13 = vpop.eup %1598 }
 0x1b6   : > { %v2034_v55 = vsub.f32 %v1960_v16, %v990_v4  ;;  %v993_v9 = vpop.xlane.xlu1 %992  ;;  %1058 = vadd.xlane.f32.xlu1 %v1057_v7  ;;  %v1066_v21 = vsel %vm948_vm0, %v1599_v13, 0.0 }
 0x1b7   : > { %1608 = vpow2.f32 %v1037_v2  ;;  %v2038_v12 = vsub.f32 %v1946_v5, %v993_v9  ;;  %1049 = vadd.xlane.f32.xlu0 %v1048_v10 }
 0x1b8   : > { %v1601_v15 = vpop.eup %1600  ;;  %1610 = vpow2.f32 %v1031_v1  ;;  %v1039_v17 = vmul.f32 1.442695, %v2034_v55 }
 0x1b9   : > { %v1041_v18 = vmul.f32 1.442695, %v2038_v12  ;;  %v996_v19 = vpop.xlane.xlu0 %995  ;;  %v1075_v16 = vsel %vm948_vm0, %v1601_v15, 0.0  ;;  %v1603_v23 = vpop.eup %1602 }
 0x1ba   : > { %v2044_v20 = vsub.f32 %v1953_v14, %v996_v19  ;;  %1076 = vadd.xlane.f32.xlu1 %v1075_v16  ;;  %v1060_v30 = vsel %vm948_vm0, %v1603_v23, 0.0 }
 0x1bb   : > { %1612 = vpow2.f32 %v1041_v18  ;;  %1067 = vadd.xlane.f32.xlu0 %v1066_v21 }
 0x1bc   : > { %v1605_v5 = vpop.eup %1604  ;;  %1614 = vpow2.f32 %v1039_v17  ;;  %v1043_v25 = vmul.f32 1.442695, %v2044_v20 }
 0x1bd   : > { %v1069_v26 = vsel %vm948_vm0, %v1605_v5, 0.0  ;;  %v1607_v32 = vpop.eup %1606 }
 0x1be   : > { %1070 = vadd.xlane.f32.xlu1 %v1069_v26  ;;  %1616 = vpow2.f32 %v1043_v25  ;;  %v1078_v14 = vsel %vm948_vm0, %v1607_v32, 0.0 }
 0x1bf   : > { %1061 = vadd.xlane.f32.xlu0 %v1060_v30 }
 0x1c1   : > { %v1609_v34 = vpop.eup %1608 }
 0x1c2   : > { %v1081_v36 = vsel %vm948_vm0, %v1609_v34, 0.0  ;;  %v1611_v37 = vpop.eup %1610 }
 0x1c3   : > { %1079 = vadd.xlane.f32.xlu0 %v1078_v14  ;;  %1082 = vadd.xlane.f32.xlu1 %v1081_v36  ;;  %v1072_v38 = vsel %vm948_vm0, %v1611_v37, 0.0 }
 0x1c5   : > { %v1613_v6 = vpop.eup %1612 }
 0x1c6   : > { %v1087_v39 = vsel %vm948_vm0, %v1613_v6, 0.0  ;;  %v1615_v24 = vpop.eup %1614 }
 0x1c7   : > { %1073 = vadd.xlane.f32.xlu0 %v1072_v38  ;;  %1088 = vadd.xlane.f32.xlu1 %v1087_v39  ;;  %v1084_v8 = vsel %vm948_vm0, %v1615_v24, 0.0 }
 0x1c8   : > { %v1617_v41 = vpop.eup %1616 }
 0x1c9   : > { %v1090_v42 = vsel %vm948_vm0, %v1617_v41, 0.0 }
 0x1cb   : > { %1085 = vadd.xlane.f32.xlu0 %v1084_v8 }
 0x1cf   : > { %1091 = vadd.xlane.f32.xlu0 %v1090_v42 }
 0x237   : > { %v1053_v43 = vpop.xlane.xlu1 %1052 }
 0x238   : > { %1618 = vlog2.f32 %v1053_v43 }
 0x23b   : > { %v1047_v44 = vpop.xlane.xlu1 %1046 }
 0x23c   : > { %1620 = vlog2.f32 %v1047_v44 }
 0x23f   : > { %v1065_v29 = vpop.xlane.xlu1 %1064 }
 0x240   : > { %1622 = vlog2.f32 %v1065_v29  ;;  %v1056_v47 = vpop.xlane.xlu0 %1055 }
 0x241   : > { %1624 = vlog2.f32 %v1056_v47 }
 0x242   : > { %v1619_v48 = vpop.eup %1618 }
 0x243   : > { %v1098_v50 = vmul.f32 0.6931472, %v1619_v48  ;;  %v1059_v52 = vpop.xlane.xlu1 %1058 }
 0x244   : > { %1626 = vlog2.f32 %v1059_v52  ;;  %v1050_v53 = vpop.xlane.xlu0 %1049 }
 0x245   : > { %v1143_v33 = vsub.f32 %v1977_v22, %v1098_v50  ;;  %1628 = vlog2.f32 %v1050_v53 }
 0x246   : > { %v1621_v56 = vpop.eup %1620 }
 0x247   : > { %1159 = vst.msk [vmem:[%s2061_s18 + $0x10] sm:$0xff] %vm948_vm0, %v1143_v33  ;;  %v1094_v57 = vmul.f32 0.6931472, %v1621_v56  ;;  %v1077_v58 = vpop.xlane.xlu1 %1076 }
 0x248   : > { %1630 = vlog2.f32 %v1077_v58  ;;  %v1068_v59 = vpop.xlane.xlu0 %1067 }
 0x249   : > { %v1141_v60 = vsub.f32 %v1981_v28, %v1094_v57  ;;  %1632 = vlog2.f32 %v1068_v59 }
 0x24a   : > { %v1623_v49 = vpop.eup %1622 }
 0x24b   : > { %v1625_v51 = vpop.eup %1624  ;;  %1157 = vst.msk [vmem:[%s2061_s18] sm:$0xff] %vm948_vm0, %v1141_v60  ;;  %v1106_v62 = vmul.f32 0.6931472, %v1623_v49  ;;  %v1071_v0 = vpop.xlane.xlu1 %1070 }
 0x24c   : > { %v1100_v22 = vmul.f32 0.6931472, %v1625_v51  ;;  %1634 = vlog2.f32 %v1071_v0  ;;  %v1062_v1 = vpop.xlane.xlu0 %1061 }
 0x24d   : > { %v1147_v2 = vsub.f32 %v1988_v35, %v1106_v62  ;;  %1636 = vlog2.f32 %v1062_v1 }
 0x24e   : > { %v1627_v4 = vpop.eup %1626  ;;  %v1144_v7 = vsub.f32 %v1991_v3, %v1100_v22 }
 0x24f   : > { %v1629_v28 = vpop.eup %1628  ;;  %1163 = vst.msk [vmem:[%s2061_s18 + $0x30] sm:$0xff] %vm948_vm0, %v1147_v2  ;;  %v1102_v9 = vmul.f32 0.6931472, %v1627_v4 }
 0x250   : > { %1160 = vst.msk [vmem:[%s2061_s18 + $0x18] sm:$0xff] %vm948_vm0, %v1144_v7  ;;  %v1096_v10 = vmul.f32 0.6931472, %v1629_v28  ;;  %v1080_v13 = vpop.xlane.xlu0 %1079  ;;  %v1083_v15 = vpop.xlane.xlu1 %1082 }
 0x251   : > { %v1145_v17 = vsub.f32 %v1997_v11, %v1102_v9  ;;  %1638 = vlog2.f32 %v1080_v13 }
 0x252   : > { %v1631_v18 = vpop.eup %1630  ;;  %v1142_v35 = vsub.f32 %v1985_v31, %v1096_v10  ;;  %1640 = vlog2.f32 %v1083_v15 }
 0x253   : > { %v1633_v3 = vpop.eup %1632  ;;  %1161 = vst.msk [vmem:[%s2061_s18 + $0x20] sm:$0xff] %vm948_vm0, %v1145_v17  ;;  %v1114_v19 = vmul.f32 0.6931472, %v1631_v18 }
 0x254   : > { %1158 = vst.msk [vmem:[%s2061_s18 + $0x8] sm:$0xff] %vm948_vm0, %v1142_v35  ;;  %v1108_v16 = vmul.f32 0.6931472, %v1633_v3  ;;  %v1074_v21 = vpop.xlane.xlu0 %1073  ;;  %v1089_v23 = vpop.xlane.xlu1 %1088 }
 0x255   : > { %v1151_v5 = vsub.f32 %v2006_v45, %v1114_v19  ;;  %1642 = vlog2.f32 %v1074_v21 }
 0x256   : > { %v1635_v11 = vpop.eup %1634  ;;  %v1148_v25 = vsub.f32 %v2000_v40, %v1108_v16  ;;  %1644 = vlog2.f32 %v1089_v23 }
 0x257   : > { %v1637_v31 = vpop.eup %1636  ;;  %1167 = vst.msk [vmem:[%s2061_s18 + $0x50] sm:$0xff] %vm948_vm0, %v1151_v5  ;;  %v1110_v26 = vmul.f32 0.6931472, %v1635_v11 }
 0x258   : > { %1164 = vst.msk [vmem:[%s2061_s18 + $0x38] sm:$0xff] %vm948_vm0, %v1148_v25  ;;  %v1104_v30 = vmul.f32 0.6931472, %v1637_v31  ;;  %v1086_v32 = vpop.xlane.xlu0 %1085 }
 0x259   : > { %v1149_v34 = vsub.f32 %v2015_v54, %v1110_v26  ;;  %1646 = vlog2.f32 %v1086_v32 }
 0x25a   : > { %v1146_v45 = vsub.f32 %v2009_v27, %v1104_v30 }
 0x25b   : > { %v1639_v14 = vpop.eup %1638  ;;  %1165 = vst.msk [vmem:[%s2061_s18 + $0x40] sm:$0xff] %vm948_vm0, %v1149_v34 }
 0x25c   : > { %v1641_v40 = vpop.eup %1640  ;;  %1162 = vst.msk [vmem:[%s2061_s18 + $0x28] sm:$0xff] %vm948_vm0, %v1146_v45  ;;  %v1116_v36 = vmul.f32 0.6931472, %v1639_v14  ;;  %v1092_v37 = vpop.xlane.xlu0 %1091 }
 0x25d   : > { %v1118_v6 = vmul.f32 0.6931472, %v1641_v40  ;;  %1648 = vlog2.f32 %v1092_v37 }
 0x25e   : > { %v1152_v38 = vsub.f32 %v2018_v46, %v1116_v36 }
 0x25f   : > { %v1643_v54 = vpop.eup %1642  ;;  %v1153_v39 = vsub.f32 %v2028_v63, %v1118_v6 }
 0x260   : > { %v1645_v24 = vpop.eup %1644  ;;  %1168 = vst.msk [vmem:[%s2061_s18 + $0x58] sm:$0xff] %vm948_vm0, %v1152_v38  ;;  %v1112_v27 = vmul.f32 0.6931472, %v1643_v54 }
 0x261   : > { %1169 = vst.msk [vmem:[%s2061_s18 + $0x60] sm:$0xff] %vm948_vm0, %v1153_v39  ;;  %v1122_v8 = vmul.f32 0.6931472, %v1645_v24 }
 0x262   : > { %v1150_v41 = vsub.f32 %v2024_v61, %v1112_v27 }
 0x263   : > { %v1647_v42 = vpop.eup %1646  ;;  %v1155_v43 = vsub.f32 %v2038_v12, %v1122_v8 }
 0x264   : > { %1166 = vst.msk [vmem:[%s2061_s18 + $0x48] sm:$0xff] %vm948_vm0, %v1150_v41  ;;  %v1120_v46 = vmul.f32 0.6931472, %v1647_v42 }
 0x265   : > { %1171 = vst.msk [vmem:[%s2061_s18 + $0x70] sm:$0xff] %vm948_vm0, %v1155_v43 }
 0x266   : > { %v1154_v63 = vsub.f32 %v2034_v55, %v1120_v46 }
 0x267   : > { %v1649_v44 = vpop.eup %1648 }
 0x268   : > { %1170 = vst.msk [vmem:[%s2061_s18 + $0x68] sm:$0xff] %vm948_vm0, %v1154_v63  ;;  %v1124_v29 = vmul.f32 0.6931472, %v1649_v44 }
 0x26a   : > { %v1156_v47 = vsub.f32 %v2044_v20, %v1124_v29 }
 0x26c   : > { %1172 = vst.msk [vmem:[%s2061_s18 + $0x78] sm:$0xff] %vm948_vm0, %v1156_v47 }
 0x26d PF: > { %s17_s23 = sadd.s32 1, %s1672_s23   ;;  %s2127_s21 = smov %s1668_s22 }
 0x26e   : > { %p14_p5 = scmp.ge.s32.totalorder %s17_s23, 4   ;;  %s2128_s22 = smov %s2130_s24 }
 0x270   :  { %16 = sbr.rel (!%p14_p5) target bundleno = 2 (0x2), region = 94 }

// kernel: forward.18
= control target key start
LH: loop header
LB: loop body
LE: loop exit
PB: predicated region body
PF: predicated region fallthrough
CT: control target
= control target key end

     0   :  { %s9661_s0 = inlined_call_operand.vmem [shape: bf16[16,2,1024], index: 0, kind: input, shape index: {}, may-alias: {0,1}]   ;;  %s9662_s1 = inlined_call_operand.vmem [shape: bf16[16,2,1024], index: 1, kind: input, shape index: {}, may-alias: {0,1}]   ;;  %s9663_s2 = inlined_call_operand.vmem [shape: f32[16,2,1], index: 2, kind: input, shape index: {}, may-alias: {2,3}]   ;;  %s9664_s3 = inlined_call_operand.vmem [shape: f32[16,2,1], index: 3, kind: input, shape index: {}, may-alias: {2,3}]   ;;  %s9665_s4 = inlined_call_operand.vmem [shape: bf16[128,512], index: 4, kind: input, shape index: {}]   ;;  %s9666_s5 = inlined_call_operand.vmem [shape: bf16[128,512], index: 5, kind: input, shape index: {}]   ;;  %s9667_s6 = inlined_call_operand.vmem [shape: bf16[16,2,128], index: 6, kind: output, shape index: {0}]   ;;  %s9668_s7 = inlined_call_operand.vmem [shape: bf16[16,2,128], index: 7, kind: output, shape index: {1}]  }
   0x1   :  { %9689 = sst [smem:[#allocation14_spill]] %s9661_s0 }
   0x2   :  { %9690 = sst [smem:[#allocation15_spill]] %s9662_s1 }
   0x3   :  { %s7614_s24 = smov 0   ;;  %s7616_s25 = smov 0  }
   0x4   :  { %s7618_s26 = smov 0   ;;  %s7620_s27 = smov 0  }
   0x5   :  { %s7622_s28 = smov 0  }
   0x6 LB: > { %s7640_s29 = sadd.s32 4294967295, %s7569_s28   ;;  %s7643_s30 = sadd.s32 1, %s7569_s28   ;;  %s7569_s28 = sphi %s7622_s28, %s9735_s28   ;;  %s7565_s27 = sphi %s7620_s27, %s9734_s27   ;;  %s7561_s26 = sphi %s7618_s26, %s9733_s26   ;;  %s7557_s25 = sphi %s7616_s25, %s9732_s25   ;;  %s7553_s24 = sphi %s7614_s24, %s9731_s24  }
   0x7   : > { %s22_s8 = ssub.s32 %s7569_s28, %s7643_s30  ;;  %s25_s9 = sadd.s32 1, %s7565_s27 }
   0x8   : > { %p23_p0 = scmp.eq.s32.totalorder %s22_s8, 0  ;;  %p32_p1 = scmp.ne.s32.totalorder %s7565_s27, %s7561_s26 }
   0x9   : > { %p33_p2 = scmp.eq.s32.totalorder %s7569_s28, 0  ;;  %s48_s10 = ssub.s32 1, %s7569_s28 }
   0xa   : > { %s7653_s11 = scalar_select %p23_p0, %s7565_s27, %s25_s9  }
   0xb   : > { %p34_p3 = por %p33_p2, %p32_p1  ;;  %s49_s12 = ssub.s32 1, %s7643_s30 }
   0xc   : > { %s50_s13 = ssub.s32 %s48_s10, %s49_s12  ;;  %s53_s14 = sadd.s32 1, %s7557_s25 }
   0xd   : > { %p51_p4 = scmp.eq.s32.totalorder %s50_s13, 0  ;;  %p60_p5 = scmp.ne.s32.totalorder %s7557_s25, %s7553_s24 }
   0xe   : > { %p6217_p7 = scmp.ge.s32.totalorder %s7569_s28, 2 }
   0xf   : > { %s7662_s15 = scalar_select %p51_p4, %s7557_s25, %s53_s14  }
  0x10   : > { %p7664_p6 = por %p60_p5, %p33_p2  ;;  %242 = sbr.rel (%p6217_p7) target bundleno = 53 (0x35), region = 24 }
  0x17   : > { %245 = sbr.rel (!%p34_p3) target bundleno = 38 (0x26), region = 28  ;;  %s247_s17 = sand.u32 (%p34_p3), 1, %s7565_s27  }
  0x18   : > { %s6845_s18 = sshll.u32 (%p34_p3), %s7569_s28, 6  ;;  %s6218_s19 = sshll.u32 (%p34_p3), %s247_s17, 5 }
  0x19   : > { %s9692_s0 = sld [smem:[#allocation14_spill]] (%p34_p3)  ;;  %s249_s23 = scalar_lea.vmem (%p34_p3), [#allocation6], %s6218_s19 }
  0x1f   : > { %s252_s22 = scalar_lea.vmem %s9692_s0, %s6845_s18 }
  0x20   : > { %v268_v0 = vld [vmem:[%s252_s22] sm:$0xf]  ;;  %v270_v1 = vld [vmem:[%s252_s22 + $0x8] sm:$0xf]  ;;  %v272_v2 = vld [vmem:[%s252_s22 + $0x10] sm:$0xf] }
  0x21   : > { %269 = vst [vmem:[%s249_s23] sm:$0xf] %v268_v0  ;;  %271 = vst [vmem:[%s249_s23 + $0x4] sm:$0xf] %v270_v1  ;;  %v274_v3 = vld [vmem:[%s252_s22 + $0x18] sm:$0xf] }
  0x22   : > { %v276_v4 = vld [vmem:[%s252_s22 + $0x20] sm:$0xf]  ;;  %273 = vst [vmem:[%s249_s23 + $0x8] sm:$0xf] %v272_v2  ;;  %275 = vst [vmem:[%s249_s23 + $0xc] sm:$0xf] %v274_v3 }
  0x23   : > { %277 = vst [vmem:[%s249_s23 + $0x10] sm:$0xf] %v276_v4  ;;  %v278_v5 = vld [vmem:[%s252_s22 + $0x28] sm:$0xf]  ;;  %v280_v6 = vld [vmem:[%s252_s22 + $0x30] sm:$0xf] }
  0x24   : > { %v282_v7 = vld [vmem:[%s252_s22 + $0x38] sm:$0xf]  ;;  %279 = vst [vmem:[%s249_s23 + $0x14] sm:$0xf] %v278_v5  ;;  %281 = vst [vmem:[%s249_s23 + $0x18] sm:$0xf] %v280_v6 }
  0x25   : > { %283 = vst [vmem:[%s249_s23 + $0x1c] sm:$0xf] %v282_v7 }
  0x26 PF: > { %322 = sbr.rel (!%p7664_p6) target bundleno = 53 (0x35), region = 69  ;;  %s324_s8 = sand.u32 (%p7664_p6), 1, %s7557_s25  }
  0x27   : > { %s6222_s9 = sshll.u32 (%p7664_p6), %s48_s10, 6  ;;  %s6221_s12 = sshll.u32 (%p7664_p6), %s324_s8, 5 }
  0x28   : > { %s9693_s1 = sld [smem:[#allocation15_spill]] (%p7664_p6)  ;;  %s326_s18 = scalar_lea.vmem (%p7664_p6), [#allocation7], %s6221_s12 }
  0x2e   : > { %s6129_s17 = scalar_lea.vmem %s9693_s1, %s6222_s9 }
  0x2f   : > { %v6223_v8 = vld [vmem:[%s6129_s17 + $0x4] sm:$0xf]  ;;  %v6224_v9 = vld [vmem:[%s6129_s17 + $0xc] sm:$0xf]  ;;  %v6225_v10 = vld [vmem:[%s6129_s17 + $0x14] sm:$0xf] }
  0x30   : > { %348 = vst [vmem:[%s326_s18] sm:$0xf] %v6223_v8  ;;  %350 = vst [vmem:[%s326_s18 + $0x4] sm:$0xf] %v6224_v9  ;;  %v6226_v11 = vld [vmem:[%s6129_s17 + $0x1c] sm:$0xf] }
  0x31   : > { %v6227_v12 = vld [vmem:[%s6129_s17 + $0x24] sm:$0xf]  ;;  %352 = vst [vmem:[%s326_s18 + $0x8] sm:$0xf] %v6225_v10  ;;  %354 = vst [vmem:[%s326_s18 + $0xc] sm:$0xf] %v6226_v11 }
  0x32   : > { %356 = vst [vmem:[%s326_s18 + $0x10] sm:$0xf] %v6227_v12  ;;  %v6228_v13 = vld [vmem:[%s6129_s17 + $0x2c] sm:$0xf]  ;;  %v6229_v14 = vld [vmem:[%s6129_s17 + $0x34] sm:$0xf] }
  0x33   : > { %v6230_v15 = vld [vmem:[%s6129_s17 + $0x3c] sm:$0xf]  ;;  %358 = vst [vmem:[%s326_s18 + $0x14] sm:$0xf] %v6228_v13  ;;  %360 = vst [vmem:[%s326_s18 + $0x18] sm:$0xf] %v6229_v14 }
  0x34   : > { %362 = vst [vmem:[%s326_s18 + $0x1c] sm:$0xf] %v6230_v15 }
  0x35 PF: > { %p6231_p8 = scmp.ge.s32.totalorder %s7569_s28, 1  ;;  %p420_p9 = scmp.lt.s32.totalorder %s7569_s28, 3 }
  0x37   : > { %p421_p10 = pnand %p6231_p8, %p420_p9 }
  0x39   : > { %424 = sbr.rel (%p421_p10) target bundleno = 2365 (0x93d), region = 118 }
  0x40   : > { %s427_s10 = sand.u32 1, %s7561_s26   ;;  %s434_s16 = sand.u32 1, %s7553_s24  }
  0x41   : > { %s6232_s19 = sshll.u32 %s427_s10, 5  ;;  %s6233_s20 = sshll.u32 %s434_s16, 5 }
  0x42   : > { %s6234_s21 = sshll.u32 %s7640_s29, 3  ;;  %s493_s22 = ssub.s32 1, %s7640_s29 }
  0x43   : > { %p488_p11 = scmp.lt.s32.totalorder %s6234_s21, 15  ;;  %s6236_s23 = sshll.u32 %s493_s22, 3 }
  0x44   : > { %p495_p12 = scmp.lt.s32.totalorder %s6236_s23, 15  ;;  %s7708_s1 = scalar_lea.vmem [#allocation6], %s6232_s19 }
  0x45   : > { %s9737_s21 = smov (!%p488_p11, %s6234_s21), 15  ;;  %p6240_p13 = scmp.ne.s32.totalorder %s7640_s29, 0 }
  0x46   : > { %s9739_s23 = smov (!%p495_p12, %s6236_s23), 15  ;;  %s6235_s8 = sshll.u32 %s9737_s21, 1  ;;  %v7571_v16 = vmov (!%p6240_p13), 0.0  }
  0x47   : > { %s7691_s12 = scalar_lea.vmem %s9667_s6, %s9737_s21  ;;  %s7696_s26 = scalar_lea.vmem %s9663_s2, %s6235_s8  ;;  %518 = vst [vmem:[#allocation2] sm:$0x3] (!%p6240_p13), %v7571_v16  ;;  %519 = vst [vmem:[#allocation3] sm:$0x3] (!%p6240_p13), %v7571_v16 }
  0x48   : > { %s6237_s24 = sshll.u32 %s9739_s23, 1  ;;  %s7706_s0 = scalar_lea.vmem %s9668_s7, %s9739_s23  ;;  %520 = vst [vmem:[#allocation4] sm:$0x3] (!%p6240_p13), %v7571_v16  ;;  %521 = vst [vmem:[#allocation5] sm:$0x3] (!%p6240_p13), %v7571_v16 }
  0x49   : > { %s7701_s10 = scalar_lea.vmem %s9664_s3, %s6237_s24  ;;  %s7710_s21 = scalar_lea.vmem [#allocation7], %s6233_s20 }
  0x4a   : > { %517 = sbr.rel (%p6240_p13) target bundleno = 81 (0x51), region = 130 }
  0x51 PF: > { %v7716_v17 = vld [vmem:[%s9665_s4 + $0x4] ss:$16 sps:$4 sm:$0xff]   ;;  %v7721_v18 = vld [vmem:[%s9665_s4 + $0xc] ss:$16 sps:$4 sm:$0xff]   ;;  %v9669_v19 = vmov 0  }
  0x52   : > { %750 = vmatprep.mubr.bf16.mxu0 %v9669_v19  ;;  %791 = vmatprep.mubr.bf16.mxu1 %v9669_v19  ;;  %v7729_v20 = vld [vmem:[%s9665_s4] ss:$16 sps:$4 sm:$0xff]   ;;  %v7734_v21 = vld [vmem:[%s9665_s4 + $0x8] ss:$16 sps:$4 sm:$0xff]   ;;  %v7741_v22 = vld [vmem:[%s9665_s4 + $0x24] ss:$16 sps:$4 sm:$0xff]  }
  0x53   : > { %718 = vmatprep.subr.bf16.mxu0 %v7716_v17  ;;  %6889 = vset.pattern.permute.xlu0 %v9669_v19  ;;  %v7749_v23 = vld [vmem:[%s9665_s4 + $0x2c] ss:$16 sps:$4 sm:$0xff]   ;;  %v7754_v24 = vld [vmem:[%s9665_s4 + $0x20] ss:$16 sps:$4 sm:$0xff]   ;;  %v7760_v25 = vld [vmem:[%s9665_s4 + $0x28] ss:$16 sps:$4 sm:$0xff]  }
  0x54   : > { %759 = vmatprep.subr.bf16.mxu1 %v7721_v18  ;;  %6890 = vset.pattern.permute.xlu1 %v9669_v19  ;;  %v7766_v26 = vld [vmem:[%s9665_s4 + $0x44] ss:$16 sps:$4 sm:$0xff]   ;;  %v7771_v27 = vld [vmem:[%s9665_s4 + $0x4c] ss:$16 sps:$4 sm:$0xff]   ;;  %v7776_v28 = vld [vmem:[%s9665_s4 + $0x40] ss:$16 sps:$4 sm:$0xff]  }
  0x55   : > { %719 = vmatpush1.bf16.msra.mxu0 %v7729_v20  ;;  %760 = vmatpush1.bf16.msra.mxu1 %v7734_v21  ;;  %v7781_v29 = vld [vmem:[%s9665_s4 + $0x48] ss:$16 sps:$4 sm:$0xff]   ;;  %v7788_v30 = vld [vmem:[%s9665_s4 + $0x64] ss:$16 sps:$4 sm:$0xff]   ;;  %v7795_v31 = vld [vmem:[%s9665_s4 + $0x6c] ss:$16 sps:$4 sm:$0xff]  }
  0x56   : > { %720 = vmatprep.subr.bf16.mxu0 %v7741_v22  ;;  %761 = vmatprep.subr.bf16.mxu1 %v7749_v23  ;;  %v7800_v32 = vld [vmem:[%s9665_s4 + $0x60] ss:$16 sps:$4 sm:$0xff]   ;;  %v7807_v33 = vld [vmem:[%s9665_s4 + $0x68] ss:$16 sps:$4 sm:$0xff]   ;;  %v7812_v34 = vld [vmem:[%s9665_s4 + $0x84] ss:$16 sps:$4 sm:$0xff]  }
  0x57   : > { %v7819_v35 = vld [vmem:[%s9665_s4 + $0x8c] ss:$16 sps:$4 sm:$0xff]   ;;  %v7824_v36 = vld [vmem:[%s9665_s4 + $0x80] ss:$16 sps:$4 sm:$0xff]   ;;  %v7829_v37 = vld [vmem:[%s9665_s4 + $0x88] ss:$16 sps:$4 sm:$0xff]  }
  0x58   : > { %v7836_v38 = vld [vmem:[%s9665_s4 + $0xa4] ss:$16 sps:$4 sm:$0xff]   ;;  %v7843_v39 = vld [vmem:[%s9665_s4 + $0xac] ss:$16 sps:$4 sm:$0xff]   ;;  %v7850_v40 = vld [vmem:[%s9665_s4 + $0xa0] ss:$16 sps:$4 sm:$0xff]  }
  0x59   : > { %721 = vmatpush1.bf16.msra.mxu0 %v7754_v24  ;;  %762 = vmatpush1.bf16.msra.mxu1 %v7760_v25  ;;  %v7855_v41 = vld [vmem:[%s9665_s4 + $0xa8] ss:$16 sps:$4 sm:$0xff]   ;;  %v7862_v42 = vld [vmem:[%s9665_s4 + $0xc4] ss:$16 sps:$4 sm:$0xff]   ;;  %v7867_v43 = vld [vmem:[%s9665_s4 + $0xcc] ss:$16 sps:$4 sm:$0xff]  }
  0x5a   : > { %722 = vmatprep.subr.bf16.mxu0 %v7766_v26  ;;  %763 = vmatprep.subr.bf16.mxu1 %v7771_v27  ;;  %v7872_v44 = vld [vmem:[%s9665_s4 + $0xc0] ss:$16 sps:$4 sm:$0xff]   ;;  %v7879_v45 = vld [vmem:[%s9665_s4 + $0xc8] ss:$16 sps:$4 sm:$0xff]   ;;  %v7886_v46 = vld [vmem:[%s9665_s4 + $0xe4] ss:$16 sps:$4 sm:$0xff]  }
  0x5b   : > { %v7891_v47 = vld [vmem:[%s9665_s4 + $0xec] ss:$16 sps:$4 sm:$0xff]   ;;  %v7896_v48 = vld [vmem:[%s9665_s4 + $0xe0] ss:$16 sps:$4 sm:$0xff]   ;;  %v7901_v49 = vld [vmem:[%s9665_s4 + $0xe8] ss:$16 sps:$4 sm:$0xff]  }
  0x5c   : > { %v524_v50 = vld [vmem:[#allocation2] sm:$0x3]  ;;  %v7910_v51 = vld [vmem:[%s9666_s5 + $0x4] ss:$16 sps:$4 sm:$0xff]   ;;  %v7915_v52 = vld [vmem:[%s9666_s5 + $0xc] ss:$16 sps:$4 sm:$0xff]  }
  0x5d   : > { %723 = vmatpush1.bf16.msra.mxu0 %v7776_v28  ;;  %764 = vmatpush1.bf16.msra.mxu1 %v7781_v29  ;;  %v525_v53 = vpack.c.bf16 %v524_v50, %v524_v50  ;;  %v7920_v54 = vld [vmem:[%s9666_s5] ss:$16 sps:$4 sm:$0xff]   ;;  %v7927_v55 = vld [vmem:[%s9666_s5 + $0x8] ss:$16 sps:$4 sm:$0xff]   ;;  %v7934_v56 = vld [vmem:[%s9666_s5 + $0x24] ss:$16 sps:$4 sm:$0xff]  }
  0x5e   : > { %724 = vmatprep.subr.bf16.mxu0 %v7788_v30  ;;  %765 = vmatprep.subr.bf16.mxu1 %v7795_v31  ;;  %v7939_v57 = vld [vmem:[%s9666_s5 + $0x2c] ss:$16 sps:$4 sm:$0xff]   ;;  %v7944_v58 = vld [vmem:[%s9666_s5 + $0x20] ss:$16 sps:$4 sm:$0xff]   ;;  %v7951_v59 = vld [vmem:[%s9666_s5 + $0x28] ss:$16 sps:$4 sm:$0xff]  }
  0x5f   : > { %v7958_v60 = vld [vmem:[%s9666_s5 + $0x44] ss:$16 sps:$4 sm:$0xff]   ;;  %v7963_v61 = vld [vmem:[%s9666_s5 + $0x4c] ss:$16 sps:$4 sm:$0xff]   ;;  %v7970_v62 = vld [vmem:[%s9666_s5 + $0x40] ss:$16 sps:$4 sm:$0xff]  }
  0x60   : > { %v7977_v63 = vld [vmem:[%s9666_s5 + $0x48] ss:$16 sps:$4 sm:$0xff]   ;;  %v7984_v0 = vld [vmem:[%s9666_s5 + $0x64] ss:$16 sps:$4 sm:$0xff]   ;;  %v7989_v1 = vld [vmem:[%s9666_s5 + $0x6c] ss:$16 sps:$4 sm:$0xff]  }
  0x61   : > { %725 = vmatpush1.bf16.msra.mxu0 %v7800_v32  ;;  %766 = vmatpush1.bf16.msra.mxu1 %v7807_v33  ;;  %v1189_v2 = vld [vmem:[%s7696_s26] sm:$0x3]  ;;  %v8002_v4 = vld [vmem:[%s9666_s5 + $0x68] ss:$16 sps:$4 sm:$0xff]   ;;  %v8009_v5 = vld [vmem:[%s9666_s5 + $0x84] ss:$16 sps:$4 sm:$0xff]  }
  0x62   : > { %726 = vmatprep.subr.bf16.mxu0 %v7812_v34  ;;  %767 = vmatprep.subr.bf16.mxu1 %v7819_v35  ;;  %v7997_v3 = vld [vmem:[%s9666_s5 + $0x60] ss:$16 sps:$4 sm:$0xff]   ;;  %v8014_v6 = vld [vmem:[%s9666_s5 + $0x8c] ss:$16 sps:$4 sm:$0xff]   ;;  %v8025_v9 = vld [vmem:[%s9666_s5 + $0x88] ss:$16 sps:$4 sm:$0xff]  }
  0x63   : > { %v6312_v7 = vld [vmem:[%s7701_s10 + $0xe] sm:$0x3]  ;;  %v8020_v8 = vld [vmem:[%s9666_s5 + $0x80] ss:$16 sps:$4 sm:$0xff]   ;;  %9694 = vst [vmem:[#allocation8_spill] sm:$0xff] %v8025_v9  ;;  %1194 = vperm.xlu0 %6889, %v1189_v2  }
  0x64   : > { %v8030_v10 = vld [vmem:[%s9666_s5 + $0xa4] ss:$16 sps:$4 sm:$0xff]   ;;  %v8035_v11 = vld [vmem:[%s9666_s5 + $0xac] ss:$16 sps:$4 sm:$0xff]   ;;  %v8045_v13 = vld [vmem:[%s9666_s5 + $0xa0] ss:$16 sps:$4 sm:$0xff]  }
  0x65   : > { %727 = vmatpush1.bf16.msra.mxu0 %v7824_v36  ;;  %768 = vmatpush1.bf16.msra.mxu1 %v7829_v37  ;;  %9695 = vst [vmem:[#allocation9_spill] sm:$0xff] %v8030_v10  ;;  %9696 = vst [vmem:[#allocation10_spill] sm:$0xff] %v8035_v11  ;;  %v6462_v12 = vld [vmem:[%s7696_s26 + $0x4] sm:$0x3]  ;;  %v8050_v14 = vld [vmem:[%s9666_s5 + $0xa8] ss:$16 sps:$4 sm:$0xff]  }
  0x66   : > { %728 = vmatprep.subr.bf16.mxu0 %v7836_v38  ;;  %769 = vmatprep.subr.bf16.mxu1 %v7843_v39  ;;  %9697 = vst [vmem:[#allocation11_spill] sm:$0xff] %v8050_v14  ;;  %v8055_v15 = vld [vmem:[%s9666_s5 + $0xc4] ss:$16 sps:$4 sm:$0xff]   ;;  %v8060_v16 = vld [vmem:[%s9666_s5 + $0xcc] ss:$16 sps:$4 sm:$0xff]  }
  0x67   : > { %1200 = vperm.xlu0 %6889, %v6312_v7   ;;  %9698 = vst [vmem:[#allocation12_spill] sm:$0xff] %v8055_v15  ;;  %9699 = vst [vmem:[#allocation13_spill] sm:$0xff] %v8060_v16  ;;  %v6538_v50 = vld [vmem:[%s7696_s26 + $0x6] sm:$0x3]  ;;  %v8075_v2 = vld [vmem:[%s9666_s5 + $0xc8] ss:$16 sps:$4 sm:$0xff]  }
  0x68   : > { %v8080_v7 = vld [vmem:[%s9666_s5 + $0xe4] ss:$16 sps:$4 sm:$0xff]  }
  0x69   : > { %729 = vmatpush1.bf16.msra.mxu0 %v7850_v40  ;;  %770 = vmatpush1.bf16.msra.mxu1 %v7855_v41 }
  0x6a   : > { %730 = vmatprep.subr.bf16.mxu0 %v7862_v42  ;;  %771 = vmatprep.subr.bf16.mxu1 %v7867_v43 }
  0x6b   : > { %2585 = vperm.xlu0 %6889, %v6462_v12   ;;  %v6614_v12 = vld [vmem:[%s7696_s26 + $0x8] sm:$0x3] }
  0x6d   : > { %731 = vmatpush1.bf16.msra.mxu0 %v7872_v44  ;;  %772 = vmatpush1.bf16.msra.mxu1 %v7879_v45 }
  0x6e   : > { %732 = vmatprep.subr.bf16.mxu0 %v7886_v46  ;;  %773 = vmatprep.subr.bf16.mxu1 %v7891_v47 }
  0x6f   : > { %3281 = vperm.xlu0 %6889, %v6538_v50   ;;  %v6841_v50 = vld [vmem:[%s7696_s26 + $0xe] sm:$0x3] }
  0x71   : > { %733 = vmatpush1.bf16.msra.mxu0 %v7896_v48  ;;  %774 = vmatpush1.bf16.msra.mxu1 %v7901_v49 }
  0x72   : > { %1020 = vmatprep.subr.bf16.mxu0 %v7910_v51  ;;  %1061 = vmatprep.subr.bf16.mxu1 %v7915_v52 }
  0x73   : > { %3977 = vperm.xlu0 %6889, %v6614_v12  }
  0x74   : > { %751 = vmatmul.mubr.bf16.vlgmr.msra.gmra.mrb[0].mxu0 %v525_v53  ;;  %792 = vmatmul.mubr.bf16.vlgmr.msra.gmra.mrb[0].mxu1 %v525_v53  ;;  %v8070_v53 = vld [vmem:[%s9666_s5 + $0xc0] ss:$16 sps:$4 sm:$0xff]  }
  0x75   : > { %1021 = vmatpush1.bf16.msra.mxu0 %v7920_v54  ;;  %1062 = vmatpush1.bf16.msra.mxu1 %v7927_v55 }
  0x76   : > { %1022 = vmatprep.subr.bf16.mxu0 %v7934_v56  ;;  %1063 = vmatprep.subr.bf16.mxu1 %v7939_v57 }
  0x77   : > { %1052 = vmatprep.mubr.bf16.mxu0 %v9669_v19  ;;  %1093 = vmatprep.mubr.bf16.mxu1 %v9669_v19  ;;  %v8085_v19 = vld [vmem:[%s9666_s5 + $0xec] ss:$16 sps:$4 sm:$0xff]  }
  0x79   : > { %1023 = vmatpush1.bf16.msra.mxu0 %v7944_v58  ;;  %1064 = vmatpush1.bf16.msra.mxu1 %v7951_v59 }
  0x7a   : > { %1024 = vmatprep.subr.bf16.mxu0 %v7958_v60  ;;  %1065 = vmatprep.subr.bf16.mxu1 %v7963_v61 }
  0x7d   : > { %1025 = vmatpush1.bf16.msra.mxu0 %v7970_v62  ;;  %1066 = vmatpush1.bf16.msra.mxu1 %v7977_v63 }
  0x7e   : > { %1026 = vmatprep.subr.bf16.mxu0 %v7984_v0  ;;  %1067 = vmatprep.subr.bf16.mxu1 %v7989_v1 }
  0x81   : > { %1027 = vmatpush1.bf16.msra.mxu0 %v7997_v3  ;;  %1068 = vmatpush1.bf16.msra.mxu1 %v8002_v4 }
  0x82   : > { %1028 = vmatprep.subr.bf16.mxu0 %v8009_v5  ;;  %1069 = vmatprep.subr.bf16.mxu1 %v8014_v6 }
  0x85   : > { %1029 = vmatpush1.bf16.msra.mxu0 %v8020_v8  ;;  %1070 = vmatpush1.bf16.msra.mxu1 %v8025_v9  ;;  %v826_v9 = vld [vmem:[#allocation4] sm:$0x3] }
  0x86   : > { %1030 = vmatprep.subr.bf16.mxu0 %v8030_v10  ;;  %1071 = vmatprep.subr.bf16.mxu1 %v8035_v11  ;;  %v8095_v11 = vld [vmem:[%s9666_s5 + $0xe0] ss:$16 sps:$4 sm:$0xff]   ;;  %v8100_v10 = vld [vmem:[%s9666_s5 + $0xe8] ss:$16 sps:$4 sm:$0xff]  }
  0x89   : > { %1031 = vmatpush1.bf16.msra.mxu0 %v8045_v13  ;;  %1072 = vmatpush1.bf16.msra.mxu1 %v8050_v14  ;;  %v6766_v14 = vld [vmem:[%s7696_s26 + $0xc] sm:$0x3] }
  0x8a   : > { %1032 = vmatprep.subr.bf16.mxu0 %v8055_v15  ;;  %1073 = vmatprep.subr.bf16.mxu1 %v8060_v16  ;;  %v6690_v16 = vld [vmem:[%s7696_s26 + $0xa] sm:$0x3]  ;;  %v827_v15 = vpack.c.bf16 %v826_v9, %v826_v9  ;;  %v9700_v9 = vmov 0  }
  0x8b   : > { %4673 = vperm.xlu0 %6889, %v6690_v16  }
  0x8d   : > { %1033 = vmatpush1.bf16.msra.mxu0 %v8070_v53  ;;  %1074 = vmatpush1.bf16.msra.mxu1 %v8075_v2 }
  0x8e   : > { %1034 = vmatprep.subr.bf16.mxu0 %v8080_v7  ;;  %1075 = vmatprep.subr.bf16.mxu1 %v8085_v19 }
  0x8f   : > { %5369 = vperm.xlu0 %6889, %v6766_v14  }
  0x91   : > { %1035 = vmatpush1.bf16.msra.mxu0 %v8095_v11  ;;  %1076 = vmatpush1.bf16.msra.mxu1 %v8100_v10 }
  0x92   : > { %1412 = vmatprep.subr.bf16.mxu0 %v7716_v17  ;;  %1453 = vmatprep.subr.bf16.mxu1 %v7721_v18  ;;  %v6386_v17 = vld [vmem:[%s7696_s26 + $0x2] sm:$0x3]  ;;  %v6387_v18 = vld [vmem:[%s7701_s10 + $0xc] sm:$0x3] }
  0x93   : > { %6063 = vperm.xlu0 %6889, %v6841_v50   ;;  %1889 = vperm.xlu1 %6890, %v6386_v17  }
  0x94   : > { %1053 = vmatmul.mubr.bf16.vlgmr.msra.gmra.mrb[4].mxu0 %v827_v15  ;;  %1094 = vmatmul.mubr.bf16.vlgmr.msra.gmra.mrb[4].mxu1 %v827_v15 }
  0x95   : > { %1413 = vmatpush1.bf16.msra.mxu0 %v7729_v20  ;;  %1454 = vmatpush1.bf16.msra.mxu1 %v7734_v21  ;;  %v6463_v20 = vld [vmem:[%s7701_s10 + $0xa] sm:$0x3]  ;;  %v6539_v21 = vld [vmem:[%s7701_s10 + $0x8] sm:$0x3] }
  0x96   : > { %1414 = vmatprep.subr.bf16.mxu0 %v7741_v22  ;;  %1455 = vmatprep.subr.bf16.mxu1 %v7749_v23  ;;  %v6615_v22 = vld [vmem:[%s7701_s10 + $0x6] sm:$0x3]  ;;  %v6691_v23 = vld [vmem:[%s7701_s10 + $0x4] sm:$0x3] }
  0x97   : > { %1444 = vmatprep.mubr.bf16.mxu0 %v9700_v9  ;;  %1485 = vmatprep.mubr.bf16.mxu1 %v9700_v9 }
  0x98   : > { %1895 = vperm.xlu1 %6890, %v6387_v18  }
  0x99   : > { %1415 = vmatpush1.bf16.msra.mxu0 %v7754_v24  ;;  %1456 = vmatpush1.bf16.msra.mxu1 %v7760_v25  ;;  %v7573_v24 = vmov 1983009808  }
  0x9a   : > { %1416 = vmatprep.subr.bf16.mxu0 %v7766_v26  ;;  %1457 = vmatprep.subr.bf16.mxu1 %v7771_v27  ;;  %v807_v25 = vunpack.c.l.s4 %v7573_v24  ;;  %v809_v26 = vlaneseq  ;;  %v6767_v27 = vld [vmem:[%s7701_s10 + $0x2] sm:$0x3] }
  0x9c   : > { %2591 = vperm.xlu1 %6890, %v6463_v20  }
  0x9d   : > { %1417 = vmatpush1.bf16.msra.mxu0 %v7776_v28  ;;  %1458 = vmatpush1.bf16.msra.mxu1 %v7781_v29  ;;  %v808_v28 = vunpack.c.0.s8 %v807_v25  ;;  %v810_v29 = vshrl.u32 %v809_v26, 7 }
  0x9e   : > { %1418 = vmatprep.subr.bf16.mxu0 %v7788_v30  ;;  %1459 = vmatprep.subr.bf16.mxu1 %v7795_v31  ;;  %v6060_v30 = vld [vmem:[%s7701_s10] sm:$0x3] }
  0xa0   : > { %3287 = vperm.xlu1 %6890, %v6539_v21  }
  0xa1   : > { %1419 = vmatpush1.bf16.msra.mxu0 %v7800_v32  ;;  %1460 = vmatpush1.bf16.msra.mxu1 %v7807_v33  ;;  %v8155_v33 = vsub.s32 %v808_v28, %v810_v29 }
  0xa2   : > { %1420 = vmatprep.subr.bf16.mxu0 %v7812_v34  ;;  %1461 = vmatprep.subr.bf16.mxu1 %v7819_v35  ;;  %v8158_v35 = vld [vmem:[%s7708_s1] sm:$0xff]  }
  0xa4   : > { %3983 = vperm.xlu1 %6890, %v6615_v22   ;;  %v8164_v22 = vld [vmem:[%s7710_s21 + $0x18] sm:$0xff]  }
  0xa5   : > { %1421 = vmatpush1.bf16.msra.mxu0 %v7824_v36  ;;  %1462 = vmatpush1.bf16.msra.mxu1 %v7829_v37 }
  0xa6   : > { %1422 = vmatprep.subr.bf16.mxu0 %v7836_v38  ;;  %1463 = vmatprep.subr.bf16.mxu1 %v7843_v39 }
  0xa8   : > { %4679 = vperm.xlu1 %6890, %v6691_v23  }
  0xa9   : > { %1423 = vmatpush1.bf16.msra.mxu0 %v7850_v40  ;;  %1464 = vmatpush1.bf16.msra.mxu1 %v7855_v41 }
  0xaa   : > { %1424 = vmatprep.subr.bf16.mxu0 %v7862_v42  ;;  %1465 = vmatprep.subr.bf16.mxu1 %v7867_v43 }
  0xac   : > { %5375 = vperm.xlu1 %6890, %v6767_v27  }
  0xad   : > { %1425 = vmatpush1.bf16.msra.mxu0 %v7872_v44  ;;  %1466 = vmatpush1.bf16.msra.mxu1 %v7879_v45  ;;  %v523_v44 = vunpack.c.l.bf16 %v8158_v35 }
  0xae   : > { %1426 = vmatprep.subr.bf16.mxu0 %v7886_v46  ;;  %1467 = vmatprep.subr.bf16.mxu1 %v7891_v47 }
  0xb0   : > { %6069 = vperm.xlu1 %6890, %v6060_v30   ;;  %v1125_v30 = vld [vmem:[#allocation3] sm:$0x3] }
  0xb1   : > { %1427 = vmatpush1.bf16.msra.mxu0 %v7896_v48  ;;  %1468 = vmatpush1.bf16.msra.mxu1 %v7901_v49 }
  0xb2   : > { %1714 = vmatprep.subr.bf16.mxu0 %v7910_v51  ;;  %1755 = vmatprep.subr.bf16.mxu1 %v7915_v52 }
 0x147   : > { %v752_v31 = vpop.f32.mrb[0].mxu0  ;;  %v793_v32 = vpop.f32.mrb[0].mxu1 }
 0x148   : > { %v754_v34 = vpop.f32.mrb[1].mxu0  ;;  %v795_v36 = vpop.f32.mrb[1].mxu1 }
 0x149   : > { %v804_v37 = vcombine.low %v752_v31, %v754_v34  ;;  %v805_v38 = vcombine.low %v793_v32, %v795_v36  ;;  %v756_v39 = vpop.f32.mrb[2].mxu0  ;;  %v797_v40 = vpop.f32.mrb[2].mxu1 }
 0x14a   : > { %v757_v41 = vpop.f32.mrb[3].mxu0  ;;  %v798_v42 = vpop.f32.mrb[3].mxu1 }
 0x14b   : > { %v812_v43 = vrot.slane %v804_v37, %v8155_v33  ;;  %v819_v45 = vrot.slane %v805_v38, %v8155_v33  ;;  %v825_v37 = vunpack.c.h.bf16 %v8164_v22 }
 0x14d   : > { %v820_v46 = vcombine.low %v812_v43, %v819_v45 }
 0x14f   : > { %v822_v47 = vadd.f32 %v820_v46, %v523_v44  ;;  %v1195_v46 = vpop.permute.xlu0 %1194 }
 0x151   : > { %v6306_v48 = vmul.f32 -1.442695, %v822_v47  ;;  %v1133_v49 = vrot.slane %v822_v47, 2  ;;  %v1144_v52 = vrot.slane %v822_v47, 6  ;;  %v1141_v16 = vrot.slane %v822_v47, 4 }
 0x153   : > { %7275 = vpow2.f32 %v6306_v48  ;;  %v6307_v51 = vmul.f32 -1.442695, %v1133_v49  ;;  %v6308_v14 = vmul.f32 -1.442695, %v1144_v52 }
 0x155   : > { %7277 = vpow2.f32 %v6307_v51 }
 0x156   : > { %7279 = vpow2.f32 %v6308_v14 }
 0x15d   : > { %v7276_v15 = vpop.eup %7275 }
 0x15e   : > { %v1129_v12 = vadd.f32 1.0, %v7276_v15 }
 0x15f   : > { %v7278_v50 = vpop.eup %7277 }
 0x160   : > { %7281 = vrcp.f32 %v1129_v12  ;;  %v1138_v17 = vadd.f32 1.0, %v7278_v50  ;;  %v7280_v24 = vpop.eup %7279 }
 0x161   : > { %7283 = vtanh.f32 %v1141_v16  ;;  %v1149_v40 = vadd.f32 1.0, %v7280_v24 }
 0x162   : > { %7285 = vrcp.f32 %v1138_v17 }
 0x163   : > { %7287 = vrcp.f32 %v1149_v40  ;;  %v8271_v40 = vld [vmem:[%s9665_s4 + $0x48] ss:$16 sps:$4 sm:$0xff]  }
 0x167   : > { %v1054_v18 = vpop.f32.mrb[4].mxu0  ;;  %v1095_v20 = vpop.f32.mrb[4].mxu1 }
 0x168   : > { %v1056_v21 = vpop.f32.mrb[5].mxu0  ;;  %v1097_v23 = vpop.f32.mrb[5].mxu1 }
 0x169   : > { %v1106_v25 = vcombine.low %v1054_v18, %v1056_v21  ;;  %v1107_v26 = vcombine.low %v1095_v20, %v1097_v23  ;;  %v1058_v27 = vpop.f32.mrb[6].mxu0  ;;  %v1099_v28 = vpop.f32.mrb[6].mxu1 }
 0x16a   : > { %v7282_v29 = vpop.eup %7281  ;;  %v1059_v31 = vpop.f32.mrb[7].mxu0 }
 0x16b   : > { %v1100_v32 = vpop.f32.mrb[7].mxu1  ;;  %v7284_v34 = vpop.eup %7283  ;;  %v1114_v36 = vrot.slane %v1106_v25, %v8155_v33  ;;  %v1121_v38 = vrot.slane %v1107_v26, %v8155_v33 }
 0x16c   : > { %v7286_v39 = vpop.eup %7285  ;;  %v1153_v42 = vmul.f32 %v7284_v34, %v7282_v29  ;;  %v1157_v29 = vld [vmem:[#allocation5] sm:$0x3] }
 0x16d   : > { %v1152_v41 = vmul.f32 %v7286_v39, %v1125_v30  ;;  %v1122_v43 = vcombine.low %v1114_v36, %v1121_v38  ;;  %v7288_v14 = vpop.eup %7287  ;;  %v8261_v38 = vld [vmem:[%s9665_s4 + $0x4c] ss:$16 sps:$4 sm:$0xff]   ;;  %v8266_v39 = vld [vmem:[%s9665_s4 + $0x40] ss:$16 sps:$4 sm:$0xff]  }
 0x16f   : > { %v1154_v44 = vadd.f32 %v1153_v42, %v1152_v41  ;;  %v1124_v45 = vadd.f32 %v1122_v43, %v825_v37  ;;  %v8280_v41 = vld [vmem:[%s9665_s4 + $0x64] ss:$16 sps:$4 sm:$0xff]   ;;  %v8285_v42 = vld [vmem:[%s9665_s4 + $0x6c] ss:$16 sps:$4 sm:$0xff]   ;;  %v8290_v43 = vld [vmem:[%s9665_s4 + $0x60] ss:$16 sps:$4 sm:$0xff]  }
 0x171   : > { %7289 = vtanh.f32 %v1154_v44  ;;  %v1204_v47 = vmul.f32 %v1195_v46, %v1154_v44  ;;  %v6309_v48 = vmul.f32 -1.442695, %v1124_v45  ;;  %v1165_v49 = vrot.slane %v1124_v45, 2  ;;  %v8295_v44 = vld [vmem:[%s9665_s4 + $0x68] ss:$16 sps:$4 sm:$0xff]  }
 0x172   : > { %v1176_v52 = vrot.slane %v1124_v45, 6  ;;  %v1173_v17 = vrot.slane %v1124_v45, 4  ;;  %v8304_v45 = vld [vmem:[%s9665_s4 + $0x84] ss:$16 sps:$4 sm:$0xff]  }
 0x173   : > { %1205 = vst [vmem:[#allocation3] sm:$0x3] %v1204_v47  ;;  %7291 = vpow2.f32 %v6309_v48  ;;  %v6310_v51 = vmul.f32 -1.442695, %v1165_v49  ;;  %v8314_v47 = vld [vmem:[%s9665_s4 + $0x80] ss:$16 sps:$4 sm:$0xff]  }
 0x174   : > { %v6311_v16 = vmul.f32 -1.442695, %v1176_v52  ;;  %v8319_v48 = vld [vmem:[%s9665_s4 + $0x88] ss:$16 sps:$4 sm:$0xff]   ;;  %v8328_v49 = vld [vmem:[%s9665_s4 + $0xa4] ss:$16 sps:$4 sm:$0xff]  }
 0x175   : > { %7293 = vpow2.f32 %v6310_v51  ;;  %v8333_v51 = vld [vmem:[%s9665_s4 + $0xac] ss:$16 sps:$4 sm:$0xff]   ;;  %v8338_v52 = vld [vmem:[%s9665_s4 + $0xa0] ss:$16 sps:$4 sm:$0xff]  }
 0x176   : > { %7295 = vpow2.f32 %v6311_v16  ;;  %v8357_v16 = vld [vmem:[%s9665_s4 + $0xcc] ss:$16 sps:$4 sm:$0xff]  }
 0x17b   : > { %v7290_v15 = vpop.eup %7289 }
 0x17c   : > { %v1156_v12 = vmul.f32 %v7290_v15, %v7288_v14  ;;  %v8343_v14 = vld [vmem:[%s9665_s4 + $0xa8] ss:$16 sps:$4 sm:$0xff]   ;;  %v8352_v15 = vld [vmem:[%s9665_s4 + $0xc4] ss:$16 sps:$4 sm:$0xff]  }
 0x17d   : > { %v7292_v50 = vpop.eup %7291 }
 0x17e   : > { %v1197_v18 = vmul.f32 %v1195_v46, %v1156_v12  ;;  %v1161_v20 = vadd.f32 1.0, %v7292_v50  ;;  %v8309_v46 = vld [vmem:[%s9665_s4 + $0x8c] ss:$16 sps:$4 sm:$0xff]   ;;  %v8362_v12 = vld [vmem:[%s9665_s4 + $0xc0] ss:$16 sps:$4 sm:$0xff]  }
 0x17f   : > { %v7294_v21 = vpop.eup %7293  ;;  %v8367_v50 = vld [vmem:[%s9665_s4 + $0xc8] ss:$16 sps:$4 sm:$0xff]  }
 0x180   : > { %1206 = vst [vmem:[#allocation2] sm:$0x3] %v1197_v18  ;;  %v1210_v23 = vpack.c.bf16 %v1197_v18, %v1197_v18  ;;  %7297 = vrcp.f32 %v1161_v20  ;;  %v1170_v24 = vadd.f32 1.0, %v7294_v21  ;;  %v7296_v27 = vpop.eup %7295  ;;  %v8381_v18 = vld [vmem:[%s9665_s4 + $0xec] ss:$16 sps:$4 sm:$0xff]  }
 0x181   : > { %7299 = vtanh.f32 %v1173_v17  ;;  %v1181_v32 = vadd.f32 1.0, %v7296_v27  ;;  %v8376_v17 = vld [vmem:[%s9665_s4 + $0xe4] ss:$16 sps:$4 sm:$0xff]   ;;  %v8386_v20 = vld [vmem:[%s9665_s4 + $0xe0] ss:$16 sps:$4 sm:$0xff]  }
 0x182   : > { %1211 = vst [vmem:[%s7691_s12] sm:$0x1] %v1210_v23  ;;  %7301 = vrcp.f32 %v1170_v24  ;;  %v8391_v21 = vld [vmem:[%s9665_s4 + $0xe8] ss:$16 sps:$4 sm:$0xff]   ;;  %v8400_v23 = vld [vmem:[%s9666_s5 + $0x4] ss:$16 sps:$4 sm:$0xff]  }
 0x183   : > { %7303 = vrcp.f32 %v1181_v32  ;;  %v8405_v24 = vld [vmem:[%s9666_s5 + $0xc] ss:$16 sps:$4 sm:$0xff]  }
 0x187   : > { %v1218_v25 = vld [vmem:[#allocation2] sm:$0x3] }
 0x188   : > { %v1219_v26 = vpack.c.bf16 %v1218_v25, %v1218_v25 }
 0x18a   : > { %v7298_v28 = vpop.eup %7297  ;;  %1445 = vmatmul.mubr.bf16.vlgmr.msra.gmra.mrb[8].mxu0 %v1219_v26  ;;  %1486 = vmatmul.mubr.bf16.vlgmr.msra.gmra.mrb[8].mxu1 %v1219_v26 }
 0x18b   : > { %v7300_v30 = vpop.eup %7299  ;;  %1715 = vmatpush1.bf16.msra.mxu0 %v7920_v54  ;;  %1756 = vmatpush1.bf16.msra.mxu1 %v7927_v55  ;;  %v1201_v54 = vpop.permute.xlu0 %1200 }
 0x18c   : > { %v7302_v31 = vpop.eup %7301  ;;  %1716 = vmatprep.subr.bf16.mxu0 %v7934_v56  ;;  %1757 = vmatprep.subr.bf16.mxu1 %v7939_v57  ;;  %v1185_v36 = vmul.f32 %v7300_v30, %v7298_v28 }
 0x18d   : > { %v1184_v34 = vmul.f32 %v7302_v31, %v1157_v29  ;;  %1746 = vmatprep.mubr.bf16.mxu0 %v9700_v9  ;;  %1787 = vmatprep.mubr.bf16.mxu1 %v9700_v9  ;;  %v7304_v56 = vpop.eup %7303 }
 0x18f   : > { %v1186_v37 = vadd.f32 %v1185_v36, %v1184_v34  ;;  %1717 = vmatpush1.bf16.msra.mxu0 %v7944_v58  ;;  %1758 = vmatpush1.bf16.msra.mxu1 %v7951_v59  ;;  %v9701_v58 = vld [vmem:[#allocation8_spill] sm:$0xff] }
 0x190   : > { %1718 = vmatprep.subr.bf16.mxu0 %v7958_v60  ;;  %1759 = vmatprep.subr.bf16.mxu1 %v7963_v61  ;;  %v9702_v60 = vld [vmem:[#allocation9_spill] sm:$0xff]  ;;  %v9703_v61 = vld [vmem:[#allocation10_spill] sm:$0xff] }
 0x191   : > { %7305 = vtanh.f32 %v1186_v37  ;;  %v1207_v55 = vmul.f32 %v1201_v54, %v1186_v37 }
 0x193   : > { %1208 = vst [vmem:[#allocation5] sm:$0x3] %v1207_v55  ;;  %1719 = vmatpush1.bf16.msra.mxu0 %v7970_v62  ;;  %1760 = vmatpush1.bf16.msra.mxu1 %v7977_v63  ;;  %v9704_v63 = vld [vmem:[#allocation11_spill] sm:$0xff] }
 0x194   : > { %1720 = vmatprep.subr.bf16.mxu0 %v7984_v0  ;;  %1761 = vmatprep.subr.bf16.mxu1 %v7989_v1  ;;  %v9705_v1 = vld [vmem:[#allocation12_spill] sm:$0xff] }
 0x197   : > { %1721 = vmatpush1.bf16.msra.mxu0 %v7997_v3  ;;  %1762 = vmatpush1.bf16.msra.mxu1 %v8002_v4  ;;  %v9706_v3 = vld [vmem:[#allocation13_spill] sm:$0xff] }
 0x198   : > { %1722 = vmatprep.subr.bf16.mxu0 %v8009_v5  ;;  %1763 = vmatprep.subr.bf16.mxu1 %v8014_v6  ;;  %v8208_v6 = vld [vmem:[%s9665_s4 + $0x4] ss:$16 sps:$4 sm:$0xff]  }
 0x19b   : > { %v7306_v57 = vpop.eup %7305  ;;  %1723 = vmatpush1.bf16.msra.mxu0 %v8020_v8  ;;  %1764 = vmatpush1.bf16.msra.mxu1 %v9701_v58  ;;  %v8218_v8 = vld [vmem:[%s9665_s4] ss:$16 sps:$4 sm:$0xff]  }
 0x19c   : > { %v1188_v59 = vmul.f32 %v7306_v57, %v7304_v56  ;;  %1724 = vmatprep.subr.bf16.mxu0 %v9702_v60  ;;  %1765 = vmatprep.subr.bf16.mxu1 %v9703_v61 }
 0x19e   : > { %v1203_v62 = vmul.f32 %v1201_v54, %v1188_v59  ;;  %v1217_v54 = vunpack.c.h.bf16 %v8158_v35 }
 0x19f   : > { %1725 = vmatpush1.bf16.msra.mxu0 %v8045_v13  ;;  %1766 = vmatpush1.bf16.msra.mxu1 %v9704_v63  ;;  %v8237_v13 = vld [vmem:[%s9665_s4 + $0x2c] ss:$16 sps:$4 sm:$0xff]  }
 0x1a0   : > { %1209 = vst [vmem:[#allocation4] sm:$0x3] %v1203_v62  ;;  %v1212_v0 = vpack.c.bf16 %v1203_v62, %v1203_v62  ;;  %1726 = vmatprep.subr.bf16.mxu0 %v9705_v1  ;;  %1767 = vmatprep.subr.bf16.mxu1 %v9706_v3 }
 0x1a2   : > { %6313 = vst [vmem:[%s7706_s0 + $0x7] sm:$0x1] %v1212_v0 }
 0x1a3   : > { %1727 = vmatpush1.bf16.msra.mxu0 %v8070_v53  ;;  %1768 = vmatpush1.bf16.msra.mxu1 %v8075_v2  ;;  %v8242_v53 = vld [vmem:[%s9665_s4 + $0x20] ss:$16 sps:$4 sm:$0xff]   ;;  %v8247_v2 = vld [vmem:[%s9665_s4 + $0x28] ss:$16 sps:$4 sm:$0xff]  }
 0x1a4   : > { %1728 = vmatprep.subr.bf16.mxu0 %v8080_v7  ;;  %1769 = vmatprep.subr.bf16.mxu1 %v8085_v19  ;;  %v8213_v19 = vld [vmem:[%s9665_s4 + $0xc] ss:$16 sps:$4 sm:$0xff]   ;;  %v8256_v7 = vld [vmem:[%s9665_s4 + $0x44] ss:$16 sps:$4 sm:$0xff]  }
 0x1a7   : > { %1729 = vmatpush1.bf16.msra.mxu0 %v8095_v11  ;;  %1770 = vmatpush1.bf16.msra.mxu1 %v8100_v10  ;;  %v1520_v4 = vld [vmem:[#allocation4] sm:$0x3]  ;;  %v8223_v10 = vld [vmem:[%s9665_s4 + $0x8] ss:$16 sps:$4 sm:$0xff]  }
 0x1a8   : > { %v1521_v5 = vpack.c.bf16 %v1520_v4, %v1520_v4  ;;  %2108 = vmatprep.subr.bf16.mxu0 %v8208_v6  ;;  %2149 = vmatprep.subr.bf16.mxu1 %v8213_v19  ;;  %v8232_v11 = vld [vmem:[%s9665_s4 + $0x24] ss:$16 sps:$4 sm:$0xff]  }
 0x1aa   : > { %1747 = vmatmul.mubr.bf16.vlgmr.msra.gmra.mrb[12].mxu0 %v1521_v5  ;;  %1788 = vmatmul.mubr.bf16.vlgmr.msra.gmra.mrb[12].mxu1 %v1521_v5 }
 0x1ab   : > { %2140 = vmatprep.mubr.bf16.mxu0 %v9700_v9  ;;  %2181 = vmatprep.mubr.bf16.mxu1 %v9700_v9 }
 0x1ac   : > { %2109 = vmatpush1.bf16.msra.mxu0 %v8218_v8  ;;  %2150 = vmatpush1.bf16.msra.mxu1 %v8223_v10 }
 0x1ad   : > { %2110 = vmatprep.subr.bf16.mxu0 %v8232_v11  ;;  %2151 = vmatprep.subr.bf16.mxu1 %v8237_v13 }
 0x1b0   : > { %2111 = vmatpush1.bf16.msra.mxu0 %v8242_v53  ;;  %2152 = vmatpush1.bf16.msra.mxu1 %v8247_v2 }
 0x1b1   : > { %2112 = vmatprep.subr.bf16.mxu0 %v8256_v7  ;;  %2153 = vmatprep.subr.bf16.mxu1 %v8261_v38 }
 0x1b4   : > { %2113 = vmatpush1.bf16.msra.mxu0 %v8266_v39  ;;  %2154 = vmatpush1.bf16.msra.mxu1 %v8271_v40 }
 0x1b5   : > { %2114 = vmatprep.subr.bf16.mxu0 %v8280_v41  ;;  %2155 = vmatprep.subr.bf16.mxu1 %v8285_v42 }
 0x1b8   : > { %2115 = vmatpush1.bf16.msra.mxu0 %v8290_v43  ;;  %2156 = vmatpush1.bf16.msra.mxu1 %v8295_v44 }
 0x1b9   : > { %2116 = vmatprep.subr.bf16.mxu0 %v8304_v45  ;;  %2157 = vmatprep.subr.bf16.mxu1 %v8309_v46 }
 0x1bc   : > { %2117 = vmatpush1.bf16.msra.mxu0 %v8314_v47  ;;  %2158 = vmatpush1.bf16.msra.mxu1 %v8319_v48 }
 0x1bd   : > { %2118 = vmatprep.subr.bf16.mxu0 %v8328_v49  ;;  %2159 = vmatprep.subr.bf16.mxu1 %v8333_v51 }
 0x1c0   : > { %2119 = vmatpush1.bf16.msra.mxu0 %v8338_v52  ;;  %2160 = vmatpush1.bf16.msra.mxu1 %v8343_v14 }
 0x1c1   : > { %2120 = vmatprep.subr.bf16.mxu0 %v8352_v15  ;;  %2161 = vmatprep.subr.bf16.mxu1 %v8357_v16 }
 0x1c4   : > { %2121 = vmatpush1.bf16.msra.mxu0 %v8362_v12  ;;  %2162 = vmatpush1.bf16.msra.mxu1 %v8367_v50 }
 0x1c5   : > { %2122 = vmatprep.subr.bf16.mxu0 %v8376_v17  ;;  %2163 = vmatprep.subr.bf16.mxu1 %v8381_v18 }
 0x1c8   : > { %2123 = vmatpush1.bf16.msra.mxu0 %v8386_v20  ;;  %2164 = vmatpush1.bf16.msra.mxu1 %v8391_v21 }
 0x1c9   : > { %2410 = vmatprep.subr.bf16.mxu0 %v8400_v23  ;;  %2451 = vmatprep.subr.bf16.mxu1 %v8405_v24 }
 0x25d   : > { %v1446_v25 = vpop.f32.mrb[8].mxu0  ;;  %v1487_v26 = vpop.f32.mrb[8].mxu1 }
 0x25e   : > { %v1448_v27 = vpop.f32.mrb[9].mxu0  ;;  %v1489_v28 = vpop.f32.mrb[9].mxu1 }
 0x25f   : > { %v1498_v29 = vcombine.low %v1446_v25, %v1448_v27  ;;  %v1499_v30 = vcombine.low %v1487_v26, %v1489_v28  ;;  %v1450_v31 = vpop.f32.mrb[10].mxu0  ;;  %v1491_v32 = vpop.f32.mrb[10].mxu1 }
 0x260   : > { %v1451_v34 = vpop.f32.mrb[11].mxu0  ;;  %v1492_v36 = vpop.f32.mrb[11].mxu1 }
 0x261   : > { %v1506_v37 = vrot.slane %v1498_v29, %v8155_v33  ;;  %v1513_v55 = vrot.slane %v1499_v30, %v8155_v33 }
 0x263   : > { %v1514_v56 = vcombine.low %v1506_v37, %v1513_v55  ;;  %v1519_v55 = vunpack.c.l.bf16 %v8164_v22 }
 0x265   : > { %v1516_v57 = vadd.f32 %v1514_v56, %v1217_v54 }
 0x267   : > { %v6380_v58 = vmul.f32 -1.442695, %v1516_v57  ;;  %v1827_v59 = vrot.slane %v1516_v57, 2  ;;  %v1838_v61 = vrot.slane %v1516_v57, 6  ;;  %v1835_v0 = vrot.slane %v1516_v57, 4 }
 0x269   : > { %7307 = vpow2.f32 %v6380_v58  ;;  %v6381_v60 = vmul.f32 -1.442695, %v1827_v59  ;;  %v6382_v62 = vmul.f32 -1.442695, %v1838_v61  ;;  %v1819_v58 = vld [vmem:[#allocation3] sm:$0x3] }
 0x26b   : > { %7309 = vpow2.f32 %v6381_v60 }
 0x26c   : > { %7311 = vpow2.f32 %v6382_v62 }
 0x273   : > { %v7308_v63 = vpop.eup %7307 }
 0x274   : > { %v1823_v1 = vadd.f32 1.0, %v7308_v63 }
 0x275   : > { %v7310_v3 = vpop.eup %7309 }
 0x276   : > { %7313 = vrcp.f32 %v1823_v1  ;;  %v1832_v4 = vadd.f32 1.0, %v7310_v3  ;;  %v7312_v27 = vpop.eup %7311  ;;  %v1890_v1 = vpop.permute.xlu1 %1889 }
 0x277   : > { %7315 = vtanh.f32 %v1835_v0  ;;  %v1843_v59 = vadd.f32 1.0, %v7312_v27 }
 0x278   : > { %7317 = vrcp.f32 %v1832_v4 }
 0x279   : > { %7319 = vrcp.f32 %v1843_v59  ;;  %v8434_v59 = vld [vmem:[%s9666_s5 + $0x2c] ss:$16 sps:$4 sm:$0xff]  }
 0x27d   : > { %v1748_v35 = vpop.f32.mrb[12].mxu0  ;;  %v1789_v5 = vpop.f32.mrb[12].mxu1 }
 0x27e   : > { %v1750_v25 = vpop.f32.mrb[13].mxu0  ;;  %v1791_v26 = vpop.f32.mrb[13].mxu1 }
 0x27f   : > { %v1800_v28 = vcombine.low %v1748_v35, %v1750_v25  ;;  %v1801_v29 = vcombine.low %v1789_v5, %v1791_v26  ;;  %v1752_v30 = vpop.f32.mrb[14].mxu0  ;;  %v1793_v31 = vpop.f32.mrb[14].mxu1 }
 0x280   : > { %v7314_v32 = vpop.eup %7313  ;;  %v1753_v34 = vpop.f32.mrb[15].mxu0 }
 0x281   : > { %v1794_v36 = vpop.f32.mrb[15].mxu1  ;;  %v7316_v37 = vpop.eup %7315  ;;  %v1808_v54 = vrot.slane %v1800_v28, %v8155_v33  ;;  %v1815_v56 = vrot.slane %v1801_v29, %v8155_v33 }
 0x282   : > { %v7318_v57 = vpop.eup %7317  ;;  %v1847_v61 = vmul.f32 %v7316_v37, %v7314_v32 }
 0x283   : > { %v1846_v60 = vmul.f32 %v7318_v57, %v1819_v58  ;;  %v1816_v62 = vcombine.low %v1808_v54, %v1815_v56  ;;  %v7320_v25 = vpop.eup %7319  ;;  %v8424_v56 = vld [vmem:[%s9666_s5 + $0x8] ss:$16 sps:$4 sm:$0xff]   ;;  %v8429_v58 = vld [vmem:[%s9666_s5 + $0x24] ss:$16 sps:$4 sm:$0xff]  }
 0x285   : > { %v1848_v63 = vadd.f32 %v1847_v61, %v1846_v60  ;;  %v1818_v0 = vadd.f32 %v1816_v62, %v1519_v55  ;;  %v8419_v55 = vld [vmem:[%s9666_s5] ss:$16 sps:$4 sm:$0xff]  }
 0x287   : > { %7321 = vtanh.f32 %v1848_v63  ;;  %v1899_v3 = vmul.f32 %v1890_v1, %v1848_v63  ;;  %v6383_v4 = vmul.f32 -1.442695, %v1818_v0  ;;  %v1859_v35 = vrot.slane %v1818_v0, 2  ;;  %v1851_v63 = vld [vmem:[#allocation5] sm:$0x3] }
 0x288   : > { %v1870_v22 = vrot.slane %v1818_v0, 6  ;;  %v1867_v30 = vrot.slane %v1818_v0, 4  ;;  %v8441_v0 = vld [vmem:[%s9666_s5 + $0x20] ss:$16 sps:$4 sm:$0xff]  }
 0x289   : > { %1900 = vst [vmem:[#allocation3] sm:$0x3] %v1899_v3  ;;  %7323 = vpow2.f32 %v6383_v4  ;;  %v6384_v5 = vmul.f32 -1.442695, %v1859_v35  ;;  %v8453_v35 = vld [vmem:[%s9666_s5 + $0x44] ss:$16 sps:$4 sm:$0xff]  }
 0x28a   : > { %v6385_v27 = vmul.f32 -1.442695, %v1870_v22 }
 0x28b   : > { %7325 = vpow2.f32 %v6384_v5  ;;  %v8458_v5 = vld [vmem:[%s9666_s5 + $0x4c] ss:$16 sps:$4 sm:$0xff]  }
 0x28c   : > { %7327 = vpow2.f32 %v6385_v27  ;;  %v8467_v27 = vld [vmem:[%s9666_s5 + $0x40] ss:$16 sps:$4 sm:$0xff]  }
 0x291   : > { %v7322_v26 = vpop.eup %7321 }
 0x292   : > { %v1850_v28 = vmul.f32 %v7322_v26, %v7320_v25 }
 0x293   : > { %v7324_v29 = vpop.eup %7323 }
 0x294   : > { %v1892_v31 = vmul.f32 %v1890_v1, %v1850_v28  ;;  %v1855_v32 = vadd.f32 1.0, %v7324_v29  ;;  %v8446_v1 = vld [vmem:[%s9666_s5 + $0x28] ss:$16 sps:$4 sm:$0xff]   ;;  %v1896_v29 = vpop.permute.xlu1 %1895 }
 0x295   : > { %v7326_v34 = vpop.eup %7325  ;;  %v8472_v28 = vld [vmem:[%s9666_s5 + $0x48] ss:$16 sps:$4 sm:$0xff]  }
 0x296   : > { %1901 = vst [vmem:[#allocation2] sm:$0x3] %v1892_v31  ;;  %v1905_v36 = vpack.c.bf16 %v1892_v31, %v1892_v31  ;;  %7329 = vrcp.f32 %v1855_v32  ;;  %v1864_v37 = vadd.f32 1.0, %v7326_v34  ;;  %v7328_v60 = vpop.eup %7327  ;;  %v8484_v31 = vld [vmem:[%s9666_s5 + $0x6c] ss:$16 sps:$4 sm:$0xff]  }
 0x297   : > { %7331 = vtanh.f32 %v1867_v30  ;;  %v1875_v4 = vadd.f32 1.0, %v7328_v60  ;;  %v8479_v30 = vld [vmem:[%s9666_s5 + $0x64] ss:$16 sps:$4 sm:$0xff]   ;;  %v8491_v34 = vld [vmem:[%s9666_s5 + $0x60] ss:$16 sps:$4 sm:$0xff]  }
 0x298   : > { %6388 = vst [vmem:[%s7691_s12 + $0x1] sm:$0x1] %v1905_v36  ;;  %7333 = vrcp.f32 %v1864_v37  ;;  %v8496_v36 = vld [vmem:[%s9666_s5 + $0x68] ss:$16 sps:$4 sm:$0xff]   ;;  %v8503_v37 = vld [vmem:[%s9666_s5 + $0x84] ss:$16 sps:$4 sm:$0xff]  }
 0x299   : > { %7335 = vrcp.f32 %v1875_v4  ;;  %v8520_v60 = vld [vmem:[%s9666_s5 + $0x88] ss:$16 sps:$4 sm:$0xff]   ;;  %v8539_v4 = vld [vmem:[%s9666_s5 + $0xa0] ss:$16 sps:$4 sm:$0xff]  }
 0x29a   : > { %9707 = vst [vmem:[#allocation8_spill] sm:$0xff] %v8520_v60 }
 0x29d   : > { %v1914_v54 = vld [vmem:[#allocation2] sm:$0x3] }
 0x29e   : > { %v1915_v57 = vpack.c.bf16 %v1914_v54, %v1914_v54  ;;  %v8508_v54 = vld [vmem:[%s9666_s5 + $0x8c] ss:$16 sps:$4 sm:$0xff]  }
 0x2a0   : > { %v7330_v61 = vpop.eup %7329  ;;  %2141 = vmatmul.mubr.bf16.vlgmr.msra.gmra.mrb[16].mxu0 %v1915_v57  ;;  %2182 = vmatmul.mubr.bf16.vlgmr.msra.gmra.mrb[16].mxu1 %v1915_v57  ;;  %v8515_v57 = vld [vmem:[%s9666_s5 + $0x80] ss:$16 sps:$4 sm:$0xff]  }
 0x2a1   : > { %v7332_v62 = vpop.eup %7331  ;;  %2411 = vmatpush1.bf16.msra.mxu0 %v8419_v55  ;;  %2452 = vmatpush1.bf16.msra.mxu1 %v8424_v56 }
 0x2a2   : > { %v7334_v3 = vpop.eup %7333  ;;  %2412 = vmatprep.subr.bf16.mxu0 %v8429_v58  ;;  %2453 = vmatprep.subr.bf16.mxu1 %v8434_v59  ;;  %v1879_v25 = vmul.f32 %v7332_v62, %v7330_v61  ;;  %v8527_v61 = vld [vmem:[%s9666_s5 + $0xa4] ss:$16 sps:$4 sm:$0xff]   ;;  %v8532_v62 = vld [vmem:[%s9666_s5 + $0xac] ss:$16 sps:$4 sm:$0xff]  }
 0x2a3   : > { %v1878_v22 = vmul.f32 %v7334_v3, %v1851_v63  ;;  %2442 = vmatprep.mubr.bf16.mxu0 %v9700_v9  ;;  %2483 = vmatprep.mubr.bf16.mxu1 %v9700_v9  ;;  %9708 = vst [vmem:[#allocation9_spill] sm:$0xff] %v8532_v62  ;;  %v7336_v63 = vpop.eup %7335 }
 0x2a5   : > { %v1880_v26 = vadd.f32 %v1879_v25, %v1878_v22  ;;  %2413 = vmatpush1.bf16.msra.mxu0 %v8441_v0  ;;  %2454 = vmatpush1.bf16.msra.mxu1 %v8446_v1  ;;  %v8544_v22 = vld [vmem:[%s9666_s5 + $0xa8] ss:$16 sps:$4 sm:$0xff]  }
 0x2a6   : > { %2414 = vmatprep.subr.bf16.mxu0 %v8453_v35  ;;  %2455 = vmatprep.subr.bf16.mxu1 %v8458_v5 }
 0x2a7   : > { %7337 = vtanh.f32 %v1880_v26  ;;  %v1902_v32 = vmul.f32 %v1896_v29, %v1880_v26  ;;  %v8551_v26 = vld [vmem:[%s9666_s5 + $0xc4] ss:$16 sps:$4 sm:$0xff]  }
 0x2a9   : > { %1903 = vst [vmem:[#allocation5] sm:$0x3] %v1902_v32  ;;  %2415 = vmatpush1.bf16.msra.mxu0 %v8467_v27  ;;  %2456 = vmatpush1.bf16.msra.mxu1 %v8472_v28  ;;  %v8556_v32 = vld [vmem:[%s9666_s5 + $0xcc] ss:$16 sps:$4 sm:$0xff]  }
 0x2aa   : > { %2416 = vmatprep.subr.bf16.mxu0 %v8479_v30  ;;  %2457 = vmatprep.subr.bf16.mxu1 %v8484_v31  ;;  %9709 = vst [vmem:[#allocation10_spill] sm:$0xff] %v8556_v32 }
 0x2ad   : > { %2417 = vmatpush1.bf16.msra.mxu0 %v8491_v34  ;;  %2458 = vmatpush1.bf16.msra.mxu1 %v8496_v36 }
 0x2ae   : > { %2418 = vmatprep.subr.bf16.mxu0 %v8503_v37  ;;  %2459 = vmatprep.subr.bf16.mxu1 %v8508_v54 }
 0x2b1   : > { %v7338_v3 = vpop.eup %7337  ;;  %2419 = vmatpush1.bf16.msra.mxu0 %v8515_v57  ;;  %2460 = vmatpush1.bf16.msra.mxu1 %v8520_v60 }
 0x2b2   : > { %v1882_v25 = vmul.f32 %v7338_v3, %v7336_v63  ;;  %2420 = vmatprep.subr.bf16.mxu0 %v8527_v61  ;;  %2461 = vmatprep.subr.bf16.mxu1 %v8532_v62  ;;  %v8563_v63 = vld [vmem:[%s9666_s5 + $0xc0] ss:$16 sps:$4 sm:$0xff]   ;;  %v8568_v3 = vld [vmem:[%s9666_s5 + $0xc8] ss:$16 sps:$4 sm:$0xff]  }
 0x2b3   : > { %9710 = vst [vmem:[#allocation11_spill] sm:$0xff] %v8568_v3 }
 0x2b4   : > { %v1898_v60 = vmul.f32 %v1896_v29, %v1882_v25  ;;  %v8575_v29 = vld [vmem:[%s9666_s5 + $0xe4] ss:$16 sps:$4 sm:$0xff]   ;;  %v8580_v25 = vld [vmem:[%s9666_s5 + $0xec] ss:$16 sps:$4 sm:$0xff]  }
 0x2b5   : > { %2421 = vmatpush1.bf16.msra.mxu0 %v8539_v4  ;;  %2462 = vmatpush1.bf16.msra.mxu1 %v8544_v22 }
 0x2b6   : > { %1904 = vst [vmem:[#allocation4] sm:$0x3] %v1898_v60  ;;  %v1908_v62 = vpack.c.bf16 %v1898_v60, %v1898_v60  ;;  %2422 = vmatprep.subr.bf16.mxu0 %v8551_v26  ;;  %2463 = vmatprep.subr.bf16.mxu1 %v8556_v32  ;;  %v8588_v60 = vld [vmem:[%s9666_s5 + $0xe0] ss:$16 sps:$4 sm:$0xff]   ;;  %v8593_v32 = vld [vmem:[%s9666_s5 + $0xe8] ss:$16 sps:$4 sm:$0xff]  }
 0x2b8   : > { %6389 = vst [vmem:[%s7706_s0 + $0x6] sm:$0x1] %v1908_v62 }
 0x2b9   : > { %2423 = vmatpush1.bf16.msra.mxu0 %v8563_v63  ;;  %2464 = vmatpush1.bf16.msra.mxu1 %v8568_v3 }
 0x2ba   : > { %2424 = vmatprep.subr.bf16.mxu0 %v8575_v29  ;;  %2465 = vmatprep.subr.bf16.mxu1 %v8580_v25 }
 0x2bd   : > { %2425 = vmatpush1.bf16.msra.mxu0 %v8588_v60  ;;  %2466 = vmatpush1.bf16.msra.mxu1 %v8593_v32  ;;  %v2216_v62 = vld [vmem:[#allocation4] sm:$0x3] }
 0x2be   : > { %v2217_v3 = vpack.c.bf16 %v2216_v62, %v2216_v62  ;;  %2804 = vmatprep.subr.bf16.mxu0 %v8208_v6  ;;  %2845 = vmatprep.subr.bf16.mxu1 %v8213_v19 }
 0x2c0   : > { %2443 = vmatmul.mubr.bf16.vlgmr.msra.gmra.mrb[20].mxu0 %v2217_v3  ;;  %2484 = vmatmul.mubr.bf16.vlgmr.msra.gmra.mrb[20].mxu1 %v2217_v3 }
 0x2c1   : > { %2805 = vmatpush1.bf16.msra.mxu0 %v8218_v8  ;;  %2846 = vmatpush1.bf16.msra.mxu1 %v8223_v10  ;;  %v8636_v10 = vld [vmem:[%s7708_s1 + $0x8] sm:$0xff]  }
 0x2c2   : > { %2806 = vmatprep.subr.bf16.mxu0 %v8232_v11  ;;  %2847 = vmatprep.subr.bf16.mxu1 %v8237_v13 }
 0x2c3   : > { %2836 = vmatprep.mubr.bf16.mxu0 %v9700_v9  ;;  %2877 = vmatprep.mubr.bf16.mxu1 %v9700_v9 }
 0x2c5   : > { %2807 = vmatpush1.bf16.msra.mxu0 %v8242_v53  ;;  %2848 = vmatpush1.bf16.msra.mxu1 %v8247_v2 }
 0x2c6   : > { %2808 = vmatprep.subr.bf16.mxu0 %v8256_v7  ;;  %2849 = vmatprep.subr.bf16.mxu1 %v8261_v38 }
 0x2c9   : > { %2809 = vmatpush1.bf16.msra.mxu0 %v8266_v39  ;;  %2850 = vmatpush1.bf16.msra.mxu1 %v8271_v40 }
 0x2ca   : > { %2810 = vmatprep.subr.bf16.mxu0 %v8280_v41  ;;  %2851 = vmatprep.subr.bf16.mxu1 %v8285_v42  ;;  %v1913_v41 = vunpack.c.l.bf16 %v8636_v10 }
 0x2cd   : > { %2811 = vmatpush1.bf16.msra.mxu0 %v8290_v43  ;;  %2852 = vmatpush1.bf16.msra.mxu1 %v8295_v44 }
 0x2ce   : > { %2812 = vmatprep.subr.bf16.mxu0 %v8304_v45  ;;  %2853 = vmatprep.subr.bf16.mxu1 %v8309_v46 }
 0x2d1   : > { %2813 = vmatpush1.bf16.msra.mxu0 %v8314_v47  ;;  %2854 = vmatpush1.bf16.msra.mxu1 %v8319_v48 }
 0x2d2   : > { %2814 = vmatprep.subr.bf16.mxu0 %v8328_v49  ;;  %2855 = vmatprep.subr.bf16.mxu1 %v8333_v51 }
 0x2d5   : > { %2815 = vmatpush1.bf16.msra.mxu0 %v8338_v52  ;;  %2856 = vmatpush1.bf16.msra.mxu1 %v8343_v14 }
 0x2d6   : > { %2816 = vmatprep.subr.bf16.mxu0 %v8352_v15  ;;  %2857 = vmatprep.subr.bf16.mxu1 %v8357_v16 }
 0x2d9   : > { %2817 = vmatpush1.bf16.msra.mxu0 %v8362_v12  ;;  %2858 = vmatpush1.bf16.msra.mxu1 %v8367_v50 }
 0x2da   : > { %2818 = vmatprep.subr.bf16.mxu0 %v8376_v17  ;;  %2859 = vmatprep.subr.bf16.mxu1 %v8381_v18  ;;  %v8642_v18 = vld [vmem:[%s7710_s21 + $0x10] sm:$0xff]  }
 0x2dd   : > { %2819 = vmatpush1.bf16.msra.mxu0 %v8386_v20  ;;  %2860 = vmatpush1.bf16.msra.mxu1 %v8391_v21 }
 0x2de   : > { %3106 = vmatprep.subr.bf16.mxu0 %v8400_v23  ;;  %3147 = vmatprep.subr.bf16.mxu1 %v8405_v24 }
 0x373   : > { %v2142_v6 = vpop.f32.mrb[16].mxu0  ;;  %v2183_v19 = vpop.f32.mrb[16].mxu1 }
 0x374   : > { %v2144_v8 = vpop.f32.mrb[17].mxu0  ;;  %v2185_v11 = vpop.f32.mrb[17].mxu1 }
 0x375   : > { %v2194_v13 = vcombine.low %v2142_v6, %v2144_v8  ;;  %v2195_v53 = vcombine.low %v2183_v19, %v2185_v11  ;;  %v2146_v2 = vpop.f32.mrb[18].mxu0  ;;  %v2187_v7 = vpop.f32.mrb[18].mxu1 }
 0x376   : > { %v2147_v38 = vpop.f32.mrb[19].mxu0  ;;  %v2188_v39 = vpop.f32.mrb[19].mxu1 }
 0x377   : > { %v2202_v40 = vrot.slane %v2194_v13, %v8155_v33  ;;  %v2209_v42 = vrot.slane %v2195_v53, %v8155_v33  ;;  %v2215_v53 = vunpack.c.h.bf16 %v8642_v18  ;;  %v2515_v38 = vld [vmem:[#allocation3] sm:$0x3] }
 0x379   : > { %v2210_v43 = vcombine.low %v2202_v40, %v2209_v42 }
 0x37b   : > { %v2212_v44 = vadd.f32 %v2210_v43, %v1913_v41 }
 0x37d   : > { %v6456_v45 = vmul.f32 -1.442695, %v2212_v44  ;;  %v2523_v46 = vrot.slane %v2212_v44, 2  ;;  %v2534_v48 = vrot.slane %v2212_v44, 6  ;;  %v2531_v52 = vrot.slane %v2212_v44, 4 }
 0x37f   : > { %7339 = vpow2.f32 %v6456_v45  ;;  %v6457_v47 = vmul.f32 -1.442695, %v2523_v46  ;;  %v6458_v49 = vmul.f32 -1.442695, %v2534_v48  ;;  %v2586_v45 = vpop.permute.xlu0 %2585 }
 0x381   : > { %7341 = vpow2.f32 %v6457_v47 }
 0x382   : > { %7343 = vpow2.f32 %v6458_v49 }
 0x389   : > { %v7340_v51 = vpop.eup %7339 }
 0x38a   : > { %v2519_v14 = vadd.f32 1.0, %v7340_v51 }
 0x38b   : > { %v7342_v15 = vpop.eup %7341 }
 0x38c   : > { %7345 = vrcp.f32 %v2519_v14  ;;  %v2528_v16 = vadd.f32 1.0, %v7342_v15  ;;  %v7344_v21 = vpop.eup %7343 }
 0x38d   : > { %7347 = vtanh.f32 %v2531_v52  ;;  %v2539_v39 = vadd.f32 1.0, %v7344_v21 }
 0x38e   : > { %7349 = vrcp.f32 %v2528_v16 }
 0x38f   : > { %7351 = vrcp.f32 %v2539_v39  ;;  %v8763_v39 = vld [vmem:[%s9665_s4 + $0x6c] ss:$16 sps:$4 sm:$0xff]  }
 0x393   : > { %v2444_v12 = vpop.f32.mrb[20].mxu0  ;;  %v2485_v50 = vpop.f32.mrb[20].mxu1 }
 0x394   : > { %v2446_v17 = vpop.f32.mrb[21].mxu0  ;;  %v2487_v20 = vpop.f32.mrb[21].mxu1 }
 0x395   : > { %v2496_v23 = vcombine.low %v2444_v12, %v2446_v17  ;;  %v2497_v24 = vcombine.low %v2485_v50, %v2487_v20  ;;  %v2448_v3 = vpop.f32.mrb[22].mxu0  ;;  %v2489_v62 = vpop.f32.mrb[22].mxu1 }
 0x396   : > { %v7346_v6 = vpop.eup %7345  ;;  %v2449_v19 = vpop.f32.mrb[23].mxu0 }
 0x397   : > { %v2490_v8 = vpop.f32.mrb[23].mxu1  ;;  %v7348_v11 = vpop.eup %7347  ;;  %v2504_v13 = vrot.slane %v2496_v23, %v8155_v33  ;;  %v2511_v2 = vrot.slane %v2497_v24, %v8155_v33 }
 0x398   : > { %v7350_v7 = vpop.eup %7349  ;;  %v2543_v41 = vmul.f32 %v7348_v11, %v7346_v6 }
 0x399   : > { %v2542_v40 = vmul.f32 %v7350_v7, %v2515_v38  ;;  %v2512_v42 = vcombine.low %v2504_v13, %v2511_v2  ;;  %v7352_v52 = vpop.eup %7351  ;;  %v2547_v13 = vld [vmem:[#allocation5] sm:$0x3] }
 0x39b   : > { %v2544_v43 = vadd.f32 %v2543_v41, %v2542_v40  ;;  %v2514_v44 = vadd.f32 %v2512_v42, %v2215_v53  ;;  %v8768_v40 = vld [vmem:[%s9665_s4 + $0x60] ss:$16 sps:$4 sm:$0xff]   ;;  %v8773_v41 = vld [vmem:[%s9665_s4 + $0x68] ss:$16 sps:$4 sm:$0xff]   ;;  %v8782_v42 = vld [vmem:[%s9665_s4 + $0x84] ss:$16 sps:$4 sm:$0xff]  }
 0x39d   : > { %7353 = vtanh.f32 %v2544_v43  ;;  %v2595_v46 = vmul.f32 %v2586_v45, %v2544_v43  ;;  %v6459_v47 = vmul.f32 -1.442695, %v2514_v44  ;;  %v2555_v48 = vrot.slane %v2514_v44, 2  ;;  %v8787_v43 = vld [vmem:[%s9665_s4 + $0x8c] ss:$16 sps:$4 sm:$0xff]  }
 0x39e   : > { %v2566_v51 = vrot.slane %v2514_v44, 6  ;;  %v2563_v50 = vrot.slane %v2514_v44, 4  ;;  %v8792_v44 = vld [vmem:[%s9665_s4 + $0x80] ss:$16 sps:$4 sm:$0xff]  }
 0x39f   : > { %2596 = vst [vmem:[#allocation3] sm:$0x3] %v2595_v46  ;;  %7355 = vpow2.f32 %v6459_v47  ;;  %v6460_v49 = vmul.f32 -1.442695, %v2555_v48  ;;  %v8806_v46 = vld [vmem:[%s9665_s4 + $0xa4] ss:$16 sps:$4 sm:$0xff]  }
 0x3a0   : > { %v6461_v15 = vmul.f32 -1.442695, %v2566_v51  ;;  %v8811_v47 = vld [vmem:[%s9665_s4 + $0xac] ss:$16 sps:$4 sm:$0xff]   ;;  %v8816_v48 = vld [vmem:[%s9665_s4 + $0xa0] ss:$16 sps:$4 sm:$0xff]  }
 0x3a1   : > { %7357 = vpow2.f32 %v6460_v49  ;;  %v8821_v49 = vld [vmem:[%s9665_s4 + $0xa8] ss:$16 sps:$4 sm:$0xff]   ;;  %v8830_v51 = vld [vmem:[%s9665_s4 + $0xc4] ss:$16 sps:$4 sm:$0xff]  }
 0x3a2   : > { %7359 = vpow2.f32 %v6461_v15  ;;  %v8845_v15 = vld [vmem:[%s9665_s4 + $0xc8] ss:$16 sps:$4 sm:$0xff]  }
 0x3a7   : > { %v7354_v14 = vpop.eup %7353 }
 0x3a8   : > { %v2546_v16 = vmul.f32 %v7354_v14, %v7352_v52  ;;  %v8835_v52 = vld [vmem:[%s9665_s4 + $0xcc] ss:$16 sps:$4 sm:$0xff]   ;;  %v8840_v14 = vld [vmem:[%s9665_s4 + $0xc0] ss:$16 sps:$4 sm:$0xff]  }
 0x3a9   : > { %v7356_v12 = vpop.eup %7355 }
 0x3aa   : > { %v2588_v17 = vmul.f32 %v2586_v45, %v2546_v16  ;;  %v2551_v20 = vadd.f32 1.0, %v7356_v12  ;;  %v8797_v45 = vld [vmem:[%s9665_s4 + $0x88] ss:$16 sps:$4 sm:$0xff]   ;;  %v8854_v16 = vld [vmem:[%s9665_s4 + $0xe4] ss:$16 sps:$4 sm:$0xff]  }
 0x3ab   : > { %v7358_v21 = vpop.eup %7357  ;;  %v8859_v12 = vld [vmem:[%s9665_s4 + $0xec] ss:$16 sps:$4 sm:$0xff]  }
 0x3ac   : > { %2597 = vst [vmem:[#allocation2] sm:$0x3] %v2588_v17  ;;  %v2601_v23 = vpack.c.bf16 %v2588_v17, %v2588_v17  ;;  %7361 = vrcp.f32 %v2551_v20  ;;  %v2560_v24 = vadd.f32 1.0, %v7358_v21  ;;  %v7360_v6 = vpop.eup %7359  ;;  %v8869_v17 = vld [vmem:[%s9665_s4 + $0xe8] ss:$16 sps:$4 sm:$0xff]  }
 0x3ad   : > { %7363 = vtanh.f32 %v2563_v50  ;;  %v2571_v53 = vadd.f32 1.0, %v7360_v6  ;;  %v8864_v50 = vld [vmem:[%s9665_s4 + $0xe0] ss:$16 sps:$4 sm:$0xff]   ;;  %v8878_v20 = vld [vmem:[%s9666_s5 + $0x4] ss:$16 sps:$4 sm:$0xff]  }
 0x3ae   : > { %6464 = vst [vmem:[%s7691_s12 + $0x2] sm:$0x1] %v2601_v23  ;;  %7365 = vrcp.f32 %v2560_v24  ;;  %v8883_v21 = vld [vmem:[%s9666_s5 + $0xc] ss:$16 sps:$4 sm:$0xff]  }
 0x3af   : > { %7367 = vrcp.f32 %v2571_v53 }
 0x3b3   : > { %v2610_v3 = vld [vmem:[#allocation2] sm:$0x3] }
 0x3b4   : > { %v2611_v62 = vpack.c.bf16 %v2610_v3, %v2610_v3 }
 0x3b6   : > { %v7362_v19 = vpop.eup %7361  ;;  %2837 = vmatmul.mubr.bf16.vlgmr.msra.gmra.mrb[24].mxu0 %v2611_v62  ;;  %2878 = vmatmul.mubr.bf16.vlgmr.msra.gmra.mrb[24].mxu1 %v2611_v62 }
 0x3b7   : > { %v7364_v8 = vpop.eup %7363  ;;  %3107 = vmatpush1.bf16.msra.mxu0 %v8419_v55  ;;  %3148 = vmatpush1.bf16.msra.mxu1 %v8424_v56  ;;  %v2592_v55 = vpop.permute.xlu1 %2591 }
 0x3b8   : > { %v7366_v11 = vpop.eup %7365  ;;  %3108 = vmatprep.subr.bf16.mxu0 %v8429_v58  ;;  %3149 = vmatprep.subr.bf16.mxu1 %v8434_v59  ;;  %v2575_v7 = vmul.f32 %v7364_v8, %v7362_v19 }
 0x3b9   : > { %v2574_v2 = vmul.f32 %v7366_v11, %v2547_v13  ;;  %3138 = vmatprep.mubr.bf16.mxu0 %v9700_v9  ;;  %3179 = vmatprep.mubr.bf16.mxu1 %v9700_v9  ;;  %v7368_v58 = vpop.eup %7367 }
 0x3bb   : > { %v2576_v38 = vadd.f32 %v2575_v7, %v2574_v2  ;;  %3109 = vmatpush1.bf16.msra.mxu0 %v8441_v0  ;;  %3150 = vmatpush1.bf16.msra.mxu1 %v8446_v1  ;;  %v9711_v0 = vld [vmem:[#allocation8_spill] sm:$0xff]  ;;  %v2609_v7 = vunpack.c.h.bf16 %v8636_v10 }
 0x3bc   : > { %3110 = vmatprep.subr.bf16.mxu0 %v8453_v35  ;;  %3151 = vmatprep.subr.bf16.mxu1 %v8458_v5  ;;  %v9712_v35 = vld [vmem:[#allocation9_spill] sm:$0xff] }
 0x3bd   : > { %7369 = vtanh.f32 %v2576_v38  ;;  %v2598_v56 = vmul.f32 %v2592_v55, %v2576_v38 }
 0x3bf   : > { %2599 = vst [vmem:[#allocation5] sm:$0x3] %v2598_v56  ;;  %3111 = vmatpush1.bf16.msra.mxu0 %v8467_v27  ;;  %3152 = vmatpush1.bf16.msra.mxu1 %v8472_v28  ;;  %v9713_v28 = vld [vmem:[#allocation10_spill] sm:$0xff] }
 0x3c0   : > { %3112 = vmatprep.subr.bf16.mxu0 %v8479_v30  ;;  %3153 = vmatprep.subr.bf16.mxu1 %v8484_v31  ;;  %v9714_v30 = vld [vmem:[#allocation11_spill] sm:$0xff] }
 0x3c3   : > { %3113 = vmatpush1.bf16.msra.mxu0 %v8491_v34  ;;  %3154 = vmatpush1.bf16.msra.mxu1 %v8496_v36  ;;  %v8686_v36 = vld [vmem:[%s9665_s4 + $0x4] ss:$16 sps:$4 sm:$0xff]  }
 0x3c4   : > { %3114 = vmatprep.subr.bf16.mxu0 %v8503_v37  ;;  %3155 = vmatprep.subr.bf16.mxu1 %v8508_v54  ;;  %v8691_v37 = vld [vmem:[%s9665_s4 + $0xc] ss:$16 sps:$4 sm:$0xff]   ;;  %v8696_v54 = vld [vmem:[%s9665_s4] ss:$16 sps:$4 sm:$0xff]  }
 0x3c7   : > { %v7370_v59 = vpop.eup %7369  ;;  %3115 = vmatpush1.bf16.msra.mxu0 %v8515_v57  ;;  %3156 = vmatpush1.bf16.msra.mxu1 %v9711_v0  ;;  %v8701_v57 = vld [vmem:[%s9665_s4 + $0x8] ss:$16 sps:$4 sm:$0xff]  }
 0x3c8   : > { %v2578_v1 = vmul.f32 %v7370_v59, %v7368_v58  ;;  %3116 = vmatprep.subr.bf16.mxu0 %v8527_v61  ;;  %3157 = vmatprep.subr.bf16.mxu1 %v9712_v35  ;;  %v8710_v61 = vld [vmem:[%s9665_s4 + $0x24] ss:$16 sps:$4 sm:$0xff]  }
 0x3ca   : > { %v2594_v5 = vmul.f32 %v2592_v55, %v2578_v1 }
 0x3cb   : > { %3117 = vmatpush1.bf16.msra.mxu0 %v8539_v4  ;;  %3158 = vmatpush1.bf16.msra.mxu1 %v8544_v22  ;;  %v8715_v4 = vld [vmem:[%s9665_s4 + $0x2c] ss:$16 sps:$4 sm:$0xff]   ;;  %v8720_v22 = vld [vmem:[%s9665_s4 + $0x20] ss:$16 sps:$4 sm:$0xff]  }
 0x3cc   : > { %2600 = vst [vmem:[#allocation4] sm:$0x3] %v2594_v5  ;;  %v2604_v27 = vpack.c.bf16 %v2594_v5, %v2594_v5  ;;  %3118 = vmatprep.subr.bf16.mxu0 %v8551_v26  ;;  %3159 = vmatprep.subr.bf16.mxu1 %v9713_v28  ;;  %v8725_v26 = vld [vmem:[%s9665_s4 + $0x28] ss:$16 sps:$4 sm:$0xff]  }
 0x3ce   : > { %6465 = vst [vmem:[%s7706_s0 + $0x5] sm:$0x1] %v2604_v27 }
 0x3cf   : > { %3119 = vmatpush1.bf16.msra.mxu0 %v8563_v63  ;;  %3160 = vmatpush1.bf16.msra.mxu1 %v9714_v30  ;;  %v8739_v63 = vld [vmem:[%s9665_s4 + $0x4c] ss:$16 sps:$4 sm:$0xff]  }
 0x3d0   : > { %3120 = vmatprep.subr.bf16.mxu0 %v8575_v29  ;;  %3161 = vmatprep.subr.bf16.mxu1 %v8580_v25  ;;  %v8744_v29 = vld [vmem:[%s9665_s4 + $0x40] ss:$16 sps:$4 sm:$0xff]   ;;  %v8749_v25 = vld [vmem:[%s9665_s4 + $0x48] ss:$16 sps:$4 sm:$0xff]  }
 0x3d3   : > { %3121 = vmatpush1.bf16.msra.mxu0 %v8588_v60  ;;  %3162 = vmatpush1.bf16.msra.mxu1 %v8593_v32  ;;  %v2912_v31 = vld [vmem:[#allocation4] sm:$0x3] }
 0x3d4   : > { %v2913_v34 = vpack.c.bf16 %v2912_v31, %v2912_v31  ;;  %3500 = vmatprep.subr.bf16.mxu0 %v8686_v36  ;;  %3541 = vmatprep.subr.bf16.mxu1 %v8691_v37  ;;  %v8734_v32 = vld [vmem:[%s9665_s4 + $0x44] ss:$16 sps:$4 sm:$0xff]  }
 0x3d5   : > { %v8758_v60 = vld [vmem:[%s9665_s4 + $0x64] ss:$16 sps:$4 sm:$0xff]  }
 0x3d6   : > { %3139 = vmatmul.mubr.bf16.vlgmr.msra.gmra.mrb[28].mxu0 %v2913_v34  ;;  %3180 = vmatmul.mubr.bf16.vlgmr.msra.gmra.mrb[28].mxu1 %v2913_v34 }
 0x3d7   : > { %3532 = vmatprep.mubr.bf16.mxu0 %v9700_v9  ;;  %3573 = vmatprep.mubr.bf16.mxu1 %v9700_v9 }
 0x3d8   : > { %3501 = vmatpush1.bf16.msra.mxu0 %v8696_v54  ;;  %3542 = vmatpush1.bf16.msra.mxu1 %v8701_v57 }
 0x3d9   : > { %3502 = vmatprep.subr.bf16.mxu0 %v8710_v61  ;;  %3543 = vmatprep.subr.bf16.mxu1 %v8715_v4 }
 0x3dc   : > { %3503 = vmatpush1.bf16.msra.mxu0 %v8720_v22  ;;  %3544 = vmatpush1.bf16.msra.mxu1 %v8725_v26 }
 0x3dd   : > { %3504 = vmatprep.subr.bf16.mxu0 %v8734_v32  ;;  %3545 = vmatprep.subr.bf16.mxu1 %v8739_v63 }
 0x3e0   : > { %3505 = vmatpush1.bf16.msra.mxu0 %v8744_v29  ;;  %3546 = vmatpush1.bf16.msra.mxu1 %v8749_v25 }
 0x3e1   : > { %3506 = vmatprep.subr.bf16.mxu0 %v8758_v60  ;;  %3547 = vmatprep.subr.bf16.mxu1 %v8763_v39 }
 0x3e4   : > { %3507 = vmatpush1.bf16.msra.mxu0 %v8768_v40  ;;  %3548 = vmatpush1.bf16.msra.mxu1 %v8773_v41 }
 0x3e5   : > { %3508 = vmatprep.subr.bf16.mxu0 %v8782_v42  ;;  %3549 = vmatprep.subr.bf16.mxu1 %v8787_v43 }
 0x3e8   : > { %3509 = vmatpush1.bf16.msra.mxu0 %v8792_v44  ;;  %3550 = vmatpush1.bf16.msra.mxu1 %v8797_v45 }
 0x3e9   : > { %3510 = vmatprep.subr.bf16.mxu0 %v8806_v46  ;;  %3551 = vmatprep.subr.bf16.mxu1 %v8811_v47 }
 0x3ec   : > { %3511 = vmatpush1.bf16.msra.mxu0 %v8816_v48  ;;  %3552 = vmatpush1.bf16.msra.mxu1 %v8821_v49 }
 0x3ed   : > { %3512 = vmatprep.subr.bf16.mxu0 %v8830_v51  ;;  %3553 = vmatprep.subr.bf16.mxu1 %v8835_v52 }
 0x3f0   : > { %3513 = vmatpush1.bf16.msra.mxu0 %v8840_v14  ;;  %3554 = vmatpush1.bf16.msra.mxu1 %v8845_v15 }
 0x3f1   : > { %3514 = vmatprep.subr.bf16.mxu0 %v8854_v16  ;;  %3555 = vmatprep.subr.bf16.mxu1 %v8859_v12 }
 0x3f4   : > { %3515 = vmatpush1.bf16.msra.mxu0 %v8864_v50  ;;  %3556 = vmatpush1.bf16.msra.mxu1 %v8869_v17 }
 0x3f5   : > { %3802 = vmatprep.subr.bf16.mxu0 %v8878_v20  ;;  %3843 = vmatprep.subr.bf16.mxu1 %v8883_v21 }
 0x489   : > { %v2838_v23 = vpop.f32.mrb[24].mxu0  ;;  %v2879_v24 = vpop.f32.mrb[24].mxu1 }
 0x48a   : > { %v2840_v3 = vpop.f32.mrb[25].mxu0  ;;  %v2881_v62 = vpop.f32.mrb[25].mxu1 }
 0x48b   : > { %v2890_v6 = vcombine.low %v2838_v23, %v2840_v3  ;;  %v2891_v19 = vcombine.low %v2879_v24, %v2881_v62  ;;  %v2842_v8 = vpop.f32.mrb[26].mxu0  ;;  %v2883_v11 = vpop.f32.mrb[26].mxu1 }
 0x48c   : > { %v2843_v13 = vpop.f32.mrb[27].mxu0  ;;  %v2884_v53 = vpop.f32.mrb[27].mxu1 }
 0x48d   : > { %v2898_v2 = vrot.slane %v2890_v6, %v8155_v33  ;;  %v2905_v38 = vrot.slane %v2891_v19, %v8155_v33 }
 0x48f   : > { %v2906_v55 = vcombine.low %v2898_v2, %v2905_v38  ;;  %v2911_v38 = vunpack.c.l.bf16 %v8642_v18 }
 0x491   : > { %v2908_v56 = vadd.f32 %v2906_v55, %v2609_v7 }
 0x493   : > { %v6532_v58 = vmul.f32 -1.442695, %v2908_v56  ;;  %v3219_v59 = vrot.slane %v2908_v56, 2  ;;  %v3230_v1 = vrot.slane %v2908_v56, 6  ;;  %v3227_v27 = vrot.slane %v2908_v56, 4 }
 0x495   : > { %7371 = vpow2.f32 %v6532_v58  ;;  %v6533_v0 = vmul.f32 -1.442695, %v3219_v59  ;;  %v6534_v35 = vmul.f32 -1.442695, %v3230_v1  ;;  %v3211_v58 = vld [vmem:[#allocation3] sm:$0x3] }
 0x497   : > { %7373 = vpow2.f32 %v6533_v0 }
 0x498   : > { %7375 = vpow2.f32 %v6534_v35 }
 0x49f   : > { %v7372_v5 = vpop.eup %7371 }
 0x4a0   : > { %v3215_v28 = vadd.f32 1.0, %v7372_v5 }
 0x4a1   : > { %v7374_v30 = vpop.eup %7373 }
 0x4a2   : > { %7377 = vrcp.f32 %v3215_v28  ;;  %v3224_v31 = vadd.f32 1.0, %v7374_v30  ;;  %v7376_v3 = vpop.eup %7375  ;;  %v3282_v28 = vpop.permute.xlu0 %3281 }
 0x4a3   : > { %7379 = vtanh.f32 %v3227_v27  ;;  %v3235_v59 = vadd.f32 1.0, %v7376_v3 }
 0x4a4   : > { %7381 = vrcp.f32 %v3224_v31 }
 0x4a5   : > { %7383 = vrcp.f32 %v3235_v59  ;;  %v8912_v59 = vld [vmem:[%s9666_s5 + $0x2c] ss:$16 sps:$4 sm:$0xff]  }
 0x4a9   : > { %v3140_v10 = vpop.f32.mrb[28].mxu0  ;;  %v3181_v34 = vpop.f32.mrb[28].mxu1 }
 0x4aa   : > { %v3142_v23 = vpop.f32.mrb[29].mxu0  ;;  %v3183_v24 = vpop.f32.mrb[29].mxu1 }
 0x4ab   : > { %v3192_v62 = vcombine.low %v3140_v10, %v3142_v23  ;;  %v3193_v6 = vcombine.low %v3181_v34, %v3183_v24  ;;  %v3144_v19 = vpop.f32.mrb[30].mxu0  ;;  %v3185_v8 = vpop.f32.mrb[30].mxu1 }
 0x4ac   : > { %v7378_v11 = vpop.eup %7377  ;;  %v3145_v13 = vpop.f32.mrb[31].mxu0 }
 0x4ad   : > { %v3186_v53 = vpop.f32.mrb[31].mxu1  ;;  %v7380_v2 = vpop.eup %7379  ;;  %v3200_v7 = vrot.slane %v3192_v62, %v8155_v33  ;;  %v3207_v55 = vrot.slane %v3193_v6, %v8155_v33 }
 0x4ae   : > { %v7382_v56 = vpop.eup %7381  ;;  %v3239_v1 = vmul.f32 %v7380_v2, %v7378_v11 }
 0x4af   : > { %v3238_v0 = vmul.f32 %v7382_v56, %v3211_v58  ;;  %v3208_v35 = vcombine.low %v3200_v7, %v3207_v55  ;;  %v7384_v23 = vpop.eup %7383  ;;  %v8902_v55 = vld [vmem:[%s9666_s5 + $0x8] ss:$16 sps:$4 sm:$0xff]   ;;  %v8907_v58 = vld [vmem:[%s9666_s5 + $0x24] ss:$16 sps:$4 sm:$0xff]  }
 0x4b1   : > { %v3240_v5 = vadd.f32 %v3239_v1, %v3238_v0  ;;  %v3210_v27 = vadd.f32 %v3208_v35, %v2911_v38  ;;  %v8897_v38 = vld [vmem:[%s9666_s5] ss:$16 sps:$4 sm:$0xff]  }
 0x4b3   : > { %7385 = vtanh.f32 %v3240_v5  ;;  %v3291_v30 = vmul.f32 %v3282_v28, %v3240_v5  ;;  %v6535_v31 = vmul.f32 -1.442695, %v3210_v27  ;;  %v3251_v10 = vrot.slane %v3210_v27, 2  ;;  %v3243_v5 = vld [vmem:[#allocation5] sm:$0x3] }
 0x4b4   : > { %v3262_v18 = vrot.slane %v3210_v27, 6  ;;  %v3259_v19 = vrot.slane %v3210_v27, 4  ;;  %v8919_v27 = vld [vmem:[%s9666_s5 + $0x20] ss:$16 sps:$4 sm:$0xff]  }
 0x4b5   : > { %3292 = vst [vmem:[#allocation3] sm:$0x3] %v3291_v30  ;;  %7387 = vpow2.f32 %v6535_v31  ;;  %v6536_v34 = vmul.f32 -1.442695, %v3251_v10  ;;  %v8931_v10 = vld [vmem:[%s9666_s5 + $0x44] ss:$16 sps:$4 sm:$0xff]  }
 0x4b6   : > { %v6537_v3 = vmul.f32 -1.442695, %v3262_v18 }
 0x4b7   : > { %7389 = vpow2.f32 %v6536_v34  ;;  %v8936_v34 = vld [vmem:[%s9666_s5 + $0x4c] ss:$16 sps:$4 sm:$0xff]  }
 0x4b8   : > { %7391 = vpow2.f32 %v6537_v3  ;;  %v8945_v3 = vld [vmem:[%s9666_s5 + $0x40] ss:$16 sps:$4 sm:$0xff]  }
 0x4bd   : > { %v7386_v24 = vpop.eup %7385 }
 0x4be   : > { %v3242_v62 = vmul.f32 %v7386_v24, %v7384_v23 }
 0x4bf   : > { %v7388_v6 = vpop.eup %7387 }
 0x4c0   : > { %v3284_v8 = vmul.f32 %v3282_v28, %v3242_v62  ;;  %v3247_v11 = vadd.f32 1.0, %v7388_v6  ;;  %v8924_v28 = vld [vmem:[%s9666_s5 + $0x28] ss:$16 sps:$4 sm:$0xff]   ;;  %v3288_v6 = vpop.permute.xlu1 %3287 }
 0x4c1   : > { %v7390_v13 = vpop.eup %7389  ;;  %v8950_v62 = vld [vmem:[%s9666_s5 + $0x48] ss:$16 sps:$4 sm:$0xff]  }
 0x4c2   : > { %v3297_v53 = vpack.c.bf16 %v3284_v8, %v3284_v8  ;;  %3293 = vst [vmem:[#allocation2] sm:$0x3] %v3284_v8  ;;  %7393 = vrcp.f32 %v3247_v11  ;;  %v3256_v2 = vadd.f32 1.0, %v7390_v13  ;;  %v7392_v0 = vpop.eup %7391  ;;  %v8962_v8 = vld [vmem:[%s9666_s5 + $0x6c] ss:$16 sps:$4 sm:$0xff]  }
 0x4c3   : > { %7395 = vtanh.f32 %v3259_v19  ;;  %v3267_v31 = vadd.f32 1.0, %v7392_v0  ;;  %v8957_v19 = vld [vmem:[%s9666_s5 + $0x64] ss:$16 sps:$4 sm:$0xff]   ;;  %v8969_v13 = vld [vmem:[%s9666_s5 + $0x60] ss:$16 sps:$4 sm:$0xff]  }
 0x4c4   : > { %6540 = vst [vmem:[%s7691_s12 + $0x3] sm:$0x1] %v3297_v53  ;;  %7397 = vrcp.f32 %v3256_v2  ;;  %v8974_v53 = vld [vmem:[%s9666_s5 + $0x68] ss:$16 sps:$4 sm:$0xff]   ;;  %v8981_v2 = vld [vmem:[%s9666_s5 + $0x84] ss:$16 sps:$4 sm:$0xff]  }
 0x4c5   : > { %7399 = vrcp.f32 %v3267_v31  ;;  %v8998_v0 = vld [vmem:[%s9666_s5 + $0x88] ss:$16 sps:$4 sm:$0xff]   ;;  %v9017_v31 = vld [vmem:[%s9666_s5 + $0xa0] ss:$16 sps:$4 sm:$0xff]  }
 0x4c6   : > { %9715 = vst [vmem:[#allocation12_spill] sm:$0xff] %v8998_v0 }
 0x4c9   : > { %v3306_v7 = vld [vmem:[#allocation2] sm:$0x3] }
 0x4ca   : > { %v3307_v56 = vpack.c.bf16 %v3306_v7, %v3306_v7  ;;  %v8986_v7 = vld [vmem:[%s9666_s5 + $0x8c] ss:$16 sps:$4 sm:$0xff]  }
 0x4cc   : > { %v7394_v1 = vpop.eup %7393  ;;  %3533 = vmatmul.mubr.bf16.vlgmr.msra.gmra.mrb[32].mxu0 %v3307_v56  ;;  %3574 = vmatmul.mubr.bf16.vlgmr.msra.gmra.mrb[32].mxu1 %v3307_v56  ;;  %v8993_v56 = vld [vmem:[%s9666_s5 + $0x80] ss:$16 sps:$4 sm:$0xff]  }
 0x4cd   : > { %v7396_v35 = vpop.eup %7395  ;;  %3803 = vmatpush1.bf16.msra.mxu0 %v8897_v38  ;;  %3844 = vmatpush1.bf16.msra.mxu1 %v8902_v55 }
 0x4ce   : > { %v7398_v30 = vpop.eup %7397  ;;  %3804 = vmatprep.subr.bf16.mxu0 %v8907_v58  ;;  %3845 = vmatprep.subr.bf16.mxu1 %v8912_v59  ;;  %v3271_v23 = vmul.f32 %v7396_v35, %v7394_v1  ;;  %v9005_v1 = vld [vmem:[%s9666_s5 + $0xa4] ss:$16 sps:$4 sm:$0xff]   ;;  %v9010_v35 = vld [vmem:[%s9666_s5 + $0xac] ss:$16 sps:$4 sm:$0xff]  }
 0x4cf   : > { %v3270_v18 = vmul.f32 %v7398_v30, %v3243_v5  ;;  %3834 = vmatprep.mubr.bf16.mxu0 %v9700_v9  ;;  %3875 = vmatprep.mubr.bf16.mxu1 %v9700_v9  ;;  %9716 = vst [vmem:[#allocation13_spill] sm:$0xff] %v9010_v35  ;;  %v7400_v5 = vpop.eup %7399 }
 0x4d1   : > { %v3272_v24 = vadd.f32 %v3271_v23, %v3270_v18  ;;  %3805 = vmatpush1.bf16.msra.mxu0 %v8919_v27  ;;  %3846 = vmatpush1.bf16.msra.mxu1 %v8924_v28  ;;  %v9022_v18 = vld [vmem:[%s9666_s5 + $0xa8] ss:$16 sps:$4 sm:$0xff]  }
 0x4d2   : > { %3806 = vmatprep.subr.bf16.mxu0 %v8931_v10  ;;  %3847 = vmatprep.subr.bf16.mxu1 %v8936_v34 }
 0x4d3   : > { %7401 = vtanh.f32 %v3272_v24  ;;  %v3294_v11 = vmul.f32 %v3288_v6, %v3272_v24  ;;  %v9029_v24 = vld [vmem:[%s9666_s5 + $0xc4] ss:$16 sps:$4 sm:$0xff]  }
 0x4d5   : > { %3295 = vst [vmem:[#allocation5] sm:$0x3] %v3294_v11  ;;  %3807 = vmatpush1.bf16.msra.mxu0 %v8945_v3  ;;  %3848 = vmatpush1.bf16.msra.mxu1 %v8950_v62  ;;  %v9034_v11 = vld [vmem:[%s9666_s5 + $0xcc] ss:$16 sps:$4 sm:$0xff]  }
 0x4d6   : > { %3808 = vmatprep.subr.bf16.mxu0 %v8957_v19  ;;  %3849 = vmatprep.subr.bf16.mxu1 %v8962_v8  ;;  %9717 = vst [vmem:[#allocation8_spill] sm:$0xff] %v9034_v11 }
 0x4d9   : > { %3809 = vmatpush1.bf16.msra.mxu0 %v8969_v13  ;;  %3850 = vmatpush1.bf16.msra.mxu1 %v8974_v53 }
 0x4da   : > { %3810 = vmatprep.subr.bf16.mxu0 %v8981_v2  ;;  %3851 = vmatprep.subr.bf16.mxu1 %v8986_v7 }
 0x4dd   : > { %v7402_v30 = vpop.eup %7401  ;;  %3811 = vmatpush1.bf16.msra.mxu0 %v8993_v56  ;;  %3852 = vmatpush1.bf16.msra.mxu1 %v8998_v0 }
 0x4de   : > { %v3274_v23 = vmul.f32 %v7402_v30, %v7400_v5  ;;  %3812 = vmatprep.subr.bf16.mxu0 %v9005_v1  ;;  %3853 = vmatprep.subr.bf16.mxu1 %v9010_v35  ;;  %v9041_v5 = vld [vmem:[%s9666_s5 + $0xc0] ss:$16 sps:$4 sm:$0xff]   ;;  %v9046_v30 = vld [vmem:[%s9666_s5 + $0xc8] ss:$16 sps:$4 sm:$0xff]  }
 0x4df   : > { %9718 = vst [vmem:[#allocation9_spill] sm:$0xff] %v9046_v30 }
 0x4e0   : > { %v3290_v0 = vmul.f32 %v3288_v6, %v3274_v23  ;;  %v9053_v6 = vld [vmem:[%s9666_s5 + $0xe4] ss:$16 sps:$4 sm:$0xff]   ;;  %v9058_v23 = vld [vmem:[%s9666_s5 + $0xec] ss:$16 sps:$4 sm:$0xff]  }
 0x4e1   : > { %3813 = vmatpush1.bf16.msra.mxu0 %v9017_v31  ;;  %3854 = vmatpush1.bf16.msra.mxu1 %v9022_v18 }
 0x4e2   : > { %v3300_v35 = vpack.c.bf16 %v3290_v0, %v3290_v0  ;;  %3296 = vst [vmem:[#allocation4] sm:$0x3] %v3290_v0  ;;  %3814 = vmatprep.subr.bf16.mxu0 %v9029_v24  ;;  %3855 = vmatprep.subr.bf16.mxu1 %v9034_v11  ;;  %v9066_v0 = vld [vmem:[%s9666_s5 + $0xe0] ss:$16 sps:$4 sm:$0xff]   ;;  %v9071_v11 = vld [vmem:[%s9666_s5 + $0xe8] ss:$16 sps:$4 sm:$0xff]  }
 0x4e4   : > { %6541 = vst [vmem:[%s7706_s0 + $0x4] sm:$0x1] %v3300_v35 }
 0x4e5   : > { %3815 = vmatpush1.bf16.msra.mxu0 %v9041_v5  ;;  %3856 = vmatpush1.bf16.msra.mxu1 %v9046_v30 }
 0x4e6   : > { %3816 = vmatprep.subr.bf16.mxu0 %v9053_v6  ;;  %3857 = vmatprep.subr.bf16.mxu1 %v9058_v23 }
 0x4e9   : > { %3817 = vmatpush1.bf16.msra.mxu0 %v9066_v0  ;;  %3858 = vmatpush1.bf16.msra.mxu1 %v9071_v11  ;;  %v3608_v35 = vld [vmem:[#allocation4] sm:$0x3] }
 0x4ea   : > { %v3609_v30 = vpack.c.bf16 %v3608_v35, %v3608_v35  ;;  %4196 = vmatprep.subr.bf16.mxu0 %v8686_v36  ;;  %4237 = vmatprep.subr.bf16.mxu1 %v8691_v37 }
 0x4ec   : > { %3835 = vmatmul.mubr.bf16.vlgmr.msra.gmra.mrb[36].mxu0 %v3609_v30  ;;  %3876 = vmatmul.mubr.bf16.vlgmr.msra.gmra.mrb[36].mxu1 %v3609_v30 }
 0x4ed   : > { %4197 = vmatpush1.bf16.msra.mxu0 %v8696_v54  ;;  %4238 = vmatpush1.bf16.msra.mxu1 %v8701_v57  ;;  %v9114_v57 = vld [vmem:[%s7708_s1 + $0x10] sm:$0xff]  }
 0x4ee   : > { %4198 = vmatprep.subr.bf16.mxu0 %v8710_v61  ;;  %4239 = vmatprep.subr.bf16.mxu1 %v8715_v4 }
 0x4ef   : > { %4228 = vmatprep.mubr.bf16.mxu0 %v9700_v9  ;;  %4269 = vmatprep.mubr.bf16.mxu1 %v9700_v9 }
 0x4f1   : > { %4199 = vmatpush1.bf16.msra.mxu0 %v8720_v22  ;;  %4240 = vmatpush1.bf16.msra.mxu1 %v8725_v26 }
 0x4f2   : > { %4200 = vmatprep.subr.bf16.mxu0 %v8734_v32  ;;  %4241 = vmatprep.subr.bf16.mxu1 %v8739_v63 }
 0x4f5   : > { %4201 = vmatpush1.bf16.msra.mxu0 %v8744_v29  ;;  %4242 = vmatpush1.bf16.msra.mxu1 %v8749_v25 }
 0x4f6   : > { %4202 = vmatprep.subr.bf16.mxu0 %v8758_v60  ;;  %4243 = vmatprep.subr.bf16.mxu1 %v8763_v39  ;;  %v3305_v60 = vunpack.c.l.bf16 %v9114_v57 }
 0x4f9   : > { %4203 = vmatpush1.bf16.msra.mxu0 %v8768_v40  ;;  %4244 = vmatpush1.bf16.msra.mxu1 %v8773_v41 }
 0x4fa   : > { %4204 = vmatprep.subr.bf16.mxu0 %v8782_v42  ;;  %4245 = vmatprep.subr.bf16.mxu1 %v8787_v43 }
 0x4fd   : > { %4205 = vmatpush1.bf16.msra.mxu0 %v8792_v44  ;;  %4246 = vmatpush1.bf16.msra.mxu1 %v8797_v45 }
 0x4fe   : > { %4206 = vmatprep.subr.bf16.mxu0 %v8806_v46  ;;  %4247 = vmatprep.subr.bf16.mxu1 %v8811_v47 }
 0x501   : > { %4207 = vmatpush1.bf16.msra.mxu0 %v8816_v48  ;;  %4248 = vmatpush1.bf16.msra.mxu1 %v8821_v49 }
 0x502   : > { %4208 = vmatprep.subr.bf16.mxu0 %v8830_v51  ;;  %4249 = vmatprep.subr.bf16.mxu1 %v8835_v52 }
 0x505   : > { %4209 = vmatpush1.bf16.msra.mxu0 %v8840_v14  ;;  %4250 = vmatpush1.bf16.msra.mxu1 %v8845_v15 }
 0x506   : > { %4210 = vmatprep.subr.bf16.mxu0 %v8854_v16  ;;  %4251 = vmatprep.subr.bf16.mxu1 %v8859_v12  ;;  %v9120_v12 = vld [vmem:[%s7710_s21 + $0x8] sm:$0xff]  }
 0x509   : > { %4211 = vmatpush1.bf16.msra.mxu0 %v8864_v50  ;;  %4252 = vmatpush1.bf16.msra.mxu1 %v8869_v17 }
 0x50a   : > { %4498 = vmatprep.subr.bf16.mxu0 %v8878_v20  ;;  %4539 = vmatprep.subr.bf16.mxu1 %v8883_v21 }
 0x59f   : > { %v3534_v36 = vpop.f32.mrb[32].mxu0  ;;  %v3575_v37 = vpop.f32.mrb[32].mxu1 }
 0x5a0   : > { %v3536_v54 = vpop.f32.mrb[33].mxu0  ;;  %v3577_v61 = vpop.f32.mrb[33].mxu1 }
 0x5a1   : > { %v3586_v4 = vcombine.low %v3534_v36, %v3536_v54  ;;  %v3587_v22 = vcombine.low %v3575_v37, %v3577_v61  ;;  %v3538_v26 = vpop.f32.mrb[34].mxu0  ;;  %v3579_v32 = vpop.f32.mrb[34].mxu1 }
 0x5a2   : > { %v3539_v63 = vpop.f32.mrb[35].mxu0  ;;  %v3580_v29 = vpop.f32.mrb[35].mxu1 }
 0x5a3   : > { %v3594_v25 = vrot.slane %v3586_v4, %v8155_v33  ;;  %v3601_v39 = vrot.slane %v3587_v22, %v8155_v33  ;;  %v3607_v22 = vunpack.c.h.bf16 %v9120_v12  ;;  %v3907_v63 = vld [vmem:[#allocation3] sm:$0x3] }
 0x5a5   : > { %v3602_v40 = vcombine.low %v3594_v25, %v3601_v39 }
 0x5a7   : > { %v3604_v41 = vadd.f32 %v3602_v40, %v3305_v60 }
 0x5a9   : > { %v6608_v42 = vmul.f32 -1.442695, %v3604_v41  ;;  %v3915_v43 = vrot.slane %v3604_v41, 2  ;;  %v3926_v45 = vrot.slane %v3604_v41, 6  ;;  %v3923_v48 = vrot.slane %v3604_v41, 4 }
 0x5ab   : > { %7403 = vpow2.f32 %v6608_v42  ;;  %v6609_v44 = vmul.f32 -1.442695, %v3915_v43  ;;  %v6610_v46 = vmul.f32 -1.442695, %v3926_v45  ;;  %v3978_v42 = vpop.permute.xlu0 %3977 }
 0x5ad   : > { %7405 = vpow2.f32 %v6609_v44 }
 0x5ae   : > { %7407 = vpow2.f32 %v6610_v46 }
 0x5b5   : > { %v7404_v47 = vpop.eup %7403 }
 0x5b6   : > { %v3911_v49 = vadd.f32 1.0, %v7404_v47 }
 0x5b7   : > { %v7406_v51 = vpop.eup %7405 }
 0x5b8   : > { %7409 = vrcp.f32 %v3911_v49  ;;  %v3920_v52 = vadd.f32 1.0, %v7406_v51  ;;  %v7408_v17 = vpop.eup %7407 }
 0x5b9   : > { %7411 = vtanh.f32 %v3923_v48  ;;  %v3931_v29 = vadd.f32 1.0, %v7408_v17 }
 0x5ba   : > { %7413 = vrcp.f32 %v3920_v52 }
 0x5bb   : > { %7415 = vrcp.f32 %v3931_v29  ;;  %v9241_v29 = vld [vmem:[%s9665_s4 + $0x6c] ss:$16 sps:$4 sm:$0xff]  }
 0x5bf   : > { %v3836_v14 = vpop.f32.mrb[36].mxu0  ;;  %v3877_v15 = vpop.f32.mrb[36].mxu1 }
 0x5c0   : > { %v3838_v16 = vpop.f32.mrb[37].mxu0  ;;  %v3879_v50 = vpop.f32.mrb[37].mxu1 }
 0x5c1   : > { %v3888_v20 = vcombine.low %v3836_v14, %v3838_v16  ;;  %v3889_v21 = vcombine.low %v3877_v15, %v3879_v50  ;;  %v3840_v30 = vpop.f32.mrb[38].mxu0  ;;  %v3881_v35 = vpop.f32.mrb[38].mxu1 }
 0x5c2   : > { %v7410_v36 = vpop.eup %7409  ;;  %v3841_v37 = vpop.f32.mrb[39].mxu0 }
 0x5c3   : > { %v3882_v54 = vpop.f32.mrb[39].mxu1  ;;  %v7412_v61 = vpop.eup %7411  ;;  %v3896_v4 = vrot.slane %v3888_v20, %v8155_v33  ;;  %v3903_v26 = vrot.slane %v3889_v21, %v8155_v33 }
 0x5c4   : > { %v7414_v32 = vpop.eup %7413  ;;  %v3935_v60 = vmul.f32 %v7412_v61, %v7410_v36 }
 0x5c5   : > { %v3934_v25 = vmul.f32 %v7414_v32, %v3907_v63  ;;  %v3904_v39 = vcombine.low %v3896_v4, %v3903_v26  ;;  %v7416_v48 = vpop.eup %7415  ;;  %v3939_v4 = vld [vmem:[#allocation5] sm:$0x3] }
 0x5c7   : > { %v3936_v40 = vadd.f32 %v3935_v60, %v3934_v25  ;;  %v3906_v41 = vadd.f32 %v3904_v39, %v3607_v22  ;;  %v9246_v25 = vld [vmem:[%s9665_s4 + $0x60] ss:$16 sps:$4 sm:$0xff]   ;;  %v9251_v60 = vld [vmem:[%s9665_s4 + $0x68] ss:$16 sps:$4 sm:$0xff]   ;;  %v9260_v39 = vld [vmem:[%s9665_s4 + $0x84] ss:$16 sps:$4 sm:$0xff]  }
 0x5c9   : > { %7417 = vtanh.f32 %v3936_v40  ;;  %v3987_v43 = vmul.f32 %v3978_v42, %v3936_v40  ;;  %v6611_v44 = vmul.f32 -1.442695, %v3906_v41  ;;  %v3947_v45 = vrot.slane %v3906_v41, 2  ;;  %v9265_v40 = vld [vmem:[%s9665_s4 + $0x8c] ss:$16 sps:$4 sm:$0xff]  }
 0x5ca   : > { %v3958_v47 = vrot.slane %v3906_v41, 6  ;;  %v3955_v15 = vrot.slane %v3906_v41, 4  ;;  %v9270_v41 = vld [vmem:[%s9665_s4 + $0x80] ss:$16 sps:$4 sm:$0xff]  }
 0x5cb   : > { %3988 = vst [vmem:[#allocation3] sm:$0x3] %v3987_v43  ;;  %7419 = vpow2.f32 %v6611_v44  ;;  %v6612_v46 = vmul.f32 -1.442695, %v3947_v45  ;;  %v9284_v43 = vld [vmem:[%s9665_s4 + $0xa4] ss:$16 sps:$4 sm:$0xff]  }
 0x5cc   : > { %v6613_v51 = vmul.f32 -1.442695, %v3958_v47  ;;  %v9289_v44 = vld [vmem:[%s9665_s4 + $0xac] ss:$16 sps:$4 sm:$0xff]   ;;  %v9294_v45 = vld [vmem:[%s9665_s4 + $0xa0] ss:$16 sps:$4 sm:$0xff]  }
 0x5cd   : > { %7421 = vpow2.f32 %v6612_v46  ;;  %v9299_v46 = vld [vmem:[%s9665_s4 + $0xa8] ss:$16 sps:$4 sm:$0xff]   ;;  %v9308_v47 = vld [vmem:[%s9665_s4 + $0xc4] ss:$16 sps:$4 sm:$0xff]  }
 0x5ce   : > { %7423 = vpow2.f32 %v6613_v51  ;;  %v9323_v51 = vld [vmem:[%s9665_s4 + $0xc8] ss:$16 sps:$4 sm:$0xff]  }
 0x5d3   : > { %v7418_v49 = vpop.eup %7417 }
 0x5d4   : > { %v3938_v52 = vmul.f32 %v7418_v49, %v7416_v48  ;;  %v9313_v48 = vld [vmem:[%s9665_s4 + $0xcc] ss:$16 sps:$4 sm:$0xff]   ;;  %v9318_v49 = vld [vmem:[%s9665_s4 + $0xc0] ss:$16 sps:$4 sm:$0xff]  }
 0x5d5   : > { %v7420_v14 = vpop.eup %7419 }
 0x5d6   : > { %v3980_v16 = vmul.f32 %v3978_v42, %v3938_v52  ;;  %v3943_v50 = vadd.f32 1.0, %v7420_v14  ;;  %v9275_v42 = vld [vmem:[%s9665_s4 + $0x88] ss:$16 sps:$4 sm:$0xff]   ;;  %v9332_v52 = vld [vmem:[%s9665_s4 + $0xe4] ss:$16 sps:$4 sm:$0xff]  }
 0x5d7   : > { %v7422_v17 = vpop.eup %7421  ;;  %v9337_v14 = vld [vmem:[%s9665_s4 + $0xec] ss:$16 sps:$4 sm:$0xff]  }
 0x5d8   : > { %v3993_v20 = vpack.c.bf16 %v3980_v16, %v3980_v16  ;;  %3989 = vst [vmem:[#allocation2] sm:$0x3] %v3980_v16  ;;  %7425 = vrcp.f32 %v3943_v50  ;;  %v3952_v21 = vadd.f32 1.0, %v7422_v17  ;;  %v7424_v36 = vpop.eup %7423  ;;  %v9347_v16 = vld [vmem:[%s9665_s4 + $0xe8] ss:$16 sps:$4 sm:$0xff]  }
 0x5d9   : > { %7427 = vtanh.f32 %v3955_v15  ;;  %v3963_v22 = vadd.f32 1.0, %v7424_v36  ;;  %v9342_v15 = vld [vmem:[%s9665_s4 + $0xe0] ss:$16 sps:$4 sm:$0xff]   ;;  %v9356_v50 = vld [vmem:[%s9666_s5 + $0x4] ss:$16 sps:$4 sm:$0xff]  }
 0x5da   : > { %6616 = vst [vmem:[%s7691_s12 + $0x4] sm:$0x1] %v3993_v20  ;;  %7429 = vrcp.f32 %v3952_v21  ;;  %v9361_v17 = vld [vmem:[%s9666_s5 + $0xc] ss:$16 sps:$4 sm:$0xff]  }
 0x5db   : > { %7431 = vrcp.f32 %v3963_v22 }
 0x5df   : > { %v4002_v30 = vld [vmem:[#allocation2] sm:$0x3] }
 0x5e0   : > { %v4003_v35 = vpack.c.bf16 %v4002_v30, %v4002_v30 }
 0x5e2   : > { %v7426_v37 = vpop.eup %7425  ;;  %4229 = vmatmul.mubr.bf16.vlgmr.msra.gmra.mrb[40].mxu0 %v4003_v35  ;;  %4270 = vmatmul.mubr.bf16.vlgmr.msra.gmra.mrb[40].mxu1 %v4003_v35 }
 0x5e3   : > { %v7428_v54 = vpop.eup %7427  ;;  %4499 = vmatpush1.bf16.msra.mxu0 %v8897_v38  ;;  %4540 = vmatpush1.bf16.msra.mxu1 %v8902_v55  ;;  %v3984_v38 = vpop.permute.xlu1 %3983 }
 0x5e4   : > { %v7430_v61 = vpop.eup %7429  ;;  %4500 = vmatprep.subr.bf16.mxu0 %v8907_v58  ;;  %4541 = vmatprep.subr.bf16.mxu1 %v8912_v59  ;;  %v3967_v32 = vmul.f32 %v7428_v54, %v7426_v37 }
 0x5e5   : > { %v3966_v26 = vmul.f32 %v7430_v61, %v3939_v4  ;;  %4530 = vmatprep.mubr.bf16.mxu0 %v9700_v9  ;;  %4571 = vmatprep.mubr.bf16.mxu1 %v9700_v9  ;;  %v7432_v58 = vpop.eup %7431 }
 0x5e7   : > { %v3968_v63 = vadd.f32 %v3967_v32, %v3966_v26  ;;  %4501 = vmatpush1.bf16.msra.mxu0 %v8919_v27  ;;  %4542 = vmatpush1.bf16.msra.mxu1 %v8924_v28  ;;  %v9719_v27 = vld [vmem:[#allocation12_spill] sm:$0xff]  ;;  %v4001_v32 = vunpack.c.h.bf16 %v9114_v57 }
 0x5e8   : > { %4502 = vmatprep.subr.bf16.mxu0 %v8931_v10  ;;  %4543 = vmatprep.subr.bf16.mxu1 %v8936_v34  ;;  %v9720_v10 = vld [vmem:[#allocation13_spill] sm:$0xff] }
 0x5e9   : > { %7433 = vtanh.f32 %v3968_v63  ;;  %v3990_v55 = vmul.f32 %v3984_v38, %v3968_v63 }
 0x5eb   : > { %3991 = vst [vmem:[#allocation5] sm:$0x3] %v3990_v55  ;;  %4503 = vmatpush1.bf16.msra.mxu0 %v8945_v3  ;;  %4544 = vmatpush1.bf16.msra.mxu1 %v8950_v62  ;;  %v9721_v62 = vld [vmem:[#allocation8_spill] sm:$0xff] }
 0x5ec   : > { %4504 = vmatprep.subr.bf16.mxu0 %v8957_v19  ;;  %4545 = vmatprep.subr.bf16.mxu1 %v8962_v8  ;;  %v9722_v19 = vld [vmem:[#allocation9_spill] sm:$0xff] }
 0x5ef   : > { %4505 = vmatpush1.bf16.msra.mxu0 %v8969_v13  ;;  %4546 = vmatpush1.bf16.msra.mxu1 %v8974_v53  ;;  %v9164_v53 = vld [vmem:[%s9665_s4 + $0x4] ss:$16 sps:$4 sm:$0xff]  }
 0x5f0   : > { %4506 = vmatprep.subr.bf16.mxu0 %v8981_v2  ;;  %4547 = vmatprep.subr.bf16.mxu1 %v8986_v7  ;;  %v9169_v2 = vld [vmem:[%s9665_s4 + $0xc] ss:$16 sps:$4 sm:$0xff]   ;;  %v9174_v7 = vld [vmem:[%s9665_s4] ss:$16 sps:$4 sm:$0xff]  }
 0x5f3   : > { %v7434_v59 = vpop.eup %7433  ;;  %4507 = vmatpush1.bf16.msra.mxu0 %v8993_v56  ;;  %4548 = vmatpush1.bf16.msra.mxu1 %v9719_v27  ;;  %v9179_v56 = vld [vmem:[%s9665_s4 + $0x8] ss:$16 sps:$4 sm:$0xff]  }
 0x5f4   : > { %v3970_v28 = vmul.f32 %v7434_v59, %v7432_v58  ;;  %4508 = vmatprep.subr.bf16.mxu0 %v9005_v1  ;;  %4549 = vmatprep.subr.bf16.mxu1 %v9720_v10  ;;  %v9188_v1 = vld [vmem:[%s9665_s4 + $0x24] ss:$16 sps:$4 sm:$0xff]  }
 0x5f6   : > { %v3986_v34 = vmul.f32 %v3984_v38, %v3970_v28 }
 0x5f7   : > { %4509 = vmatpush1.bf16.msra.mxu0 %v9017_v31  ;;  %4550 = vmatpush1.bf16.msra.mxu1 %v9022_v18  ;;  %v9193_v31 = vld [vmem:[%s9665_s4 + $0x2c] ss:$16 sps:$4 sm:$0xff]   ;;  %v9198_v18 = vld [vmem:[%s9665_s4 + $0x20] ss:$16 sps:$4 sm:$0xff]  }
 0x5f8   : > { %v3996_v3 = vpack.c.bf16 %v3986_v34, %v3986_v34  ;;  %3992 = vst [vmem:[#allocation4] sm:$0x3] %v3986_v34  ;;  %4510 = vmatprep.subr.bf16.mxu0 %v9029_v24  ;;  %4551 = vmatprep.subr.bf16.mxu1 %v9721_v62  ;;  %v9203_v24 = vld [vmem:[%s9665_s4 + $0x28] ss:$16 sps:$4 sm:$0xff]  }
 0x5fa   : > { %6617 = vst [vmem:[%s7706_s0 + $0x3] sm:$0x1] %v3996_v3 }
 0x5fb   : > { %4511 = vmatpush1.bf16.msra.mxu0 %v9041_v5  ;;  %4552 = vmatpush1.bf16.msra.mxu1 %v9722_v19  ;;  %v9217_v5 = vld [vmem:[%s9665_s4 + $0x4c] ss:$16 sps:$4 sm:$0xff]  }
 0x5fc   : > { %4512 = vmatprep.subr.bf16.mxu0 %v9053_v6  ;;  %4553 = vmatprep.subr.bf16.mxu1 %v9058_v23  ;;  %v9222_v6 = vld [vmem:[%s9665_s4 + $0x40] ss:$16 sps:$4 sm:$0xff]   ;;  %v9227_v23 = vld [vmem:[%s9665_s4 + $0x48] ss:$16 sps:$4 sm:$0xff]  }
 0x5ff   : > { %4513 = vmatpush1.bf16.msra.mxu0 %v9066_v0  ;;  %4554 = vmatpush1.bf16.msra.mxu1 %v9071_v11  ;;  %v4304_v8 = vld [vmem:[#allocation4] sm:$0x3] }
 0x600   : > { %v4305_v13 = vpack.c.bf16 %v4304_v8, %v4304_v8  ;;  %4892 = vmatprep.subr.bf16.mxu0 %v9164_v53  ;;  %4933 = vmatprep.subr.bf16.mxu1 %v9169_v2  ;;  %v9212_v11 = vld [vmem:[%s9665_s4 + $0x44] ss:$16 sps:$4 sm:$0xff]  }
 0x601   : > { %v9236_v0 = vld [vmem:[%s9665_s4 + $0x64] ss:$16 sps:$4 sm:$0xff]  }
 0x602   : > { %4531 = vmatmul.mubr.bf16.vlgmr.msra.gmra.mrb[44].mxu0 %v4305_v13  ;;  %4572 = vmatmul.mubr.bf16.vlgmr.msra.gmra.mrb[44].mxu1 %v4305_v13 }
 0x603   : > { %4924 = vmatprep.mubr.bf16.mxu0 %v9700_v9  ;;  %4965 = vmatprep.mubr.bf16.mxu1 %v9700_v9 }
 0x604   : > { %4893 = vmatpush1.bf16.msra.mxu0 %v9174_v7  ;;  %4934 = vmatpush1.bf16.msra.mxu1 %v9179_v56 }
 0x605   : > { %4894 = vmatprep.subr.bf16.mxu0 %v9188_v1  ;;  %4935 = vmatprep.subr.bf16.mxu1 %v9193_v31 }
 0x608   : > { %4895 = vmatpush1.bf16.msra.mxu0 %v9198_v18  ;;  %4936 = vmatpush1.bf16.msra.mxu1 %v9203_v24 }
 0x609   : > { %4896 = vmatprep.subr.bf16.mxu0 %v9212_v11  ;;  %4937 = vmatprep.subr.bf16.mxu1 %v9217_v5 }
 0x60c   : > { %4897 = vmatpush1.bf16.msra.mxu0 %v9222_v6  ;;  %4938 = vmatpush1.bf16.msra.mxu1 %v9227_v23 }
 0x60d   : > { %4898 = vmatprep.subr.bf16.mxu0 %v9236_v0  ;;  %4939 = vmatprep.subr.bf16.mxu1 %v9241_v29 }
 0x610   : > { %4899 = vmatpush1.bf16.msra.mxu0 %v9246_v25  ;;  %4940 = vmatpush1.bf16.msra.mxu1 %v9251_v60 }
 0x611   : > { %4900 = vmatprep.subr.bf16.mxu0 %v9260_v39  ;;  %4941 = vmatprep.subr.bf16.mxu1 %v9265_v40 }
 0x614   : > { %4901 = vmatpush1.bf16.msra.mxu0 %v9270_v41  ;;  %4942 = vmatpush1.bf16.msra.mxu1 %v9275_v42 }
 0x615   : > { %4902 = vmatprep.subr.bf16.mxu0 %v9284_v43  ;;  %4943 = vmatprep.subr.bf16.mxu1 %v9289_v44 }
 0x618   : > { %4903 = vmatpush1.bf16.msra.mxu0 %v9294_v45  ;;  %4944 = vmatpush1.bf16.msra.mxu1 %v9299_v46 }
 0x619   : > { %4904 = vmatprep.subr.bf16.mxu0 %v9308_v47  ;;  %4945 = vmatprep.subr.bf16.mxu1 %v9313_v48 }
 0x61c   : > { %4905 = vmatpush1.bf16.msra.mxu0 %v9318_v49  ;;  %4946 = vmatpush1.bf16.msra.mxu1 %v9323_v51 }
 0x61d   : > { %4906 = vmatprep.subr.bf16.mxu0 %v9332_v52  ;;  %4947 = vmatprep.subr.bf16.mxu1 %v9337_v14 }
 0x620   : > { %4907 = vmatpush1.bf16.msra.mxu0 %v9342_v15  ;;  %4948 = vmatpush1.bf16.msra.mxu1 %v9347_v16 }
 0x621   : > { %5194 = vmatprep.subr.bf16.mxu0 %v9356_v50  ;;  %5235 = vmatprep.subr.bf16.mxu1 %v9361_v17 }
 0x6b5   : > { %v4230_v20 = vpop.f32.mrb[40].mxu0  ;;  %v4271_v21 = vpop.f32.mrb[40].mxu1 }
 0x6b6   : > { %v4232_v30 = vpop.f32.mrb[41].mxu0  ;;  %v4273_v35 = vpop.f32.mrb[41].mxu1 }
 0x6b7   : > { %v4282_v36 = vcombine.low %v4230_v20, %v4232_v30  ;;  %v4283_v37 = vcombine.low %v4271_v21, %v4273_v35  ;;  %v4234_v54 = vpop.f32.mrb[42].mxu0  ;;  %v4275_v61 = vpop.f32.mrb[42].mxu1 }
 0x6b8   : > { %v4235_v4 = vpop.f32.mrb[43].mxu0  ;;  %v4276_v22 = vpop.f32.mrb[43].mxu1 }
 0x6b9   : > { %v4290_v26 = vrot.slane %v4282_v36, %v8155_v33  ;;  %v4297_v63 = vrot.slane %v4283_v37, %v8155_v33 }
 0x6bb   : > { %v4298_v38 = vcombine.low %v4290_v26, %v4297_v63  ;;  %v4303_v63 = vunpack.c.l.bf16 %v9120_v12 }
 0x6bd   : > { %v4300_v55 = vadd.f32 %v4298_v38, %v4001_v32 }
 0x6bf   : > { %v6684_v58 = vmul.f32 -1.442695, %v4300_v55  ;;  %v4611_v59 = vrot.slane %v4300_v55, 2  ;;  %v4622_v28 = vrot.slane %v4300_v55, 6  ;;  %v4619_v3 = vrot.slane %v4300_v55, 4 }
 0x6c1   : > { %7435 = vpow2.f32 %v6684_v58  ;;  %v6685_v27 = vmul.f32 -1.442695, %v4611_v59  ;;  %v6686_v10 = vmul.f32 -1.442695, %v4622_v28  ;;  %v4603_v58 = vld [vmem:[#allocation3] sm:$0x3] }
 0x6c3   : > { %7437 = vpow2.f32 %v6685_v27 }
 0x6c4   : > { %7439 = vpow2.f32 %v6686_v10 }
 0x6cb   : > { %v7436_v34 = vpop.eup %7435 }
 0x6cc   : > { %v4607_v62 = vadd.f32 1.0, %v7436_v34 }
 0x6cd   : > { %v7438_v19 = vpop.eup %7437 }
 0x6ce   : > { %7441 = vrcp.f32 %v4607_v62  ;;  %v4616_v8 = vadd.f32 1.0, %v7438_v19  ;;  %v7440_v30 = vpop.eup %7439  ;;  %v4674_v62 = vpop.permute.xlu0 %4673 }
 0x6cf   : > { %7443 = vtanh.f32 %v4619_v3  ;;  %v4627_v59 = vadd.f32 1.0, %v7440_v30 }
 0x6d0   : > { %7445 = vrcp.f32 %v4616_v8 }
 0x6d1   : > { %7447 = vrcp.f32 %v4627_v59  ;;  %v9390_v59 = vld [vmem:[%s9666_s5 + $0x2c] ss:$16 sps:$4 sm:$0xff]  }
 0x6d5   : > { %v4532_v57 = vpop.f32.mrb[44].mxu0  ;;  %v4573_v13 = vpop.f32.mrb[44].mxu1 }
 0x6d6   : > { %v4534_v20 = vpop.f32.mrb[45].mxu0  ;;  %v4575_v21 = vpop.f32.mrb[45].mxu1 }
 0x6d7   : > { %v4584_v35 = vcombine.low %v4532_v57, %v4534_v20  ;;  %v4585_v36 = vcombine.low %v4573_v13, %v4575_v21  ;;  %v4536_v37 = vpop.f32.mrb[46].mxu0  ;;  %v4577_v54 = vpop.f32.mrb[46].mxu1 }
 0x6d8   : > { %v7442_v61 = vpop.eup %7441  ;;  %v4537_v4 = vpop.f32.mrb[47].mxu0 }
 0x6d9   : > { %v4578_v22 = vpop.f32.mrb[47].mxu1  ;;  %v7444_v26 = vpop.eup %7443  ;;  %v4592_v32 = vrot.slane %v4584_v35, %v8155_v33  ;;  %v4599_v38 = vrot.slane %v4585_v36, %v8155_v33 }
 0x6da   : > { %v7446_v55 = vpop.eup %7445  ;;  %v4631_v28 = vmul.f32 %v7444_v26, %v7442_v61 }
 0x6db   : > { %v4630_v27 = vmul.f32 %v7446_v55, %v4603_v58  ;;  %v4600_v10 = vcombine.low %v4592_v32, %v4599_v38  ;;  %v7448_v20 = vpop.eup %7447  ;;  %v9380_v38 = vld [vmem:[%s9666_s5 + $0x8] ss:$16 sps:$4 sm:$0xff]   ;;  %v9385_v58 = vld [vmem:[%s9666_s5 + $0x24] ss:$16 sps:$4 sm:$0xff]  }
 0x6dd   : > { %v4632_v34 = vadd.f32 %v4631_v28, %v4630_v27  ;;  %v4602_v3 = vadd.f32 %v4600_v10, %v4303_v63  ;;  %v9375_v63 = vld [vmem:[%s9666_s5] ss:$16 sps:$4 sm:$0xff]  }
 0x6df   : > { %7449 = vtanh.f32 %v4632_v34  ;;  %v4683_v19 = vmul.f32 %v4674_v62, %v4632_v34  ;;  %v6687_v8 = vmul.f32 -1.442695, %v4602_v3  ;;  %v4643_v57 = vrot.slane %v4602_v3, 2  ;;  %v4635_v34 = vld [vmem:[#allocation5] sm:$0x3] }
 0x6e0   : > { %v4654_v12 = vrot.slane %v4602_v3, 6  ;;  %v4651_v37 = vrot.slane %v4602_v3, 4  ;;  %v9397_v3 = vld [vmem:[%s9666_s5 + $0x20] ss:$16 sps:$4 sm:$0xff]  }
 0x6e1   : > { %4684 = vst [vmem:[#allocation3] sm:$0x3] %v4683_v19  ;;  %7451 = vpow2.f32 %v6687_v8  ;;  %v6688_v13 = vmul.f32 -1.442695, %v4643_v57  ;;  %v9409_v57 = vld [vmem:[%s9666_s5 + $0x44] ss:$16 sps:$4 sm:$0xff]  }
 0x6e2   : > { %v6689_v30 = vmul.f32 -1.442695, %v4654_v12 }
 0x6e3   : > { %7453 = vpow2.f32 %v6688_v13  ;;  %v9414_v13 = vld [vmem:[%s9666_s5 + $0x4c] ss:$16 sps:$4 sm:$0xff]  }
 0x6e4   : > { %7455 = vpow2.f32 %v6689_v30  ;;  %v9423_v30 = vld [vmem:[%s9666_s5 + $0x40] ss:$16 sps:$4 sm:$0xff]  }
 0x6e9   : > { %v7450_v21 = vpop.eup %7449 }
 0x6ea   : > { %v4634_v35 = vmul.f32 %v7450_v21, %v7448_v20 }
 0x6eb   : > { %v7452_v36 = vpop.eup %7451 }
 0x6ec   : > { %v4676_v54 = vmul.f32 %v4674_v62, %v4634_v35  ;;  %v4639_v61 = vadd.f32 1.0, %v7452_v36  ;;  %v9402_v62 = vld [vmem:[%s9666_s5 + $0x28] ss:$16 sps:$4 sm:$0xff]   ;;  %v4680_v36 = vpop.permute.xlu1 %4679 }
 0x6ed   : > { %v7454_v4 = vpop.eup %7453  ;;  %v9428_v35 = vld [vmem:[%s9666_s5 + $0x48] ss:$16 sps:$4 sm:$0xff]  }
 0x6ee   : > { %v4689_v22 = vpack.c.bf16 %v4676_v54, %v4676_v54  ;;  %4685 = vst [vmem:[#allocation2] sm:$0x3] %v4676_v54  ;;  %7457 = vrcp.f32 %v4639_v61  ;;  %v4648_v26 = vadd.f32 1.0, %v7454_v4  ;;  %v7456_v27 = vpop.eup %7455  ;;  %v9440_v54 = vld [vmem:[%s9666_s5 + $0x6c] ss:$16 sps:$4 sm:$0xff]  }
 0x6ef   : > { %7459 = vtanh.f32 %v4651_v37  ;;  %v4659_v8 = vadd.f32 1.0, %v7456_v27  ;;  %v9435_v37 = vld [vmem:[%s9666_s5 + $0x64] ss:$16 sps:$4 sm:$0xff]   ;;  %v9447_v4 = vld [vmem:[%s9666_s5 + $0x60] ss:$16 sps:$4 sm:$0xff]  }
 0x6f0   : > { %6692 = vst [vmem:[%s7691_s12 + $0x5] sm:$0x1] %v4689_v22  ;;  %7461 = vrcp.f32 %v4648_v26  ;;  %v9452_v22 = vld [vmem:[%s9666_s5 + $0x68] ss:$16 sps:$4 sm:$0xff]   ;;  %v9459_v26 = vld [vmem:[%s9666_s5 + $0x84] ss:$16 sps:$4 sm:$0xff]  }
 0x6f1   : > { %7463 = vrcp.f32 %v4659_v8  ;;  %v9476_v27 = vld [vmem:[%s9666_s5 + $0x88] ss:$16 sps:$4 sm:$0xff]   ;;  %v9495_v8 = vld [vmem:[%s9666_s5 + $0xa0] ss:$16 sps:$4 sm:$0xff]  }
 0x6f2   : > { %9723 = vst [vmem:[#allocation10_spill] sm:$0xff] %v9476_v27 }
 0x6f5   : > { %v4698_v32 = vld [vmem:[#allocation2] sm:$0x3] }
 0x6f6   : > { %v4699_v55 = vpack.c.bf16 %v4698_v32, %v4698_v32  ;;  %v9464_v32 = vld [vmem:[%s9666_s5 + $0x8c] ss:$16 sps:$4 sm:$0xff]  }
 0x6f8   : > { %v7458_v28 = vpop.eup %7457  ;;  %4925 = vmatmul.mubr.bf16.vlgmr.msra.gmra.mrb[48].mxu0 %v4699_v55  ;;  %4966 = vmatmul.mubr.bf16.vlgmr.msra.gmra.mrb[48].mxu1 %v4699_v55  ;;  %v9471_v55 = vld [vmem:[%s9666_s5 + $0x80] ss:$16 sps:$4 sm:$0xff]  }
 0x6f9   : > { %v7460_v10 = vpop.eup %7459  ;;  %5195 = vmatpush1.bf16.msra.mxu0 %v9375_v63  ;;  %5236 = vmatpush1.bf16.msra.mxu1 %v9380_v38 }
 0x6fa   : > { %v7462_v19 = vpop.eup %7461  ;;  %5196 = vmatprep.subr.bf16.mxu0 %v9385_v58  ;;  %5237 = vmatprep.subr.bf16.mxu1 %v9390_v59  ;;  %v4663_v20 = vmul.f32 %v7460_v10, %v7458_v28  ;;  %v9483_v28 = vld [vmem:[%s9666_s5 + $0xa4] ss:$16 sps:$4 sm:$0xff]   ;;  %v9488_v10 = vld [vmem:[%s9666_s5 + $0xac] ss:$16 sps:$4 sm:$0xff]  }
 0x6fb   : > { %v4662_v12 = vmul.f32 %v7462_v19, %v4635_v34  ;;  %5226 = vmatprep.mubr.bf16.mxu0 %v9700_v9  ;;  %5267 = vmatprep.mubr.bf16.mxu1 %v9700_v9  ;;  %9724 = vst [vmem:[#allocation11_spill] sm:$0xff] %v9488_v10  ;;  %v7464_v34 = vpop.eup %7463 }
 0x6fd   : > { %v4664_v21 = vadd.f32 %v4663_v20, %v4662_v12  ;;  %5197 = vmatpush1.bf16.msra.mxu0 %v9397_v3  ;;  %5238 = vmatpush1.bf16.msra.mxu1 %v9402_v62  ;;  %v9500_v12 = vld [vmem:[%s9666_s5 + $0xa8] ss:$16 sps:$4 sm:$0xff]  }
 0x6fe   : > { %5198 = vmatprep.subr.bf16.mxu0 %v9409_v57  ;;  %5239 = vmatprep.subr.bf16.mxu1 %v9414_v13 }
 0x6ff   : > { %7465 = vtanh.f32 %v4664_v21  ;;  %v4686_v61 = vmul.f32 %v4680_v36, %v4664_v21  ;;  %v9507_v21 = vld [vmem:[%s9666_s5 + $0xc4] ss:$16 sps:$4 sm:$0xff]  }
 0x701   : > { %4687 = vst [vmem:[#allocation5] sm:$0x3] %v4686_v61  ;;  %5199 = vmatpush1.bf16.msra.mxu0 %v9423_v30  ;;  %5240 = vmatpush1.bf16.msra.mxu1 %v9428_v35  ;;  %v9512_v61 = vld [vmem:[%s9666_s5 + $0xcc] ss:$16 sps:$4 sm:$0xff]  }
 0x702   : > { %5200 = vmatprep.subr.bf16.mxu0 %v9435_v37  ;;  %5241 = vmatprep.subr.bf16.mxu1 %v9440_v54  ;;  %9725 = vst [vmem:[#allocation12_spill] sm:$0xff] %v9512_v61 }
 0x705   : > { %5201 = vmatpush1.bf16.msra.mxu0 %v9447_v4  ;;  %5242 = vmatpush1.bf16.msra.mxu1 %v9452_v22 }
 0x706   : > { %5202 = vmatprep.subr.bf16.mxu0 %v9459_v26  ;;  %5243 = vmatprep.subr.bf16.mxu1 %v9464_v32 }
 0x709   : > { %v7466_v19 = vpop.eup %7465  ;;  %5203 = vmatpush1.bf16.msra.mxu0 %v9471_v55  ;;  %5244 = vmatpush1.bf16.msra.mxu1 %v9476_v27 }
 0x70a   : > { %v4666_v20 = vmul.f32 %v7466_v19, %v7464_v34  ;;  %5204 = vmatprep.subr.bf16.mxu0 %v9483_v28  ;;  %5245 = vmatprep.subr.bf16.mxu1 %v9488_v10  ;;  %v9519_v34 = vld [vmem:[%s9666_s5 + $0xc0] ss:$16 sps:$4 sm:$0xff]   ;;  %v9524_v19 = vld [vmem:[%s9666_s5 + $0xc8] ss:$16 sps:$4 sm:$0xff]  }
 0x70b   : > { %9726 = vst [vmem:[#allocation13_spill] sm:$0xff] %v9524_v19 }
 0x70c   : > { %v4682_v27 = vmul.f32 %v4680_v36, %v4666_v20  ;;  %v9531_v36 = vld [vmem:[%s9666_s5 + $0xe4] ss:$16 sps:$4 sm:$0xff]   ;;  %v9536_v20 = vld [vmem:[%s9666_s5 + $0xec] ss:$16 sps:$4 sm:$0xff]  }
 0x70d   : > { %5205 = vmatpush1.bf16.msra.mxu0 %v9495_v8  ;;  %5246 = vmatpush1.bf16.msra.mxu1 %v9500_v12 }
 0x70e   : > { %v4692_v10 = vpack.c.bf16 %v4682_v27, %v4682_v27  ;;  %4688 = vst [vmem:[#allocation4] sm:$0x3] %v4682_v27  ;;  %5206 = vmatprep.subr.bf16.mxu0 %v9507_v21  ;;  %5247 = vmatprep.subr.bf16.mxu1 %v9512_v61  ;;  %v9544_v27 = vld [vmem:[%s9666_s5 + $0xe0] ss:$16 sps:$4 sm:$0xff]   ;;  %v9549_v61 = vld [vmem:[%s9666_s5 + $0xe8] ss:$16 sps:$4 sm:$0xff]  }
 0x710   : > { %6693 = vst [vmem:[%s7706_s0 + $0x2] sm:$0x1] %v4692_v10 }
 0x711   : > { %5207 = vmatpush1.bf16.msra.mxu0 %v9519_v34  ;;  %5248 = vmatpush1.bf16.msra.mxu1 %v9524_v19 }
 0x712   : > { %5208 = vmatprep.subr.bf16.mxu0 %v9531_v36  ;;  %5249 = vmatprep.subr.bf16.mxu1 %v9536_v20 }
 0x715   : > { %5209 = vmatpush1.bf16.msra.mxu0 %v9544_v27  ;;  %5250 = vmatpush1.bf16.msra.mxu1 %v9549_v61  ;;  %v5000_v10 = vld [vmem:[#allocation4] sm:$0x3] }
 0x716   : > { %v5001_v19 = vpack.c.bf16 %v5000_v10, %v5000_v10  ;;  %5588 = vmatprep.subr.bf16.mxu0 %v9164_v53  ;;  %5629 = vmatprep.subr.bf16.mxu1 %v9169_v2 }
 0x718   : > { %5227 = vmatmul.mubr.bf16.vlgmr.msra.gmra.mrb[52].mxu0 %v5001_v19  ;;  %5268 = vmatmul.mubr.bf16.vlgmr.msra.gmra.mrb[52].mxu1 %v5001_v19 }
 0x719   : > { %5589 = vmatpush1.bf16.msra.mxu0 %v9174_v7  ;;  %5630 = vmatpush1.bf16.msra.mxu1 %v9179_v56  ;;  %v9592_v56 = vld [vmem:[%s7708_s1 + $0x18] sm:$0xff]  }
 0x71a   : > { %5590 = vmatprep.subr.bf16.mxu0 %v9188_v1  ;;  %5631 = vmatprep.subr.bf16.mxu1 %v9193_v31 }
 0x71b   : > { %5620 = vmatprep.mubr.bf16.mxu0 %v9700_v9  ;;  %5661 = vmatprep.mubr.bf16.mxu1 %v9700_v9 }
 0x71d   : > { %5591 = vmatpush1.bf16.msra.mxu0 %v9198_v18  ;;  %5632 = vmatpush1.bf16.msra.mxu1 %v9203_v24 }
 0x71e   : > { %5592 = vmatprep.subr.bf16.mxu0 %v9212_v11  ;;  %5633 = vmatprep.subr.bf16.mxu1 %v9217_v5 }
 0x721   : > { %5593 = vmatpush1.bf16.msra.mxu0 %v9222_v6  ;;  %5634 = vmatpush1.bf16.msra.mxu1 %v9227_v23 }
 0x722   : > { %5594 = vmatprep.subr.bf16.mxu0 %v9236_v0  ;;  %5635 = vmatprep.subr.bf16.mxu1 %v9241_v29  ;;  %v4697_v0 = vunpack.c.l.bf16 %v9592_v56 }
 0x725   : > { %5595 = vmatpush1.bf16.msra.mxu0 %v9246_v25  ;;  %5636 = vmatpush1.bf16.msra.mxu1 %v9251_v60 }
 0x726   : > { %5596 = vmatprep.subr.bf16.mxu0 %v9260_v39  ;;  %5637 = vmatprep.subr.bf16.mxu1 %v9265_v40 }
 0x729   : > { %5597 = vmatpush1.bf16.msra.mxu0 %v9270_v41  ;;  %5638 = vmatpush1.bf16.msra.mxu1 %v9275_v42 }
 0x72a   : > { %5598 = vmatprep.subr.bf16.mxu0 %v9284_v43  ;;  %5639 = vmatprep.subr.bf16.mxu1 %v9289_v44 }
 0x72d   : > { %5599 = vmatpush1.bf16.msra.mxu0 %v9294_v45  ;;  %5640 = vmatpush1.bf16.msra.mxu1 %v9299_v46 }
 0x72e   : > { %5600 = vmatprep.subr.bf16.mxu0 %v9308_v47  ;;  %5641 = vmatprep.subr.bf16.mxu1 %v9313_v48 }
 0x731   : > { %5601 = vmatpush1.bf16.msra.mxu0 %v9318_v49  ;;  %5642 = vmatpush1.bf16.msra.mxu1 %v9323_v51 }
 0x732   : > { %5602 = vmatprep.subr.bf16.mxu0 %v9332_v52  ;;  %5643 = vmatprep.subr.bf16.mxu1 %v9337_v14  ;;  %v9598_v14 = vld [vmem:[%s7710_s21] sm:$0xff]  }
 0x735   : > { %5603 = vmatpush1.bf16.msra.mxu0 %v9342_v15  ;;  %5644 = vmatpush1.bf16.msra.mxu1 %v9347_v16 }
 0x736   : > { %5889 = vmatprep.subr.bf16.mxu0 %v9356_v50  ;;  %5930 = vmatprep.subr.bf16.mxu1 %v9361_v17 }
 0x7cb   : > { %v4926_v53 = vpop.f32.mrb[48].mxu0  ;;  %v4967_v2 = vpop.f32.mrb[48].mxu1 }
 0x7cc   : > { %v4928_v7 = vpop.f32.mrb[49].mxu0  ;;  %v4969_v1 = vpop.f32.mrb[49].mxu1 }
 0x7cd   : > { %v4978_v31 = vcombine.low %v4926_v53, %v4928_v7  ;;  %v4979_v18 = vcombine.low %v4967_v2, %v4969_v1  ;;  %v4930_v24 = vpop.f32.mrb[50].mxu0  ;;  %v4971_v11 = vpop.f32.mrb[50].mxu1 }
 0x7ce   : > { %v4931_v5 = vpop.f32.mrb[51].mxu0  ;;  %v4972_v6 = vpop.f32.mrb[51].mxu1 }
 0x7cf   : > { %v4986_v23 = vrot.slane %v4978_v31, %v8155_v33  ;;  %v4993_v29 = vrot.slane %v4979_v18, %v8155_v33  ;;  %v4999_v18 = vunpack.c.h.bf16 %v9598_v14  ;;  %v5299_v5 = vld [vmem:[#allocation3] sm:$0x3] }
 0x7d1   : > { %v4994_v25 = vcombine.low %v4986_v23, %v4993_v29 }
 0x7d3   : > { %v4996_v60 = vadd.f32 %v4994_v25, %v4697_v0 }
 0x7d5   : > { %v6760_v39 = vmul.f32 -1.442695, %v4996_v60  ;;  %v5307_v40 = vrot.slane %v4996_v60, 2  ;;  %v5318_v42 = vrot.slane %v4996_v60, 6  ;;  %v5315_v45 = vrot.slane %v4996_v60, 4 }
 0x7d7   : > { %7467 = vpow2.f32 %v6760_v39  ;;  %v6761_v41 = vmul.f32 -1.442695, %v5307_v40  ;;  %v6762_v43 = vmul.f32 -1.442695, %v5318_v42  ;;  %v5370_v39 = vpop.permute.xlu0 %5369 }
 0x7d9   : > { %7469 = vpow2.f32 %v6761_v41 }
 0x7da   : > { %7471 = vpow2.f32 %v6762_v43 }
 0x7e1   : > { %v7468_v44 = vpop.eup %7467 }
 0x7e2   : > { %v5303_v46 = vadd.f32 1.0, %v7468_v44 }
 0x7e3   : > { %v7470_v47 = vpop.eup %7469 }
 0x7e4   : > { %7473 = vrcp.f32 %v5303_v46  ;;  %v5312_v48 = vadd.f32 1.0, %v7470_v47  ;;  %v7472_v16 = vpop.eup %7471 }
 0x7e5   : > { %7475 = vtanh.f32 %v5315_v45  ;;  %v5323_v6 = vadd.f32 1.0, %v7472_v16 }
 0x7e6   : > { %7477 = vrcp.f32 %v5312_v48 }
 0x7e7   : > { %7479 = vrcp.f32 %v5323_v6 }
 0x7eb   : > { %v5228_v49 = vpop.f32.mrb[52].mxu0  ;;  %v5269_v51 = vpop.f32.mrb[52].mxu1 }
 0x7ec   : > { %v5230_v52 = vpop.f32.mrb[53].mxu0  ;;  %v5271_v15 = vpop.f32.mrb[53].mxu1 }
 0x7ed   : > { %v5280_v50 = vcombine.low %v5228_v49, %v5230_v52  ;;  %v5281_v17 = vcombine.low %v5269_v51, %v5271_v15  ;;  %v5232_v19 = vpop.f32.mrb[54].mxu0  ;;  %v5273_v10 = vpop.f32.mrb[54].mxu1 }
 0x7ee   : > { %v7474_v53 = vpop.eup %7473  ;;  %v5233_v2 = vpop.f32.mrb[55].mxu0 }
 0x7ef   : > { %v5274_v7 = vpop.f32.mrb[55].mxu1  ;;  %v7476_v1 = vpop.eup %7475  ;;  %v5288_v31 = vrot.slane %v5280_v50, %v8155_v33  ;;  %v5295_v24 = vrot.slane %v5281_v17, %v8155_v33 }
 0x7f0   : > { %v7478_v11 = vpop.eup %7477  ;;  %v5327_v0 = vmul.f32 %v7476_v1, %v7474_v53 }
 0x7f1   : > { %v5326_v23 = vmul.f32 %v7478_v11, %v5299_v5  ;;  %v5296_v29 = vcombine.low %v5288_v31, %v5295_v24  ;;  %v7480_v45 = vpop.eup %7479  ;;  %v5331_v31 = vld [vmem:[#allocation5] sm:$0x3] }
 0x7f3   : > { %v5328_v25 = vadd.f32 %v5327_v0, %v5326_v23  ;;  %v5298_v60 = vadd.f32 %v5296_v29, %v4999_v18 }
 0x7f5   : > { %7481 = vtanh.f32 %v5328_v25  ;;  %v5379_v40 = vmul.f32 %v5370_v39, %v5328_v25  ;;  %v6763_v41 = vmul.f32 -1.442695, %v5298_v60  ;;  %v5339_v42 = vrot.slane %v5298_v60, 2 }
 0x7f6   : > { %v5350_v44 = vrot.slane %v5298_v60, 6  ;;  %v5347_v51 = vrot.slane %v5298_v60, 4 }
 0x7f7   : > { %5380 = vst [vmem:[#allocation3] sm:$0x3] %v5379_v40  ;;  %7483 = vpow2.f32 %v6763_v41  ;;  %v6764_v43 = vmul.f32 -1.442695, %v5339_v42 }
 0x7f8   : > { %v6765_v47 = vmul.f32 -1.442695, %v5350_v44 }
 0x7f9   : > { %7485 = vpow2.f32 %v6764_v43 }
 0x7fa   : > { %7487 = vpow2.f32 %v6765_v47 }
 0x7ff   : > { %v7482_v46 = vpop.eup %7481 }
 0x800   : > { %v5330_v48 = vmul.f32 %v7482_v46, %v7480_v45 }
 0x801   : > { %v7484_v49 = vpop.eup %7483 }
 0x802   : > { %v5372_v52 = vmul.f32 %v5370_v39, %v5330_v48  ;;  %v5335_v15 = vadd.f32 1.0, %v7484_v49 }
 0x803   : > { %v7486_v16 = vpop.eup %7485 }
 0x804   : > { %v5385_v50 = vpack.c.bf16 %v5372_v52, %v5372_v52  ;;  %5381 = vst [vmem:[#allocation2] sm:$0x3] %v5372_v52  ;;  %7489 = vrcp.f32 %v5335_v15  ;;  %v5344_v17 = vadd.f32 1.0, %v7486_v16  ;;  %v7488_v53 = vpop.eup %7487 }
 0x805   : > { %7491 = vtanh.f32 %v5347_v51  ;;  %v5355_v18 = vadd.f32 1.0, %v7488_v53 }
 0x806   : > { %6768 = vst [vmem:[%s7691_s12 + $0x6] sm:$0x1] %v5385_v50  ;;  %7493 = vrcp.f32 %v5344_v17 }
 0x807   : > { %7495 = vrcp.f32 %v5355_v18 }
 0x80b   : > { %v5394_v19 = vld [vmem:[#allocation2] sm:$0x3] }
 0x80c   : > { %v5395_v10 = vpack.c.bf16 %v5394_v19, %v5394_v19 }
 0x80e   : > { %v7490_v2 = vpop.eup %7489  ;;  %5621 = vmatmul.mubr.bf16.vlgmr.msra.gmra.mrb[56].mxu0 %v5395_v10  ;;  %5662 = vmatmul.mubr.bf16.vlgmr.msra.gmra.mrb[56].mxu1 %v5395_v10  ;;  %v5694_v10 = vunpack.c.l.bf16 %v9598_v14 }
 0x80f   : > { %v7492_v7 = vpop.eup %7491  ;;  %5890 = vmatpush1.bf16.msra.mxu0 %v9375_v63  ;;  %5931 = vmatpush1.bf16.msra.mxu1 %v9380_v38  ;;  %v5376_v63 = vpop.permute.xlu1 %5375 }
 0x810   : > { %v7494_v1 = vpop.eup %7493  ;;  %5891 = vmatprep.subr.bf16.mxu0 %v9385_v58  ;;  %5932 = vmatprep.subr.bf16.mxu1 %v9390_v59  ;;  %v5359_v11 = vmul.f32 %v7492_v7, %v7490_v2  ;;  %v9727_v59 = vld [vmem:[#allocation10_spill] sm:$0xff]  ;;  %v5994_v7 = vld [vmem:[#allocation3] sm:$0x3] }
 0x811   : > { %v5358_v24 = vmul.f32 %v7494_v1, %v5331_v31  ;;  %5921 = vmatprep.mubr.bf16.mxu0 %v9700_v9  ;;  %5962 = vmatprep.mubr.bf16.mxu1 %v9700_v9  ;;  %v7496_v9 = vpop.eup %7495 }
 0x813   : > { %v5360_v5 = vadd.f32 %v5359_v11, %v5358_v24  ;;  %5892 = vmatpush1.bf16.msra.mxu0 %v9397_v3  ;;  %5933 = vmatpush1.bf16.msra.mxu1 %v9402_v62  ;;  %v9728_v62 = vld [vmem:[#allocation11_spill] sm:$0xff] }
 0x814   : > { %5893 = vmatprep.subr.bf16.mxu0 %v9409_v57  ;;  %5934 = vmatprep.subr.bf16.mxu1 %v9414_v13 }
 0x815   : > { %7497 = vtanh.f32 %v5360_v5  ;;  %v5382_v38 = vmul.f32 %v5376_v63, %v5360_v5 }
 0x817   : > { %5383 = vst [vmem:[#allocation5] sm:$0x3] %v5382_v38  ;;  %5894 = vmatpush1.bf16.msra.mxu0 %v9423_v30  ;;  %5935 = vmatpush1.bf16.msra.mxu1 %v9428_v35  ;;  %v9729_v30 = vld [vmem:[#allocation12_spill] sm:$0xff]  ;;  %v9730_v35 = vld [vmem:[#allocation13_spill] sm:$0xff] }
 0x818   : > { %5895 = vmatprep.subr.bf16.mxu0 %v9435_v37  ;;  %5936 = vmatprep.subr.bf16.mxu1 %v9440_v54 }
 0x81b   : > { %5896 = vmatpush1.bf16.msra.mxu0 %v9447_v4  ;;  %5937 = vmatpush1.bf16.msra.mxu1 %v9452_v22 }
 0x81c   : > { %5897 = vmatprep.subr.bf16.mxu0 %v9459_v26  ;;  %5938 = vmatprep.subr.bf16.mxu1 %v9464_v32 }
 0x81f   : > { %v7498_v58 = vpop.eup %7497  ;;  %5898 = vmatpush1.bf16.msra.mxu0 %v9471_v55  ;;  %5939 = vmatpush1.bf16.msra.mxu1 %v9727_v59 }
 0x820   : > { %v5362_v3 = vmul.f32 %v7498_v58, %v7496_v9  ;;  %5899 = vmatprep.subr.bf16.mxu0 %v9483_v28  ;;  %5940 = vmatprep.subr.bf16.mxu1 %v9728_v62 }
 0x822   : > { %v5378_v57 = vmul.f32 %v5376_v63, %v5362_v3  ;;  %v6064_v63 = vpop.permute.xlu0 %6063 }
 0x823   : > { %5900 = vmatpush1.bf16.msra.mxu0 %v9495_v8  ;;  %5941 = vmatpush1.bf16.msra.mxu1 %v9500_v12 }
 0x824   : > { %v5388_v13 = vpack.c.bf16 %v5378_v57, %v5378_v57  ;;  %5384 = vst [vmem:[#allocation4] sm:$0x3] %v5378_v57  ;;  %5901 = vmatprep.subr.bf16.mxu0 %v9507_v21  ;;  %5942 = vmatprep.subr.bf16.mxu1 %v9729_v30 }
 0x826   : > { %6769 = vst [vmem:[%s7706_s0 + $0x1] sm:$0x1] %v5388_v13 }
 0x827   : > { %5902 = vmatpush1.bf16.msra.mxu0 %v9519_v34  ;;  %5943 = vmatpush1.bf16.msra.mxu1 %v9730_v35 }
 0x828   : > { %5903 = vmatprep.subr.bf16.mxu0 %v9531_v36  ;;  %5944 = vmatprep.subr.bf16.mxu1 %v9536_v20  ;;  %v5393_v20 = vunpack.c.h.bf16 %v9592_v56 }
 0x82b   : > { %5904 = vmatpush1.bf16.msra.mxu0 %v9544_v27  ;;  %5945 = vmatpush1.bf16.msra.mxu1 %v9549_v61  ;;  %v5695_v37 = vld [vmem:[#allocation4] sm:$0x3] }
 0x82c   : > { %v5696_v54 = vpack.c.bf16 %v5695_v37, %v5695_v37 }
 0x82e   : > { %5922 = vmatmul.mubr.bf16.vlgmr.msra.gmra.mrb[60].mxu0 %v5696_v54  ;;  %5963 = vmatmul.mubr.bf16.vlgmr.msra.gmra.mrb[60].mxu1 %v5696_v54 }
 0x8e1   : > { %v5622_v4 = vpop.f32.mrb[56].mxu0  ;;  %v5663_v22 = vpop.f32.mrb[56].mxu1 }
 0x8e2   : > { %v5624_v26 = vpop.f32.mrb[57].mxu0  ;;  %v5665_v32 = vpop.f32.mrb[57].mxu1 }
 0x8e3   : > { %v5674_v55 = vcombine.low %v5622_v4, %v5624_v26  ;;  %v5675_v28 = vcombine.low %v5663_v22, %v5665_v32  ;;  %v5626_v8 = vpop.f32.mrb[58].mxu0  ;;  %v5667_v12 = vpop.f32.mrb[58].mxu1 }
 0x8e4   : > { %v5627_v21 = vpop.f32.mrb[59].mxu0  ;;  %v5668_v34 = vpop.f32.mrb[59].mxu1  ;;  %v6026_v8 = vld [vmem:[#allocation5] sm:$0x3] }
 0x8e5   : > { %v5682_v36 = vrot.slane %v5674_v55, %v8155_v33  ;;  %v5689_v61 = vrot.slane %v5675_v28, %v8155_v33 }
 0x8e7   : > { %v5690_v27 = vcombine.low %v5682_v36, %v5689_v61 }
 0x8e9   : > { %v5692_v6 = vadd.f32 %v5690_v27, %v5393_v20  ;;  %v6070_v20 = vpop.permute.xlu1 %6069 }
 0x8eb   : > { %v6835_v23 = vmul.f32 -1.442695, %v5692_v6  ;;  %v6002_v0 = vrot.slane %v5692_v6, 2  ;;  %v6013_v25 = vrot.slane %v5692_v6, 6  ;;  %v6010_v40 = vrot.slane %v5692_v6, 4 }
 0x8ed   : > { %7499 = vpow2.f32 %v6835_v23  ;;  %v6836_v29 = vmul.f32 -1.442695, %v6002_v0  ;;  %v6837_v60 = vmul.f32 -1.442695, %v6013_v25 }
 0x8ef   : > { %7501 = vpow2.f32 %v6836_v29 }
 0x8f0   : > { %7503 = vpow2.f32 %v6837_v60 }
 0x8f7   : > { %v7500_v39 = vpop.eup %7499 }
 0x8f8   : > { %v5998_v41 = vadd.f32 1.0, %v7500_v39 }
 0x8f9   : > { %v7502_v42 = vpop.eup %7501 }
 0x8fa   : > { %7505 = vrcp.f32 %v5998_v41  ;;  %v6007_v43 = vadd.f32 1.0, %v7502_v42  ;;  %v7504_v47 = vpop.eup %7503 }
 0x8fb   : > { %7507 = vtanh.f32 %v6010_v40  ;;  %v6018_v1 = vadd.f32 1.0, %v7504_v47 }
 0x8fc   : > { %7509 = vrcp.f32 %v6007_v43 }
 0x8fd   : > { %7511 = vrcp.f32 %v6018_v1 }
 0x901   : > { %v5923_v56 = vpop.f32.mrb[60].mxu0  ;;  %v5964_v44 = vpop.f32.mrb[60].mxu1 }
 0x902   : > { %v5925_v45 = vpop.f32.mrb[61].mxu0  ;;  %v5966_v46 = vpop.f32.mrb[61].mxu1 }
 0x903   : > { %v5975_v48 = vcombine.low %v5923_v56, %v5925_v45  ;;  %v5976_v49 = vcombine.low %v5964_v44, %v5966_v46  ;;  %v5927_v51 = vpop.f32.mrb[62].mxu0  ;;  %v5968_v52 = vpop.f32.mrb[62].mxu1 }
 0x904   : > { %v7506_v15 = vpop.eup %7505  ;;  %v5928_v16 = vpop.f32.mrb[63].mxu0 }
 0x905   : > { %v5969_v50 = vpop.f32.mrb[63].mxu1  ;;  %v7508_v17 = vpop.eup %7507  ;;  %v5983_v19 = vrot.slane %v5975_v48, %v8155_v33  ;;  %v5990_v53 = vrot.slane %v5976_v49, %v8155_v33 }
 0x906   : > { %v7510_v2 = vpop.eup %7509  ;;  %v6022_v18 = vmul.f32 %v7508_v17, %v7506_v15 }
 0x907   : > { %v6021_v31 = vmul.f32 %v7510_v2, %v5994_v7  ;;  %v5991_v24 = vcombine.low %v5983_v19, %v5990_v53  ;;  %v7512_v33 = vpop.eup %7511 }
 0x909   : > { %v6023_v11 = vadd.f32 %v6022_v18, %v6021_v31  ;;  %v5993_v5 = vadd.f32 %v5991_v24, %v5694_v10 }
 0x90b   : > { %7513 = vtanh.f32 %v6023_v11  ;;  %v6073_v38 = vmul.f32 %v6064_v63, %v6023_v11  ;;  %v6838_v9 = vmul.f32 -1.442695, %v5993_v5  ;;  %v6034_v58 = vrot.slane %v5993_v5, 2 }
 0x90c   : > { %v6045_v14 = vrot.slane %v5993_v5, 6  ;;  %v6042_v30 = vrot.slane %v5993_v5, 4 }
 0x90d   : > { %6074 = vst [vmem:[#allocation3] sm:$0x3] %v6073_v38  ;;  %7515 = vpow2.f32 %v6838_v9  ;;  %v6839_v59 = vmul.f32 -1.442695, %v6034_v58 }
 0x90e   : > { %v6840_v62 = vmul.f32 -1.442695, %v6045_v14 }
 0x90f   : > { %7517 = vpow2.f32 %v6839_v59 }
 0x910   : > { %7519 = vpow2.f32 %v6840_v62 }
 0x915   : > { %v7514_v3 = vpop.eup %7513 }
 0x916   : > { %v6025_v57 = vmul.f32 %v7514_v3, %v7512_v33 }
 0x917   : > { %v7516_v13 = vpop.eup %7515 }
 0x918   : > { %v6066_v35 = vmul.f32 %v6064_v63, %v6025_v57  ;;  %v6030_v37 = vadd.f32 1.0, %v7516_v13 }
 0x919   : > { %v7518_v54 = vpop.eup %7517 }
 0x91a   : > { %6075 = vst [vmem:[#allocation2] sm:$0x3] %v6066_v35  ;;  %v6079_v4 = vpack.c.bf16 %v6066_v35, %v6066_v35  ;;  %7521 = vrcp.f32 %v6030_v37  ;;  %v6039_v22 = vadd.f32 1.0, %v7518_v54  ;;  %v7520_v26 = vpop.eup %7519 }
 0x91b   : > { %7523 = vtanh.f32 %v6042_v30  ;;  %v6050_v12 = vadd.f32 1.0, %v7520_v26 }
 0x91c   : > { %6842 = vst [vmem:[%s7691_s12 + $0x7] sm:$0x1] %v6079_v4  ;;  %7525 = vrcp.f32 %v6039_v22 }
 0x91d   : > { %7527 = vrcp.f32 %v6050_v12 }
 0x924   : > { %v7522_v32 = vpop.eup %7521 }
 0x925   : > { %v7524_v55 = vpop.eup %7523 }
 0x926   : > { %v7526_v28 = vpop.eup %7525  ;;  %v6054_v34 = vmul.f32 %v7524_v55, %v7522_v32 }
 0x927   : > { %v6053_v21 = vmul.f32 %v7526_v28, %v6026_v8  ;;  %v7528_v27 = vpop.eup %7527 }
 0x929   : > { %v6055_v36 = vadd.f32 %v6054_v34, %v6053_v21 }
 0x92b   : > { %7529 = vtanh.f32 %v6055_v36  ;;  %v6076_v61 = vmul.f32 %v6070_v20, %v6055_v36 }
 0x92d   : > { %6077 = vst [vmem:[#allocation5] sm:$0x3] %v6076_v61 }
 0x935   : > { %v7530_v6 = vpop.eup %7529 }
 0x936   : > { %v6057_v23 = vmul.f32 %v7530_v6, %v7528_v27 }
 0x938   : > { %v6072_v0 = vmul.f32 %v6070_v20, %v6057_v23 }
 0x93a   : > { %6078 = vst [vmem:[#allocation4] sm:$0x3] %v6072_v0  ;;  %v6082_v29 = vpack.c.bf16 %v6072_v0, %v6072_v0 }
 0x93c   : > { %6083 = vst [vmem:[%s7706_s0] sm:$0x1] %v6082_v29 }
 0x93d PF: > { %p15_p0 = scmp.ge.s32.totalorder %s7643_s30, 4   ;;  %s9731_s24 = smov %s7557_s25 }
 0x93e   : > { %s9732_s25 = smov %s7662_s15  ;;  %s9733_s26 = smov %s7565_s27 }
 0x93f   : > { %s9734_s27 = smov %s7653_s11  ;;  %s9735_s28 = smov %s7643_s30 }
 0x940   :  { %17 = sbr.rel (!%p15_p0) target bundleno = 6 (0x6), region = 233 }

</bundles_post_ra>
